<compile_context>
chip_gen: v7x
topology: tpu7x:2x2x1
jax: 0.10.0
libtpu: 0.0.40
codegen_flags: <defaults>
</compile_context>

<pallas_src>
import jax
import jax.numpy as jnp
from jax import lax
from jax.experimental import pallas as pl
from jax.experimental.pallas import tpu as pltpu

C_MID = 64                                   # conv channel width
FC_OUT = 1049
K1_PAD = 128                                 # layer-1 im2col depth: 9*3=27 -> 128 (lane-dense)


# ----------------------------------------------------------------------------
# Fused kernel: conv1+relu -> conv2+relu -> conv3+relu -> global average pool
#   p1_ref  : (BB, H*W, 128) bf16   layer-1 im2col patches (built in XLA)
#   w1_ref  : (128, 64) bf16        b1_ref: (1, 64) f32
#   w2_ref  : (576, 64) bf16        b2_ref: (1, 64) f32
#   w3_ref  : (576, 64) bf16        b3_ref: (1, 64) f32
#   out_ref : (BB, 1, 64) f32       pooled activations (FC applied in XLA)
#   pad_ref : (BB, H+2, W+2, 64) bf16  scratch: zero-halo activation buffer
#   p_ref   : (BB*H*W, 576) bf16       scratch: layer-2/3 im2col patches
# ----------------------------------------------------------------------------
def fused_net_kernel(p1_ref, w1_ref, b1_ref, w2_ref, b2_ref, w3_ref, b3_ref,
                     out_ref, pad_ref, p_ref):
    BB, Hp, Wp, C = pad_ref.shape
    H, W = Hp - 2, Wp - 2
    HW = H * W
    M = BB * HW

    # ---- layer 1: single MXU matmul over pre-built patches, (M,128)x(128,64)
    y = jnp.dot(p1_ref[...].reshape(M, p1_ref.shape[-1]), w1_ref[...],
                preferred_element_type=jnp.float32)
    y = jnp.maximum(y + b1_ref[...], 0.0)                           # (M, 64) f32

    # ---- zero only the halo ring (interior is fully overwritten below) ----
    # NOTE: intentionally executed every grid step; a program_id==0 guard
    # would silently break on v7x (parallel grid: core 1 never runs index 0).
    zrow = jnp.zeros((BB, 1, Wp, C), jnp.bfloat16)
    zcol = jnp.zeros((BB, Hp, 1, C), jnp.bfloat16)
    pad_ref[:, 0:1, :, :] = zrow
    pad_ref[:, Hp - 1:Hp, :, :] = zrow
    pad_ref[:, :, 0:1, :] = zcol
    pad_ref[:, :, Wp - 1:Wp, :] = zcol

    def conv3x3(y_f32, w_ref, b_ref):
        # Write activation interior once, cast to bf16 (the matmul operand
        # dtype) at the store; bias/ReLU math stayed f32.
        pad_ref[:, 1:H + 1, 1:W + 1, :] = (
            y_f32.astype(jnp.bfloat16).reshape(BB, H, W, C))
        # im2col with 128-lane-aligned paired-tap stores (offsets 0/128/256/384
        # are unmasked 128-wide vst; only the final tap is a 64-wide store).
        for k in (0, 2, 4, 6):                                      # static, unrolled
            dy0, dx0 = k // 3, k % 3
            dy1, dx1 = (k + 1) // 3, (k + 1) % 3
            a = pad_ref[:, dy0:dy0 + H, dx0:dx0 + W, :].reshape(M, C)
            b = pad_ref[:, dy1:dy1 + H, dx1:dx1 + W, :].reshape(M, C)
            p_ref[:, k * C:(k + 2) * C] = jnp.concatenate([a, b], axis=-1)
        p_ref[:, 8 * C:9 * C] = pad_ref[:, 2:Hp, 2:Wp, :].reshape(M, C)
        z = jnp.dot(p_ref[...], w_ref[...], preferred_element_type=jnp.float32)
        return jnp.maximum(z + b_ref[...], 0.0)                     # (M, 64) f32

    y = conv3x3(y, w2_ref, b2_ref)                                  # conv2 + ReLU
    y = conv3x3(y, w3_ref, b3_ref)                                  # conv3 + ReLU

    # ---- epilogue: global average pool per image ---------------------------
    pooled = jnp.sum(y.reshape(BB, HW, C), axis=1) * (1.0 / HW)     # (BB, 64) f32
    out_ref[...] = pooled.reshape(BB, 1, C)


# ----------------------------------------------------------------------------
# Wrappers
# ----------------------------------------------------------------------------
def _pick_block_b(B):
    # Keep at least 2 grid steps when B >= 2 (v7x has 2 TensorCores; don't
    # collapse the whole batch into one step); otherwise block as many images
    # per step as possible to amortize per-step / per-matmul overhead on the
    # single-TC v5e/v6e.  For the B=2 demo this keeps grid=(2,).
    for bb in (8, 4, 2):
        if B % bb == 0 and B // bb >= 2:
            return bb
    return 1


def _build_call(B, H, W, block_b):
    HW = H * W
    grid_spec = pltpu.PrefetchScalarGridSpec(
        num_scalar_prefetch=0,
        grid=(B // block_b,),
        in_specs=[
            pl.BlockSpec((block_b, HW, K1_PAD), lambda b: (b, 0, 0)),   # layer-1 patches
            pl.BlockSpec((K1_PAD, C_MID), lambda b: (0, 0)),            # w1
            pl.BlockSpec((1, C_MID), lambda b: (0, 0)),                 # b1
            pl.BlockSpec((9 * C_MID, C_MID), lambda b: (0, 0)),         # w2
            pl.BlockSpec((1, C_MID), lambda b: (0, 0)),                 # b2
            pl.BlockSpec((9 * C_MID, C_MID), lambda b: (0, 0)),         # w3
            pl.BlockSpec((1, C_MID), lambda b: (0, 0)),                 # b3
        ],
        out_specs=pl.BlockSpec((block_b, 1, C_MID), lambda b: (b, 0, 0)),
        scratch_shapes=[
            pltpu.VMEM((block_b, H + 2, W + 2, C_MID), jnp.bfloat16),   # bf16 halo buffer
            pltpu.VMEM((block_b * HW, 9 * C_MID), jnp.bfloat16),        # layer-2/3 patches
        ],
    )
    return pl.pallas_call(
        fused_net_kernel,
        out_shape=jax.ShapeDtypeStruct((B, 1, C_MID), jnp.float32),
        grid_spec=grid_spec,
        compiler_params=pltpu.CompilerParams(
            dimension_semantics=("parallel",)),   # batch steps shard across v7x's 2 TCs
    )


def prepare_params(p):
    """One-time repack: im2col weight layout, bf16 conv operands, f32 FC."""
    cin = p["w1"].shape[2]
    w1 = p["w1"].reshape(9 * cin, C_MID)                       # rows ordered (kh, kw, cin)
    w1 = jnp.pad(w1, ((0, K1_PAD - 9 * cin), (0, 0))).astype(jnp.bfloat16)
    return {
        "w1": w1,                                              # (128, 64) bf16
        "b1": p["b1"].reshape(1, C_MID).astype(jnp.float32),
        "w2": p["w2"].reshape(9 * C_MID, C_MID).astype(jnp.bfloat16),
        "b2": p["b2"].reshape(1, C_MID).astype(jnp.float32),
        "w3": p["w3"].reshape(9 * C_MID, C_MID).astype(jnp.bfloat16),
        "b3": p["b3"].reshape(1, C_MID).astype(jnp.float32),
        "fc_w": p["fc_w"].astype(jnp.float32),                 # FC applied in XLA (f32)
        "fc_b": p["fc_b"].astype(jnp.float32),
    }


@jax.jit
def network_forward(x_nchw, prep):
    # NCHW (PyTorch convention) -> NHWC.
    x = jnp.transpose(x_nchw, (0, 2, 3, 1)).astype(jnp.float32)
    B, H, W, cin = x.shape
    # Layer-1 im2col in XLA: the raw input is only a few KB, so building the
    # lane-dense (B, H*W, 128) bf16 patch tensor here is essentially free and
    # lets the kernel's layer 1 be a single K=128 matmul (tap order k=dy*3+dx,
    # cin fastest, matching w1's (kh,kw,cin) row order).
    xp = jnp.pad(x, ((0, 0), (1, 1), (1, 1), (0, 0)))
    wins = [xp[:, dy:dy + H, dx:dx + W, :] for dy in range(3) for dx in range(3)]
    p1 = jnp.concatenate(wins, axis=-1).reshape(B, H * W, 9 * cin)
    p1 = jnp.pad(p1, ((0, 0), (0, 0), (0, K1_PAD - 9 * cin))).astype(jnp.bfloat16)

    block_b = _pick_block_b(B)
    pooled = _build_call(B, H, W, block_b)(
        p1, prep["w1"], prep["b1"], prep["w2"], prep["b2"],
        prep["w3"], prep["b3"])
    pooled = pooled.reshape(B, C_MID)                          # == .squeeze() for B > 1
    # Whole-batch Linear(64 -> 1049) in f32 XLA (review: removes the degenerate
    # M=1 MXU matmul from every grid step's serial tail).
    return pooled @ prep["fc_w"] + prep["fc_b"]                # (B, 1049)


def init_params(key):
    ks = jax.random.split(key, 8)
    def conv_w(k, cin, cout):
        return 0.1 * jax.random.normal(k, (3, 3, cin, cout), jnp.float32)
    return {
        "w1": conv_w(ks[0], 3, 64),  "b1": 0.01 * jax.random.normal(ks[1], (64,), jnp.float32),
        "w2": conv_w(ks[2], 64, 64), "b2": 0.01 * jax.random.normal(ks[3], (64,), jnp.float32),
        "w3": conv_w(ks[4], 64, 64), "b3": 0.01 * jax.random.normal(ks[5], (64,), jnp.float32),
        "fc_w": 0.1 * jax.random.normal(ks[6], (64, FC_OUT), jnp.float32),
        "fc_b": 0.01 * jax.random.normal(ks[7], (FC_OUT,), jnp.float32),
    }


# Pure-JAX f32 reference (same math via lax.conv) for a correctness check.
def reference_forward(x_nchw, params):
    def conv(x, w, b):  # x NCHW, w (kh,kw,cin,cout)
        w_oihw = jnp.transpose(w, (3, 2, 0, 1))
        y = lax.conv_general_dilated(
            x, w_oihw, window_strides=(1, 1), padding=((1, 1), (1, 1)),
            dimension_numbers=("NCHW", "OIHW", "NCHW"))
        return jax.nn.relu(y + b[None, :, None, None])
    x = conv(x_nchw, params["w1"], params["b1"])
    x = conv(x, params["w2"], params["b2"])
    x = conv(x, params["w3"], params["b3"])
    pooled = jnp.mean(x, axis=(2, 3))                          # (B, 64) == .squeeze()
    return pooled @ params["fc_w"] + params["fc_b"]


if __name__ == "__main__":
    key = jax.random.PRNGKey(0)
    kx, kp = jax.random.split(key)
    x = jax.random.normal(kx, (2, 3, 16, 16), jnp.float32)     # NCHW, batch=2
    params = init_params(kp)
    prep = prepare_params(params)

    out = network_forward(x, prep)
    out = jax.block_until_ready(out)
    assert out.shape == (2, FC_OUT), out.shape
    assert bool(jnp.all(jnp.isfinite(out)))

    ref = reference_forward(x, params)
    # bf16 conv matmul operands + f32 accumulation => small relative error vs f32 ref.
    assert bool(jnp.allclose(out, ref, rtol=3e-2, atol=3e-2)), \
        float(jnp.max(jnp.abs(out - ref)))

    print("KERNEL_OK")
</pallas_src>

<mosaic_0001>
module attributes {stable_mosaic.version = 11 : i64} {
  func.func @fused_net_kernel(%arg0: i32, %arg1: memref<1x256x128xbf16, #tpu.memory_space<vmem>>, %arg2: memref<128x64xbf16, #tpu.memory_space<vmem>>, %arg3: memref<1x64xf32, #tpu.memory_space<vmem>>, %arg4: memref<576x64xbf16, #tpu.memory_space<vmem>>, %arg5: memref<1x64xf32, #tpu.memory_space<vmem>>, %arg6: memref<576x64xbf16, #tpu.memory_space<vmem>>, %arg7: memref<1x64xf32, #tpu.memory_space<vmem>>, %arg8: memref<1x1x64xf32, #tpu.memory_space<vmem>>, %arg9: memref<1x18x18x64xbf16, #tpu.memory_space<vmem>>, %arg10: memref<256x576xbf16, #tpu.memory_space<vmem>>) attributes {dimension_semantics = [#tpu.dimension_semantics<parallel>], iteration_bounds = array<i64: 2>, scalar_prefetch = 0 : i64, scratch_operands = 2 : i64, tpu.core_type = #tpu.core_type<tc>, window_params = [{transform_indices = @transform_0, window_bounds = array<i64: 1, 256, 128>}, {pipeline_mode = #tpu.pipeline_mode<synchronous>, transform_indices = @transform_1, window_bounds = array<i64: 128, 64>}, {pipeline_mode = #tpu.pipeline_mode<synchronous>, transform_indices = @transform_2, window_bounds = array<i64: 1, 64>}, {pipeline_mode = #tpu.pipeline_mode<synchronous>, transform_indices = @transform_3, window_bounds = array<i64: 576, 64>}, {pipeline_mode = #tpu.pipeline_mode<synchronous>, transform_indices = @transform_4, window_bounds = array<i64: 1, 64>}, {pipeline_mode = #tpu.pipeline_mode<synchronous>, transform_indices = @transform_5, window_bounds = array<i64: 576, 64>}, {pipeline_mode = #tpu.pipeline_mode<synchronous>, transform_indices = @transform_6, window_bounds = array<i64: 1, 64>}, {transform_indices = @transform_7, window_bounds = array<i64: 1, 1, 64>}]} {
    %c0 = arith.constant 0 : index
    %c0_0 = arith.constant 0 : index
    %c0_1 = arith.constant 0 : index
    %0 = vector.load %arg1[%c0, %c0_0, %c0_1] : memref<1x256x128xbf16, #tpu.memory_space<vmem>>, vector<1x256x128xbf16>
    %1 = vector.shape_cast %0 : vector<1x256x128xbf16> to vector<256x128xbf16>
    %c0_2 = arith.constant 0 : index
    %c0_3 = arith.constant 0 : index
    %2 = vector.load %arg2[%c0_2, %c0_3] : memref<128x64xbf16, #tpu.memory_space<vmem>>, vector<128x64xbf16>
    %cst = arith.constant dense<0.000000e+00> : vector<256x64xf32>
    %3 = tpu.matmul %1, %2, %cst {dimension_numbers = #tpu.dot_dimension_numbers<[1], [0], [0], [1], [0, 0, 1, 1], [], []>} : vector<256x128xbf16>, vector<128x64xbf16>, vector<256x64xf32> -> vector<256x64xf32>
    %c0_4 = arith.constant 0 : index
    %c0_5 = arith.constant 0 : index
    %4 = vector.load %arg3[%c0_4, %c0_5] : memref<1x64xf32, #tpu.memory_space<vmem>>, vector<1x64xf32>
    %5 = vector.broadcast %4 : vector<1x64xf32> to vector<256x64xf32>
    %6 = arith.addf %3, %5 : vector<256x64xf32>
    %cst_6 = arith.constant 0.000000e+00 : f32
    %7 = vector.broadcast %cst_6 : f32 to vector<256x64xf32>
    %8 = arith.maximumf %6, %7 : vector<256x64xf32>
    %cst_7 = arith.constant 0.000000e+00 : bf16
    %9 = vector.broadcast %cst_7 : bf16 to vector<1x1x18x64xbf16>
    %cst_8 = arith.constant 0.000000e+00 : bf16
    %10 = vector.broadcast %cst_8 : bf16 to vector<1x18x1x64xbf16>
    %c0_9 = arith.constant 0 : index
    %c0_10 = arith.constant 0 : index
    %c0_11 = arith.constant 0 : index
    %c0_12 = arith.constant 0 : index
    %11 = vector.load %arg9[%c0_9, %c0_10, %c0_11, %c0_12] : memref<1x18x18x64xbf16, #tpu.memory_space<vmem>>, vector<1x1x18x64xbf16>
    tpu.vector_store %arg9[%c0_9, %c0_10, %c0_11, %c0_12], %9 {strides = array<i32>} : memref<1x18x18x64xbf16, #tpu.memory_space<vmem>>, vector<1x1x18x64xbf16>,
    %c0_13 = arith.constant 0 : index
    %c17 = arith.constant 17 : index
    %c0_14 = arith.constant 0 : index
    %c0_15 = arith.constant 0 : index
    %12 = vector.load %arg9[%c0_13, %c17, %c0_14, %c0_15] : memref<1x18x18x64xbf16, #tpu.memory_space<vmem>>, vector<1x1x18x64xbf16>
    tpu.vector_store %arg9[%c0_13, %c17, %c0_14, %c0_15], %9 {strides = array<i32>} : memref<1x18x18x64xbf16, #tpu.memory_space<vmem>>, vector<1x1x18x64xbf16>,
    %c0_16 = arith.constant 0 : index
    %c0_17 = arith.constant 0 : index
    %c0_18 = arith.constant 0 : index
    %c0_19 = arith.constant 0 : index
    %13 = vector.load %arg9[%c0_16, %c0_17, %c0_18, %c0_19] : memref<1x18x18x64xbf16, #tpu.memory_space<vmem>>, vector<1x18x1x64xbf16>
    tpu.vector_store %arg9[%c0_16, %c0_17, %c0_18, %c0_19], %10 {strides = array<i32>} : memref<1x18x18x64xbf16, #tpu.memory_space<vmem>>, vector<1x18x1x64xbf16>,
    %c0_20 = arith.constant 0 : index
    %c0_21 = arith.constant 0 : index
    %c17_22 = arith.constant 17 : index
    %c0_23 = arith.constant 0 : index
    %14 = vector.load %arg9[%c0_20, %c0_21, %c17_22, %c0_23] : memref<1x18x18x64xbf16, #tpu.memory_space<vmem>>, vector<1x18x1x64xbf16>
    tpu.vector_store %arg9[%c0_20, %c0_21, %c17_22, %c0_23], %10 {strides = array<i32>} : memref<1x18x18x64xbf16, #tpu.memory_space<vmem>>, vector<1x18x1x64xbf16>,
    %15 = arith.truncf %8 : vector<256x64xf32> to vector<256x64xbf16>
    %16 = vector.shape_cast %15 : vector<256x64xbf16> to vector<1x16x16x64xbf16>
    %c0_24 = arith.constant 0 : index
    %c1 = arith.constant 1 : index
    %c1_25 = arith.constant 1 : index
    %c0_26 = arith.constant 0 : index
    %17 = vector.load %arg9[%c0_24, %c1, %c1_25, %c0_26] : memref<1x18x18x64xbf16, #tpu.memory_space<vmem>>, vector<1x16x16x64xbf16>
    tpu.vector_store %arg9[%c0_24, %c1, %c1_25, %c0_26], %16 {strides = array<i32>} : memref<1x18x18x64xbf16, #tpu.memory_space<vmem>>, vector<1x16x16x64xbf16>,
    %c0_27 = arith.constant 0 : index
    %c0_28 = arith.constant 0 : index
    %c0_29 = arith.constant 0 : index
    %c0_30 = arith.constant 0 : index
    %18 = vector.load %arg9[%c0_27, %c0_28, %c0_29, %c0_30] : memref<1x18x18x64xbf16, #tpu.memory_space<vmem>>, vector<1x16x16x64xbf16>
    %19 = vector.shape_cast %18 : vector<1x16x16x64xbf16> to vector<256x64xbf16>
    %c0_31 = arith.constant 0 : index
    %c0_32 = arith.constant 0 : index
    %c1_33 = arith.constant 1 : index
    %c0_34 = arith.constant 0 : index
    %20 = vector.load %arg9[%c0_31, %c0_32, %c1_33, %c0_34] : memref<1x18x18x64xbf16, #tpu.memory_space<vmem>>, vector<1x16x16x64xbf16>
    %21 = vector.shape_cast %20 : vector<1x16x16x64xbf16> to vector<256x64xbf16>
    %22 = tpu.concatenate %19, %21 in 1 : vector<256x64xbf16>, vector<256x64xbf16> -> vector<256x128xbf16>
    %c0_35 = arith.constant 0 : index
    %c0_36 = arith.constant 0 : index
    %23 = vector.load %arg10[%c0_35, %c0_36] : memref<256x576xbf16, #tpu.memory_space<vmem>>, vector<256x128xbf16>
    tpu.vector_store %arg10[%c0_35, %c0_36], %22 {strides = array<i32>} : memref<256x576xbf16, #tpu.memory_space<vmem>>, vector<256x128xbf16>,
    %c0_37 = arith.constant 0 : index
    %c0_38 = arith.constant 0 : index
    %c2 = arith.constant 2 : index
    %c0_39 = arith.constant 0 : index
    %24 = vector.load %arg9[%c0_37, %c0_38, %c2, %c0_39] : memref<1x18x18x64xbf16, #tpu.memory_space<vmem>>, vector<1x16x16x64xbf16>
    %25 = vector.shape_cast %24 : vector<1x16x16x64xbf16> to vector<256x64xbf16>
    %c0_40 = arith.constant 0 : index
    %c1_41 = arith.constant 1 : index
    %c0_42 = arith.constant 0 : index
    %c0_43 = arith.constant 0 : index
    %26 = vector.load %arg9[%c0_40, %c1_41, %c0_42, %c0_43] : memref<1x18x18x64xbf16, #tpu.memory_space<vmem>>, vector<1x16x16x64xbf16>
    %27 = vector.shape_cast %26 : vector<1x16x16x64xbf16> to vector<256x64xbf16>
    %28 = tpu.concatenate %25, %27 in 1 : vector<256x64xbf16>, vector<256x64xbf16> -> vector<256x128xbf16>
    %c0_44 = arith.constant 0 : index
    %c128 = arith.constant 128 : index
    %29 = vector.load %arg10[%c0_44, %c128] : memref<256x576xbf16, #tpu.memory_space<vmem>>, vector<256x128xbf16>
    tpu.vector_store %arg10[%c0_44, %c128], %28 {strides = array<i32>} : memref<256x576xbf16, #tpu.memory_space<vmem>>, vector<256x128xbf16>,
    %c0_45 = arith.constant 0 : index
    %c1_46 = arith.constant 1 : index
    %c1_47 = arith.constant 1 : index
    %c0_48 = arith.constant 0 : index
    %30 = vector.load %arg9[%c0_45, %c1_46, %c1_47, %c0_48] : memref<1x18x18x64xbf16, #tpu.memory_space<vmem>>, vector<1x16x16x64xbf16>
    %31 = vector.shape_cast %30 : vector<1x16x16x64xbf16> to vector<256x64xbf16>
    %c0_49 = arith.constant 0 : index
    %c1_50 = arith.constant 1 : index
    %c2_51 = arith.constant 2 : index
    %c0_52 = arith.constant 0 : index
    %32 = vector.load %arg9[%c0_49, %c1_50, %c2_51, %c0_52] : memref<1x18x18x64xbf16, #tpu.memory_space<vmem>>, vector<1x16x16x64xbf16>
    %33 = vector.shape_cast %32 : vector<1x16x16x64xbf16> to vector<256x64xbf16>
    %34 = tpu.concatenate %31, %33 in 1 : vector<256x64xbf16>, vector<256x64xbf16> -> vector<256x128xbf16>
    %c0_53 = arith.constant 0 : index
    %c256 = arith.constant 256 : index
    %35 = vector.load %arg10[%c0_53, %c256] : memref<256x576xbf16, #tpu.memory_space<vmem>>, vector<256x128xbf16>
    tpu.vector_store %arg10[%c0_53, %c256], %34 {strides = array<i32>} : memref<256x576xbf16, #tpu.memory_space<vmem>>, vector<256x128xbf16>,
    %c0_54 = arith.constant 0 : index
    %c2_55 = arith.constant 2 : index
    %c0_56 = arith.constant 0 : index
    %c0_57 = arith.constant 0 : index
    %36 = vector.load %arg9[%c0_54, %c2_55, %c0_56, %c0_57] : memref<1x18x18x64xbf16, #tpu.memory_space<vmem>>, vector<1x16x16x64xbf16>
    %37 = vector.shape_cast %36 : vector<1x16x16x64xbf16> to vector<256x64xbf16>
    %c0_58 = arith.constant 0 : index
    %c2_59 = arith.constant 2 : index
    %c1_60 = arith.constant 1 : index
    %c0_61 = arith.constant 0 : index
    %38 = vector.load %arg9[%c0_58, %c2_59, %c1_60, %c0_61] : memref<1x18x18x64xbf16, #tpu.memory_space<vmem>>, vector<1x16x16x64xbf16>
    %39 = vector.shape_cast %38 : vector<1x16x16x64xbf16> to vector<256x64xbf16>
    %40 = tpu.concatenate %37, %39 in 1 : vector<256x64xbf16>, vector<256x64xbf16> -> vector<256x128xbf16>
    %c0_62 = arith.constant 0 : index
    %c384 = arith.constant 384 : index
    %41 = vector.load %arg10[%c0_62, %c384] : memref<256x576xbf16, #tpu.memory_space<vmem>>, vector<256x128xbf16>
    tpu.vector_store %arg10[%c0_62, %c384], %40 {strides = array<i32>} : memref<256x576xbf16, #tpu.memory_space<vmem>>, vector<256x128xbf16>,
    %c0_63 = arith.constant 0 : index
    %c2_64 = arith.constant 2 : index
    %c2_65 = arith.constant 2 : index
    %c0_66 = arith.constant 0 : index
    %42 = vector.load %arg9[%c0_63, %c2_64, %c2_65, %c0_66] : memref<1x18x18x64xbf16, #tpu.memory_space<vmem>>, vector<1x16x16x64xbf16>
    %43 = vector.shape_cast %42 : vector<1x16x16x64xbf16> to vector<256x64xbf16>
    %c0_67 = arith.constant 0 : index
    %c512 = arith.constant 512 : index
    %44 = vector.load %arg10[%c0_67, %c512] : memref<256x576xbf16, #tpu.memory_space<vmem>>, vector<256x64xbf16>
    tpu.vector_store %arg10[%c0_67, %c512], %43 {strides = array<i32>} : memref<256x576xbf16, #tpu.memory_space<vmem>>, vector<256x64xbf16>,
    %c0_68 = arith.constant 0 : index
    %c0_69 = arith.constant 0 : index
    %45 = vector.load %arg10[%c0_68, %c0_69] : memref<256x576xbf16, #tpu.memory_space<vmem>>, vector<256x576xbf16>
    %c0_70 = arith.constant 0 : index
    %c0_71 = arith.constant 0 : index
    %46 = vector.load %arg4[%c0_70, %c0_71] : memref<576x64xbf16, #tpu.memory_space<vmem>>, vector<576x64xbf16>
    %cst_72 = arith.constant dense<0.000000e+00> : vector<256x64xf32>
    %47 = tpu.matmul %45, %46, %cst_72 {dimension_numbers = #tpu.dot_dimension_numbers<[1], [0], [0], [1], [0, 0, 1, 1], [], []>} : vector<256x576xbf16>, vector<576x64xbf16>, vector<256x64xf32> -> vector<256x64xf32>
    %c0_73 = arith.constant 0 : index
    %c0_74 = arith.constant 0 : index
    %48 = vector.load %arg5[%c0_73, %c0_74] : memref<1x64xf32, #tpu.memory_space<vmem>>, vector<1x64xf32>
    %49 = vector.broadcast %48 : vector<1x64xf32> to vector<256x64xf32>
    %50 = arith.addf %47, %49 : vector<256x64xf32>
    %cst_75 = arith.constant 0.000000e+00 : f32
    %51 = vector.broadcast %cst_75 : f32 to vector<256x64xf32>
    %52 = arith.maximumf %50, %51 : vector<256x64xf32>
    %53 = arith.truncf %52 : vector<256x64xf32> to vector<256x64xbf16>
    %54 = vector.shape_cast %53 : vector<256x64xbf16> to vector<1x16x16x64xbf16>
    %c0_76 = arith.constant 0 : index
    %c1_77 = arith.constant 1 : index
    %c1_78 = arith.constant 1 : index
    %c0_79 = arith.constant 0 : index
    %55 = vector.load %arg9[%c0_76, %c1_77, %c1_78, %c0_79] : memref<1x18x18x64xbf16, #tpu.memory_space<vmem>>, vector<1x16x16x64xbf16>
    tpu.vector_store %arg9[%c0_76, %c1_77, %c1_78, %c0_79], %54 {strides = array<i32>} : memref<1x18x18x64xbf16, #tpu.memory_space<vmem>>, vector<1x16x16x64xbf16>,
    %c0_80 = arith.constant 0 : index
    %c0_81 = arith.constant 0 : index
    %c0_82 = arith.constant 0 : index
    %c0_83 = arith.constant 0 : index
    %56 = vector.load %arg9[%c0_80, %c0_81, %c0_82, %c0_83] : memref<1x18x18x64xbf16, #tpu.memory_space<vmem>>, vector<1x16x16x64xbf16>
    %57 = vector.shape_cast %56 : vector<1x16x16x64xbf16> to vector<256x64xbf16>
    %c0_84 = arith.constant 0 : index
    %c0_85 = arith.constant 0 : index
    %c1_86 = arith.constant 1 : index
    %c0_87 = arith.constant 0 : index
    %58 = vector.load %arg9[%c0_84, %c0_85, %c1_86, %c0_87] : memref<1x18x18x64xbf16, #tpu.memory_space<vmem>>, vector<1x16x16x64xbf16>
    %59 = vector.shape_cast %58 : vector<1x16x16x64xbf16> to vector<256x64xbf16>
    %60 = tpu.concatenate %57, %59 in 1 : vector<256x64xbf16>, vector<256x64xbf16> -> vector<256x128xbf16>
    %c0_88 = arith.constant 0 : index
    %c0_89 = arith.constant 0 : index
    %61 = vector.load %arg10[%c0_88, %c0_89] : memref<256x576xbf16, #tpu.memory_space<vmem>>, vector<256x128xbf16>
    tpu.vector_store %arg10[%c0_88, %c0_89], %60 {strides = array<i32>} : memref<256x576xbf16, #tpu.memory_space<vmem>>, vector<256x128xbf16>,
    %c0_90 = arith.constant 0 : index
    %c0_91 = arith.constant 0 : index
    %c2_92 = arith.constant 2 : index
    %c0_93 = arith.constant 0 : index
    %62 = vector.load %arg9[%c0_90, %c0_91, %c2_92, %c0_93] : memref<1x18x18x64xbf16, #tpu.memory_space<vmem>>, vector<1x16x16x64xbf16>
    %63 = vector.shape_cast %62 : vector<1x16x16x64xbf16> to vector<256x64xbf16>
    %c0_94 = arith.constant 0 : index
    %c1_95 = arith.constant 1 : index
    %c0_96 = arith.constant 0 : index
    %c0_97 = arith.constant 0 : index
    %64 = vector.load %arg9[%c0_94, %c1_95, %c0_96, %c0_97] : memref<1x18x18x64xbf16, #tpu.memory_space<vmem>>, vector<1x16x16x64xbf16>
    %65 = vector.shape_cast %64 : vector<1x16x16x64xbf16> to vector<256x64xbf16>
    %66 = tpu.concatenate %63, %65 in 1 : vector<256x64xbf16>, vector<256x64xbf16> -> vector<256x128xbf16>
    %c0_98 = arith.constant 0 : index
    %c128_99 = arith.constant 128 : index
    %67 = vector.load %arg10[%c0_98, %c128_99] : memref<256x576xbf16, #tpu.memory_space<vmem>>, vector<256x128xbf16>
    tpu.vector_store %arg10[%c0_98, %c128_99], %66 {strides = array<i32>} : memref<256x576xbf16, #tpu.memory_space<vmem>>, vector<256x128xbf16>,
    %c0_100 = arith.constant 0 : index
    %c1_101 = arith.constant 1 : index
    %c1_102 = arith.constant 1 : index
    %c0_103 = arith.constant 0 : index
    %68 = vector.load %arg9[%c0_100, %c1_101, %c1_102, %c0_103] : memref<1x18x18x64xbf16, #tpu.memory_space<vmem>>, vector<1x16x16x64xbf16>
    %69 = vector.shape_cast %68 : vector<1x16x16x64xbf16> to vector<256x64xbf16>
    %c0_104 = arith.constant 0 : index
    %c1_105 = arith.constant 1 : index
    %c2_106 = arith.constant 2 : index
    %c0_107 = arith.constant 0 : index
    %70 = vector.load %arg9[%c0_104, %c1_105, %c2_106, %c0_107] : memref<1x18x18x64xbf16, #tpu.memory_space<vmem>>, vector<1x16x16x64xbf16>
    %71 = vector.shape_cast %70 : vector<1x16x16x64xbf16> to vector<256x64xbf16>
    %72 = tpu.concatenate %69, %71 in 1 : vector<256x64xbf16>, vector<256x64xbf16> -> vector<256x128xbf16>
    %c0_108 = arith.constant 0 : index
    %c256_109 = arith.constant 256 : index
    %73 = vector.load %arg10[%c0_108, %c256_109] : memref<256x576xbf16, #tpu.memory_space<vmem>>, vector<256x128xbf16>
    tpu.vector_store %arg10[%c0_108, %c256_109], %72 {strides = array<i32>} : memref<256x576xbf16, #tpu.memory_space<vmem>>, vector<256x128xbf16>,
    %c0_110 = arith.constant 0 : index
    %c2_111 = arith.constant 2 : index
    %c0_112 = arith.constant 0 : index
    %c0_113 = arith.constant 0 : index
    %74 = vector.load %arg9[%c0_110, %c2_111, %c0_112, %c0_113] : memref<1x18x18x64xbf16, #tpu.memory_space<vmem>>, vector<1x16x16x64xbf16>
    %75 = vector.shape_cast %74 : vector<1x16x16x64xbf16> to vector<256x64xbf16>
    %c0_114 = arith.constant 0 : index
    %c2_115 = arith.constant 2 : index
    %c1_116 = arith.constant 1 : index
    %c0_117 = arith.constant 0 : index
    %76 = vector.load %arg9[%c0_114, %c2_115, %c1_116, %c0_117] : memref<1x18x18x64xbf16, #tpu.memory_space<vmem>>, vector<1x16x16x64xbf16>
    %77 = vector.shape_cast %76 : vector<1x16x16x64xbf16> to vector<256x64xbf16>
    %78 = tpu.concatenate %75, %77 in 1 : vector<256x64xbf16>, vector<256x64xbf16> -> vector<256x128xbf16>
    %c0_118 = arith.constant 0 : index
    %c384_119 = arith.constant 384 : index
    %79 = vector.load %arg10[%c0_118, %c384_119] : memref<256x576xbf16, #tpu.memory_space<vmem>>, vector<256x128xbf16>
    tpu.vector_store %arg10[%c0_118, %c384_119], %78 {strides = array<i32>} : memref<256x576xbf16, #tpu.memory_space<vmem>>, vector<256x128xbf16>,
    %c0_120 = arith.constant 0 : index
    %c2_121 = arith.constant 2 : index
    %c2_122 = arith.constant 2 : index
    %c0_123 = arith.constant 0 : index
    %80 = vector.load %arg9[%c0_120, %c2_121, %c2_122, %c0_123] : memref<1x18x18x64xbf16, #tpu.memory_space<vmem>>, vector<1x16x16x64xbf16>
    %81 = vector.shape_cast %80 : vector<1x16x16x64xbf16> to vector<256x64xbf16>
    %c0_124 = arith.constant 0 : index
    %c512_125 = arith.constant 512 : index
    %82 = vector.load %arg10[%c0_124, %c512_125] : memref<256x576xbf16, #tpu.memory_space<vmem>>, vector<256x64xbf16>
    tpu.vector_store %arg10[%c0_124, %c512_125], %81 {strides = array<i32>} : memref<256x576xbf16, #tpu.memory_space<vmem>>, vector<256x64xbf16>,
    %c0_126 = arith.constant 0 : index
    %c0_127 = arith.constant 0 : index
    %83 = vector.load %arg10[%c0_126, %c0_127] : memref<256x576xbf16, #tpu.memory_space<vmem>>, vector<256x576xbf16>
    %c0_128 = arith.constant 0 : index
    %c0_129 = arith.constant 0 : index
    %84 = vector.load %arg6[%c0_128, %c0_129] : memref<576x64xbf16, #tpu.memory_space<vmem>>, vector<576x64xbf16>
    %cst_130 = arith.constant dense<0.000000e+00> : vector<256x64xf32>
    %85 = tpu.matmul %83, %84, %cst_130 {dimension_numbers = #tpu.dot_dimension_numbers<[1], [0], [0], [1], [0, 0, 1, 1], [], []>} : vector<256x576xbf16>, vector<576x64xbf16>, vector<256x64xf32> -> vector<256x64xf32>
    %c0_131 = arith.constant 0 : index
    %c0_132 = arith.constant 0 : index
    %86 = vector.load %arg7[%c0_131, %c0_132] : memref<1x64xf32, #tpu.memory_space<vmem>>, vector<1x64xf32>
    %87 = vector.broadcast %86 : vector<1x64xf32> to vector<256x64xf32>
    %88 = arith.addf %85, %87 : vector<256x64xf32>
    %cst_133 = arith.constant 0.000000e+00 : f32
    %89 = vector.broadcast %cst_133 : f32 to vector<256x64xf32>
    %90 = arith.maximumf %88, %89 : vector<256x64xf32>
    %91 = vector.shape_cast %90 : vector<256x64xf32> to vector<1x256x64xf32>
    %cst_134 = arith.constant dense<0.000000e+00> : vector<1x64xf32>
    %92 = vector.multi_reduction <add>, %91, %cst_134 [1] : vector<1x256x64xf32> to vector<1x64xf32>
    %cst_135 = arith.constant 3.906250e-03 : f32
    %93 = vector.broadcast %cst_135 : f32 to vector<1x64xf32>
    %94 = arith.mulf %92, %93 : vector<1x64xf32>
    %95 = vector.shape_cast %94 : vector<1x64xf32> to vector<1x1x64xf32>
    %c0_136 = arith.constant 0 : index
    %c0_137 = arith.constant 0 : index
    %c0_138 = arith.constant 0 : index
    %96 = vector.load %arg8[%c0_136, %c0_137, %c0_138] : memref<1x1x64xf32, #tpu.memory_space<vmem>>, vector<1x1x64xf32>
    tpu.vector_store %arg8[%c0_136, %c0_137, %c0_138], %95 {strides = array<i32>} : memref<1x1x64xf32, #tpu.memory_space<vmem>>, vector<1x1x64xf32>,
    return
  }
  func.func @transform_0(%arg0: i32) -> (i32, i32, i32) {
    %c0_i32 = arith.constant 0 : i32
    %c0_i32_0 = arith.constant 0 : i32
    %c0_i32_1 = arith.constant 0 : i32
    return %arg0, %c0_i32, %c0_i32_0 : i32, i32, i32
  }
  func.func @transform_1(%arg0: i32) -> (i32, i32) {
    %c0_i32 = arith.constant 0 : i32
    %c0_i32_0 = arith.constant 0 : i32
    %c0_i32_1 = arith.constant 0 : i32
    return %c0_i32, %c0_i32_0 : i32, i32
  }
  func.func @transform_2(%arg0: i32) -> (i32, i32) {
    %c0_i32 = arith.constant 0 : i32
    %c0_i32_0 = arith.constant 0 : i32
    %c0_i32_1 = arith.constant 0 : i32
    return %c0_i32, %c0_i32_0 : i32, i32
  }
  func.func @transform_3(%arg0: i32) -> (i32, i32) {
    %c0_i32 = arith.constant 0 : i32
    %c0_i32_0 = arith.constant 0 : i32
    %c0_i32_1 = arith.constant 0 : i32
    return %c0_i32, %c0_i32_0 : i32, i32
  }
  func.func @transform_4(%arg0: i32) -> (i32, i32) {
    %c0_i32 = arith.constant 0 : i32
    %c0_i32_0 = arith.constant 0 : i32
    %c0_i32_1 = arith.constant 0 : i32
    return %c0_i32, %c0_i32_0 : i32, i32
  }
  func.func @transform_5(%arg0: i32) -> (i32, i32) {
    %c0_i32 = arith.constant 0 : i32
    %c0_i32_0 = arith.constant 0 : i32
    %c0_i32_1 = arith.constant 0 : i32
    return %c0_i32, %c0_i32_0 : i32, i32
  }
  func.func @transform_6(%arg0: i32) -> (i32, i32) {
    %c0_i32 = arith.constant 0 : i32
    %c0_i32_0 = arith.constant 0 : i32
    %c0_i32_1 = arith.constant 0 : i32
    return %c0_i32, %c0_i32_0 : i32, i32
  }
  func.func @transform_7(%arg0: i32) -> (i32, i32, i32) {
    %c0_i32 = arith.constant 0 : i32
    %c0_i32_0 = arith.constant 0 : i32
    %c0_i32_1 = arith.constant 0 : i32
    return %arg0, %c0_i32, %c0_i32_0 : i32, i32, i32
  }
}

</mosaic_0001>

<bundles_post_ra>
// kernel: network_forward.1
= control target key start
LH: loop header
LB: loop body
LE: loop exit
PB: predicated region body
PF: predicated region fallthrough
CT: control target
= control target key end

     0   :  { %s11444_s24 = smov 0   ;;  %s14551_s0 = inlined_call_operand.vmem [shape: bf16[2,256,128], index: 0, kind: input, shape index: {}]   ;;  %s14552_s1 = inlined_call_operand.vmem [shape: bf16[128,64], index: 1, kind: input, shape index: {}]   ;;  %s14553_s2 = inlined_call_operand.vmem [shape: f32[1,64], index: 2, kind: input, shape index: {}]   ;;  %s14554_s3 = inlined_call_operand.vmem [shape: bf16[576,64], index: 3, kind: input, shape index: {}]   ;;  %s14555_s4 = inlined_call_operand.vmem [shape: f32[1,64], index: 4, kind: input, shape index: {}]   ;;  %s14556_s5 = inlined_call_operand.vmem [shape: bf16[576,64], index: 5, kind: input, shape index: {}]   ;;  %s14557_s6 = inlined_call_operand.vmem [shape: f32[1,64], index: 6, kind: input, shape index: {}]   ;;  %s14558_s7 = inlined_call_operand.vmem [shape: f32[2,1,64], index: 7, kind: output, shape index: {}]  }
   0x1 LB: > { %s9709_s25 = sadd.s32 4294967295, %s11400_s24   ;;  %p9713_p0 = scmp.ge.s32.totalorder %s11400_s24, 1  ;;  %s11400_s24 = sphi %s11444_s24, %s17_s24  }
   0x2   : > { %p237_p1 = scmp.lt.s32.totalorder %s11400_s24, 3 }
   0x4   : > { %p238_p2 = pnand %p9713_p0, %p237_p1 }
   0x6   : > { %241 = sbr.rel (%p238_p2) target bundleno = 1516 (0x5ec), region = 48 }
   0xd   : > { %v11028_v0 = vld [vmem:[%s14552_s1] sm:$0xff]   ;;  %p267_p3 = scmp.lt.s32.totalorder %s9709_s25, 1  ;;  %v11029_v1 = vld [vmem:[%s14552_s1 + $0x8] sm:$0xff]   ;;  %v11030_v2 = vld [vmem:[%s14552_s1 + $0x10] sm:$0xff]   ;;  %vm671_vm0 = vcmask 516096   ;;  %vm668_vm5 = vcmask 519168  }
   0xe   : > { %10874 = vmatprep.subr.bf16.mxu0 %v11028_v0  ;;  %11002 = vmatprep.subr.bf16.mxu1 %v11028_v0  ;;  %v11031_v3 = vld [vmem:[%s14552_s1 + $0x18] sm:$0xff]   ;;  %v11032_v5 = vld [vmem:[%s14552_s1 + $0x20] sm:$0xff]   ;;  %v11033_v6 = vld [vmem:[%s14552_s1 + $0x28] sm:$0xff]   ;;  %vm678_vm1 = vsmask.f32 256  ;;  %v11402_v34 = vmov 0  }
   0xf   : > { %s14589_s25 = smov (!%p267_p3, %s9709_s25), 1  ;;  %10875 = vmatpush3.bf16.msra.mxu0 %v11028_v0  ;;  %11010 = vmatpush3.bf16.msra.mxu1 %v11028_v0  ;;  %v11034_v8 = vld [vmem:[%s14552_s1 + $0x30] sm:$0xff]   ;;  %v11035_v9 = vld [vmem:[%s14552_s1 + $0x38] sm:$0xff]   ;;  %vm11502_vm2 = vmand %vm671_vm0, %vm678_vm1  ;;  %vm734_vm3 = vsmask.f32 7938  ;;  %s11403_s27 = smov 64  }
  0x10   : > { %10876 = vmatprep.subr.bf16.mxu0 %v11029_v1  ;;  %s10297_s9 = sshll.u32 %s14589_s25, 7  ;;  %11003 = vmatprep.subr.bf16.mxu1 %v11029_v1  ;;  %v686_v25 = vld [vmem:[#allocation2 + $0x18] sm:$0x1]  ;;  %v683_v27 = vld [vmem:[#allocation2 + $0xc] sm:$0x1]  ;;  %vm11512_vm4 = vmand %vm671_vm0, %vm734_vm3  ;;  %vm2095_vm12 = vcmask 1042432   ;;  %s274_s20 = scalar_lea.vmem %s14558_s7, %s14589_s25 }
  0x11   : > { %s11467_s12 = scalar_lea.vmem %s14551_s0, %s10297_s9  ;;  %v687_v26 = vsel %vm11502_vm2, 0, %v686_v25  ;;  %v684_v28 = vsel %vm11502_vm2, 0, %v683_v27  ;;  %v742_v30 = vld [vmem:[#allocation2 + $0x20] sm:$0x1]  ;;  %v739_v32 = vld [vmem:[#allocation2 + $0x14] sm:$0x1]  ;;  %vm11626_vm10 = vmand %vm668_vm5, %vm734_vm3 }
  0x12   : > { %v11036_v4 = vld [vmem:[%s11467_s12] sm:$0xff]   ;;  %v11037_v10 = vld [vmem:[%s11467_s12 + $0x8] sm:$0xff]   ;;  %v11038_v12 = vld [vmem:[%s11467_s12 + $0x10] sm:$0xff]   ;;  %688 = vst [vmem:[#allocation2 + $0x18] sm:$0x1] %v687_v26  ;;  %v743_v31 = vsel %vm11512_vm4, 0, %v742_v30 }
  0x13   : > { %10877 = vmatpush3.bf16.msra.mxu0 %v11029_v1  ;;  %11011 = vmatpush3.bf16.msra.mxu1 %v11029_v1  ;;  %v11044_v7 = vld [vmem:[%s11467_s12 + $0x40] sm:$0xff]   ;;  %v11045_v11 = vld [vmem:[%s11467_s12 + $0x48] sm:$0xff]   ;;  %v11046_v13 = vld [vmem:[%s11467_s12 + $0x50] sm:$0xff]   ;;  %685 = vst [vmem:[#allocation2 + $0xc] sm:$0x1] %v684_v28  ;;  %v740_v33 = vsel %vm11512_vm4, 0, %v739_v32 }
  0x14   : > { %10878 = vmatprep.subr.bf16.mxu0 %v11030_v2  ;;  %11004 = vmatprep.subr.bf16.mxu1 %v11030_v2  ;;  %v11039_v14 = vld [vmem:[%s11467_s12 + $0x18] sm:$0xff]   ;;  %v11040_v16 = vld [vmem:[%s11467_s12 + $0x20] sm:$0xff]   ;;  %v11041_v18 = vld [vmem:[%s11467_s12 + $0x28] sm:$0xff]   ;;  %744 = vst [vmem:[#allocation2 + $0x20] sm:$0x1] %v743_v31  ;;  %vm2096_vm13 = vcmask 1046532  }
  0x15   : > { %10890 = vmatprep.mubr.bf16.mxu0 %v11036_v4  ;;  %10906 = vmatprep.mubr.bf16.mxu1 %v11044_v7  ;;  %v11047_v15 = vld [vmem:[%s11467_s12 + $0x58] sm:$0xff]   ;;  %v11048_v17 = vld [vmem:[%s11467_s12 + $0x60] sm:$0xff]   ;;  %v11049_v19 = vld [vmem:[%s11467_s12 + $0x68] sm:$0xff]   ;;  %741 = vst [vmem:[#allocation2 + $0x14] sm:$0x1] %v740_v33  ;;  %vm1918_vm15 = vcmask 523264  }
  0x16   : > { %v11042_v20 = vld [vmem:[%s11467_s12 + $0x30] sm:$0xff]   ;;  %v11043_v22 = vld [vmem:[%s11467_s12 + $0x38] sm:$0xff]   ;;  %669 = vst.msk [vmem:[#allocation2] sm:$0xf] %vm668_vm5, %v11402_v34  ;;  %670 = vst.msk [vmem:[#allocation2 + $0x4] sm:$0xf] %vm668_vm5, %v11402_v34 }
  0x17   : > { %10879 = vmatpush3.bf16.msra.mxu0 %v11030_v2  ;;  %11012 = vmatpush3.bf16.msra.mxu1 %v11030_v2  ;;  %v11050_v21 = vld [vmem:[%s11467_s12 + $0x70] sm:$0xff]   ;;  %v11051_v23 = vld [vmem:[%s11467_s12 + $0x78] sm:$0xff]   ;;  %672 = vst.msk [vmem:[#allocation2 + $0x8] sm:$0x1] %vm671_vm0, %v11402_v34  ;;  %676 = vst.msk [vmem:[#allocation2 + $0xd4] sm:$0x1] %vm671_vm0, %v11402_v34 }
  0x18   : > { %10880 = vmatprep.subr.bf16.mxu0 %v11031_v3  ;;  %11005 = vmatprep.subr.bf16.mxu1 %v11031_v3  ;;  %674 = vst.msk [vmem:[#allocation2 + $0xcc] sm:$0xf] %vm668_vm5, %v11402_v34  ;;  %675 = vst.msk [vmem:[#allocation2 + $0xd0] sm:$0xf] %vm668_vm5, %v11402_v34  ;;  %v689_v35 = vld [vmem:[#allocation2 + $0x24] sm:$0x1] }
  0x19   : > { %v692_v36 = vld [vmem:[#allocation2 + $0x30] sm:$0x1]  ;;  %v690_v37 = vsel %vm11502_vm2, 0, %v689_v35  ;;  %v748_v41 = vld [vmem:[#allocation2 + $0x38] sm:$0x1]  ;;  %vm12005_vm14 = vmor %vm2095_vm12, %vm2096_vm13 }
  0x1a   : > { %v693_v38 = vsel %vm11502_vm2, 0, %v692_v36  ;;  %691 = vst [vmem:[#allocation2 + $0x24] sm:$0x1] %v690_v37  ;;  %v745_v42 = vld [vmem:[#allocation2 + $0x2c] sm:$0x1]  ;;  %v749_v43 = vsel %vm11512_vm4, 0, %v748_v41 }
  0x1b   : > { %10881 = vmatpush3.bf16.msra.mxu0 %v11031_v3  ;;  %11013 = vmatpush3.bf16.msra.mxu1 %v11031_v3  ;;  %694 = vst [vmem:[#allocation2 + $0x30] sm:$0x1] %v693_v38  ;;  %v746_v44 = vsel %vm11512_vm4, 0, %v745_v42  ;;  %750 = vst [vmem:[#allocation2 + $0x38] sm:$0x1] %v749_v43 }
  0x1c   : > { %10882 = vmatprep.subr.bf16.mxu0 %v11032_v5  ;;  %11006 = vmatprep.subr.bf16.mxu1 %v11032_v5  ;;  %747 = vst [vmem:[#allocation2 + $0x2c] sm:$0x1] %v746_v44  ;;  %v695_v47 = vld [vmem:[#allocation2 + $0x3c] sm:$0x1]  ;;  %v698_v49 = vld [vmem:[#allocation2 + $0x48] sm:$0x1] }
  0x1d   : > { %v680_v39 = vld [vmem:[#allocation2] sm:$0x1]  ;;  %v696_v48 = vsel %vm11502_vm2, 0, %v695_v47  ;;  %v751_v50 = vld [vmem:[#allocation2 + $0x44] sm:$0x1]  ;;  %v699_v51 = vsel %vm11502_vm2, 0, %v698_v49 }
  0x1e   : > { %v681_v40 = vsel %vm11502_vm2, 0, %v680_v39  ;;  %v736_v45 = vld [vmem:[#allocation2 + $0x8] sm:$0x1]  ;;  %697 = vst [vmem:[#allocation2 + $0x3c] sm:$0x1] %v696_v48  ;;  %v752_v52 = vsel %vm11512_vm4, 0, %v751_v50 }
  0x1f   : > { %10883 = vmatpush3.bf16.msra.mxu0 %v11032_v5  ;;  %11014 = vmatpush3.bf16.msra.mxu1 %v11032_v5  ;;  %682 = vst [vmem:[#allocation2] sm:$0x1] %v681_v40  ;;  %v737_v46 = vsel %vm11512_vm4, 0, %v736_v45  ;;  %700 = vst [vmem:[#allocation2 + $0x48] sm:$0x1] %v699_v51 }
  0x20   : > { %10884 = vmatprep.subr.bf16.mxu0 %v11033_v6  ;;  %11007 = vmatprep.subr.bf16.mxu1 %v11033_v6  ;;  %738 = vst [vmem:[#allocation2 + $0x8] sm:$0x1] %v737_v46  ;;  %753 = vst [vmem:[#allocation2 + $0x44] sm:$0x1] %v752_v52  ;;  %v754_v53 = vld [vmem:[#allocation2 + $0x50] sm:$0x1] }
  0x21   : > { %v755_v54 = vsel %vm11512_vm4, 0, %v754_v53  ;;  %v701_v55 = vld [vmem:[#allocation2 + $0x54] sm:$0x1]  ;;  %v704_v57 = vld [vmem:[#allocation2 + $0x60] sm:$0x1] }
  0x22   : > { %756 = vst [vmem:[#allocation2 + $0x50] sm:$0x1] %v755_v54  ;;  %v702_v56 = vsel %vm11502_vm2, 0, %v701_v55  ;;  %v705_v58 = vsel %vm11502_vm2, 0, %v704_v57  ;;  %v757_v59 = vld [vmem:[#allocation2 + $0x5c] sm:$0x1] }
  0x23   : > { %10885 = vmatpush3.bf16.msra.mxu0 %v11033_v6  ;;  %11015 = vmatpush3.bf16.msra.mxu1 %v11033_v6  ;;  %703 = vst [vmem:[#allocation2 + $0x54] sm:$0x1] %v702_v56  ;;  %706 = vst [vmem:[#allocation2 + $0x60] sm:$0x1] %v705_v58  ;;  %v760_v60 = vld [vmem:[#allocation2 + $0x68] sm:$0x1] }
  0x24   : > { %10886 = vmatprep.subr.bf16.mxu0 %v11034_v8  ;;  %11008 = vmatprep.subr.bf16.mxu1 %v11034_v8  ;;  %v758_v61 = vsel %vm11512_vm4, 0, %v757_v59  ;;  %v761_v62 = vsel %vm11512_vm4, 0, %v760_v60  ;;  %v707_v63 = vld [vmem:[#allocation2 + $0x6c] sm:$0x1]  ;;  %v710_v1 = vld [vmem:[#allocation2 + $0x78] sm:$0x1] }
  0x25   : > { %759 = vst [vmem:[#allocation2 + $0x5c] sm:$0x1] %v758_v61  ;;  %762 = vst [vmem:[#allocation2 + $0x68] sm:$0x1] %v761_v62  ;;  %v708_v0 = vsel %vm11502_vm2, 0, %v707_v63  ;;  %v711_v3 = vsel %vm11502_vm2, 0, %v710_v1 }
  0x26   : > { %709 = vst [vmem:[#allocation2 + $0x6c] sm:$0x1] %v708_v0  ;;  %v763_v2 = vld [vmem:[#allocation2 + $0x74] sm:$0x1]  ;;  %712 = vst [vmem:[#allocation2 + $0x78] sm:$0x1] %v711_v3 }
  0x27   : > { %10887 = vmatpush3.bf16.msra.mxu0 %v11034_v8  ;;  %11016 = vmatpush3.bf16.msra.mxu1 %v11034_v8  ;;  %v764_v4 = vsel %vm11512_vm4, 0, %v763_v2  ;;  %v766_v5 = vld [vmem:[#allocation2 + $0x80] sm:$0x1]  ;;  %v716_v7 = vld [vmem:[#allocation2 + $0x90] sm:$0x1] }
  0x28   : > { %10888 = vmatprep.subr.bf16.mxu0 %v11035_v9  ;;  %11009 = vmatprep.subr.bf16.mxu1 %v11035_v9  ;;  %765 = vst [vmem:[#allocation2 + $0x74] sm:$0x1] %v764_v4  ;;  %v767_v6 = vsel %vm11512_vm4, 0, %v766_v5  ;;  %v717_v8 = vsel %vm11502_vm2, 0, %v716_v7  ;;  %v725_v26 = vld [vmem:[#allocation2 + $0xb4] sm:$0x1] }
  0x29   : > { %768 = vst [vmem:[#allocation2 + $0x80] sm:$0x1] %v767_v6  ;;  %718 = vst [vmem:[#allocation2 + $0x90] sm:$0x1] %v717_v8  ;;  %v726_v27 = vsel %vm11502_vm2, 0, %v725_v26 }
  0x2a   : > { %727 = vst [vmem:[#allocation2 + $0xb4] sm:$0x1] %v726_v27  ;;  %v784_v28 = vld [vmem:[#allocation2 + $0xc8] sm:$0x1]  ;;  %v1323_v31 = vld [vmem:[#allocation2] sm:$0xf] }
  0x2b   : > { %10889 = vmatpush3.bf16.msra.mxu0 %v11035_v9  ;;  %11017 = vmatpush3.bf16.msra.mxu1 %v11035_v9  ;;  %v713_v9 = vld [vmem:[#allocation2 + $0x84] sm:$0x1]  ;;  %v785_v30 = vsel %vm11512_vm4, 0, %v784_v28  ;;  %v781_v33 = vld [vmem:[#allocation2 + $0xbc] sm:$0x1]  ;;  %v1375_v35 = vshrl.u32 %v1323_v31, 16 }
  0x2c   : > { %786 = vst [vmem:[#allocation2 + $0xc8] sm:$0x1] %v785_v30  ;;  %v1324_v32 = vld [vmem:[#allocation2 + $0x4] sm:$0xf]  ;;  %v782_v34 = vsel %vm11512_vm4, 0, %v781_v33  ;;  %v1378_v36 = vshll.u32 %v1323_v31, 16 }
  0x2d   : > { %v1384_v37 = vshll.u32 %v1324_v32, 16  ;;  %v1388_v38 = vshrl.u32 %v1324_v32, 16  ;;  %783 = vst [vmem:[#allocation2 + $0xbc] sm:$0x1] %v782_v34  ;;  %v1377_v39 = vrot.slane %v1375_v35, 4 }
  0x2e   : > { %10891 = vmatmul.mubr.bf16.vlgmr.msra.gmra.mrb[0].mxu0 %v11037_v10  ;;  %10907 = vmatmul.mubr.bf16.vlgmr.msra.gmra.mrb[0].mxu1 %v11045_v11  ;;  %v714_v10 = vsel %vm11502_vm2, 0, %v713_v9  ;;  %v772_v11 = vld [vmem:[#allocation2 + $0x98] sm:$0x1]  ;;  %v1380_v40 = vrot.slane %v1378_v36, 5  ;;  %v1355_v43 = vld [vmem:[#allocation2 + $0x8] sm:$0x1] }
  0x2f   : > { %10894 = vmatprep.mubr.bf16.mxu0 %v11038_v12  ;;  %10910 = vmatprep.mubr.bf16.mxu1 %v11046_v13  ;;  %715 = vst [vmem:[#allocation2 + $0x84] sm:$0x1] %v714_v10  ;;  %v773_v12 = vsel %vm11512_vm4, 0, %v772_v11  ;;  %v769_v13 = vld [vmem:[#allocation2 + $0x8c] sm:$0x1]  ;;  %v1386_v41 = vrot.slane %v1384_v37, 5 }
  0x30   : > { %774 = vst [vmem:[#allocation2 + $0x98] sm:$0x1] %v773_v12  ;;  %v1390_v42 = vrot.slane %v1388_v38, 4  ;;  %v1381_v44 = vor.u32 %v1380_v40, %v1377_v39  ;;  %v1394_v46 = vshll.u32 %v1355_v43, 16  ;;  %vm1371_vm6 = vsmask.f32 3328 }
  0x31   : > { %vm1372_vm7 = vsmask.f32 7440  ;;  %v11589_v47 = vld [vmem:[%s14553_s2] ss:$0 sm:$0xff]  ;;  %vm886_vm9 = vsmask.f32 4368 }
  0x32   : > { %v1391_v45 = vor.u32 %v1390_v42, %v1386_v41  ;;  %v1382_v48 = vrot.slane %v1381_v44, 4  ;;  %v1396_v50 = vrot.slane %v1394_v46, 5  ;;  %vm11591_vm8 = vmor %vm1371_vm6, %vm1372_vm7  ;;  %v1211_v28 = vld [vmem:[#allocation2 + $0xc] sm:$0xf] }
  0x33   : > { %vm11637_vm11 = vmor %vm678_vm1, %vm886_vm9 }
  0x34   : > { %v1392_v49 = vrot.slane %v1391_v45, 4  ;;  %v1387_v60 = vsel %vm11591_vm8, %v1382_v48, %v1386_v41 }
  0x36   : > { %10895 = vmatmul.mubr.bf16.gmra.mrb[4].mxu0 %v11039_v14  ;;  %10911 = vmatmul.mubr.bf16.gmra.mrb[4].mxu1 %v11047_v15  ;;  %v770_v14 = vsel %vm11512_vm4, 0, %v769_v13  ;;  %v722_v15 = vld [vmem:[#allocation2 + $0xa8] sm:$0x1]  ;;  %v1397_v61 = vsel %vm11591_vm8, %v1392_v49, %v1396_v50 }
  0x37   : > { %10898 = vmatprep.mubr.bf16.mxu0 %v11040_v16  ;;  %10914 = vmatprep.mubr.bf16.mxu1 %v11048_v17  ;;  %771 = vst [vmem:[#allocation2 + $0x8c] sm:$0x1] %v770_v14  ;;  %v723_v16 = vsel %vm11502_vm2, 0, %v722_v15  ;;  %v719_v17 = vld [vmem:[#allocation2 + $0x9c] sm:$0x1]  ;;  %v11610_v10 = vcombine.low %v1387_v60, %v1397_v61 }
  0x38   : > { %724 = vst [vmem:[#allocation2 + $0xa8] sm:$0x1] %v723_v16 }
  0x3e   : > { %10899 = vmatmul.mubr.bf16.gmra.mrb[8].mxu0 %v11041_v18  ;;  %10915 = vmatmul.mubr.bf16.gmra.mrb[8].mxu1 %v11049_v19  ;;  %v720_v18 = vsel %vm11502_vm2, 0, %v719_v17  ;;  %v778_v19 = vld [vmem:[#allocation2 + $0xb0] sm:$0x1] }
  0x3f   : > { %10902 = vmatprep.mubr.bf16.mxu0 %v11042_v20  ;;  %10918 = vmatprep.mubr.bf16.mxu1 %v11050_v21  ;;  %721 = vst [vmem:[#allocation2 + $0x9c] sm:$0x1] %v720_v18  ;;  %v779_v20 = vsel %vm11512_vm4, 0, %v778_v19  ;;  %v775_v21 = vld [vmem:[#allocation2 + $0xa4] sm:$0x1] }
  0x40   : > { %780 = vst [vmem:[#allocation2 + $0xb0] sm:$0x1] %v779_v20  ;;  %v1218_v20 = vld [vmem:[#allocation2 + $0x18] sm:$0xf] }
  0x46   : > { %10903 = vmatmul.mubr.bf16.gmra.mrb[12].mxu0 %v11043_v22  ;;  %10919 = vmatmul.mubr.bf16.gmra.mrb[12].mxu1 %v11051_v23  ;;  %v776_v22 = vsel %vm11512_vm4, 0, %v775_v21  ;;  %v728_v23 = vld [vmem:[#allocation2 + $0xc0] sm:$0x1] }
  0x47   : > { %777 = vst [vmem:[#allocation2 + $0xa4] sm:$0x1] %v776_v22  ;;  %v729_v25 = vsel %vm11502_vm2, 0, %v728_v23 }
  0x48   : > { %730 = vst [vmem:[#allocation2 + $0xc0] sm:$0x1] %v729_v25 }
 0x101   : > { %v10892_v52 = vpop.f32.mrb[0].mxu0  ;;  %v10908_v53 = vpop.f32.mrb[0].mxu1 }
 0x102   : > { %v518_v54 = vadd.f32 %v10892_v52, %v11589_v47  ;;  %v509_v55 = vpop.f32.mrb[1].mxu0  ;;  %v582_v56 = vadd.f32 %v10908_v53, %v11589_v47  ;;  %v573_v57 = vpop.f32.mrb[1].mxu1  ;;  %v1222_v53 = vld [vmem:[#allocation2 + $0x20] sm:$0x1] }
 0x103   : > { %v510_v58 = vadd.f32 %v11589_v47, %v509_v55  ;;  %v10893_v59 = vpop.f32.mrb[2].mxu0  ;;  %v11603_v62 = vadd.f32 %v11589_v47, %v573_v57  ;;  %v10909_v63 = vpop.f32.mrb[2].mxu1 }
 0x104   : > { %v638_v0 = vmax.f32 %v518_v54, 0.0  ;;  %v521_v1 = vadd.f32 %v10893_v59, %v11589_v47  ;;  %v512_v2 = vpop.f32.mrb[3].mxu0  ;;  %v654_v3 = vmax.f32 %v582_v56, 0.0  ;;  %v11607_v4 = vadd.f32 %v10909_v63, %v11589_v47  ;;  %v576_v5 = vpop.f32.mrb[3].mxu1  ;;  %v1215_v59 = vld [vmem:[#allocation2 + $0x14] sm:$0x1] }
 0x105   : > { %v636_v6 = vmax.f32 %v510_v58, 0.0  ;;  %v513_v7 = vadd.f32 %v11589_v47, %v512_v2  ;;  %v652_v13 = vmax.f32 %v11603_v62, 0.0  ;;  %v11614_v14 = vadd.f32 %v11589_v47, %v576_v5 }
 0x106   : > { %v10300_v8 = vpack.c.bf16 %v638_v0, %v638_v0  ;;  %v639_v9 = vmax.f32 %v521_v1, 0.0  ;;  %v11616_v17 = vpack.c.bf16 %v654_v3, %v654_v3  ;;  %v655_v18 = vmax.f32 %v11607_v4, 0.0 }
 0x107   : > { %v10298_v11 = vpack.c.bf16 %v636_v6, %v636_v6  ;;  %v637_v12 = vmax.f32 %v513_v7, 0.0 }
 0x108   : > { %v906_v15 = vshrl.u32 %v10300_v8, 16  ;;  %v10301_v16 = vpack.c.bf16 %v639_v9, %v639_v9  ;;  %v909_v19 = vshll.u32 %v10300_v8, 16 }
 0x109   : > { %v889_v21 = vshrl.u32 %v10298_v11, 16  ;;  %v892_v22 = vshll.u32 %v10298_v11, 16  ;;  %v10299_v23 = vpack.c.bf16 %v637_v12, %v637_v12  ;;  %v10896_v25 = vpop.f32.mrb[4].mxu0  ;;  %v11619_v26 = vpop.f32.mrb[4].mxu1 }
 0x10a   : > { %v908_v27 = vrot.slane %v906_v15, 7  ;;  %v914_v30 = vshrl.u32 %v10301_v16, 16  ;;  %v917_v31 = vshll.u32 %v10301_v16, 16  ;;  %v534_v32 = vadd.f32 %v10896_v25, %v11589_v47  ;;  %v525_v33 = vpop.f32.mrb[5].mxu0  ;;  %v11622_v34 = vpop.f32.mrb[5].mxu1 }
 0x10b   : > { %v891_v36 = vrot.slane %v889_v21, 7  ;;  %v897_v37 = vshrl.u32 %v10299_v23, 16  ;;  %v900_v38 = vshll.u32 %v10299_v23, 16  ;;  %v526_v39 = vadd.f32 %v11589_v47, %v525_v33  ;;  %v10897_v40 = vpop.f32.mrb[6].mxu0  ;;  %v11631_v41 = vpop.f32.mrb[6].mxu1 }
 0x10c   : > { %v911_v42 = vor.u32 %v909_v19, %v908_v27  ;;  %v912_v43 = vrot.slane %v908_v27, 4  ;;  %v916_v44 = vrot.slane %v914_v30, 7  ;;  %v642_v45 = vmax.f32 %v534_v32, 0.0  ;;  %v528_v46 = vpop.f32.mrb[7].mxu0  ;;  %v11633_v48 = vpop.f32.mrb[7].mxu1 }
 0x10d   : > { %v894_v49 = vor.u32 %v892_v22, %v891_v36  ;;  %v895_v50 = vrot.slane %v891_v36, 4  ;;  %v899_v54 = vrot.slane %v897_v37, 7  ;;  %v640_v55 = vmax.f32 %v526_v39, 0.0  ;;  %v1225_v19 = vld [vmem:[#allocation2 + $0x24] sm:$0xf] }
 0x10e   : > { %v1219_v56 = vsel %vm11626_vm10, %v911_v42, %v1218_v20  ;;  %v919_v57 = vor.u32 %v917_v31, %v916_v44  ;;  %v921_v58 = vrot.slane %v916_v44, 4  ;;  %v10304_v60 = vpack.c.bf16 %v642_v45, %v642_v45  ;;  %v1232_v27 = vld [vmem:[#allocation2 + $0x30] sm:$0xf] }
 0x10f   : > { %1220 = vst [vmem:[#allocation2 + $0x18] sm:$0xf] %v1219_v56  ;;  %v1212_v61 = vsel %vm11626_vm10, %v894_v49, %v1211_v28  ;;  %v902_v63 = vor.u32 %v900_v38, %v899_v54  ;;  %v904_v0 = vrot.slane %v899_v54, 4  ;;  %v10302_v1 = vpack.c.bf16 %v640_v55, %v640_v55 }
 0x110   : > { %1213 = vst [vmem:[#allocation2 + $0xc] sm:$0xf] %v1212_v61  ;;  %v920_v2 = vsel %vm11637_vm11, %v912_v43, %v919_v57  ;;  %v1223_v3 = vsel %vm11502_vm2, %v921_v58, %v1222_v53  ;;  %v940_v5 = vshrl.u32 %v10304_v60, 16  ;;  %v943_v6 = vshll.u32 %v10304_v60, 16 }
 0x111   : > { %1221 = vst.msk [vmem:[#allocation2 + $0x1c] sm:$0xf] %vm668_vm5, %v920_v2  ;;  %1224 = vst [vmem:[#allocation2 + $0x20] sm:$0x1] %v1223_v3  ;;  %v903_v7 = vsel %vm11637_vm11, %v895_v50, %v902_v63  ;;  %v1216_v8 = vsel %vm11502_vm2, %v904_v0, %v1215_v59  ;;  %v923_v9 = vshrl.u32 %v10302_v1, 16  ;;  %v926_v11 = vshll.u32 %v10302_v1, 16 }
 0x112   : > { %v10900_v12 = vpop.f32.mrb[8].mxu0  ;;  %v11654_v15 = vpop.f32.mrb[8].mxu1  ;;  %1214 = vst.msk [vmem:[#allocation2 + $0x10] sm:$0xf] %vm668_vm5, %v903_v7  ;;  %1217 = vst [vmem:[#allocation2 + $0x14] sm:$0x1] %v1216_v8  ;;  %v537_v20 = vadd.f32 %v10897_v40, %v11589_v47  ;;  %v529_v21 = vadd.f32 %v11589_v47, %v528_v46  ;;  %v11671_v33 = vpack.c.bf16 %v652_v13, %v652_v13 }
 0x113   : > { %v11657_v16 = vrot.slane %v940_v5, 7  ;;  %v550_v22 = vadd.f32 %v10900_v12, %v11589_v47  ;;  %v541_v23 = vpop.f32.mrb[9].mxu0  ;;  %v11662_v25 = vpop.f32.mrb[9].mxu1  ;;  %v11664_v28 = vrot.slane %v923_v9, 7  ;;  %v1042_v32 = vshrl.u32 %v11616_v17, 16 }
 0x114   : > { %v542_v30 = vadd.f32 %v11589_v47, %v541_v23  ;;  %v10901_v31 = vpop.f32.mrb[10].mxu0  ;;  %v11673_v36 = vpop.f32.mrb[10].mxu1  ;;  %v643_v39 = vmax.f32 %v537_v20, 0.0  ;;  %v641_v40 = vmax.f32 %v529_v21, 0.0  ;;  %v1236_v63 = vld [vmem:[#allocation2 + $0x38] sm:$0x1] }
 0x115   : > { %v945_v37 = vor.u32 %v943_v6, %v11657_v16  ;;  %v946_v38 = vrot.slane %v11657_v16, 4  ;;  %v544_v42 = vpop.f32.mrb[11].mxu0  ;;  %v11677_v43 = vpop.f32.mrb[11].mxu1  ;;  %v928_v44 = vor.u32 %v926_v11, %v11664_v28  ;;  %v929_v45 = vrot.slane %v11664_v28, 4  ;;  %v1229_v0 = vld [vmem:[#allocation2 + $0x2c] sm:$0x1] }
 0x116   : > { %v646_v46 = vmax.f32 %v550_v22, 0.0  ;;  %v644_v62 = vmax.f32 %v542_v30, 0.0  ;;  %v10305_v49 = vpack.c.bf16 %v643_v39, %v643_v39  ;;  %v10303_v50 = vpack.c.bf16 %v641_v40, %v641_v40  ;;  %v1246_v11 = vld [vmem:[#allocation2 + $0x48] sm:$0xf]  ;;  %v1239_v12 = vld [vmem:[#allocation2 + $0x3c] sm:$0xf] }
 0x117   : > { %v1233_v13 = vsel %vm11626_vm10, %v945_v37, %v1232_v27  ;;  %v553_v53 = vadd.f32 %v10901_v31, %v11589_v47  ;;  %v1226_v54 = vsel %vm11626_vm10, %v928_v44, %v1225_v19  ;;  %v545_v57 = vadd.f32 %v11589_v47, %v544_v42 }
 0x118   : > { %1234 = vst [vmem:[#allocation2 + $0x30] sm:$0xf] %v1233_v13  ;;  %v10308_v55 = vpack.c.bf16 %v646_v46, %v646_v46  ;;  %v10306_v56 = vpack.c.bf16 %v644_v62, %v644_v62  ;;  %1227 = vst [vmem:[#allocation2 + $0x24] sm:$0xf] %v1226_v54  ;;  %v948_v58 = vshrl.u32 %v10305_v49, 16  ;;  %v951_v59 = vshll.u32 %v10305_v49, 16 }
 0x119   : > { %v931_v60 = vshrl.u32 %v10303_v50, 16  ;;  %v934_v61 = vshll.u32 %v10303_v50, 16  ;;  %v10904_v6 = vpop.f32.mrb[12].mxu0  ;;  %v11052_v7 = vld [vmem:[#allocation2 + $0x18] sm:$0xff]   ;;  %v647_v16 = vmax.f32 %v553_v53, 0.0  ;;  %v645_v19 = vmax.f32 %v545_v57, 0.0 }
 0x11a   : > { %v974_v1 = vshrl.u32 %v10308_v55, 16  ;;  %v977_v2 = vshll.u32 %v10308_v55, 16  ;;  %v957_v3 = vshrl.u32 %v10306_v56, 16  ;;  %v960_v5 = vshll.u32 %v10306_v56, 16  ;;  %v557_v20 = vpop.f32.mrb[13].mxu0  ;;  %v11053_v21 = vld [vmem:[#allocation2 + $0xc] sm:$0xff]   ;;  %2372 = vrot.lane.b32.xlu1 %v11052_v7, %s11403_s27 }
 0x11b   : > { %v950_v8 = vrot.slane %v948_v58, 7  ;;  %v933_v9 = vrot.slane %v931_v60, 7  ;;  %v566_v27 = vadd.f32 %v10904_v6, %v11589_v47  ;;  %v558_v28 = vadd.f32 %v11589_v47, %v557_v20  ;;  %v10905_v30 = vpop.f32.mrb[14].mxu0  ;;  %v11694_v31 = vpop.f32.mrb[12].mxu1  ;;  %2370 = vrot.lane.b32.xlu0 %v11053_v21, %s11403_s27 }
 0x11c   : > { %v11687_v22 = vrot.slane %v974_v1, 7  ;;  %v11689_v23 = vrot.slane %v957_v3, 7  ;;  %v560_v44 = vpop.f32.mrb[15].mxu0  ;;  %v11697_v46 = vpop.f32.mrb[13].mxu1  ;;  %v11701_v49 = vrot.slane %v1042_v32, 7  ;;  %v1045_v50 = vshll.u32 %v11616_v17, 16 }
 0x11d   : > { %v953_v37 = vor.u32 %v951_v59, %v950_v8  ;;  %v955_v39 = vrot.slane %v950_v8, 4  ;;  %v936_v40 = vor.u32 %v934_v61, %v933_v9  ;;  %v938_v42 = vrot.slane %v933_v9, 4  ;;  %v11722_v61 = vpop.f32.mrb[14].mxu1 }
 0x11e   : > { %v979_v62 = vor.u32 %v977_v2, %v11687_v22  ;;  %v962_v13 = vor.u32 %v960_v5, %v11689_v23  ;;  %v10307_v57 = vpack.c.bf16 %v645_v19, %v645_v19  ;;  %v648_v58 = vmax.f32 %v558_v28, 0.0  ;;  %v11724_v3 = vpop.f32.mrb[15].mxu1  ;;  %v1250_v19 = vld [vmem:[#allocation2 + $0x50] sm:$0x1] }
 0x11f   : > { %v954_v53 = vsel %vm11637_vm11, %v946_v38, %v953_v37  ;;  %v1237_v54 = vsel %vm11502_vm2, %v955_v39, %v1236_v63  ;;  %v937_v55 = vsel %vm11637_vm11, %v929_v45, %v936_v40  ;;  %v1230_v56 = vsel %vm11502_vm2, %v938_v42, %v1229_v0  ;;  %1886 = vrot.lane.b32.xlu0 %v11610_v10, %s11403_s27  ;;  %v1243_v40 = vld [vmem:[#allocation2 + $0x44] sm:$0x1] }
 0x120   : > { %1235 = vst.msk [vmem:[#allocation2 + $0x34] sm:$0xf] %vm668_vm5, %v954_v53  ;;  %1238 = vst [vmem:[#allocation2 + $0x38] sm:$0x1] %v1237_v54  ;;  %v1247_v17 = vsel %vm11626_vm10, %v979_v62, %v1246_v11  ;;  %v1240_v32 = vsel %vm11626_vm10, %v962_v13, %v1239_v12  ;;  %v10309_v38 = vpack.c.bf16 %v647_v16, %v647_v16  ;;  %v650_v45 = vmax.f32 %v566_v27, 0.0 }
 0x121   : > { %1228 = vst.msk [vmem:[#allocation2 + $0x28] sm:$0xf] %vm668_vm5, %v937_v55  ;;  %1231 = vst [vmem:[#allocation2 + $0x2c] sm:$0x1] %v1230_v56  ;;  %v569_v59 = vadd.f32 %v10905_v30, %v11589_v47  ;;  %v653_v60 = vmax.f32 %v11614_v14, 0.0  ;;  %v965_v1 = vshrl.u32 %v10307_v57, 16  ;;  %v10310_v6 = vpack.c.bf16 %v648_v58, %v648_v58 }
 0x122   : > { %1248 = vst [vmem:[#allocation2 + $0x48] sm:$0xf] %v1247_v17  ;;  %1241 = vst [vmem:[#allocation2 + $0x3c] sm:$0xf] %v1240_v32  ;;  %v982_v63 = vshrl.u32 %v10309_v38, 16  ;;  %v985_v0 = vshll.u32 %v10309_v38, 16  ;;  %v10312_v5 = vpack.c.bf16 %v650_v45, %v650_v45  ;;  %v1047_v10 = vor.u32 %v1045_v50, %v11701_v49 }
 0x123   : > { %v968_v2 = vshll.u32 %v10307_v57, 16  ;;  %v651_v7 = vmax.f32 %v569_v59, 0.0  ;;  %v1025_v8 = vshrl.u32 %v11671_v33, 16  ;;  %v980_v9 = vrot.slane %v11687_v22, 4  ;;  %v1274_v14 = vld [vmem:[#allocation2 + $0x78] sm:$0xf] }
 0x124   : > { %v984_v11 = vrot.slane %v982_v63, 7  ;;  %v967_v12 = vrot.slane %v965_v1, 7  ;;  %v963_v16 = vrot.slane %v11689_v23, 4  ;;  %v1008_v20 = vshrl.u32 %v10312_v5, 16  ;;  %v1253_v53 = vld [vmem:[#allocation2 + $0x54] sm:$0xf] }
 0x125   : > { %v991_v21 = vshrl.u32 %v10310_v6, 16  ;;  %v561_v27 = vadd.f32 %v11589_v47, %v560_v44  ;;  %v1011_v42 = vshll.u32 %v10312_v5, 16  ;;  %v994_v62 = vshll.u32 %v10310_v6, 16  ;;  %v1260_v57 = vld [vmem:[#allocation2 + $0x60] sm:$0xf] }
 0x126   : > { %v987_v28 = vor.u32 %v985_v0, %v984_v11  ;;  %v989_v30 = vrot.slane %v984_v11, 4  ;;  %v970_v37 = vor.u32 %v968_v2, %v967_v12  ;;  %v972_v39 = vrot.slane %v967_v12, 4  ;;  %v1264_v12 = vld [vmem:[#allocation2 + $0x68] sm:$0x1] }
 0x127   : > { %v10313_v22 = vpack.c.bf16 %v651_v7, %v651_v7  ;;  %v1275_v13 = vsel %vm11626_vm10, %v1047_v10, %v1274_v14  ;;  %v1048_v44 = vrot.slane %v11701_v49, 4  ;;  %v10317_v54 = vpack.c.bf16 %v655_v18, %v655_v18  ;;  %v11055_v59 = vld [vmem:[#allocation2 + $0x30] sm:$0xff]   ;;  %v1267_v10 = vld [vmem:[#allocation2 + $0x6c] sm:$0xf] }
 0x128   : > { %v988_v50 = vsel %vm11637_vm11, %v980_v9, %v987_v28  ;;  %v1251_v23 = vsel %vm11502_vm2, %v989_v30, %v1250_v19  ;;  %1276 = vst [vmem:[#allocation2 + $0x78] sm:$0xf] %v1275_v13  ;;  %v11054_v55 = vld [vmem:[#allocation2 + $0x24] sm:$0xff]   ;;  %v971_v56 = vsel %vm11637_vm11, %v963_v16, %v970_v37  ;;  %v1244_v17 = vsel %vm11502_vm2, %v972_v39, %v1243_v40  ;;  %v1325_v28 = vld [vmem:[#allocation2 + $0xc] sm:$0xf] }
 0x129   : > { %1249 = vst.msk [vmem:[#allocation2 + $0x4c] sm:$0xf] %vm668_vm5, %v988_v50  ;;  %1252 = vst [vmem:[#allocation2 + $0x50] sm:$0x1] %v1251_v23  ;;  %v1010_v32 = vrot.slane %v1008_v20, 7  ;;  %v11746_v38 = vrot.slane %v991_v21, 7  ;;  %v10315_v58 = vpack.c.bf16 %v653_v60, %v653_v60  ;;  %2374 = vrot.lane.b32.xlu0 %v11054_v55, %s11403_s27 }
 0x12a   : > { %1242 = vst.msk [vmem:[#allocation2 + $0x40] sm:$0xf] %vm668_vm5, %v971_v56  ;;  %1245 = vst [vmem:[#allocation2 + $0x44] sm:$0x1] %v1244_v17  ;;  %v1016_v4 = vshrl.u32 %v10313_v22, 16  ;;  %v1019_v45 = vshll.u32 %v10313_v22, 16 }
 0x12b   : > { %v649_v18 = vmax.f32 %v561_v27, 0.0  ;;  %v1013_v63 = vor.u32 %v1011_v42, %v1010_v32  ;;  %v1014_v0 = vrot.slane %v1010_v32, 4  ;;  %v996_v1 = vor.u32 %v994_v62, %v11746_v38  ;;  %v1278_v22 = vld [vmem:[#allocation2 + $0x80] sm:$0x1]  ;;  %v1271_v55 = vld [vmem:[#allocation2 + $0x74] sm:$0x1] }
 0x12c   : > { %v997_v2 = vrot.slane %v11746_v38, 4  ;;  %v1018_v5 = vrot.slane %v1016_v4, 7  ;;  %v1027_v7 = vrot.slane %v1025_v8, 7  ;;  %v1028_v9 = vshll.u32 %v11671_v33, 16  ;;  %v1257_v33 = vld [vmem:[#allocation2 + $0x5c] sm:$0x1] }
 0x12d   : > { %v10311_v6 = vpack.c.bf16 %v649_v18, %v649_v18  ;;  %v1261_v11 = vsel %vm11626_vm10, %v1013_v63, %v1260_v57  ;;  %v1254_v60 = vsel %vm11626_vm10, %v996_v1, %v1253_v53  ;;  %v1050_v14 = vshrl.u32 %v10317_v54, 16  ;;  %2376 = vrot.lane.b32.xlu0 %v11055_v59, %s11403_s27  ;;  %v1326_v32 = vld [vmem:[#allocation2 + $0x10] sm:$0xf]  ;;  %v1356_v63 = vld [vmem:[#allocation2 + $0x14] sm:$0x1] }
 0x12e   : > { %v1053_v16 = vshll.u32 %v10317_v54, 16  ;;  %1262 = vst [vmem:[#allocation2 + $0x60] sm:$0xf] %v1261_v11  ;;  %1255 = vst [vmem:[#allocation2 + $0x54] sm:$0xf] %v1254_v60  ;;  %v1021_v19 = vor.u32 %v1019_v45, %v1018_v5  ;;  %v1023_v20 = vrot.slane %v1018_v5, 4  ;;  %v1030_v8 = vor.u32 %v1028_v9, %v1027_v7 }
 0x12f   : > { %v999_v21 = vshrl.u32 %v10311_v6, 16  ;;  %v1002_v27 = vshll.u32 %v10311_v6, 16  ;;  %v1031_v30 = vrot.slane %v1027_v7, 4  ;;  %v1052_v37 = vrot.slane %v1050_v14, 7  ;;  %v1328_v7 = vld [vmem:[#allocation2 + $0x1c] sm:$0xf] }
 0x130   : > { %v1033_v39 = vshrl.u32 %v10315_v58, 16  ;;  %v1022_v40 = vsel %vm11637_vm11, %v1014_v0, %v1021_v19  ;;  %v1265_v42 = vsel %vm11502_vm2, %v1023_v20, %v1264_v12  ;;  %v1036_v13 = vshll.u32 %v10315_v58, 16  ;;  %v1327_v0 = vld [vmem:[#allocation2 + $0x18] sm:$0xf] }
 0x131   : > { %v1001_v62 = vrot.slane %v999_v21, 7  ;;  %1263 = vst.msk [vmem:[#allocation2 + $0x64] sm:$0xf] %vm668_vm5, %v1022_v40  ;;  %1266 = vst [vmem:[#allocation2 + $0x68] sm:$0x1] %v1265_v42  ;;  %v1268_v50 = vsel %vm11626_vm10, %v1030_v8, %v1267_v10  ;;  %v1055_v23 = vor.u32 %v1053_v16, %v1052_v37  ;;  %v1057_v53 = vrot.slane %v1052_v37, 4 }
 0x132   : > { %v1035_v54 = vrot.slane %v1033_v39, 7  ;;  %1269 = vst [vmem:[#allocation2 + $0x6c] sm:$0xf] %v1268_v50  ;;  %v1399_v38 = vshrl.u32 %v1325_v28, 16  ;;  %v1402_v57 = vshll.u32 %v1325_v28, 16  ;;  %v11056_v4 = vld [vmem:[#allocation2 + $0x3c] sm:$0xff]   ;;  %v598_v14 = vadd.f32 %v11619_v26, %v11589_v47 }
 0x133   : > { %v1004_v56 = vor.u32 %v1002_v27, %v1001_v62  ;;  %v1006_v17 = vrot.slane %v1001_v62, 4  ;;  %v1056_v45 = vsel %vm11637_vm11, %v1048_v44, %v1055_v23  ;;  %v1279_v18 = vsel %vm11502_vm2, %v1057_v53, %v1278_v22  ;;  %2378 = vrot.lane.b32.xlu0 %v11056_v4, %s11403_s27  ;;  %v11057_v44 = vld [vmem:[#allocation2 + $0x48] sm:$0xff]   ;;  %v1357_v21 = vld [vmem:[#allocation2 + $0x20] sm:$0x1] }
 0x134   : > { %v1038_v58 = vor.u32 %v1036_v13, %v1035_v54  ;;  %v1040_v59 = vrot.slane %v1035_v54, 4  ;;  %1277 = vst.msk [vmem:[#allocation2 + $0x7c] sm:$0xf] %vm668_vm5, %v1056_v45  ;;  %1280 = vst [vmem:[#allocation2 + $0x80] sm:$0x1] %v1279_v18  ;;  %v1401_v49 = vrot.slane %v1399_v38, 4  ;;  %v590_v50 = vadd.f32 %v11589_v47, %v11622_v34 }
 0x135   : > { %v1005_v1 = vsel %vm11637_vm11, %v997_v2, %v1004_v56  ;;  %v1258_v5 = vsel %vm11502_vm2, %v1006_v17, %v1257_v33  ;;  %v1404_v6 = vrot.slane %v1402_v57, 5  ;;  %v1408_v11 = vshll.u32 %v1326_v32, 16  ;;  %v1329_v57 = vld [vmem:[#allocation2 + $0x24] sm:$0xf] }
 0x136   : > { %1256 = vst.msk [vmem:[#allocation2 + $0x58] sm:$0xf] %vm668_vm5, %v1005_v1  ;;  %1259 = vst [vmem:[#allocation2 + $0x5c] sm:$0x1] %v1258_v5  ;;  %v1039_v9 = vsel %vm11637_vm11, %v1031_v30, %v1038_v58  ;;  %v1272_v2 = vsel %vm11502_vm2, %v1040_v59, %v1271_v55  ;;  %v1412_v60 = vshrl.u32 %v1326_v32, 16  ;;  %v1418_v10 = vshll.u32 %v1356_v63, 16 }
 0x137   : > { %1270 = vst.msk [vmem:[#allocation2 + $0x70] sm:$0xf] %vm668_vm5, %v1039_v9  ;;  %1273 = vst [vmem:[#allocation2 + $0x74] sm:$0x1] %v1272_v2  ;;  %v1405_v12 = vor.u32 %v1404_v6, %v1401_v49  ;;  %v1423_v16 = vshrl.u32 %v1327_v0, 16  ;;  %v1410_v19 = vrot.slane %v1408_v11, 5  ;;  %2380 = vrot.lane.b32.xlu0 %v11057_v44, %s11403_s27  ;;  %v601_v55 = vadd.f32 %v11631_v41, %v11589_v47 }
 0x138   : > { %v1414_v20 = vrot.slane %v1412_v60, 4  ;;  %v1426_v27 = vshll.u32 %v1327_v0, 16  ;;  %v1432_v28 = vshll.u32 %v1328_v7, 16  ;;  %v1420_v8 = vrot.slane %v1418_v10, 5  ;;  %v1288_v5 = vld [vmem:[#allocation2 + $0x90] sm:$0xf] }
 0x139   : > { %v1406_v33 = vrot.slane %v1405_v12, 4  ;;  %v658_v30 = vmax.f32 %v598_v14, 0.0  ;;  %v1425_v37 = vrot.slane %v1423_v16, 4  ;;  %v1436_v62 = vshrl.u32 %v1328_v7, 16  ;;  %v1330_v60 = vld [vmem:[#allocation2 + $0x28] sm:$0xf] }
 0x13a   : > { %v1415_v39 = vor.u32 %v1414_v20, %v1410_v19  ;;  %v1428_v40 = vrot.slane %v1426_v27, 5  ;;  %v1434_v42 = vrot.slane %v1432_v28, 5  ;;  %v1442_v13 = vshll.u32 %v1357_v21, 16  ;;  %v11059_v12 = vld [vmem:[#allocation2 + $0x60] sm:$0xff]  }
 0x13b   : > { %v1411_v22 = vsel %vm11591_vm8, %v1406_v33, %v1410_v19  ;;  %v10320_v26 = vpack.c.bf16 %v658_v30, %v658_v30  ;;  %v1438_v54 = vrot.slane %v1436_v62, 4  ;;  %v656_v38 = vmax.f32 %v590_v50, 0.0  ;;  %v1358_v19 = vld [vmem:[#allocation2 + $0x2c] sm:$0x1]  ;;  %v1281_v28 = vld [vmem:[#allocation2 + $0x84] sm:$0xf] }
 0x13c   : > { %v1416_v23 = vrot.slane %v1415_v39, 4  ;;  %v1429_v53 = vor.u32 %v1428_v40, %v1425_v37  ;;  %v1444_v32 = vrot.slane %v1442_v13, 5  ;;  %v659_v58 = vmax.f32 %v601_v55, 0.0  ;;  %v1292_v30 = vld [vmem:[#allocation2 + $0x98] sm:$0x1] }
 0x13d   : > { %v1076_v56 = vshrl.u32 %v10320_v26, 16  ;;  %v1079_v17 = vshll.u32 %v10320_v26, 16  ;;  %v1439_v18 = vor.u32 %v1438_v54, %v1434_v42  ;;  %v10318_v34 = vpack.c.bf16 %v656_v38, %v656_v38  ;;  %v11058_v1 = vld [vmem:[#allocation2 + $0x54] sm:$0xff]  }
 0x13e   : > { %v1421_v4 = vsel %vm11591_vm8, %v1416_v23, %v1420_v8  ;;  %v1430_v45 = vrot.slane %v1429_v53, 4  ;;  %v593_v0 = vadd.f32 %v11589_v47, %v11633_v48  ;;  %v10321_v6 = vpack.c.bf16 %v659_v58, %v659_v58  ;;  %2382 = vrot.lane.b32.xlu0 %v11058_v1, %s11403_s27  ;;  %v11060_v50 = vld [vmem:[#allocation2 + $0x6c] sm:$0xff]   ;;  %v11069_v23 = vld [vmem:[%s14554_s3] sm:$0xff]  }
 0x13f   : > { %v9790_v59 = vcombine.low %v1411_v22, %v1421_v4  ;;  %v1078_v63 = vrot.slane %v1076_v56, 7  ;;  %v1440_v49 = vrot.slane %v1439_v18, 4  ;;  %v1447_v7 = vshrl.u32 %v1329_v57, 16 }
 0x140   : > { %v1435_v41 = vsel %vm11591_vm8, %v1430_v45, %v1434_v42  ;;  %v1059_v2 = vshrl.u32 %v10318_v34, 16  ;;  %v1062_v11 = vshll.u32 %v10318_v34, 16  ;;  %v1084_v10 = vshrl.u32 %v10321_v6, 16  ;;  %v11068_v42 = vld [vmem:[%s14554_s3 + $0x40] sm:$0xff]   ;;  %v1332_v45 = vld [vmem:[#allocation2 + $0x34] sm:$0xf] }
 0x141   : > { %1888 = vrot.lane.b32.xlu1 %v9790_v59, %s11403_s27  ;;  %v1081_v44 = vor.u32 %v1079_v17, %v1078_v63  ;;  %v1082_v9 = vrot.slane %v1078_v63, 4  ;;  %v1445_v48 = vsel %vm11591_vm8, %v1440_v49, %v1444_v32  ;;  %v1087_v14 = vshll.u32 %v10321_v6, 16  ;;  %v1331_v17 = vld [vmem:[#allocation2 + $0x30] sm:$0xf]  ;;  %10386 = vmatprep.subr.bf16.mxu1 %v11068_v42  ;;  %v1285_v34 = vld [vmem:[#allocation2 + $0x8c] sm:$0x1] }
 0x142   : > { %v657_v16 = vmax.f32 %v593_v0, 0.0  ;;  %v9791_v21 = vcombine.low %v1435_v41, %v1445_v48  ;;  %v1061_v27 = vrot.slane %v1059_v2, 7  ;;  %v1449_v33 = vrot.slane %v1447_v7, 4  ;;  %2384 = vrot.lane.b32.xlu0 %v11059_v12, %s11403_s27  ;;  %10387 = vmatpush3.bf16.msra.mxu1 %v11069_v23  ;;  %v11061_v49 = vld [vmem:[#allocation2 + $0x78] sm:$0xff]  }
 0x143   : > { %v1289_v20 = vsel %vm11626_vm10, %v1081_v44, %v1288_v5  ;;  %v1086_v8 = vrot.slane %v1084_v10, 7  ;;  %v1450_v39 = vshll.u32 %v1329_v57, 16  ;;  %v1456_v40 = vshll.u32 %v1330_v60, 16  ;;  %v1359_v44 = vld [vmem:[#allocation2 + $0x38] sm:$0x1] }
 0x144   : > { %1290 = vst [vmem:[#allocation2 + $0x90] sm:$0xf] %v1289_v20  ;;  %v10319_v37 = vpack.c.bf16 %v657_v16, %v657_v16  ;;  %v1064_v62 = vor.u32 %v1062_v11, %v1061_v27  ;;  %v1065_v22 = vrot.slane %v1061_v27, 4  ;;  %v1460_v26 = vshrl.u32 %v1330_v60, 16 }
 0x145   : > { %1890 = vrot.lane.b32.xlu1 %v9791_v21, %s11403_s27  ;;  %v1466_v13 = vshll.u32 %v1358_v19, 16  ;;  %v1089_v53 = vor.u32 %v1087_v14, %v1086_v8  ;;  %v1091_v54 = vrot.slane %v1086_v8, 4  ;;  %v1452_v38 = vrot.slane %v1450_v39, 5  ;;  %v1333_v39 = vld [vmem:[#allocation2 + $0x3c] sm:$0xf] }
 0x146   : > { %v1067_v55 = vshrl.u32 %v10319_v37, 16  ;;  %v1070_v56 = vshll.u32 %v10319_v37, 16  ;;  %v1282_v32 = vsel %vm11626_vm10, %v1064_v62, %v1281_v28  ;;  %v1458_v57 = vrot.slane %v1456_v40, 5  ;;  %2386 = vrot.lane.b32.xlu0 %v11060_v50, %s11403_s27  ;;  %v11070_v28 = vld [vmem:[%s14554_s3 + $0x48] sm:$0xff]  }
 0x147   : > { %v1462_v4 = vrot.slane %v1460_v26, 4  ;;  %1283 = vst [vmem:[#allocation2 + $0x84] sm:$0xf] %v1282_v32  ;;  %v1090_v18 = vsel %vm11637_vm11, %v1082_v9, %v1089_v53  ;;  %v1293_v58 = vsel %vm11502_vm2, %v1091_v54, %v1292_v30  ;;  %v1468_v63 = vrot.slane %v1466_v13, 5  ;;  %v11071_v40 = vld [vmem:[%s14554_s3 + $0x8] sm:$0xff]   ;;  %10388 = vmatprep.subr.bf16.mxu1 %v11070_v28 }
 0x148   : > { %v1069_v59 = vrot.slane %v1067_v55, 7  ;;  %1291 = vst.msk [vmem:[#allocation2 + $0x94] sm:$0xf] %vm668_vm5, %v1090_v18  ;;  %1294 = vst [vmem:[#allocation2 + $0x98] sm:$0x1] %v1293_v58  ;;  %v1453_v0 = vor.u32 %v1452_v38, %v1449_v33  ;;  %v614_v5 = vadd.f32 %v11654_v15, %v11589_v47  ;;  %v1471_v41 = vshrl.u32 %v1331_v17, 16  ;;  %10389 = vmatpush3.bf16.msra.mxu1 %v11071_v40 }
 0x149   : > { %v1463_v1 = vor.u32 %v1462_v4, %v1458_v57  ;;  %v1474_v9 = vshll.u32 %v1331_v17, 16  ;;  %v1480_v2 = vshll.u32 %v1332_v45, 16  ;;  %v1484_v27 = vshrl.u32 %v1332_v45, 16  ;;  %v11072_v17 = vld [vmem:[%s14554_s3 + $0x50] sm:$0xff]  }
 0x14a   : > { %v1072_v6 = vor.u32 %v1070_v56, %v1069_v59  ;;  %v1074_v7 = vrot.slane %v1069_v59, 4  ;;  %v1454_v11 = vrot.slane %v1453_v0, 4  ;;  %v662_v12 = vmax.f32 %v614_v5, 0.0  ;;  %2388 = vrot.lane.b32.xlu0 %v11061_v49, %s11403_s27  ;;  %10390 = vmatprep.subr.bf16.mxu1 %v11072_v17 }
 0x14b   : > { %v1464_v60 = vrot.slane %v1463_v1, 4  ;;  %v1473_v48 = vrot.slane %v1471_v41, 4  ;;  %v1476_v15 = vrot.slane %v1474_v9, 5  ;;  %v1482_v16 = vrot.slane %v1480_v2, 5 }
 0x14c   : > { %v1073_v10 = vsel %vm11637_vm11, %v1065_v22, %v1072_v6  ;;  %v1286_v14 = vsel %vm11502_vm2, %v1074_v7, %v1285_v34  ;;  %v1459_v19 = vsel %vm11591_vm8, %v1454_v11, %v1458_v57  ;;  %v10324_v21 = vpack.c.bf16 %v662_v12, %v662_v12  ;;  %v1334_v34 = vld [vmem:[#allocation2 + $0x40] sm:$0xf]  ;;  %v1360_v7 = vld [vmem:[#allocation2 + $0x44] sm:$0x1]  ;;  %v11073_v12 = vld [vmem:[%s14554_s3 + $0x10] sm:$0xff]  }
 0x14d   : > { %1284 = vst.msk [vmem:[#allocation2 + $0x88] sm:$0xf] %vm668_vm5, %v1073_v10  ;;  %1287 = vst [vmem:[#allocation2 + $0x8c] sm:$0x1] %v1286_v14  ;;  %v1469_v20 = vsel %vm11591_vm8, %v1464_v60, %v1468_v63  ;;  %v1477_v8 = vor.u32 %v1476_v15, %v1473_v48  ;;  %v1490_v30 = vshll.u32 %v1359_v44, 16  ;;  %v606_v37 = vadd.f32 %v11589_v47, %v11662_v25 }
 0x14e   : > { %v9792_v33 = vcombine.low %v1459_v19, %v1469_v20  ;;  %v1110_v42 = vshrl.u32 %v10324_v21, 16  ;;  %v1113_v62 = vshll.u32 %v10324_v21, 16  ;;  %v1486_v22 = vrot.slane %v1484_v27, 4  ;;  %v1295_v48 = vld [vmem:[#allocation2 + $0x9c] sm:$0xf]  ;;  %10391 = vmatpush3.bf16.msra.mxu1 %v11073_v12 }
 0x14f   : > { %v617_v26 = vadd.f32 %v11673_v36, %v11589_v47  ;;  %v1478_v13 = vrot.slane %v1477_v8, 4  ;;  %v1492_v50 = vrot.slane %v1490_v30, 5  ;;  %v660_v23 = vmax.f32 %v606_v37, 0.0  ;;  %v1302_v36 = vld [vmem:[#allocation2 + $0xa8] sm:$0xf]  ;;  %v11063_v60 = vld [vmem:[#allocation2 + $0x90] sm:$0xff]  }
 0x150   : > { %1892 = vrot.lane.b32.xlu1 %v9792_v33, %s11403_s27  ;;  %v609_v25 = vadd.f32 %v11589_v47, %v11677_v43  ;;  %v11845_v53 = vrot.slane %v1110_v42, 7  ;;  %v1487_v54 = vor.u32 %v1486_v22, %v1482_v16  ;;  %v1495_v56 = vshrl.u32 %v1333_v39, 16  ;;  %v1306_v21 = vld [vmem:[#allocation2 + $0xb0] sm:$0x1]  ;;  %v11074_v33 = vld [vmem:[%s14554_s3 + $0x58] sm:$0xff]  }
 0x151   : > { %v663_v55 = vmax.f32 %v617_v26, 0.0  ;;  %v1483_v32 = vsel %vm11591_vm8, %v1478_v13, %v1482_v16  ;;  %v10322_v38 = vpack.c.bf16 %v660_v23, %v660_v23  ;;  %v1498_v4 = vshll.u32 %v1333_v39, 16  ;;  %v1299_v37 = vld [vmem:[#allocation2 + $0xa4] sm:$0x1]  ;;  %v1335_v13 = vld [vmem:[#allocation2 + $0x48] sm:$0xf]  ;;  %10392 = vmatprep.subr.bf16.mxu1 %v11074_v33 }
 0x152   : > { %v661_v57 = vmax.f32 %v609_v25, 0.0  ;;  %v1115_v45 = vor.u32 %v1113_v62, %v11845_v53  ;;  %v1116_v47 = vrot.slane %v11845_v53, 4  ;;  %v1488_v43 = vrot.slane %v1487_v54, 4 }
 0x153   : > { %v10325_v18 = vpack.c.bf16 %v663_v55, %v663_v55  ;;  %v1093_v58 = vshrl.u32 %v10322_v38, 16  ;;  %v1096_v59 = vshll.u32 %v10322_v38, 16  ;;  %v1497_v0 = vrot.slane %v1495_v56, 4  ;;  %v1361_v55 = vld [vmem:[#allocation2 + $0x50] sm:$0x1] }
 0x154   : > { %v10323_v63 = vpack.c.bf16 %v661_v57, %v661_v57  ;;  %v11062_v1 = vld [vmem:[#allocation2 + $0x84] sm:$0xff]   ;;  %v1303_v5 = vsel %vm11626_vm10, %v1115_v45, %v1302_v36  ;;  %v1493_v41 = vsel %vm11591_vm8, %v1488_v43, %v1492_v50  ;;  %v1500_v14 = vrot.slane %v1498_v4, 5  ;;  %v1336_v50 = vld [vmem:[#allocation2 + $0x4c] sm:$0xf]  ;;  %v11075_v43 = vld [vmem:[%s14554_s3 + $0x18] sm:$0xff]  }
 0x155   : > { %v1118_v49 = vshrl.u32 %v10325_v18, 16  ;;  %v1121_v6 = vshll.u32 %v10325_v18, 16  ;;  %1304 = vst [vmem:[#allocation2 + $0xa8] sm:$0xf] %v1303_v5  ;;  %v9793_v44 = vcombine.low %v1483_v32, %v1493_v41  ;;  %v1095_v9 = vrot.slane %v1093_v58, 7  ;;  %2390 = vrot.lane.b32.xlu0 %v11062_v1, %s11403_s27  ;;  %10393 = vmatpush3.bf16.msra.mxu1 %v11075_v43  ;;  %v11076_v5 = vld [vmem:[%s14554_s3 + $0x60] sm:$0xff]  }
 0x156   : > { %v1101_v2 = vshrl.u32 %v10323_v63, 16  ;;  %v1104_v11 = vshll.u32 %v10323_v63, 16  ;;  %v1504_v15 = vshll.u32 %v1334_v34, 16  ;;  %v1508_v16 = vshrl.u32 %v1334_v34, 16  ;;  %v11203_v32 = vld [vmem:[%s14553_s2] ss:$0 sm:$0xff]  ;;  %10394 = vmatprep.subr.bf16.mxu1 %v11076_v5 }
 0x157   : > { %v1120_v10 = vrot.slane %v1118_v49, 7  ;;  %1894 = vrot.lane.b32.xlu1 %v9793_v44, %s11403_s27  ;;  %v1098_v19 = vor.u32 %v1096_v59, %v1095_v9  ;;  %v1099_v20 = vrot.slane %v1095_v9, 4  ;;  %v1514_v28 = vshll.u32 %v1360_v7, 16  ;;  %v1337_v44 = vld [vmem:[#allocation2 + $0x54] sm:$0xf] }
 0x158   : > { %v1103_v27 = vrot.slane %v1101_v2, 7  ;;  %v1501_v39 = vor.u32 %v1500_v14, %v1497_v0  ;;  %v1506_v40 = vrot.slane %v1504_v15, 5  ;;  %v1510_v26 = vrot.slane %v1508_v16, 4  ;;  %v1313_v5 = vld [vmem:[#allocation2 + $0xbc] sm:$0x1] }
 0x159   : > { %v1123_v8 = vor.u32 %v1121_v6, %v1120_v10  ;;  %v1125_v30 = vrot.slane %v1120_v10, 4  ;;  %v1296_v42 = vsel %vm11626_vm10, %v1098_v19, %v1295_v48  ;;  %2392 = vrot.lane.b32.xlu0 %v11063_v60, %s11403_s27  ;;  %v1516_v54 = vrot.slane %v1514_v28, 5 }
 0x15a   : > { %v1106_v62 = vor.u32 %v1104_v11, %v1103_v27  ;;  %v1108_v22 = vrot.slane %v1103_v27, 4  ;;  %1297 = vst [vmem:[#allocation2 + $0x9c] sm:$0xf] %v1296_v42  ;;  %v1502_v53 = vrot.slane %v1501_v39, 4  ;;  %v1511_v36 = vor.u32 %v1510_v26, %v1506_v40  ;;  %v1316_v27 = vld [vmem:[#allocation2 + $0xc0] sm:$0xf] }
 0x15b   : > { %v1124_v23 = vsel %vm11637_vm11, %v1116_v47, %v1123_v8  ;;  %v1307_v25 = vsel %vm11502_vm2, %v1125_v30, %v1306_v21  ;;  %v630_v38 = vadd.f32 %v11203_v32, %v11694_v31  ;;  %v1519_v4 = vshrl.u32 %v1335_v13, 16 }
 0x15c   : > { %1305 = vst.msk [vmem:[#allocation2 + $0xac] sm:$0xf] %vm668_vm5, %v1124_v23  ;;  %1308 = vst [vmem:[#allocation2 + $0xb0] sm:$0x1] %v1307_v25  ;;  %v1107_v56 = vsel %vm11637_vm11, %v1099_v20, %v1106_v62  ;;  %v1300_v17 = vsel %vm11502_vm2, %v1108_v22, %v1299_v37  ;;  %v1507_v57 = vsel %vm11591_vm8, %v1502_v53, %v1506_v40  ;;  %v1522_v45 = vshll.u32 %v1335_v13, 16 }
 0x15d   : > { %1298 = vst.msk [vmem:[#allocation2 + $0xa0] sm:$0xf] %vm668_vm5, %v1107_v56  ;;  %1301 = vst [vmem:[#allocation2 + $0xa4] sm:$0x1] %v1300_v17  ;;  %v1528_v47 = vshll.u32 %v1336_v50, 16  ;;  %v1512_v18 = vrot.slane %v1511_v36, 4  ;;  %v622_v1 = vadd.f32 %v11203_v32, %v11697_v46  ;;  %v633_v60 = vadd.f32 %v11203_v32, %v11722_v61 }
 0x15e   : > { %v666_v58 = vmax.f32 %v630_v38, 0.0  ;;  %v1532_v59 = vshrl.u32 %v1336_v50, 16  ;;  %v1538_v63 = vshll.u32 %v1361_v55, 16  ;;  %v1521_v34 = vrot.slane %v1519_v4, 4  ;;  %v11077_v46 = vld [vmem:[%s14554_s3 + $0x20] sm:$0xff]   ;;  %v11079_v50 = vld [vmem:[%s14554_s3 + $0x28] sm:$0xff]  }
 0x15f   : > { %v1524_v0 = vrot.slane %v1522_v45, 5  ;;  %v1530_v31 = vrot.slane %v1528_v47, 5  ;;  %v1517_v41 = vsel %vm11591_vm8, %v1512_v18, %v1516_v54  ;;  %v664_v11 = vmax.f32 %v622_v1, 0.0  ;;  %10395 = vmatpush3.bf16.msra.mxu1 %v11077_v46  ;;  %v1338_v13 = vld [vmem:[#allocation2 + $0x58] sm:$0xf] }
 0x160   : > { %v10328_v49 = vpack.c.bf16 %v666_v58, %v666_v58  ;;  %v1534_v6 = vrot.slane %v1532_v59, 4  ;;  %v1540_v7 = vrot.slane %v1538_v63, 5  ;;  %v9794_v9 = vcombine.low %v1507_v57, %v1517_v41  ;;  %v1362_v55 = vld [vmem:[#allocation2 + $0x5c] sm:$0x1]  ;;  %v1309_v36 = vld [vmem:[#allocation2 + $0xb4] sm:$0xf] }
 0x161   : > { %v1525_v2 = vor.u32 %v1524_v0, %v1521_v34  ;;  %v625_v14 = vadd.f32 %v11203_v32, %v11724_v3  ;;  %v10326_v16 = vpack.c.bf16 %v664_v11, %v664_v11  ;;  %v667_v19 = vmax.f32 %v633_v60, 0.0  ;;  %v11078_v3 = vld [vmem:[%s14554_s3 + $0x68] sm:$0xff]  }
 0x162   : > { %v1144_v12 = vshrl.u32 %v10328_v49, 16  ;;  %v1147_v48 = vshll.u32 %v10328_v49, 16  ;;  %v1535_v10 = vor.u32 %v1534_v6, %v1530_v31  ;;  %1896 = vrot.lane.b32.xlu1 %v9794_v9, %s11403_s27  ;;  %v1543_v20 = vshrl.u32 %v1337_v44, 16  ;;  %10396 = vmatprep.subr.bf16.mxu1 %v11078_v3  ;;  %v1320_v18 = vld [vmem:[#allocation2 + $0xc8] sm:$0x1] }
 0x163   : > { %v1526_v15 = vrot.slane %v1525_v2, 4  ;;  %v665_v28 = vmax.f32 %v625_v14, 0.0  ;;  %v1546_v33 = vshll.u32 %v1337_v44, 16  ;;  %v1127_v30 = vshrl.u32 %v10326_v16, 16  ;;  %v11065_v56 = vld [vmem:[#allocation2 + $0xa8] sm:$0xff]   ;;  %10397 = vmatpush3.bf16.msra.mxu1 %v11079_v50 }
 0x164   : > { %v1146_v21 = vrot.slane %v1144_v12, 7  ;;  %v1536_v61 = vrot.slane %v1535_v10, 4  ;;  %v1130_v37 = vshll.u32 %v10326_v16, 16  ;;  %v10329_v39 = vpack.c.bf16 %v667_v19, %v667_v19  ;;  %v11064_v40 = vld [vmem:[#allocation2 + $0x9c] sm:$0xff]   ;;  %v1340_v2 = vld [vmem:[#allocation2 + $0x64] sm:$0xf] }
 0x165   : > { %v1531_v8 = vsel %vm11591_vm8, %v1526_v15, %v1530_v31  ;;  %v10327_v26 = vpack.c.bf16 %v665_v28, %v665_v28  ;;  %v1129_v25 = vrot.slane %v1127_v30, 7  ;;  %2394 = vrot.lane.b32.xlu0 %v11064_v40, %s11403_s27  ;;  %v1545_v57 = vrot.slane %v1543_v20, 4  ;;  %v1339_v49 = vld [vmem:[#allocation2 + $0x60] sm:$0xf]  ;;  %v1341_v10 = vld [vmem:[#allocation2 + $0x6c] sm:$0xf] }
 0x166   : > { %v1149_v42 = vor.u32 %v1147_v48, %v1146_v21  ;;  %v1150_v62 = vrot.slane %v1146_v21, 4  ;;  %v1541_v22 = vsel %vm11591_vm8, %v1536_v61, %v1540_v7  ;;  %v1152_v53 = vshrl.u32 %v10329_v39, 16  ;;  %v1363_v48 = vld [vmem:[#allocation2 + $0x68] sm:$0x1]  ;;  %v11080_v20 = vld [vmem:[%s14554_s3 + $0x70] sm:$0xff]  }
 0x167   : > { %v9795_v23 = vcombine.low %v1531_v8, %v1541_v22  ;;  %v1155_v54 = vshll.u32 %v10329_v39, 16  ;;  %v1135_v32 = vshrl.u32 %v10327_v26, 16  ;;  %v1138_v38 = vshll.u32 %v10327_v26, 16  ;;  %v1343_v8 = vld [vmem:[#allocation2 + $0x78] sm:$0xf]  ;;  %v11081_v30 = vld [vmem:[%s14554_s3 + $0x30] sm:$0xff]   ;;  %10398 = vmatprep.subr.bf16.mxu1 %v11080_v20 }
 0x168   : > { %v1317_v17 = vsel %vm11626_vm10, %v1149_v42, %v1316_v27  ;;  %v1132_v4 = vor.u32 %v1130_v37, %v1129_v25  ;;  %v1133_v45 = vrot.slane %v1129_v25, 4  ;;  %v1154_v47 = vrot.slane %v1152_v53, 7  ;;  %v1364_v26 = vld [vmem:[#allocation2 + $0x74] sm:$0x1]  ;;  %10399 = vmatpush3.bf16.msra.mxu1 %v11081_v30 }
 0x169   : > { %1318 = vst [vmem:[#allocation2 + $0xc0] sm:$0xf] %v1317_v17  ;;  %1898 = vrot.lane.b32.xlu1 %v9795_v23, %s11403_s27  ;;  %v1548_v43 = vrot.slane %v1546_v33, 5  ;;  %v1137_v58 = vrot.slane %v1135_v32, 7  ;;  %v1552_v59 = vshll.u32 %v1338_v13, 16  ;;  %v1556_v63 = vshrl.u32 %v1338_v13, 16  ;;  %2396 = vrot.lane.b32.xlu0 %v11065_v56, %s11403_s27 }
 0x16a   : > { %v1562_v34 = vshll.u32 %v1362_v55, 16  ;;  %v1310_v0 = vsel %vm11626_vm10, %v1132_v4, %v1309_v36  ;;  %v1157_v31 = vor.u32 %v1155_v54, %v1154_v47  ;;  %v1159_v1 = vrot.slane %v1154_v47, 4  ;;  %v1342_v33 = vld [vmem:[#allocation2 + $0x70] sm:$0xf]  ;;  %v1344_v36 = vld [vmem:[#allocation2 + $0x7c] sm:$0xf] }
 0x16b   : > { %v1549_v41 = vor.u32 %v1548_v43, %v1545_v57  ;;  %1311 = vst [vmem:[#allocation2 + $0xb4] sm:$0xf] %v1310_v0  ;;  %v1140_v6 = vor.u32 %v1138_v38, %v1137_v58  ;;  %v1142_v7 = vrot.slane %v1137_v58, 4  ;;  %v1554_v44 = vrot.slane %v1552_v59, 5  ;;  %v1365_v4 = vld [vmem:[#allocation2 + $0x80] sm:$0x1] }
 0x16c   : > { %v1558_v9 = vrot.slane %v1556_v63, 4  ;;  %v1158_v11 = vsel %vm11637_vm11, %v1150_v62, %v1157_v31  ;;  %v1321_v60 = vsel %vm11502_vm2, %v1159_v1, %v1320_v18  ;;  %v1564_v12 = vrot.slane %v1562_v34, 5  ;;  %v1345_v59 = vld [vmem:[#allocation2 + $0x84] sm:$0xf]  ;;  %v1346_v1 = vld [vmem:[#allocation2 + $0x88] sm:$0xf] }
 0x16d   : > { %v1550_v46 = vrot.slane %v1549_v41, 4  ;;  %1319 = vst.msk [vmem:[#allocation2 + $0xc4] sm:$0xf] %vm668_vm5, %v1158_v11  ;;  %1322 = vst [vmem:[#allocation2 + $0xc8] sm:$0x1] %v1321_v60  ;;  %v1141_v14 = vsel %vm11637_vm11, %v1133_v45, %v1140_v6  ;;  %v1314_v15 = vsel %vm11502_vm2, %v1142_v7, %v1313_v5  ;;  %v1567_v19 = vshrl.u32 %v1339_v49, 16 }
 0x16e   : > { %v1559_v16 = vor.u32 %v1558_v9, %v1554_v44  ;;  %1312 = vst.msk [vmem:[#allocation2 + $0xb8] sm:$0xf] %vm668_vm5, %v1141_v14  ;;  %1315 = vst [vmem:[#allocation2 + $0xbc] sm:$0x1] %v1314_v15  ;;  %v1570_v27 = vshll.u32 %v1339_v49, 16  ;;  %v1576_v61 = vshll.u32 %v1340_v2, 16 }
 0x16f   : > { %v1555_v21 = vsel %vm11591_vm8, %v1550_v46, %v1554_v44  ;;  %v1580_v28 = vshrl.u32 %v1340_v2, 16  ;;  %v1569_v39 = vrot.slane %v1567_v19, 4  ;;  %v1586_v40 = vshll.u32 %v1363_v48, 16  ;;  %v11082_v44 = vld [vmem:[%s14554_s3 + $0x78] sm:$0xff]   ;;  %v1366_v19 = vld [vmem:[#allocation2 + $0x8c] sm:$0x1] }
 0x170   : > { %v1560_v37 = vrot.slane %v1559_v16, 4  ;;  %v1591_v3 = vshrl.u32 %v1341_v10, 16  ;;  %v1572_v42 = vrot.slane %v1570_v27, 5  ;;  %v1578_v62 = vrot.slane %v1576_v61, 5  ;;  %10400 = vmatprep.subr.bf16.mxu1 %v11082_v44  ;;  %v1351_v44 = vld [vmem:[#allocation2 + $0xa8] sm:$0xf] }
 0x171   : > { %v1582_v22 = vrot.slane %v1580_v28, 4  ;;  %v1594_v13 = vshll.u32 %v1341_v10, 16  ;;  %v1588_v23 = vrot.slane %v1586_v40, 5  ;;  %v1600_v53 = vshll.u32 %v1342_v33, 16 }
 0x172   : > { %v1565_v50 = vsel %vm11591_vm8, %v1560_v37, %v1564_v12  ;;  %v1593_v25 = vrot.slane %v1591_v3, 4  ;;  %v1573_v55 = vor.u32 %v1572_v42, %v1569_v39  ;;  %v1604_v38 = vshrl.u32 %v1342_v33, 16  ;;  %v1348_v3 = vld [vmem:[#allocation2 + $0x94] sm:$0xf] }
 0x173   : > { %v9796_v54 = vcombine.low %v1555_v21, %v1565_v50  ;;  %v1583_v56 = vor.u32 %v1582_v22, %v1578_v62  ;;  %v1596_v17 = vrot.slane %v1594_v13, 5  ;;  %v1602_v32 = vrot.slane %v1600_v53, 5 }
 0x174   : > { %v1610_v57 = vshll.u32 %v1364_v26, 16  ;;  %v1615_v45 = vshrl.u32 %v1343_v8, 16  ;;  %v1574_v47 = vrot.slane %v1573_v55, 4  ;;  %v1618_v58 = vshll.u32 %v1343_v8, 16  ;;  %v11067_v14 = vld [vmem:[#allocation2 + $0xc0] sm:$0xff]  }
 0x175   : > { %1900 = vrot.lane.b32.xlu1 %v9796_v54, %s11403_s27  ;;  %v1584_v43 = vrot.slane %v1583_v56, 4  ;;  %v1597_v18 = vor.u32 %v1596_v17, %v1593_v25  ;;  %v1606_v63 = vrot.slane %v1604_v38, 4  ;;  %v1624_v31 = vshll.u32 %v1344_v36, 16  ;;  %v11066_v7 = vld [vmem:[#allocation2 + $0xb4] sm:$0xff]   ;;  %v1347_v8 = vld [vmem:[#allocation2 + $0x90] sm:$0xf] }
 0x176   : > { %v1612_v34 = vrot.slane %v1610_v57, 5  ;;  %v1617_v0 = vrot.slane %v1615_v45, 4  ;;  %v1579_v5 = vsel %vm11591_vm8, %v1574_v47, %v1578_v62  ;;  %v1620_v6 = vrot.slane %v1618_v58, 5  ;;  %2398 = vrot.lane.b32.xlu0 %v11066_v7, %s11403_s27  ;;  %v11083_v54 = vld [vmem:[%s14554_s3 + $0x38] sm:$0xff]   ;;  %v11084_v38 = vld [vmem:[%s14554_s3 + $0x100] sm:$0xff]  }
 0x177   : > { %v1589_v41 = vsel %vm11591_vm8, %v1584_v43, %v1588_v23  ;;  %v1598_v49 = vrot.slane %v1597_v18, 4  ;;  %v1607_v2 = vor.u32 %v1606_v63, %v1602_v32  ;;  %v1626_v11 = vrot.slane %v1624_v31, 5  ;;  %v1367_v23 = vld [vmem:[#allocation2 + $0x98] sm:$0x1]  ;;  %v1350_v43 = vld [vmem:[#allocation2 + $0xa0] sm:$0xf]  ;;  %10401 = vmatpush3.bf16.msra.mxu1 %v11083_v54 }
 0x178   : > { %v9797_v9 = vcombine.low %v1579_v5, %v1589_v41  ;;  %v1628_v60 = vshrl.u32 %v1344_v36, 16  ;;  %v1621_v12 = vor.u32 %v1620_v6, %v1617_v0  ;;  %v1634_v48 = vshll.u32 %v1365_v4, 16  ;;  %10922 = vmatprep.subr.bf16.mxu1 %v11084_v38 }
 0x179   : > { %v1603_v46 = vsel %vm11591_vm8, %v1598_v49, %v1602_v32  ;;  %v1639_v10 = vshrl.u32 %v1345_v59, 16  ;;  %v1608_v15 = vrot.slane %v1607_v2, 4  ;;  %v1642_v20 = vshll.u32 %v1345_v59, 16  ;;  %v1349_v32 = vld [vmem:[#allocation2 + $0x9c] sm:$0xf] }
 0x17a   : > { %1902 = vrot.lane.b32.xlu1 %v9797_v9, %s11403_s27  ;;  %v1630_v16 = vrot.slane %v1628_v60, 4  ;;  %v1648_v21 = vshll.u32 %v1346_v1, 16  ;;  %v1622_v27 = vrot.slane %v1621_v12, 4  ;;  %v1636_v61 = vrot.slane %v1634_v48, 5  ;;  %2400 = vrot.lane.b32.xlu0 %v11067_v14, %s11403_s27  ;;  %v1368_v49 = vld [vmem:[#allocation2 + $0xa4] sm:$0x1] }
 0x17b   : > { %v1641_v28 = vrot.slane %v1639_v10, 4  ;;  %v1652_v33 = vshrl.u32 %v1346_v1, 16  ;;  %v1613_v30 = vsel %vm11591_vm8, %v1608_v15, %v1612_v34  ;;  %v1644_v39 = vrot.slane %v1642_v20, 5 }
 0x17c   : > { %v1631_v37 = vor.u32 %v1630_v16, %v1626_v11  ;;  %v1650_v40 = vrot.slane %v1648_v21, 5  ;;  %v9798_v42 = vcombine.low %v1603_v46, %v1613_v30  ;;  %v1627_v62 = vsel %vm11591_vm8, %v1622_v27, %v1626_v11  ;;  %v1352_v46 = vld [vmem:[#allocation2 + $0xac] sm:$0xf] }
 0x17d   : > { %v1654_v22 = vrot.slane %v1652_v33, 4  ;;  %v1658_v26 = vshll.u32 %v1366_v19, 16  ;;  %v1645_v50 = vor.u32 %v1644_v39, %v1641_v28  ;;  %v1663_v25 = vshrl.u32 %v1347_v8, 16  ;;  %v1369_v28 = vld [vmem:[#allocation2 + $0xb0] sm:$0x1] }
 0x17e   : > { %v1632_v13 = vrot.slane %v1631_v37, 4  ;;  %v1666_v53 = vshll.u32 %v1347_v8, 16  ;;  %1904 = vrot.lane.b32.xlu1 %v9798_v42, %s11403_s27  ;;  %v1672_v17 = vshll.u32 %v1348_v3, 16  ;;  %v1676_v36 = vshrl.u32 %v1348_v3, 16  ;;  %v3299_v8 = vld [vmem:[#allocation2 + $0x18] sm:$0xf] }
 0x17f   : > { %v1655_v55 = vor.u32 %v1654_v22, %v1650_v40  ;;  %v1660_v56 = vrot.slane %v1658_v26, 5  ;;  %v1646_v4 = vrot.slane %v1645_v50, 4  ;;  %v1665_v45 = vrot.slane %v1663_v25, 4  ;;  %v3300_v3 = vld [vmem:[#allocation2 + $0x1c] sm:$0xf] }
 0x180   : > { %v1637_v57 = vsel %vm11591_vm8, %v1632_v13, %v1636_v61  ;;  %v1668_v47 = vrot.slane %v1666_v53, 5  ;;  %v1674_v59 = vrot.slane %v1672_v17, 5  ;;  %v1678_v63 = vrot.slane %v1676_v36, 4 }
 0x181   : > { %v9799_v18 = vcombine.low %v1627_v62, %v1637_v57  ;;  %v1656_v58 = vrot.slane %v1655_v55, 4  ;;  %v1651_v34 = vsel %vm11591_vm8, %v1646_v4, %v1650_v40  ;;  %v1682_v31 = vshll.u32 %v1367_v23, 16  ;;  %v1353_v4 = vld [vmem:[#allocation2 + $0xb4] sm:$0xf] }
 0x182   : > { %v1669_v0 = vor.u32 %v1668_v47, %v1665_v45  ;;  %v1687_v1 = vshrl.u32 %v1349_v32, 16  ;;  %v1679_v41 = vor.u32 %v1678_v63, %v1674_v59  ;;  %v1690_v6 = vshll.u32 %v1349_v32, 16 }
 0x183   : > { %1906 = vrot.lane.b32.xlu1 %v9799_v18, %s11403_s27  ;;  %v1661_v5 = vsel %vm11591_vm8, %v1656_v58, %v1660_v56  ;;  %v1696_v7 = vshll.u32 %v1350_v43, 16  ;;  %v1684_v11 = vrot.slane %v1682_v31, 5  ;;  %v1700_v14 = vshrl.u32 %v1350_v43, 16  ;;  %v3331_v56 = vld [vmem:[#allocation2 + $0x20] sm:$0x1] }
 0x184   : > { %v9800_v9 = vcombine.low %v1651_v34, %v1661_v5  ;;  %v1670_v2 = vrot.slane %v1669_v0, 4  ;;  %v1689_v60 = vrot.slane %v1687_v1, 4  ;;  %v1680_v12 = vrot.slane %v1679_v41, 4  ;;  %v1354_v58 = vld [vmem:[#allocation2 + $0xb8] sm:$0xf] }
 0x185   : > { %v1692_v48 = vrot.slane %v1690_v6, 5  ;;  %v1698_v10 = vrot.slane %v1696_v7, 5  ;;  %v1706_v16 = vshll.u32 %v1368_v49, 16  ;;  %v1711_v19 = vshrl.u32 %v1351_v44, 16  ;;  %v3301_v49 = vld [vmem:[#allocation2 + $0x24] sm:$0xf] }
 0x186   : > { %v1675_v15 = vsel %vm11591_vm8, %v1670_v2, %v1674_v59  ;;  %v1714_v20 = vshll.u32 %v1351_v44, 16  ;;  %v1685_v21 = vsel %vm11591_vm8, %v1680_v12, %v1684_v11  ;;  %v1702_v61 = vrot.slane %v1700_v14, 4  ;;  %v1370_v44 = vld [vmem:[#allocation2 + $0xbc] sm:$0x1] }
 0x187   : > { %1908 = vrot.lane.b32.xlu1 %v9800_v9, %s11403_s27  ;;  %v1693_v27 = vor.u32 %v1692_v48, %v1689_v60  ;;  %v1720_v33 = vshll.u32 %v1352_v46, 16  ;;  %v9801_v30 = vcombine.low %v1675_v15, %v1685_v21  ;;  %v1708_v37 = vrot.slane %v1706_v16, 5  ;;  %v3302_v48 = vld [vmem:[#allocation2 + $0x28] sm:$0xf] }
 0x188   : > { %v1713_v39 = vrot.slane %v1711_v19, 4  ;;  %v1716_v40 = vrot.slane %v1714_v20, 5  ;;  %v1703_v62 = vor.u32 %v1702_v61, %v1698_v10  ;;  %v1724_v26 = vshrl.u32 %v1352_v46, 16  ;;  %v2914_v61 = vld [vmem:[#allocation2 + $0xc] sm:$0xe] }
 0x189   : > { %v1694_v42 = vrot.slane %v1693_v27, 4  ;;  %v1722_v22 = vrot.slane %v1720_v33, 5  ;;  %v1730_v50 = vshll.u32 %v1369_v28, 16  ;;  %v3348_v23 = vshrl.u32 %v3299_v8, 16  ;;  %v3332_v33 = vld [vmem:[#allocation2 + $0x2c] sm:$0x1] }
 0x18a   : > { %v1717_v13 = vor.u32 %v1716_v40, %v1713_v39  ;;  %v3351_v25 = vshll.u32 %v3299_v8, 16  ;;  %v1704_v54 = vrot.slane %v1703_v62, 4  ;;  %v1726_v55 = vrot.slane %v1724_v26, 4  ;;  %v11090_v39 = vld [vmem:[%s14554_s3 + $0xc0] sm:$0xff]  }
 0x18b   : > { %1910 = vrot.lane.b32.xlu1 %v9801_v30, %s11403_s27  ;;  %v1699_v53 = vsel %vm11591_vm8, %v1694_v42, %v1698_v10  ;;  %v3357_v17 = vshll.u32 %v3300_v3, 16  ;;  %v1732_v32 = vrot.slane %v1730_v50, 5  ;;  %v3350_v38 = vrot.slane %v3348_v23, 4  ;;  %v11091_v26 = vld [vmem:[%s14554_s3 + $0x80] sm:$0xff]   ;;  %10498 = vmatprep.subr.bf16.mxu0 %v11090_v39 }
 0x18c   : > { %v1718_v36 = vrot.slane %v1717_v13, 4  ;;  %v3353_v57 = vrot.slane %v3351_v25, 5  ;;  %v1709_v45 = vsel %vm11591_vm8, %v1704_v54, %v1708_v37  ;;  %v1727_v47 = vor.u32 %v1726_v55, %v1722_v22  ;;  %v11093_v54 = vld [vmem:[%s14554_s3 + $0xc8] sm:$0xff]   ;;  %10499 = vmatpush3.bf16.msra.mxu0 %v11091_v26  ;;  %v11100_v26 = vld [vmem:[%s14554_s3 + $0x98] sm:$0xff]  }
 0x18d   : > { %v3359_v43 = vrot.slane %v3357_v17, 5  ;;  %v3361_v18 = vshrl.u32 %v3300_v3, 16  ;;  %v9802_v59 = vcombine.low %v1699_v53, %v1709_v45  ;;  %v3367_v0 = vshll.u32 %v3331_v56, 16  ;;  %v2484_v53 = vld [vmem:[#allocation2 + $0x14] sm:$0x1]  ;;  %10500 = vmatprep.subr.bf16.mxu0 %v11093_v54  ;;  %v11102_v54 = vld [vmem:[%s14554_s3 + $0xe0] sm:$0xff]  }
 0x18e   : > { %v1723_v63 = vsel %vm11591_vm8, %v1718_v36, %v1722_v22  ;;  %v3354_v34 = vor.u32 %v3353_v57, %v3350_v38  ;;  %v1728_v31 = vrot.slane %v1727_v47, 4  ;;  %v1735_v5 = vshrl.u32 %v1353_v4, 16  ;;  %v2483_v22 = vld [vmem:[#allocation2 + $0x10] sm:$0xf]  ;;  %v3304_v45 = vld [vmem:[#allocation2 + $0x34] sm:$0xf] }
 0x18f   : > { %v3363_v1 = vrot.slane %v3361_v18, 4  ;;  %v1738_v41 = vshll.u32 %v1353_v4, 16  ;;  %1912 = vrot.lane.b32.xlu1 %v9802_v59, %s11403_s27  ;;  %v3369_v7 = vrot.slane %v3367_v0, 5  ;;  %v1744_v9 = vshll.u32 %v1354_v58, 16  ;;  %v3303_v36 = vld [vmem:[#allocation2 + $0x30] sm:$0xf] }
 0x190   : > { %v3355_v6 = vrot.slane %v3354_v34, 4  ;;  %v1748_v2 = vshrl.u32 %v1354_v58, 16  ;;  %v1733_v11 = vsel %vm11591_vm8, %v1728_v31, %v1732_v32  ;;  %v1737_v46 = vrot.slane %v1735_v5, 4  ;;  %v11094_v32 = vld [vmem:[%s14554_s3 + $0x88] sm:$0xff]   ;;  %v2486_v5 = vld [vmem:[#allocation2 + $0x1c] sm:$0xf] }
 0x191   : > { %v3364_v60 = vor.u32 %v3363_v1, %v3359_v43  ;;  %v1740_v12 = vrot.slane %v1738_v41, 5  ;;  %v9803_v10 = vcombine.low %v1723_v63, %v1733_v11  ;;  %v1746_v15 = vrot.slane %v1744_v9, 5  ;;  %v3333_v63 = vld [vmem:[#allocation2 + $0x38] sm:$0x1]  ;;  %10501 = vmatpush3.bf16.msra.mxu0 %v11094_v32  ;;  %v11096_v9 = vld [vmem:[%s14554_s3 + $0xd0] sm:$0xff]  }
 0x192   : > { %v3360_v14 = vsel %vm11591_vm8, %v3355_v6, %v3359_v43  ;;  %v1750_v16 = vrot.slane %v1748_v2, 4  ;;  %v1754_v21 = vshll.u32 %v1370_v44, 16  ;;  %v3372_v27 = vshrl.u32 %v3301_v49, 16  ;;  %v2487_v44 = vld [vmem:[#allocation2 + $0x20] sm:$0x1]  ;;  %10502 = vmatprep.subr.bf16.mxu0 %v11096_v9 }
 0x193   : > { %v3365_v19 = vrot.slane %v3364_v60, 4  ;;  %v1741_v20 = vor.u32 %v1740_v12, %v1737_v46  ;;  %1914 = vrot.lane.b32.xlu1 %v9803_v10, %s11403_s27  ;;  %v3375_v8 = vshll.u32 %v3301_v49, 16  ;;  %v3381_v30 = vshll.u32 %v3302_v48, 16  ;;  %v2915_v12 = vld [vmem:[#allocation2 + $0x18] sm:$0xe] }
 0x194   : > { %v1751_v28 = vor.u32 %v1750_v16, %v1746_v15  ;;  %v3385_v37 = vshrl.u32 %v3302_v48, 16  ;;  %v1756_v42 = vrot.slane %v1754_v21, 5  ;;  %v3374_v62 = vrot.slane %v3372_v27, 4  ;;  %v11097_v48 = vld [vmem:[%s14554_s3 + $0x90] sm:$0xff]   ;;  %v2490_v32 = vld [vmem:[#allocation2 + $0x2c] sm:$0x1] }
 0x195   : > { %v3370_v40 = vsel %vm11591_vm8, %v3365_v19, %v3369_v7  ;;  %v1742_v3 = vrot.slane %v1741_v20, 4  ;;  %v3377_v23 = vrot.slane %v3375_v8, 5  ;;  %v3383_v25 = vrot.slane %v3381_v30, 5  ;;  %v3305_v19 = vld [vmem:[#allocation2 + $0x3c] sm:$0xf]  ;;  %10503 = vmatpush3.bf16.msra.mxu0 %v11097_v48 }
 0x196   : > { %v9917_v13 = vcombine.low %v3360_v14, %v3370_v40  ;;  %v1752_v50 = vrot.slane %v1751_v28, 4  ;;  %v3387_v56 = vrot.slane %v3385_v37, 4  ;;  %v3391_v17 = vshll.u32 %v3332_v33, 16  ;;  %v3306_v28 = vld [vmem:[#allocation2 + $0x40] sm:$0xf]  ;;  %v11099_v33 = vld [vmem:[%s14554_s3 + $0xd8] sm:$0xff]  }
 0x197   : > { %v1747_v55 = vsel %vm11591_vm8, %v1742_v3, %v1746_v15  ;;  %v3378_v57 = vor.u32 %v3377_v23, %v3374_v62  ;;  %v9853_v4 = vrot.slane %v2914_v61, 9  ;;  %v14571_v58 = vmov 0  ;;  %10504 = vmatprep.subr.bf16.mxu0 %v11099_v33  ;;  %v3335_v9 = vld [vmem:[#allocation2 + $0x50] sm:$0x1] }
 0x198   : > { %3859 = vrot.lane.b32.xlu0 %v9917_v13, %s11403_s27  ;;  %v1757_v38 = vsel %vm11591_vm8, %v1752_v50, %v1756_v42  ;;  %v3388_v43 = vor.u32 %v3387_v56, %v3383_v25  ;;  %v3393_v18 = vrot.slane %v3391_v17, 5  ;;  %v14572_v58 = vsel %vm12005_vm14, 4294967295, %v14571_v58  ;;  %v3334_v42 = vld [vmem:[#allocation2 + $0x44] sm:$0x1] }
 0x199   : > { %v9804_v47 = vcombine.low %v1747_v55, %v1757_v38  ;;  %14573 = vst [vmem:[#allocation4_spill] sm:$0xff] %v14572_v58  ;;  %v2980_v59 = vrot.slane %v2483_v22, 5  ;;  %v3379_v34 = vrot.slane %v3378_v57, 4  ;;  %v2983_v0 = vrot.slane %v2484_v53, 5  ;;  %v2916_v53 = vld [vmem:[#allocation2 + $0x24] sm:$0xe]  ;;  %10505 = vmatpush3.bf16.msra.mxu0 %v11100_v26 }
 0x19a   : > { %v3396_v31 = vshrl.u32 %v3303_v36, 16  ;;  %v3399_v1 = vshll.u32 %v3303_v36, 16  ;;  %v3389_v41 = vrot.slane %v3388_v43, 4  ;;  %v3405_v7 = vshll.u32 %v3304_v45, 16  ;;  %v11103_v43 = vld [vmem:[%s14554_s3 + $0xa0] sm:$0xff]   ;;  %10506 = vmatprep.subr.bf16.mxu0 %v11102_v54 }
 0x19b   : > { %1916 = vrot.lane.b32.xlu1 %v9804_v47, %s11403_s27  ;;  %v2981_v49 = vsel %vm12005_vm14, %v9853_v4, %v2980_v59  ;;  %v2982_v6 = vrot.slane %v2980_v59, 4  ;;  %v3384_v2 = vsel %vm11591_vm8, %v3379_v34, %v3383_v25  ;;  %v3409_v46 = vshrl.u32 %v3304_v45, 16  ;;  %v3307_v47 = vld [vmem:[#allocation2 + $0x48] sm:$0xf]  ;;  %v3336_v54 = vld [vmem:[#allocation2 + $0x5c] sm:$0x1] }
 0x19c   : > { %v3398_v11 = vrot.slane %v3396_v31, 4  ;;  %v3401_v60 = vrot.slane %v3399_v1, 5  ;;  %v3394_v10 = vsel %vm11591_vm8, %v3389_v41, %v3393_v18  ;;  %v3407_v15 = vrot.slane %v3405_v7, 5  ;;  %v2489_v34 = vld [vmem:[#allocation2 + $0x28] sm:$0xf] }
 0x19d   : > { %v2984_v14 = vsel %vm12005_vm14, %v2982_v6, %v2983_v0  ;;  %v3415_v16 = vshll.u32 %v3333_v63, 16  ;;  %v9918_v20 = vcombine.low %v3384_v2, %v3394_v10  ;;  %v3411_v61 = vrot.slane %v3409_v46, 4  ;;  %v3308_v31 = vld [vmem:[#allocation2 + $0x4c] sm:$0xf]  ;;  %v2493_v10 = vld [vmem:[#allocation2 + $0x38] sm:$0x1]  ;;  %10507 = vmatpush3.bf16.msra.mxu0 %v11103_v43 }
 0x19e   : > { %v9885_v21 = vcombine.low %v2981_v49, %v2984_v14  ;;  %v3402_v27 = vor.u32 %v3401_v60, %v3398_v11  ;;  %v9854_v30 = vrot.slane %v2915_v12, 9  ;;  %v2987_v37 = vrot.slane %v2486_v5, 5  ;;  %v11106_v1 = vld [vmem:[%s14554_s3 + $0xe8] sm:$0xff]  }
 0x19f   : > { %v3417_v8 = vrot.slane %v3415_v16, 5  ;;  %v2990_v39 = vrot.slane %v2487_v44, 5  ;;  %3861 = vrot.lane.b32.xlu0 %v9918_v20, %s11403_s27  ;;  %v3412_v3 = vor.u32 %v3411_v61, %v3407_v15  ;;  %v3420_v62 = vshrl.u32 %v3305_v19, 16  ;;  %v11107_v14 = vld [vmem:[%s14554_s3 + $0xa8] sm:$0xff]   ;;  %10508 = vmatprep.subr.bf16.mxu0 %v11106_v1 }
 0x1a0   : > { %3186 = vrot.lane.b32.xlu1 %v9885_v21, %s11403_s27  ;;  %v3403_v40 = vrot.slane %v3402_v27, 4  ;;  %v3423_v22 = vshll.u32 %v3305_v19, 16  ;;  %v2988_v13 = vsel %vm12005_vm14, %v9854_v30, %v2987_v37  ;;  %v2989_v50 = vrot.slane %v2987_v37, 4  ;;  %v2917_v21 = vld [vmem:[#allocation2 + $0x30] sm:$0xe] }
 0x1a1   : > { %v3429_v23 = vshll.u32 %v3306_v28, 16  ;;  %v3433_v25 = vshrl.u32 %v3306_v28, 16  ;;  %v3413_v56 = vrot.slane %v3412_v3, 4  ;;  %v3422_v17 = vrot.slane %v3420_v62, 4  ;;  %v11109_v30 = vld [vmem:[%s14554_s3 + $0xf0] sm:$0xff]   ;;  %10509 = vmatpush3.bf16.msra.mxu0 %v11107_v14 }
 0x1a2   : > { %v3408_v55 = vsel %vm11591_vm8, %v3403_v40, %v3407_v15  ;;  %v3425_v36 = vrot.slane %v3423_v22, 5  ;;  %v2991_v38 = vsel %vm12005_vm14, %v2989_v50, %v2990_v39  ;;  %v3439_v45 = vshll.u32 %v3334_v42, 16  ;;  %v2492_v42 = vld [vmem:[#allocation2 + $0x34] sm:$0xf]  ;;  %v3310_v62 = vld [vmem:[#allocation2 + $0x58] sm:$0xf]  ;;  %10510 = vmatprep.subr.bf16.mxu0 %v11109_v30 }
 0x1a3   : > { %v3431_v57 = vrot.slane %v3429_v23, 5  ;;  %v3435_v4 = vrot.slane %v3433_v25, 4  ;;  %v3418_v18 = vsel %vm11591_vm8, %v3413_v56, %v3417_v8  ;;  %v9886_v59 = vcombine.low %v2988_v13, %v2991_v38  ;;  %v3309_v8 = vld [vmem:[#allocation2 + $0x54] sm:$0xf] }
 0x1a4   : > { %v3426_v63 = vor.u32 %v3425_v36, %v3422_v17  ;;  %v9855_v0 = vrot.slane %v2916_v53, 9  ;;  %v9919_v5 = vcombine.low %v3408_v55, %v3418_v18  ;;  %v3441_v49 = vrot.slane %v3439_v45, 5  ;;  %v11110_v23 = vld [vmem:[%s14554_s3 + $0xb0] sm:$0xff]   ;;  %v2496_v18 = vld [vmem:[#allocation2 + $0x44] sm:$0x1] }
 0x1a5   : > { %v3436_v41 = vor.u32 %v3435_v4, %v3431_v57  ;;  %v2994_v6 = vrot.slane %v2489_v34, 5  ;;  %3188 = vrot.lane.b32.xlu1 %v9886_v59, %s11403_s27  ;;  %v2997_v44 = vrot.slane %v2490_v32, 5  ;;  %v3444_v2 = vshrl.u32 %v3307_v47, 16  ;;  %10511 = vmatpush3.bf16.msra.mxu0 %v11110_v23  ;;  %v2498_v23 = vld [vmem:[#allocation2 + $0x4c] sm:$0xf] }
 0x1a6   : > { %v3427_v7 = vrot.slane %v3426_v63, 4  ;;  %v3447_v11 = vshll.u32 %v3307_v47, 16  ;;  %3863 = vrot.lane.b32.xlu0 %v9919_v5, %s11403_s27  ;;  %v3453_v48 = vshll.u32 %v3308_v31, 16  ;;  %v3457_v20 = vshrl.u32 %v3308_v31, 16  ;;  %v3311_v31 = vld [vmem:[#allocation2 + $0x60] sm:$0xf] }
 0x1a7   : > { %v3437_v60 = vrot.slane %v3436_v41, 4  ;;  %v2995_v46 = vsel %vm12005_vm14, %v9855_v0, %v2994_v6  ;;  %v2996_v12 = vrot.slane %v2994_v6, 4  ;;  %v3446_v16 = vrot.slane %v3444_v2, 4 }
 0x1a8   : > { %v3432_v15 = vsel %vm11591_vm8, %v3427_v7, %v3431_v57  ;;  %v3449_v19 = vrot.slane %v3447_v11, 5  ;;  %v3455_v28 = vrot.slane %v3453_v48, 5  ;;  %v3463_v33 = vshll.u32 %v3335_v9, 16  ;;  %v2918_v57 = vld [vmem:[#allocation2 + $0x3c] sm:$0xe] }
 0x1a9   : > { %v3442_v27 = vsel %vm11591_vm8, %v3437_v60, %v3441_v49  ;;  %v2998_v61 = vsel %vm12005_vm14, %v2996_v12, %v2997_v44  ;;  %v3459_v3 = vrot.slane %v3457_v20, 4  ;;  %v9856_v26 = vrot.slane %v2917_v21, 9  ;;  %v2495_v49 = vld [vmem:[#allocation2 + $0x40] sm:$0xf]  ;;  %v3312_v7 = vld [vmem:[#allocation2 + $0x64] sm:$0xf] }
 0x1aa   : > { %v9920_v37 = vcombine.low %v3432_v15, %v3442_v27  ;;  %v9887_v39 = vcombine.low %v2995_v46, %v2998_v61  ;;  %v3450_v40 = vor.u32 %v3449_v19, %v3446_v16  ;;  %v3465_v22 = vrot.slane %v3463_v33, 5  ;;  %v11112_v44 = vld [vmem:[%s14554_s3 + $0xf8] sm:$0xff]   ;;  %v3337_v48 = vld [vmem:[#allocation2 + $0x68] sm:$0x1]  ;;  %v12082_v15 = vpop.permute.xlu0 %2370  ;;  %v2499_v27 = vld [vmem:[#allocation2 + $0x50] sm:$0x1] }
 0x1ab   : > { %v3001_v13 = vrot.slane %v2492_v42, 5  ;;  %v3004_v50 = vrot.slane %v2493_v10, 5  ;;  %v3460_v53 = vor.u32 %v3459_v3, %v3455_v28  ;;  %v3468_v55 = vshrl.u32 %v3309_v8, 16  ;;  %10512 = vmatprep.subr.bf16.mxu0 %v11112_v44  ;;  %v11113_v61 = vld [vmem:[%s14554_s3 + $0xb8] sm:$0xff]  }
 0x1ac   : > { %3865 = vrot.lane.b32.xlu0 %v9920_v37, %s11403_s27  ;;  %3190 = vrot.lane.b32.xlu1 %v9887_v39, %s11403_s27  ;;  %v3451_v25 = vrot.slane %v3450_v40, 4  ;;  %v3471_v56 = vshll.u32 %v3309_v8, 16  ;;  %v3477_v32 = vshll.u32 %v3310_v62, 16  ;;  %v3481_v38 = vshrl.u32 %v3310_v62, 16  ;;  %v2919_v37 = vld [vmem:[#allocation2 + $0x48] sm:$0xe] }
 0x1ad   : > { %v3002_v17 = vsel %vm12005_vm14, %v9856_v26, %v3001_v13  ;;  %v3003_v36 = vrot.slane %v3001_v13, 4  ;;  %v3461_v45 = vrot.slane %v3460_v53, 4  ;;  %v3470_v47 = vrot.slane %v3468_v55, 4  ;;  %v3313_v62 = vld [vmem:[#allocation2 + $0x6c] sm:$0xf]  ;;  %10513 = vmatpush3.bf16.msra.mxu0 %v11113_v61 }
 0x1ae   : > { %v3456_v4 = vsel %vm11591_vm8, %v3451_v25, %v3455_v28  ;;  %v3473_v43 = vrot.slane %v3471_v56, 5  ;;  %v3479_v63 = vrot.slane %v3477_v32, 5  ;;  %v3483_v34 = vrot.slane %v3481_v38, 4  ;;  %v3314_v25 = vld [vmem:[#allocation2 + $0x70] sm:$0xf] }
 0x1af   : > { %v3005_v59 = vsel %vm12005_vm14, %v3003_v36, %v3004_v50  ;;  %v3487_v0 = vshll.u32 %v3336_v54, 16  ;;  %v3466_v1 = vsel %vm11591_vm8, %v3461_v45, %v3465_v22  ;;  %v9857_v6 = vrot.slane %v2918_v57, 9  ;;  %v3338_v32 = vld [vmem:[#allocation2 + $0x74] sm:$0x1] }
 0x1b0   : > { %v9888_v5 = vcombine.low %v3002_v17, %v3005_v59  ;;  %v3474_v41 = vor.u32 %v3473_v43, %v3470_v47  ;;  %v9921_v9 = vcombine.low %v3456_v4, %v3466_v1  ;;  %v3484_v2 = vor.u32 %v3483_v34, %v3479_v63  ;;  %v12098_v4 = vpop.permute.xlu0 %1886  ;;  %v2920_v59 = vld [vmem:[#allocation2 + $0x54] sm:$0xe]  ;;  %v2502_v1 = vld [vmem:[#allocation2 + $0x5c] sm:$0x1] }
 0x1b1   : > { %v3489_v11 = vrot.slane %v3487_v0, 5  ;;  %v3008_v60 = vrot.slane %v2495_v49, 5  ;;  %v3011_v12 = vrot.slane %v2496_v18, 5  ;;  %v3492_v10 = vshrl.u32 %v3311_v31, 16 }
 0x1b2   : > { %3192 = vrot.lane.b32.xlu1 %v9888_v5, %s11403_s27  ;;  %v3475_v46 = vrot.slane %v3474_v41, 4  ;;  %v3495_v14 = vshll.u32 %v3311_v31, 16  ;;  %3867 = vrot.lane.b32.xlu0 %v9921_v9, %s11403_s27  ;;  %v3485_v16 = vrot.slane %v3484_v2, 4  ;;  %v3501_v21 = vshll.u32 %v3312_v7, 16 }
 0x1b3   : > { %v3009_v19 = vsel %vm12005_vm14, %v9857_v6, %v3008_v60  ;;  %v3010_v20 = vrot.slane %v3008_v60, 4  ;;  %v3494_v33 = vrot.slane %v3492_v10, 4  ;;  %v3505_v30 = vshrl.u32 %v3312_v7, 16  ;;  %v3315_v7 = vld [vmem:[#allocation2 + $0x78] sm:$0xf] }
 0x1b4   : > { %v3480_v28 = vsel %vm11591_vm8, %v3475_v46, %v3479_v63  ;;  %v3497_v8 = vrot.slane %v3495_v14, 5  ;;  %v3490_v39 = vsel %vm11591_vm8, %v3485_v16, %v3489_v11  ;;  %v3503_v3 = vrot.slane %v3501_v21, 5  ;;  %v2501_v11 = vld [vmem:[#allocation2 + $0x58] sm:$0xf]  ;;  %v3316_v46 = vld [vmem:[#allocation2 + $0x7c] sm:$0xf]  ;;  %v12109_v61 = vpop.permute.xlu0 %2374 }
 0x1b5   : > { %v3012_v40 = vsel %vm12005_vm14, %v3010_v20, %v3011_v12  ;;  %v3511_v42 = vshll.u32 %v3337_v48, 16  ;;  %v9922_v22 = vcombine.low %v3480_v28, %v3490_v39  ;;  %v3507_v50 = vrot.slane %v3505_v30, 4  ;;  %v3339_v20 = vld [vmem:[#allocation2 + $0x80] sm:$0x1]  ;;  %v12114_v39 = vpop.permute.xlu1 %2372 }
 0x1b6   : > { %v9889_v26 = vcombine.low %v3009_v19, %v3012_v40  ;;  %v3498_v13 = vor.u32 %v3497_v8, %v3494_v33  ;;  %v9858_v54 = vrot.slane %v2919_v37, 9  ;;  %v3015_v55 = vrot.slane %v2498_v23, 5  ;;  %v2505_v37 = vld [vmem:[#allocation2 + $0x68] sm:$0x1] }
 0x1b7   : > { %v3513_v53 = vrot.slane %v3511_v42, 5  ;;  %v3018_v56 = vrot.slane %v2499_v27, 5  ;;  %3869 = vrot.lane.b32.xlu0 %v9922_v22, %s11403_s27  ;;  %v3508_v36 = vor.u32 %v3507_v50, %v3503_v3  ;;  %v3516_v38 = vshrl.u32 %v3313_v62, 16  ;;  %v2921_v22 = vld [vmem:[#allocation2 + $0x60] sm:$0xe] }
 0x1b8   : > { %3194 = vrot.lane.b32.xlu1 %v9889_v26, %s11403_s27  ;;  %v3499_v17 = vrot.slane %v3498_v13, 4  ;;  %v3519_v57 = vshll.u32 %v3313_v62, 16  ;;  %v3016_v45 = vsel %vm12005_vm14, %v9858_v54, %v3015_v55  ;;  %v3017_v47 = vrot.slane %v3015_v55, 4 }
 0x1b9   : > { %v3525_v43 = vshll.u32 %v3314_v25, 16  ;;  %v3529_v18 = vshrl.u32 %v3314_v25, 16  ;;  %v3509_v34 = vrot.slane %v3508_v36, 4  ;;  %v3518_v0 = vrot.slane %v3516_v38, 4  ;;  %v3317_v25 = vld [vmem:[#allocation2 + $0x84] sm:$0xf] }
 0x1ba   : > { %v3504_v63 = vsel %vm11591_vm8, %v3499_v17, %v3503_v3  ;;  %v3521_v31 = vrot.slane %v3519_v57, 5  ;;  %v3019_v5 = vsel %vm12005_vm14, %v3017_v47, %v3018_v56  ;;  %v3535_v6 = vshll.u32 %v3338_v32, 16  ;;  %v2504_v17 = vld [vmem:[#allocation2 + $0x64] sm:$0xf]  ;;  %v3318_v36 = vld [vmem:[#allocation2 + $0x88] sm:$0xf]  ;;  %v12122_v47 = vpop.permute.xlu1 %1888 }
 0x1bb   : > { %v3527_v41 = vrot.slane %v3525_v43, 5  ;;  %v3531_v49 = vrot.slane %v3529_v18, 4  ;;  %v3514_v44 = vsel %vm11591_vm8, %v3509_v34, %v3513_v53  ;;  %v9890_v9 = vcombine.low %v3016_v45, %v3019_v5 }
 0x1bc   : > { %v3522_v2 = vor.u32 %v3521_v31, %v3518_v0  ;;  %v9859_v60 = vrot.slane %v2920_v59, 9  ;;  %v9923_v12 = vcombine.low %v3504_v63, %v3514_v44  ;;  %v3537_v10 = vrot.slane %v3535_v6, 5  ;;  %v3340_v59 = vld [vmem:[#allocation2 + $0x8c] sm:$0x1]  ;;  %v12126_v0 = vpop.permute.xlu0 %2376 }
 0x1bd   : > { %v3532_v48 = vor.u32 %v3531_v49, %v3527_v41  ;;  %v3022_v14 = vrot.slane %v2501_v11, 5  ;;  %3196 = vrot.lane.b32.xlu1 %v9890_v9, %s11403_s27  ;;  %v3025_v19 = vrot.slane %v2502_v1, 5  ;;  %v3540_v21 = vshrl.u32 %v3315_v7, 16  ;;  %v2922_v49 = vld [vmem:[#allocation2 + $0x6c] sm:$0xe] }
 0x1be   : > { %v3523_v16 = vrot.slane %v3522_v2, 4  ;;  %v3543_v27 = vshll.u32 %v3315_v7, 16  ;;  %3871 = vrot.lane.b32.xlu0 %v9923_v12, %s11403_s27  ;;  %v3549_v30 = vshll.u32 %v3316_v46, 16  ;;  %v3553_v62 = vshrl.u32 %v3316_v46, 16  ;;  %v2508_v2 = vld [vmem:[#allocation2 + $0x74] sm:$0x1] }
 0x1bf   : > { %v3533_v28 = vrot.slane %v3532_v48, 4  ;;  %v3023_v33 = vsel %vm12005_vm14, %v9859_v60, %v3022_v14  ;;  %v3024_v8 = vrot.slane %v3022_v14, 4  ;;  %v3542_v3 = vrot.slane %v3540_v21, 4  ;;  %v3319_v48 = vld [vmem:[#allocation2 + $0x90] sm:$0xf] }
 0x1c0   : > { %v3528_v40 = vsel %vm11591_vm8, %v3523_v16, %v3527_v41  ;;  %v3545_v42 = vrot.slane %v3543_v27, 5  ;;  %v3551_v50 = vrot.slane %v3549_v30, 5  ;;  %v3559_v23 = vshll.u32 %v3339_v20, 16  ;;  %v3320_v21 = vld [vmem:[#allocation2 + $0x94] sm:$0xf]  ;;  %v12136_v30 = vpop.permute.xlu1 %1890 }
 0x1c1   : > { %v3538_v26 = vsel %vm11591_vm8, %v3533_v28, %v3537_v10  ;;  %v3026_v13 = vsel %vm12005_vm14, %v3024_v8, %v3025_v19  ;;  %v3555_v56 = vrot.slane %v3553_v62, 4  ;;  %v9860_v38 = vrot.slane %v2921_v22, 9  ;;  %v2507_v19 = vld [vmem:[#allocation2 + $0x70] sm:$0xf]  ;;  %v12139_v22 = vpop.permute.xlu0 %2378 }
 0x1c2   : > { %v9924_v53 = vcombine.low %v3528_v40, %v3538_v26  ;;  %v9891_v54 = vcombine.low %v3023_v33, %v3026_v13  ;;  %v3546_v55 = vor.u32 %v3545_v42, %v3542_v3  ;;  %v3561_v32 = vrot.slane %v3559_v23, 5  ;;  %v3341_v3 = vld [vmem:[#allocation2 + $0x98] sm:$0x1] }
 0x1c3   : > { %v3029_v57 = vrot.slane %v2504_v17, 5  ;;  %v3032_v45 = vrot.slane %v2505_v37, 5  ;;  %v3556_v18 = vor.u32 %v3555_v56, %v3551_v50  ;;  %v3564_v63 = vshrl.u32 %v3317_v25, 16  ;;  %v2923_v17 = vld [vmem:[#allocation2 + $0x78] sm:$0xe] }
 0x1c4   : > { %3873 = vrot.lane.b32.xlu0 %v9924_v53, %s11403_s27  ;;  %3198 = vrot.lane.b32.xlu1 %v9891_v54, %s11403_s27  ;;  %v3547_v43 = vrot.slane %v3546_v55, 4  ;;  %v3567_v34 = vshll.u32 %v3317_v25, 16  ;;  %v3573_v5 = vshll.u32 %v3318_v36, 16  ;;  %v3577_v41 = vshrl.u32 %v3318_v36, 16  ;;  %v2511_v25 = vld [vmem:[#allocation2 + $0x80] sm:$0x1] }
 0x1c5   : > { %v3030_v31 = vsel %vm12005_vm14, %v9860_v38, %v3029_v57  ;;  %v3031_v1 = vrot.slane %v3029_v57, 4  ;;  %v3557_v7 = vrot.slane %v3556_v18, 4  ;;  %v3566_v44 = vrot.slane %v3564_v63, 4 }
 0x1c6   : > { %v3552_v6 = vsel %vm11591_vm8, %v3547_v43, %v3551_v50  ;;  %v3569_v9 = vrot.slane %v3567_v34, 5  ;;  %v3575_v60 = vrot.slane %v3573_v5, 5  ;;  %v3579_v46 = vrot.slane %v3577_v41, 4  ;;  %v2510_v34 = vld [vmem:[#allocation2 + $0x7c] sm:$0xf] }
 0x1c7   : > { %v3033_v11 = vsel %vm12005_vm14, %v3031_v1, %v3032_v45  ;;  %v3583_v12 = vshll.u32 %v3340_v59, 16  ;;  %v3562_v10 = vsel %vm11591_vm8, %v3557_v7, %v3561_v32  ;;  %v9861_v20 = vrot.slane %v2922_v49, 9  ;;  %v3321_v45 = vld [vmem:[#allocation2 + $0x9c] sm:$0xf] }
 0x1c8   : > { %v9892_v14 = vcombine.low %v3030_v31, %v3033_v11  ;;  %v3570_v16 = vor.u32 %v3569_v9, %v3566_v44  ;;  %v9925_v27 = vcombine.low %v3552_v6, %v3562_v10  ;;  %v3580_v28 = vor.u32 %v3579_v46, %v3575_v60  ;;  %v3322_v31 = vld [vmem:[#allocation2 + $0xa0] sm:$0xf]  ;;  %v12150_v6 = vpop.permute.xlu1 %1892  ;;  %v3342_v9 = vld [vmem:[#allocation2 + $0xa4] sm:$0x1] }
 0x1c9   : > { %v3585_v33 = vrot.slane %v3583_v12, 5  ;;  %v3036_v8 = vrot.slane %v2507_v19, 5  ;;  %v3039_v40 = vrot.slane %v2508_v2, 5  ;;  %v3588_v42 = vshrl.u32 %v3319_v48, 16 }
 0x1ca   : > { %3200 = vrot.lane.b32.xlu1 %v9892_v14, %s11403_s27  ;;  %v3571_v37 = vrot.slane %v3570_v16, 4  ;;  %v3591_v62 = vshll.u32 %v3319_v48, 16  ;;  %3875 = vrot.lane.b32.xlu0 %v9925_v27, %s11403_s27  ;;  %v3581_v26 = vrot.slane %v3580_v28, 4  ;;  %v3597_v23 = vshll.u32 %v3320_v21, 16  ;;  %v2924_v14 = vld [vmem:[#allocation2 + $0x84] sm:$0xe] }
 0x1cb   : > { %v3037_v13 = vsel %vm12005_vm14, %v9861_v20, %v3036_v8  ;;  %v3038_v50 = vrot.slane %v3036_v8, 4  ;;  %v3590_v54 = vrot.slane %v3588_v42, 4  ;;  %v3601_v56 = vshrl.u32 %v3320_v21, 16  ;;  %v2514_v27 = vld [vmem:[#allocation2 + $0x8c] sm:$0x1] }
 0x1cc   : > { %v3576_v53 = vsel %vm11591_vm8, %v3571_v37, %v3575_v60  ;;  %v3593_v55 = vrot.slane %v3591_v62, 5  ;;  %v3586_v36 = vsel %vm11591_vm8, %v3581_v26, %v3585_v33  ;;  %v3599_v38 = vrot.slane %v3597_v23, 5  ;;  %v12154_v60 = vpop.permute.xlu0 %2380  ;;  %v2513_v26 = vld [vmem:[#allocation2 + $0x88] sm:$0xf] }
 0x1cd   : > { %v3040_v32 = vsel %vm12005_vm14, %v3038_v50, %v3039_v40  ;;  %v3607_v57 = vshll.u32 %v3341_v3, 16  ;;  %v9926_v43 = vcombine.low %v3576_v53, %v3586_v36  ;;  %v3603_v63 = vrot.slane %v3601_v56, 4  ;;  %v3323_v40 = vld [vmem:[#allocation2 + $0xa8] sm:$0xf]  ;;  %v3324_v50 = vld [vmem:[#allocation2 + $0xac] sm:$0xf] }
 0x1ce   : > { %v9893_v18 = vcombine.low %v3037_v13, %v3040_v32  ;;  %v3594_v59 = vor.u32 %v3593_v55, %v3590_v54  ;;  %v9862_v5 = vrot.slane %v2923_v17, 9  ;;  %v3043_v41 = vrot.slane %v2510_v34, 5  ;;  %v12164_v55 = vpop.permute.xlu1 %1894  ;;  %v3343_v36 = vld [vmem:[#allocation2 + $0xb0] sm:$0x1] }
 0x1cf   : > { %v3609_v1 = vrot.slane %v3607_v57, 5  ;;  %v3046_v49 = vrot.slane %v2511_v25, 5  ;;  %3877 = vrot.lane.b32.xlu0 %v9926_v43, %s11403_s27  ;;  %v3604_v44 = vor.u32 %v3603_v63, %v3599_v38  ;;  %v3612_v2 = vshrl.u32 %v3321_v45, 16  ;;  %v2002_v63 = vld [vmem:[#allocation2 + $0xc] sm:$0xe] }
 0x1d0   : > { %3202 = vrot.lane.b32.xlu1 %v9893_v18, %s11403_s27  ;;  %v3595_v7 = vrot.slane %v3594_v59, 4  ;;  %v3615_v11 = vshll.u32 %v3321_v45, 16  ;;  %v3044_v46 = vsel %vm12005_vm14, %v9862_v5, %v3043_v41  ;;  %v3045_v12 = vrot.slane %v3043_v41, 4  ;;  %v12167_v57 = vpop.permute.xlu0 %2382  ;;  %v2003_v41 = vld [vmem:[#allocation2 + $0x10] sm:$0xf] }
 0x1d1   : > { %v3621_v48 = vshll.u32 %v3322_v31, 16  ;;  %v3625_v10 = vshrl.u32 %v3322_v31, 16  ;;  %v3605_v19 = vrot.slane %v3604_v44, 4  ;;  %v3614_v20 = vrot.slane %v3612_v2, 4  ;;  %v2004_v2 = vld [vmem:[#allocation2 + $0x14] sm:$0x1] }
 0x1d2   : > { %v3600_v16 = vsel %vm11591_vm8, %v3595_v7, %v3599_v38  ;;  %v3617_v21 = vrot.slane %v3615_v11, 5  ;;  %v3047_v28 = vsel %vm12005_vm14, %v3045_v12, %v3046_v49  ;;  %v3631_v37 = vshll.u32 %v3342_v9, 16  ;;  %v2925_v11 = vld [vmem:[#allocation2 + $0x90] sm:$0xe] }
 0x1d3   : > { %v3623_v33 = vrot.slane %v3621_v48, 5  ;;  %v3627_v8 = vrot.slane %v3625_v10, 4  ;;  %v3610_v3 = vsel %vm11591_vm8, %v3605_v19, %v3609_v1  ;;  %v9894_v42 = vcombine.low %v3044_v46, %v3047_v28  ;;  %v1999_v19 = vld [vmem:[#allocation2] sm:$0xe]  ;;  %v2000_v28 = vld [vmem:[#allocation2 + $0x4] sm:$0xf] }
 0x1d4   : > { %v3618_v62 = vor.u32 %v3617_v21, %v3614_v20  ;;  %v9863_v13 = vrot.slane %v2924_v14, 9  ;;  %v9927_v23 = vcombine.low %v3600_v16, %v3610_v3  ;;  %v3633_v53 = vrot.slane %v3631_v37, 5  ;;  %v2516_v14 = vld [vmem:[#allocation2 + $0x94] sm:$0xf]  ;;  %v2517_v16 = vld [vmem:[#allocation2 + $0x98] sm:$0x1] }
 0x1d5   : > { %v3628_v25 = vor.u32 %v3627_v8, %v3623_v33  ;;  %v3050_v54 = vrot.slane %v2513_v26, 5  ;;  %3204 = vrot.lane.b32.xlu1 %v9894_v42, %s11403_s27  ;;  %v3053_v17 = vrot.slane %v2514_v27, 5  ;;  %v3636_v32 = vshrl.u32 %v3323_v40, 16  ;;  %v2001_v42 = vld [vmem:[#allocation2 + $0x8] sm:$0x1] }
 0x1d6   : > { %v3619_v56 = vrot.slane %v3618_v62, 4  ;;  %v3639_v38 = vshll.u32 %v3323_v40, 16  ;;  %3879 = vrot.lane.b32.xlu0 %v9927_v23, %s11403_s27  ;;  %v3645_v59 = vshll.u32 %v3324_v50, 16  ;;  %v3649_v5 = vshrl.u32 %v3324_v50, 16  ;;  %v12182_v62 = vpop.permute.xlu0 %2384 }
 0x1d7   : > { %v3629_v45 = vrot.slane %v3628_v25, 4  ;;  %v3051_v43 = vsel %vm12005_vm14, %v9863_v13, %v3050_v54  ;;  %v3052_v18 = vrot.slane %v3050_v54, 4  ;;  %v3638_v31 = vrot.slane %v3636_v32, 4 }
 0x1d8   : > { %v3624_v34 = vsel %vm11591_vm8, %v3619_v56, %v3623_v33  ;;  %v3641_v1 = vrot.slane %v3639_v38, 5  ;;  %v3647_v44 = vrot.slane %v3645_v59, 5  ;;  %v3655_v9 = vshll.u32 %v3343_v36, 16  ;;  %v12178_v33 = vpop.permute.xlu1 %1896 }
 0x1d9   : > { %v3634_v49 = vsel %vm11591_vm8, %v3629_v45, %v3633_v53  ;;  %v3054_v7 = vsel %vm12005_vm14, %v3052_v18, %v3053_v17  ;;  %v3651_v10 = vrot.slane %v3649_v5, 4  ;;  %v9806_v21 = vrot.slane %v2002_v63, 9  ;;  %v3325_v17 = vld [vmem:[#allocation2 + $0xb4] sm:$0xf]  ;;  %v3344_v5 = vld [vmem:[#allocation2 + $0xbc] sm:$0x1] }
 0x1da   : > { %v9928_v46 = vcombine.low %v3624_v34, %v3634_v49  ;;  %v9895_v12 = vcombine.low %v3051_v43, %v3054_v7  ;;  %v3642_v48 = vor.u32 %v3641_v1, %v3638_v31  ;;  %v3657_v20 = vrot.slane %v3655_v9, 5  ;;  %v3326_v43 = vld [vmem:[#allocation2 + $0xb8] sm:$0xf]  ;;  %v2926_v7 = vld [vmem:[#allocation2 + $0x9c] sm:$0xe] }
 0x1db   : > { %v2107_v27 = vrot.slane %v2003_v41, 5  ;;  %v3652_v37 = vor.u32 %v3651_v10, %v3647_v44  ;;  %v2110_v40 = vrot.slane %v2004_v2, 5  ;;  %v9864_v3 = vrot.slane %v2925_v11, 9 }
 0x1dc   : > { %3881 = vrot.lane.b32.xlu0 %v9928_v46, %s11403_s27  ;;  %3206 = vrot.lane.b32.xlu1 %v9895_v12, %s11403_s27  ;;  %v3643_v8 = vrot.slane %v3642_v48, 4  ;;  %v3057_v50 = vrot.slane %v2516_v14, 5  ;;  %v3060_v23 = vrot.slane %v2517_v16, 5  ;;  %v9805_v54 = vrot.slane %v1999_v19, 9  ;;  %v2520_v12 = vld [vmem:[#allocation2 + $0xa4] sm:$0x1]  ;;  %v12204_v48 = vpop.permute.xlu0 %2386 }
 0x1dd   : > { %v2108_v26 = vsel %vm12005_vm14, %v9806_v21, %v2107_v27  ;;  %v2109_v13 = vrot.slane %v2107_v27, 4  ;;  %v3653_v53 = vrot.slane %v3652_v37, 4  ;;  %v2100_v56 = vrot.slane %v2000_v28, 5 }
 0x1de   : > { %v3648_v25 = vsel %vm11591_vm8, %v3643_v8, %v3647_v44  ;;  %v3058_v32 = vsel %vm12005_vm14, %v9864_v3, %v3057_v50  ;;  %v3059_v38 = vrot.slane %v3057_v50, 4  ;;  %v2103_v45 = vrot.slane %v2001_v42, 5  ;;  %v12198_v44 = vpop.permute.xlu1 %1898  ;;  %v3327_v8 = vld [vmem:[#allocation2 + $0xc0] sm:$0xf] }
 0x1df   : > { %v2111_v36 = vsel %vm12005_vm14, %v2109_v13, %v2110_v40  ;;  %v3658_v18 = vsel %vm11591_vm8, %v3653_v53, %v3657_v20  ;;  %v2101_v63 = vsel %vm12005_vm14, %v9805_v54, %v2100_v56  ;;  %v2102_v34 = vrot.slane %v2100_v56, 4  ;;  %v2519_v20 = vld [vmem:[#allocation2 + $0xa0] sm:$0xf]  ;;  %v11205_v53 = vld [vmem:[#allocation2 + $0x4] sm:$0xf] }
 0x1e0   : > { %v9822_v59 = vcombine.low %v2108_v26, %v2111_v36  ;;  %v9929_v31 = vcombine.low %v3648_v25, %v3658_v18  ;;  %v3061_v1 = vsel %vm12005_vm14, %v3059_v38, %v3060_v23  ;;  %v3660_v41 = vshrl.u32 %v3325_v17, 16  ;;  %v3328_v26 = vld [vmem:[#allocation2 + $0xc4] sm:$0xf]  ;;  %v11204_v25 = vld [vmem:[#allocation2] sm:$0xf] }
 0x1e1   : > { %v3663_v49 = vshll.u32 %v3325_v17, 16  ;;  %v9896_v2 = vcombine.low %v3058_v32, %v3061_v1  ;;  %v2104_v11 = vsel %vm12005_vm14, %v2102_v34, %v2103_v45  ;;  %v3669_v46 = vshll.u32 %v3326_v43, 16  ;;  %v3345_v36 = vld [vmem:[#allocation2 + $0xc8] sm:$0x1]  ;;  %v2523_v34 = vld [vmem:[#allocation2 + $0xb0] sm:$0x1]  ;;  %v12221_v1 = vpop.permute.xlu0 %2388 }
 0x1e2   : > { %v2408_v9 = vsel %vm1918_vm15, %v9822_v59, %v12114_v39  ;;  %3883 = vrot.lane.b32.xlu0 %v9929_v31, %s11403_s27  ;;  %v9821_v10 = vcombine.low %v2101_v63, %v2104_v11  ;;  %v3662_v14 = vrot.slane %v3660_v41, 4  ;;  %v3673_v19 = vshrl.u32 %v3326_v43, 16  ;;  %v2927_v31 = vld [vmem:[#allocation2 + $0xa8] sm:$0xe]  ;;  %v2005_v11 = vld [vmem:[#allocation2 + $0x18] sm:$0xe] }
 0x1e3   : > { %v3665_v16 = vrot.slane %v3663_v49, 5  ;;  %3208 = vrot.lane.b32.xlu1 %v9896_v2, %s11403_s27  ;;  %v3671_v21 = vrot.slane %v3669_v46, 5  ;;  %v3679_v27 = vshll.u32 %v3344_v5, 16  ;;  %v9865_v39 = vrot.slane %v2926_v7, 9  ;;  %v2522_v2 = vld [vmem:[#allocation2 + $0xac] sm:$0xf] }
 0x1e4   : > { %v3064_v28 = vrot.slane %v2519_v20, 5  ;;  %v2404_v37 = vsel %vm1918_vm15, %v9821_v10, %v12082_v15  ;;  %v3675_v3 = vrot.slane %v3673_v19, 4  ;;  %v3067_v42 = vrot.slane %v2520_v12, 5  ;;  %v11088_v15 = vld [vmem:[%s14554_s3 + $0x108] sm:$0xff]  }
 0x1e5   : > { %v3666_v40 = vor.u32 %v3665_v16, %v3662_v14  ;;  %v3681_v13 = vrot.slane %v3679_v27, 5  ;;  %v9773_v54 = vcombine.low %v11204_v25, %v11205_v53  ;;  %4714 = vmatprep.mubr.bf16.mxu1 %v2404_v37  ;;  %v3684_v32 = vshrl.u32 %v3327_v8, 16  ;;  %v11206_v16 = vld [vmem:[%s14554_s3 + $0x100] sm:$0xff]  }
 0x1e6   : > { %v3065_v50 = vsel %vm12005_vm14, %v9865_v39, %v3064_v28  ;;  %v3066_v23 = vrot.slane %v3064_v28, 4  ;;  %v3676_v17 = vor.u32 %v3675_v3, %v3671_v21  ;;  %v3687_v38 = vshll.u32 %v3327_v8, 16  ;;  %v2007_v39 = vld [vmem:[#allocation2 + $0x20] sm:$0x1]  ;;  %v11115_v28 = vld [vmem:[%s14554_s3 + $0x110] sm:$0xff]  }
 0x1e7   : > { %v3667_v56 = vrot.slane %v3666_v40, 4  ;;  %v12212_v45 = vpop.permute.xlu1 %1900  ;;  %v1921_v18 = vsel %vm1918_vm15, %v9773_v54, %v12098_v4  ;;  %v3693_v59 = vshll.u32 %v3328_v26, 16  ;;  %v3697_v63 = vshrl.u32 %v3328_v26, 16  ;;  %v2006_v4 = vld [vmem:[#allocation2 + $0x1c] sm:$0xf] }
 0x1e8   : > { %v3068_v43 = vsel %vm12005_vm14, %v3066_v23, %v3067_v42  ;;  %v3677_v41 = vrot.slane %v3676_v17, 4  ;;  %v3686_v7 = vrot.slane %v3684_v32, 4  ;;  %4715 = vmatmul.mubr.bf16.vlgmr.msra.gmra.mrb[16].mxu1 %v1921_v18  ;;  %v3689_v46 = vrot.slane %v3687_v38, 5  ;;  %v2526_v42 = vld [vmem:[#allocation2 + $0xbc] sm:$0x1]  ;;  %v12239_v18 = vpop.permute.xlu0 %2390 }
 0x1e9   : > { %v3672_v5 = vsel %vm11591_vm8, %v3667_v56, %v3671_v21  ;;  %v9897_v49 = vcombine.low %v3065_v50, %v3068_v43  ;;  %v3695_v12 = vrot.slane %v3693_v59, 5  ;;  %v3699_v10 = vrot.slane %v3697_v63, 4  ;;  %10923 = vmatpush3.bf16.msra.mxu1 %v11206_v16  ;;  %4722 = vmatprep.mubr.bf16.mxu1 %v2408_v9  ;;  %v2928_v9 = vld [vmem:[#allocation2 + $0xb4] sm:$0xe]  ;;  %v2008_v53 = vld [vmem:[#allocation2 + $0x24] sm:$0xe] }
 0x1ea   : > { %v3703_v14 = vshll.u32 %v3345_v36, 16  ;;  %v3682_v19 = vsel %vm11591_vm8, %v3677_v41, %v3681_v13  ;;  %v9866_v20 = vrot.slane %v2927_v31, 9  ;;  %v3071_v21 = vrot.slane %v2522_v2, 5  ;;  %10924 = vmatprep.subr.bf16.mxu1 %v11088_v15  ;;  %v11207_v36 = vld [vmem:[#allocation2 + $0xc] sm:$0xf]  ;;  %v11124_v41 = vld [vmem:[%s14554_s3 + $0x118] sm:$0xff]  }
 0x1eb   : > { %3210 = vrot.lane.b32.xlu1 %v9897_v49, %s11403_s27  ;;  %v3074_v27 = vrot.slane %v2523_v34, 5  ;;  %v9930_v8 = vcombine.low %v3672_v5, %v3682_v19  ;;  %v3690_v37 = vor.u32 %v3689_v46, %v3686_v7  ;;  %v3700_v40 = vor.u32 %v3699_v10, %v3695_v12  ;;  %v11208_v32 = vld [vmem:[#allocation2 + $0x10] sm:$0xf]  ;;  %v2009_v43 = vld [vmem:[#allocation2 + $0x28] sm:$0xf] }
 0x1ec   : > { %v3705_v3 = vrot.slane %v3703_v14, 5  ;;  %v12234_v26 = vpop.permute.xlu1 %1902  ;;  %v3072_v13 = vsel %vm12005_vm14, %v9866_v20, %v3071_v21  ;;  %v3073_v50 = vrot.slane %v3071_v21, 4  ;;  %v9807_v23 = vrot.slane %v2005_v11, 9  ;;  %v2010_v5 = vld [vmem:[#allocation2 + $0x2c] sm:$0x1] }
 0x1ed   : > { %v2114_v25 = vrot.slane %v2006_v4, 5  ;;  %3885 = vrot.lane.b32.xlu0 %v9930_v8, %s11403_s27  ;;  %v3691_v54 = vrot.slane %v3690_v37, 4  ;;  %v3701_v56 = vrot.slane %v3700_v40, 4  ;;  %v2117_v17 = vrot.slane %v2007_v39, 5  ;;  %10925 = vmatpush3.bf16.msra.mxu1 %v11088_v15  ;;  %v2525_v11 = vld [vmem:[#allocation2 + $0xb8] sm:$0xf] }
 0x1ee   : > { %v9774_v38 = vcombine.low %v11207_v36, %v11208_v32  ;;  %v3075_v59 = vsel %vm12005_vm14, %v3073_v50, %v3074_v27  ;;  %v9867_v31 = vrot.slane %v2928_v9, 9  ;;  %10926 = vmatprep.subr.bf16.mxu1 %v11115_v28  ;;  %v2929_v46 = vld [vmem:[#allocation2 + $0xc0] sm:$0xe]  ;;  %v3078_v4 = vrot.slane %v2525_v11, 5  ;;  %v2529_v39 = vld [vmem:[#allocation2 + $0xc8] sm:$0x1] }
 0x1ef   : > { %v2115_v63 = vsel %vm12005_vm14, %v9807_v23, %v2114_v25  ;;  %v2116_v34 = vrot.slane %v2114_v25, 4  ;;  %v3696_v49 = vsel %vm11591_vm8, %v3691_v54, %v3695_v12  ;;  %v3706_v15 = vsel %vm11591_vm8, %v3701_v56, %v3705_v3  ;;  %v2528_v37 = vld [vmem:[#allocation2 + $0xc4] sm:$0xf]  ;;  %v2012_v50 = vld [vmem:[#allocation2 + $0x34] sm:$0xf]  ;;  %v12266_v23 = vpop.permute.xlu0 %2392 }
 0x1f0   : > { %v9898_v7 = vcombine.low %v3072_v13, %v3075_v59  ;;  %v1925_v2 = vsel %vm1918_vm15, %v9774_v38, %v12122_v47  ;;  %v9931_v10 = vcombine.low %v3696_v49, %v3706_v15  ;;  %v3081_v16 = vrot.slane %v2526_v42, 5  ;;  %v12256_v19 = vpop.permute.xlu1 %1904  ;;  %v2013_v54 = vld [vmem:[#allocation2 + $0x38] sm:$0x1]  ;;  %v11210_v32 = vld [vmem:[#allocation2 + $0x1c] sm:$0xf] }
 0x1f1   : > { %v2118_v14 = vsel %vm12005_vm14, %v2116_v34, %v2117_v17  ;;  %4723 = vmatmul.mubr.bf16.gmra.mrb[20].mxu1 %v1925_v2  ;;  %v9808_v20 = vrot.slane %v2008_v53, 9  ;;  %v2121_v21 = vrot.slane %v2009_v43, 5  ;;  %v2124_v27 = vrot.slane %v2010_v5, 5  ;;  %v2011_v53 = vld [vmem:[#allocation2 + $0x30] sm:$0xe] }
 0x1f2   : > { %3212 = vrot.lane.b32.xlu1 %v9898_v7, %s11403_s27  ;;  %v9823_v12 = vcombine.low %v2115_v63, %v2118_v14  ;;  %10927 = vmatpush3.bf16.msra.mxu1 %v11115_v28  ;;  %v3079_v47 = vsel %vm12005_vm14, %v9867_v31, %v3078_v4  ;;  %v3080_v8 = vrot.slane %v3078_v4, 4  ;;  %v9868_v40 = vrot.slane %v2929_v46, 9  ;;  %v11209_v36 = vld [vmem:[#allocation2 + $0x18] sm:$0xf]  ;;  %v2015_v31 = vld [vmem:[#allocation2 + $0x40] sm:$0xf] }
 0x1f3   : > { %3887 = vrot.lane.b32.xlu0 %v9931_v10, %s11403_s27  ;;  %10928 = vmatprep.subr.bf16.mxu1 %v11124_v41  ;;  %v2122_v42 = vsel %vm12005_vm14, %v9808_v20, %v2121_v21  ;;  %v2123_v9 = vrot.slane %v2121_v21, 4  ;;  %v3085_v13 = vrot.slane %v2528_v37, 5  ;;  %v3088_v25 = vrot.slane %v2529_v39, 5  ;;  %v12283_v10 = vpop.permute.xlu0 %2394  ;;  %v2014_v14 = vld [vmem:[#allocation2 + $0x3c] sm:$0xe] }
 0x1f4   : > { %v2412_v3 = vsel %vm1918_vm15, %v9823_v12, %v12109_v61  ;;  %v3082_v28 = vsel %vm12005_vm14, %v3080_v8, %v3081_v16  ;;  %v9775_v38 = vcombine.low %v11209_v36, %v11210_v32  ;;  %v2128_v34 = vrot.slane %v2012_v50, 5  ;;  %v2016_v4 = vld [vmem:[#allocation2 + $0x44] sm:$0x1]  ;;  %v11212_v21 = vld [vmem:[#allocation2 + $0x28] sm:$0xf] }
 0x1f5   : > { %4730 = vmatprep.mubr.bf16.mxu1 %v2412_v3  ;;  %v12270_v56 = vpop.permute.xlu1 %1906  ;;  %v9899_v17 = vcombine.low %v3079_v47, %v3082_v28  ;;  %v2125_v61 = vsel %vm12005_vm14, %v2123_v9, %v2124_v27  ;;  %v3087_v43 = vrot.slane %v3085_v13, 4  ;;  %v3086_v63 = vsel %vm12005_vm14, %v9868_v40, %v3085_v13  ;;  %v11211_v20 = vld [vmem:[#allocation2 + $0x24] sm:$0xf]  ;;  %v2021_v37 = vld [vmem:[#allocation2 + $0x58] sm:$0xf] }
 0x1f6   : > { %10929 = vmatpush3.bf16.msra.mxu1 %v11124_v41  ;;  %v9824_v59 = vcombine.low %v2122_v42, %v2125_v61  ;;  %v1929_v5 = vsel %vm1918_vm15, %v9775_v38, %v12136_v30  ;;  %v9809_v15 = vrot.slane %v2011_v53, 9  ;;  %v2131_v7 = vrot.slane %v2013_v54, 5  ;;  %v12292_v42 = vld [vmem:[#allocation2 + $0x64] sm:$0xf]  ;;  %v2017_v13 = vld [vmem:[#allocation2 + $0x48] sm:$0xe] }
 0x1f7   : > { %3214 = vrot.lane.b32.xlu1 %v9899_v17, %s11403_s27  ;;  %v3089_v49 = vsel %vm12005_vm14, %v3087_v43, %v3088_v25  ;;  %v2130_v41 = vrot.slane %v2128_v34, 4  ;;  %v2135_v46 = vrot.slane %v2015_v31, 5  ;;  %v9776_v27 = vcombine.low %v11211_v20, %v11212_v21  ;;  %v2019_v50 = vld [vmem:[#allocation2 + $0x50] sm:$0x1]  ;;  %v2020_v28 = vld [vmem:[#allocation2 + $0x54] sm:$0xe]  ;;  %v12296_v25 = vpop.permute.xlu0 %2396 }
 0x1f8   : > { %v2416_v2 = vsel %vm1918_vm15, %v9824_v59, %v12126_v0  ;;  %v9900_v11 = vcombine.low %v3086_v63, %v3089_v49  ;;  %v2129_v30 = vsel %vm12005_vm14, %v9809_v15, %v2128_v34  ;;  %v2018_v0 = vld [vmem:[#allocation2 + $0x4c] sm:$0xf]  ;;  %v9810_v39 = vrot.slane %v2014_v14, 9  ;;  %v2022_v54 = vld [vmem:[#allocation2 + $0x5c] sm:$0x1] }
 0x1f9   : > { %4731 = vmatmul.mubr.bf16.gmra.mrb[24].mxu1 %v1929_v5  ;;  %v12285_v16 = vpop.permute.xlu1 %1908  ;;  %v2132_v12 = vsel %vm12005_vm14, %v2130_v41, %v2131_v7  ;;  %v2137_v47 = vrot.slane %v2135_v46, 4  ;;  %v2138_v8 = vrot.slane %v2016_v4, 5  ;;  %v2142_v3 = vrot.slane %v2018_v0, 5  ;;  %v12300_v61 = vld [vmem:[#allocation2 + $0x70] sm:$0xf] }
 0x1fa   : > { %4738 = vmatprep.mubr.bf16.mxu1 %v2416_v2  ;;  %v9825_v40 = vcombine.low %v2129_v30, %v2132_v12  ;;  %v1933_v9 = vsel %vm1918_vm15, %v9776_v27, %v12150_v6  ;;  %v2149_v17 = vrot.slane %v2021_v37, 5  ;;  %v2136_v32 = vsel %vm12005_vm14, %v9810_v39, %v2135_v46  ;;  %v11213_v38 = vld [vmem:[#allocation2 + $0x30] sm:$0xf]  ;;  %v11214_v43 = vld [vmem:[#allocation2 + $0x34] sm:$0xf] }
 0x1fb   : > { %3216 = vrot.lane.b32.xlu1 %v9900_v11, %s11403_s27  ;;  %v2139_v6 = vsel %vm12005_vm14, %v2137_v47, %v2138_v8  ;;  %v9777_v59 = vcombine.low %v11213_v38, %v11214_v43  ;;  %v2023_v63 = vld [vmem:[#allocation2 + $0x60] sm:$0xe]  ;;  %v2156_v34 = vrot.slane %v12292_v42, 5  ;;  %v9811_v31 = vrot.slane %v2017_v13, 9  ;;  %v2025_v15 = vld [vmem:[#allocation2 + $0x68] sm:$0x1] }
 0x1fc   : > { %v2420_v53 = vsel %vm1918_vm15, %v9825_v40, %v12139_v22  ;;  %v2030_v22 = vld [vmem:[#allocation2 + $0x7c] sm:$0xf]  ;;  %v2144_v5 = vrot.slane %v2142_v3, 4  ;;  %v2145_v49 = vrot.slane %v2019_v50, 5  ;;  %v9812_v2 = vrot.slane %v2020_v28, 9  ;;  %v12312_v40 = vpop.permute.xlu0 %2398 }
 0x1fd   : > { %v12302_v36 = vpop.permute.xlu1 %1910  ;;  %v1937_v7 = vsel %vm1918_vm15, %v9777_v59, %v12164_v55  ;;  %v2026_v41 = vld [vmem:[#allocation2 + $0x6c] sm:$0xe]  ;;  %v2028_v11 = vld [vmem:[#allocation2 + $0x74] sm:$0x1]  ;;  %v2163_v46 = vrot.slane %v12300_v61, 5  ;;  %v9826_v14 = vcombine.low %v2136_v32, %v2139_v6  ;;  %v2151_v4 = vrot.slane %v2149_v17, 4 }
 0x1fe   : > { %v2152_v30 = vrot.slane %v2022_v54, 5  ;;  %v2029_v12 = vld [vmem:[#allocation2 + $0x78] sm:$0xe]  ;;  %v2170_v0 = vrot.slane %v2030_v22, 5  ;;  %v11215_v20 = vld [vmem:[#allocation2 + $0x3c] sm:$0xf]  ;;  %v2146_v13 = vsel %vm12005_vm14, %v2144_v5, %v2145_v49  ;;  %v2150_v61 = vsel %vm12005_vm14, %v9812_v2, %v2149_v17 }
 0x1ff   : > { %v11216_v21 = vld [vmem:[#allocation2 + $0x40] sm:$0xf]  ;;  %v9813_v39 = vrot.slane %v2023_v63, 9  ;;  %v2158_v47 = vrot.slane %v2156_v34, 4  ;;  %v2159_v8 = vrot.slane %v2025_v15, 5  ;;  %v2424_v42 = vsel %vm1918_vm15, %v9826_v14, %v12154_v60 }
 0x200   : > { %v9778_v27 = vcombine.low %v11215_v20, %v11216_v21  ;;  %v2031_v37 = vld [vmem:[#allocation2 + $0x80] sm:$0x1]  ;;  %v12314_v55 = vld [vmem:[#allocation2 + $0x24] sm:$0xe]  ;;  %v11217_v50 = vld [vmem:[#allocation2 + $0x48] sm:$0xf]  ;;  %v2153_v60 = vsel %vm12005_vm14, %v2151_v4, %v2152_v30  ;;  %v12343_v21 = vpop.permute.xlu0 %2400 }
 0x201   : > { %4739 = vmatmul.mubr.bf16.gmra.mrb[28].mxu1 %v1933_v9  ;;  %v2143_v9 = vsel %vm12005_vm14, %v9811_v31, %v2142_v3  ;;  %v11218_v28 = vld [vmem:[#allocation2 + $0x4c] sm:$0xf]  ;;  %v12322_v54 = vpop.permute.xlu1 %1912  ;;  %v9814_v32 = vrot.slane %v2026_v41, 9  ;;  %v2165_v6 = vrot.slane %v2163_v46, 4  ;;  %v2166_v38 = vrot.slane %v2028_v11, 5 }
 0x202   : > { %4746 = vmatprep.mubr.bf16.mxu1 %v2420_v53  ;;  %v9779_v53 = vcombine.low %v11217_v50, %v11218_v28  ;;  %v9815_v43 = vrot.slane %v2029_v12, 9  ;;  %v2172_v59 = vrot.slane %v2170_v0, 4  ;;  %v2173_v3 = vrot.slane %v2031_v37, 5  ;;  %v2033_v5 = vld [vmem:[#allocation2 + $0x88] sm:$0xf] }
 0x203   : > { %v2157_v22 = vsel %vm12005_vm14, %v9813_v39, %v2156_v34  ;;  %v2160_v31 = vsel %vm12005_vm14, %v2158_v47, %v2159_v8  ;;  %v9827_v17 = vcombine.low %v2143_v9, %v2146_v13  ;;  %v1941_v49 = vsel %vm1918_vm15, %v9778_v27, %v12178_v33  ;;  %v11219_v2 = vld [vmem:[#allocation2 + $0x54] sm:$0xf]  ;;  %v2032_v11 = vld [vmem:[#allocation2 + $0x84] sm:$0xe]  ;;  %v11221_v30 = vld [vmem:[#allocation2 + $0x60] sm:$0xf] }
 0x204   : > { %v12337_v15 = vsel %vm1918_vm15, %v9779_v53, %v12198_v44  ;;  %v9828_v14 = vcombine.low %v2150_v61, %v2153_v60  ;;  %v2164_v34 = vsel %vm12005_vm14, %v9814_v32, %v2163_v46  ;;  %v2167_v4 = vsel %vm12005_vm14, %v2165_v6, %v2166_v38  ;;  %v11222_v12 = vld [vmem:[#allocation2 + $0x64] sm:$0xf]  ;;  %v2034_v39 = vld [vmem:[#allocation2 + $0x8c] sm:$0x1]  ;;  %v2035_v8 = vld [vmem:[#allocation2 + $0x90] sm:$0xe] }
 0x205   : > { %v9781_v20 = vcombine.low %v11221_v30, %v11222_v12  ;;  %v9829_v33 = vcombine.low %v2157_v22, %v2160_v31  ;;  %v2171_v44 = vsel %vm12005_vm14, %v9815_v43, %v2170_v0  ;;  %v2174_v27 = vsel %vm12005_vm14, %v2172_v59, %v2173_v3  ;;  %v12349_v37 = vpop.permute.xlu1 %1914  ;;  %v11223_v9 = vld [vmem:[#allocation2 + $0x6c] sm:$0xf]  ;;  %v11224_v13 = vld [vmem:[#allocation2 + $0x70] sm:$0xf]  ;;  %v2036_v0 = vld [vmem:[#allocation2 + $0x94] sm:$0xf] }
 0x206   : > { %v2177_v47 = vrot.slane %v2033_v5, 5  ;;  %v2428_v46 = vsel %vm1918_vm15, %v9827_v17, %v12167_v57  ;;  %v9782_v50 = vcombine.low %v11223_v9, %v11224_v13  ;;  %v9816_v28 = vrot.slane %v2032_v11, 9  ;;  %v2044_v53 = vld [vmem:[#allocation2 + $0xb4] sm:$0xe]  ;;  %v2046_v38 = vld [vmem:[#allocation2 + $0xbc] sm:$0x1] }
 0x207   : > { %v12359_v61 = vsel %vm1918_vm15, %v9828_v14, %v12182_v62  ;;  %v12363_v32 = vsel %vm1918_vm15, %v9829_v33, %v12204_v48  ;;  %v9830_v6 = vcombine.low %v2164_v34, %v2167_v4  ;;  %v12367_v57 = vsel %vm1918_vm15, %v9781_v20, %v12234_v26  ;;  %v11225_v3 = vld [vmem:[#allocation2 + $0x78] sm:$0xf]  ;;  %v11226_v62 = vld [vmem:[#allocation2 + $0x7c] sm:$0xf]  ;;  %v2482_v20 = vld [vmem:[#allocation2 + $0xc] sm:$0xf] }
 0x208   : > { %v9831_v60 = vcombine.low %v2171_v44, %v2174_v27  ;;  %v12371_v43 = vsel %vm1918_vm15, %v9782_v50, %v12256_v19  ;;  %v2180_v59 = vrot.slane %v2034_v39, 5  ;;  %v9783_v22 = vcombine.low %v11225_v3, %v11226_v62  ;;  %v12373_v31 = vld [vmem:[#allocation2 + $0x98] sm:$0x1]  ;;  %v11228_v4 = vld [vmem:[#allocation2 + $0x1c] sm:$0xf] }
 0x209   : > { %4747 = vmatmul.mubr.bf16.gmra.mrb[32].mxu1 %v1937_v7  ;;  %v11220_v7 = vld [vmem:[#allocation2 + $0x58] sm:$0xf]  ;;  %v2179_v48 = vrot.slane %v2177_v47, 4  ;;  %v9817_v5 = vrot.slane %v2035_v8, 9  ;;  %v2184_v17 = vrot.slane %v2036_v0, 5  ;;  %v12377_v26 = vsel %vm1918_vm15, %v9830_v6, %v12221_v1 }
 0x20a   : > { %4754 = vmatprep.mubr.bf16.mxu1 %v2424_v42  ;;  %v9780_v41 = vcombine.low %v11219_v2, %v11220_v7  ;;  %v9820_v2 = vrot.slane %v2044_v53, 9  ;;  %v12381_v7 = vsel %vm12005_vm14, %v9816_v28, %v2177_v47  ;;  %v3860_v11 = vpop.permute.xlu0 %3859  ;;  %v12385_v14 = vsel %vm1918_vm15, %v9831_v60, %v12239_v18  ;;  %v11227_v1 = vld [vmem:[#allocation2 + $0x18] sm:$0xf]  ;;  %v11229_v33 = vld [vmem:[#allocation2 + $0x84] sm:$0xf] }
 0x20b   : > { %v2187_v34 = vrot.slane %v12373_v31, 5  ;;  %v9901_v30 = vcombine.low %v11227_v1, %v11228_v4  ;;  %v11230_v44 = vld [vmem:[#allocation2 + $0x88] sm:$0xf]  ;;  %v12392_v39 = vld [vmem:[#allocation2 + $0x9c] sm:$0xe]  ;;  %v12398_v9 = vsel %vm12005_vm14, %v2179_v48, %v2180_v59  ;;  %v12402_v13 = vsel %vm12005_vm14, %v9817_v5, %v2184_v17 }
 0x20c   : > { %v12355_v42 = vsel %vm1918_vm15, %v9780_v41, %v12212_v45  ;;  %v2045_v45 = vld [vmem:[#allocation2 + $0xb8] sm:$0xf]  ;;  %v2208_v41 = vrot.slane %v2046_v38, 5  ;;  %v9784_v27 = vcombine.low %v11229_v33, %v11230_v44  ;;  %v11231_v8 = vld [vmem:[#allocation2 + $0xb4] sm:$0xf]  ;;  %v12404_v50 = vrot.slane %v2184_v17, 4 }
 0x20d   : > { %v2205_v19 = vrot.slane %v2045_v45, 5  ;;  %v1917_v12 = vpop.permute.xlu1 %1916  ;;  %v3893_v28 = vsel %vm1918_vm15, %v9901_v30, %v3860_v11  ;;  %v2531_v6 = vshrl.u32 %v2482_v20, 16  ;;  %v2534_v45 = vshll.u32 %v2482_v20, 16  ;;  %v2485_v38 = vld [vmem:[#allocation2 + $0x18] sm:$0xf] }
 0x20e   : > { %4875 = vmatprep.mubr.bf16.mxu0 %v3893_v28  ;;  %v9818_v60 = vrot.slane %v12392_v39, 9  ;;  %v11233_v3 = vld [vmem:[#allocation2 + $0x10] sm:$0xf]  ;;  %v9832_v48 = vcombine.low %v12381_v7, %v12398_v9  ;;  %v2555_v4 = vshrl.u32 %v2485_v38, 16  ;;  %v731_v30 = vld [vmem:[#allocation2 + $0xcc] sm:$0x1] }
 0x20f   : > { %v2206_v18 = vsel %vm12005_vm14, %v9820_v2, %v2205_v19  ;;  %v2207_v47 = vrot.slane %v2205_v19, 4  ;;  %v2540_v62 = vshll.u32 %v11233_v3, 16  ;;  %v2533_v5 = vrot.slane %v2531_v6, 4  ;;  %v11234_v2 = vld [vmem:[#allocation2 + $0x14] sm:$0x1] }
 0x210   : > { %v2536_v17 = vrot.slane %v2534_v45, 5  ;;  %v2550_v19 = vshll.u32 %v11234_v2, 16  ;;  %v12420_v20 = vld [vmem:[#allocation2 + $0xa0] sm:$0xf]  ;;  %v3330_v28 = vld [vmem:[#allocation2 + $0xd0] sm:$0xf] }
 0x211   : > { %4755 = vmatmul.mubr.bf16.gmra.mrb[36].mxu1 %v1941_v49  ;;  %v12389_v49 = vsel %vm1918_vm15, %v9783_v22, %v12270_v56  ;;  %v2209_v0 = vsel %vm12005_vm14, %v2207_v47, %v2208_v41  ;;  %v2544_v22 = vshrl.u32 %v11233_v3, 16  ;;  %v2542_v11 = vrot.slane %v2540_v62, 5  ;;  %v787_v47 = vld [vmem:[#allocation2 + $0xd4] sm:$0x1]  ;;  %v11236_v6 = vld [vmem:[#allocation2 + $0x20] sm:$0x1]  ;;  %v3862_v45 = vpop.permute.xlu0 %3861 }
 0x212   : > { %4762 = vmatprep.mubr.bf16.mxu1 %v2428_v46  ;;  %v11232_v46 = vld [vmem:[#allocation2 + $0xb8] sm:$0xf]  ;;  %v9836_v59 = vcombine.low %v2206_v18, %v2209_v0  ;;  %v2537_v33 = vor.u32 %v2536_v17, %v2533_v5  ;;  %v2552_v44 = vrot.slane %v2550_v19, 5  ;;  %v2558_v18 = vshll.u32 %v2485_v38, 16  ;;  %v2488_v62 = vld [vmem:[#allocation2 + $0x24] sm:$0xf]  ;;  %v3187_v19 = vpop.permute.xlu1 %3186 }
 0x213   : > { %v9788_v56 = vcombine.low %v11231_v8, %v11232_v46  ;;  %v2546_v1 = vrot.slane %v2544_v22, 4  ;;  %v2557_v8 = vrot.slane %v2555_v4, 4  ;;  %v788_v38 = vsel %vm11512_vm4, 0, %v787_v47  ;;  %v11237_v5 = vld [vmem:[#allocation2 + $0x24] sm:$0xf] }
 0x214   : > { %v2464_v41 = vsel %vm1918_vm15, %v9836_v59, %v12343_v21  ;;  %v2538_v0 = vrot.slane %v2537_v33, 4  ;;  %v2191_v22 = vrot.slane %v12420_v20, 5  ;;  %v11238_v17 = vld [vmem:[#allocation2 + $0x28] sm:$0xf]  ;;  %789 = vst [vmem:[#allocation2 + $0xd4] sm:$0x1] %v788_v38 }
 0x215   : > { %v1981_v53 = vsel %vm1918_vm15, %v9788_v56, %v1917_v12  ;;  %v12418_v12 = vsel %vm1918_vm15, %v9784_v27, %v12285_v16  ;;  %2481 = vst [vmem:[#allocation3 + $0x260] sm:$0xff] %v2464_v41  ;;  %v2547_v21 = vor.u32 %v2546_v1, %v2542_v11  ;;  %v2574_v16 = vshll.u32 %v11236_v6, 16  ;;  %v11252_v20 = vld [vmem:[#allocation2 + $0x48] sm:$0xf] }
 0x216   : > { %1998 = vst [vmem:[#allocation3 + $0x258] sm:$0xff] %v1981_v53  ;;  %v2560_v53 = vrot.slane %v2558_v18, 5  ;;  %v732_v27 = vsel %vm11502_vm2, 0, %v731_v30  ;;  %v9902_v2 = vcombine.low %v11237_v5, %v11238_v17  ;;  %v3717_v1 = vshll.u32 %v3330_v28, 16 }
 0x217   : > { %v2548_v59 = vrot.slane %v2547_v21, 4  ;;  %733 = vst [vmem:[#allocation2 + $0xcc] sm:$0x1] %v732_v27  ;;  %v2543_v4 = vsel %vm11591_vm8, %v2538_v0, %v2542_v11  ;;  %v3721_v18 = vshrl.u32 %v3330_v28, 16  ;;  %v2582_v6 = vshll.u32 %v2488_v62, 16 }
 0x218   : > { %v2561_v41 = vor.u32 %v2560_v53, %v2557_v8  ;;  %v12432_v21 = vrot.slane %v3717_v1, 5  ;;  %v3897_v11 = vsel %vm1918_vm15, %v9902_v2, %v3862_v45  ;;  %v11239_v28 = vld [vmem:[#allocation2 + $0x28] sm:$0xf]  ;;  %v11241_v45 = vld [vmem:[#allocation2 + $0x34] sm:$0xf]  ;;  %v3189_v2 = vpop.permute.xlu1 %3188 }
 0x219   : > { %4763 = vmatmul.mubr.bf16.gmra.mrb[40].mxu1 %v12337_v15  ;;  %v11235_v15 = vld [vmem:[#allocation2 + $0x1c] sm:$0xf]  ;;  %v2553_v30 = vsel %vm11591_vm8, %v2548_v59, %v2552_v44  ;;  %v3723_v53 = vrot.slane %v3721_v18, 4  ;;  %v2588_v27 = vshll.u32 %v11239_v28, 16  ;;  %v3864_v59 = vpop.permute.xlu0 %3863  ;;  %v2592_v5 = vshrl.u32 %v11239_v28, 16 }
 0x21a   : > { %4770 = vmatprep.mubr.bf16.mxu1 %v12359_v61  ;;  %v2564_v46 = vshll.u32 %v11235_v15, 16  ;;  %v2568_v56 = vshrl.u32 %v11235_v15, 16  ;;  %v9869_v29 = vcombine.low %v2543_v4, %v2553_v30  ;;  %v2562_v47 = vrot.slane %v2561_v41, 4  ;;  %v2491_v1 = vld [vmem:[#allocation2 + $0x30] sm:$0xf] }
 0x21b   : > { %v2579_v15 = vshrl.u32 %v2488_v62, 16  ;;  %v3724_v38 = vor.u32 %v3723_v53, %v12432_v21  ;;  %v11240_v62 = vld [vmem:[#allocation2 + $0x30] sm:$0xf]  ;;  %v12446_v41 = vrot.slane %v2588_v27, 5  ;;  %v3346_v4 = vld [vmem:[#allocation2 + $0xd4] sm:$0x1] }
 0x21c   : > { %v2566_v61 = vrot.slane %v2564_v46, 5  ;;  %v2570_v3 = vrot.slane %v2568_v56, 4  ;;  %v12434_v46 = vld [vmem:[#allocation2 + $0xa4] sm:$0x1]  ;;  %v2576_v56 = vrot.slane %v2574_v16, 5  ;;  %v3220_v0 = vsel %vm1918_vm15, %v9869_v29, %v3187_v19 }
 0x21d   : > { %v2581_v44 = vrot.slane %v2579_v15, 4  ;;  %4876 = vmatmul.mubr.bf16.vlgmr.msra.gmra.mrb[16].mxu0 %v3220_v0  ;;  %v9903_v17 = vcombine.low %v11240_v62, %v11241_v45  ;;  %v11242_v29 = vld [vmem:[#allocation2 + $0x2c] sm:$0x1]  ;;  %v3727_v53 = vshll.u32 %v3346_v4, 16  ;;  %v2606_v45 = vshll.u32 %v2491_v1, 16 }
 0x21e   : > { %v2571_v33 = vor.u32 %v2570_v3, %v2566_v61  ;;  %v3329_v19 = vld [vmem:[#allocation2 + $0xcc] sm:$0xf]  ;;  %4883 = vmatprep.mubr.bf16.mxu0 %v3897_v11  ;;  %v2598_v15 = vshll.u32 %v11242_v29, 16  ;;  %v2603_v11 = vshrl.u32 %v2491_v1, 16 }
 0x21f   : > { %v3708_v30 = vshrl.u32 %v3329_v19, 16  ;;  %v3729_v62 = vrot.slane %v3727_v53, 5  ;;  %v12455_v1 = vld [vmem:[#allocation2 + $0xac] sm:$0xf] }
 0x220   : > { %v2572_v8 = vrot.slane %v2571_v33, 4  ;;  %v3711_v33 = vshll.u32 %v3329_v19, 16  ;;  %v2600_v16 = vrot.slane %v2598_v15, 5  ;;  %v2605_v4 = vrot.slane %v2603_v11, 4  ;;  %v11244_v15 = vld [vmem:[#allocation2 + $0x38] sm:$0x1] }
 0x221   : > { %4771 = vmatmul.mubr.bf16.gmra.mrb[44].mxu1 %v12355_v42  ;;  %v2584_v42 = vrot.slane %v2582_v6, 5  ;;  %v2594_v6 = vrot.slane %v2592_v5, 4  ;;  %v3710_v0 = vrot.slane %v3708_v30, 4  ;;  %v2608_v30 = vrot.slane %v2606_v45, 5  ;;  %v11248_v11 = vld [vmem:[#allocation2 + $0x3c] sm:$0xf] }
 0x222   : > { %4778 = vmatprep.mubr.bf16.mxu1 %v12363_v32  ;;  %v2577_v3 = vsel %vm11591_vm8, %v2572_v8, %v2576_v56  ;;  %v2567_v32 = vsel %vm11591_vm8, %v2562_v47, %v2566_v61  ;;  %v3901_v8 = vsel %vm1918_vm15, %v9903_v17, %v3864_v59  ;;  %v3713_v28 = vrot.slane %v3711_v33, 5  ;;  %v2494_v59 = vld [vmem:[#allocation2 + $0x3c] sm:$0xf]  ;;  %v3866_v17 = vpop.permute.xlu0 %3865  ;;  %v11249_v45 = vld [vmem:[#allocation2 + $0x40] sm:$0xf] }
 0x223   : > { %v2585_v18 = vor.u32 %v2584_v42, %v2581_v44  ;;  %v9870_v56 = vcombine.low %v2567_v32, %v2577_v3  ;;  %v3725_v61 = vrot.slane %v3724_v38, 4  ;;  %v2595_v27 = vor.u32 %v2594_v6, %v12446_v41  ;;  %v11243_v44 = vld [vmem:[#allocation2 + $0x34] sm:$0xf]  ;;  %v12451_v3 = vld [vmem:[#allocation2 + $0xa8] sm:$0xe]  ;;  %v3191_v32 = vpop.permute.xlu1 %3190 }
 0x224   : > { %v3714_v63 = vor.u32 %v3713_v28, %v3710_v0  ;;  %v2612_v42 = vshll.u32 %v11243_v44, 16  ;;  %v2616_v19 = vshrl.u32 %v11243_v44, 16  ;;  %v2609_v6 = vor.u32 %v2608_v30, %v2605_v4  ;;  %v2497_v4 = vld [vmem:[#allocation2 + $0x48] sm:$0xf] }
 0x225   : > { %v2586_v47 = vrot.slane %v2585_v18, 4  ;;  %v3224_v5 = vsel %vm1918_vm15, %v9870_v56, %v3189_v2  ;;  %v2596_v38 = vrot.slane %v2595_v27, 4  ;;  %v12466_v2 = vsel %vm12005_vm14, %v12404_v50, %v2187_v34  ;;  %v11245_v34 = vld [vmem:[#allocation2 + $0x90] sm:$0xf]  ;;  %v11246_v50 = vld [vmem:[#allocation2 + $0x94] sm:$0xf] }
 0x226   : > { %v3715_v33 = vrot.slane %v3714_v63, 4  ;;  %v12459_v18 = vrot.slane %v2612_v42, 5  ;;  %v2618_v29 = vrot.slane %v2616_v19, 4  ;;  %4884 = vmatmul.mubr.bf16.gmra.mrb[20].mxu0 %v3224_v5  ;;  %v2622_v63 = vshll.u32 %v11244_v15, 16  ;;  %v3868_v19 = vpop.permute.xlu0 %3867 }
 0x227   : > { %v2627_v56 = vshrl.u32 %v2494_v59, 16  ;;  %4891 = vmatprep.mubr.bf16.mxu0 %v3901_v8  ;;  %v2601_v31 = vsel %vm11591_vm8, %v2596_v38, %v2600_v16  ;;  %v9785_v28 = vcombine.low %v11245_v34, %v11246_v50  ;;  %v2630_v16 = vshll.u32 %v2494_v59, 16  ;;  %v3193_v5 = vpop.permute.xlu1 %3192 }
 0x228   : > { %v3720_v53 = vsel %vm11591_vm8, %v3715_v33, %v12432_v21  ;;  %v2619_v0 = vor.u32 %v2618_v29, %v12459_v18  ;;  %v12484_v21 = vsel %vm1918_vm15, %v9832_v48, %v12266_v23  ;;  %v9904_v44 = vcombine.low %v11248_v11, %v11249_v45  ;;  %v11250_v33 = vld [vmem:[#allocation2 + $0x44] sm:$0x1] }
 0x229   : > { %4779 = vmatmul.mubr.bf16.gmra.mrb[48].mxu1 %v12367_v57  ;;  %v3730_v57 = vsel %vm11591_vm8, %v3725_v61, %v3729_v62  ;;  %v9819_v61 = vrot.slane %v12451_v3, 9  ;;  %v2629_v8 = vrot.slane %v2627_v56, 4  ;;  %v11247_v62 = vld [vmem:[#allocation2 + $0x40] sm:$0xf]  ;;  %v2624_v3 = vrot.slane %v2622_v63, 5 }
 0x22a   : > { %4786 = vmatprep.mubr.bf16.mxu1 %v12377_v26  ;;  %v2591_v26 = vsel %vm11591_vm8, %v2586_v47, %v12446_v41  ;;  %v2198_v41 = vrot.slane %v12455_v1, 5  ;;  %v9932_v47 = vcombine.low %v3720_v53, %v3730_v57  ;;  %v2636_v27 = vshll.u32 %v11247_v62, 16  ;;  %v2500_v53 = vld [vmem:[#allocation2 + $0x54] sm:$0xf]  ;;  %v12519_v50 = vpop.permute.xlu0 %3869 }
 0x22b   : > { %v9871_v42 = vcombine.low %v2591_v26, %v2601_v31  ;;  %v2640_v38 = vshrl.u32 %v11247_v62, 16  ;;  %v2610_v30 = vrot.slane %v2609_v6, 4  ;;  %v2620_v7 = vrot.slane %v2619_v0, 4  ;;  %v2043_v31 = vld [vmem:[#allocation2 + $0xb0] sm:$0x1] }
 0x22c   : > { %3889 = vrot.lane.b32.xlu0 %v9932_v47, %s11403_s27  ;;  %v2632_v9 = vrot.slane %v2630_v16, 5  ;;  %v12487_v23 = vrot.slane %v2636_v27, 5  ;;  %v9833_v48 = vcombine.low %v12402_v13, %v12466_v2  ;;  %v2646_v57 = vshll.u32 %v11250_v33, 16 }
 0x22d   : > { %v3228_v59 = vsel %vm1918_vm15, %v9871_v42, %v3191_v32  ;;  %v2642_v1 = vrot.slane %v2640_v38, 4  ;;  %v3905_v29 = vsel %vm1918_vm15, %v9904_v44, %v3866_v17  ;;  %v2651_v15 = vshrl.u32 %v2497_v4, 16  ;;  %v11251_v32 = vld [vmem:[#allocation2 + $0x4c] sm:$0xf]  ;;  %v2503_v38 = vld [vmem:[#allocation2 + $0x60] sm:$0xf] }
 0x22e   : > { %v2633_v26 = vor.u32 %v2632_v9, %v2629_v8  ;;  %v2654_v63 = vshll.u32 %v2497_v4, 16  ;;  %4892 = vmatmul.mubr.bf16.gmra.mrb[24].mxu0 %v3228_v59  ;;  %v2660_v2 = vshll.u32 %v11251_v32, 16  ;;  %v2664_v56 = vshrl.u32 %v11251_v32, 16  ;;  %v11257_v32 = vld [vmem:[#allocation2 + $0x9c] sm:$0xf] }
 0x22f   : > { %v2643_v13 = vor.u32 %v2642_v1, %v12487_v23  ;;  %4899 = vmatprep.mubr.bf16.mxu0 %v3905_v29  ;;  %v12508_v17 = vsel %vm1918_vm15, %v9785_v28, %v12302_v36  ;;  %v2615_v39 = vsel %vm11591_vm8, %v2610_v30, %v12459_v18  ;;  %v12517_v6 = vsel %vm12005_vm14, %v9819_v61, %v2198_v41  ;;  %v12521_v28 = vpop.permute.xlu1 %3194 }
 0x230   : > { %v2200_v0 = vrot.slane %v2198_v41, 4  ;;  %v2648_v36 = vrot.slane %v2646_v57, 5  ;;  %v2634_v47 = vrot.slane %v2633_v26, 4  ;;  %v2653_v8 = vrot.slane %v2651_v15, 4  ;;  %v11254_v41 = vld [vmem:[#allocation2 + $0x58] sm:$0xf] }
 0x231   : > { %4787 = vmatmul.mubr.bf16.gmra.mrb[52].mxu1 %v12371_v43  ;;  %v12501_v43 = vsel %vm12005_vm14, %v9818_v60, %v2191_v22  ;;  %v2625_v60 = vsel %vm11591_vm8, %v2620_v7, %v2624_v3  ;;  %v2644_v18 = vrot.slane %v2643_v13, 4  ;;  %v2656_v16 = vrot.slane %v2654_v63, 5  ;;  %v11256_v63 = vld [vmem:[#allocation2 + $0x64] sm:$0xf] }
 0x232   : > { %4794 = vmatprep.mubr.bf16.mxu1 %v12385_v14  ;;  %v2193_v14 = vrot.slane %v2191_v22, 4  ;;  %v11253_v22 = vld [vmem:[#allocation2 + $0x4c] sm:$0xf]  ;;  %v9872_v62 = vcombine.low %v2615_v39, %v2625_v60  ;;  %v12523_v27 = vrot.slane %v2660_v2, 5  ;;  %v2666_v11 = vrot.slane %v2664_v56, 4 }
 0x233   : > { %v9905_v34 = vcombine.low %v11252_v20, %v11253_v22  ;;  %v2675_v45 = vshrl.u32 %v2500_v53, 16  ;;  %v2201_v61 = vrot.slane %v2043_v31, 5  ;;  %v2678_v44 = vshll.u32 %v2500_v53, 16  ;;  %v11258_v2 = vld [vmem:[#allocation2 + $0xa0] sm:$0xf] }
 0x234   : > { %v2684_v42 = vshll.u32 %v11254_v41, 16  ;;  %v2688_v3 = vshrl.u32 %v11254_v41, 16  ;;  %v2452_v4 = vsel %vm1918_vm15, %v9833_v48, %v12283_v10  ;;  %v14574_v30 = vrot.slane %v12434_v46, 5  ;;  %v11255_v10 = vld [vmem:[#allocation2 + $0x50] sm:$0x1]  ;;  %v12540_v46 = vpop.permute.xlu0 %3871 }
 0x235   : > { %v3909_v9 = vsel %vm1918_vm15, %v9905_v34, %v3868_v19  ;;  %v3232_v59 = vsel %vm1918_vm15, %v9872_v62, %v3193_v5  ;;  %v2639_v1 = vsel %vm11591_vm8, %v2634_v47, %v12487_v23  ;;  %v2657_v33 = vor.u32 %v2656_v16, %v2653_v8  ;;  %v12543_v19 = vpop.permute.xlu1 %3196  ;;  %v11259_v8 = vld [vmem:[#allocation2 + $0x54] sm:$0xf]  ;;  %v11260_v16 = vld [vmem:[#allocation2 + $0x58] sm:$0xf] }
 0x236   : > { %v2195_v7 = vsel %vm12005_vm14, %v2193_v14, %v14574_v30  ;;  %v2670_v48 = vshll.u32 %v11255_v10, 16  ;;  %4900 = vmatmul.mubr.bf16.gmra.mrb[28].mxu0 %v3232_v59  ;;  %v2667_v57 = vor.u32 %v2666_v11, %v12523_v27  ;;  %v2677_v5 = vrot.slane %v2675_v45, 4  ;;  %v2506_v30 = vld [vmem:[#allocation2 + $0x6c] sm:$0xf] }
 0x237   : > { %v2699_v29 = vshrl.u32 %v2503_v38, 16  ;;  %4907 = vmatprep.mubr.bf16.mxu0 %v3909_v9  ;;  %v2680_v26 = vrot.slane %v2678_v44, 5  ;;  %v12545_v15 = vrot.slane %v2684_v42, 5  ;;  %v2690_v23 = vrot.slane %v2688_v3, 4  ;;  %v11261_v44 = vld [vmem:[#allocation2 + $0x5c] sm:$0x1] }
 0x238   : > { %v2708_v13 = vshll.u32 %v11256_v63, 16  ;;  %v9786_v56 = vcombine.low %v11257_v32, %v11258_v2  ;;  %v2712_v60 = vshrl.u32 %v11256_v63, 16  ;;  %v9834_v53 = vcombine.low %v12501_v43, %v2195_v7  ;;  %v12561_v42 = vpop.permute.xlu0 %3873  ;;  %v11262_v7 = vld [vmem:[#allocation2 + $0xa8] sm:$0xf]  ;;  %v11263_v9 = vld [vmem:[#allocation2 + $0xac] sm:$0xf] }
 0x239   : > { %4795 = vmatmul.mubr.bf16.gmra.mrb[56].mxu1 %v12389_v49  ;;  %v2649_v49 = vsel %vm11591_vm8, %v2644_v18, %v2648_v36  ;;  %v2701_v14 = vrot.slane %v2699_v29, 4  ;;  %v2202_v31 = vsel %vm12005_vm14, %v2200_v0, %v2201_v61  ;;  %v2672_v20 = vrot.slane %v2670_v48, 5  ;;  %v12563_v3 = vpop.permute.xlu1 %3198  ;;  %v11266_v29 = vld [vmem:[#allocation2 + $0x64] sm:$0xf] }
 0x23a   : > { %4802 = vmatprep.mubr.bf16.mxu1 %v12484_v21  ;;  %v2702_v21 = vshll.u32 %v2503_v38, 16  ;;  %v12550_v22 = vrot.slane %v2708_v13, 5  ;;  %v9873_v34 = vcombine.low %v2639_v1, %v2649_v49  ;;  %v2658_v36 = vrot.slane %v2657_v33, 4 }
 0x23b   : > { %v2668_v47 = vrot.slane %v2667_v57, 4  ;;  %v2714_v18 = vrot.slane %v2712_v60, 4  ;;  %v9906_v62 = vcombine.low %v11259_v8, %v11260_v16  ;;  %v2681_v11 = vor.u32 %v2680_v26, %v2677_v5  ;;  %v11265_v5 = vld [vmem:[#allocation2 + $0x60] sm:$0xf]  ;;  %v11269_v60 = vld [vmem:[#allocation2 + $0x70] sm:$0xf] }
 0x23c   : > { %v2704_v39 = vrot.slane %v2702_v21, 5  ;;  %v2691_v45 = vor.u32 %v2690_v23, %v12545_v15  ;;  %v2694_v41 = vshll.u32 %v11261_v44, 16  ;;  %v9835_v43 = vcombine.low %v12517_v6, %v2202_v31  ;;  %v11267_v23 = vld [vmem:[#allocation2 + $0x70] sm:$0xf]  ;;  %v11270_v31 = vld [vmem:[#allocation2 + $0x78] sm:$0xf] }
 0x23d   : > { %v12557_v0 = vsel %vm1918_vm15, %v9786_v56, %v12322_v54  ;;  %v3236_v61 = vsel %vm1918_vm15, %v9873_v34, %v12521_v28  ;;  %v9787_v59 = vcombine.low %v11262_v7, %v11263_v9  ;;  %v2715_v6 = vor.u32 %v2714_v18, %v12550_v22  ;;  %v11264_v54 = vld [vmem:[#allocation2 + $0x68] sm:$0x1]  ;;  %v2512_v16 = vld [vmem:[#allocation2 + $0x84] sm:$0xf] }
 0x23e   : > { %v2705_v38 = vor.u32 %v2704_v39, %v2701_v14  ;;  %v2718_v1 = vshll.u32 %v11264_v54, 16  ;;  %4908 = vmatmul.mubr.bf16.gmra.mrb[32].mxu0 %v3236_v61  ;;  %v2456_v28 = vsel %vm1918_vm15, %v9834_v53, %v12296_v25  ;;  %v12572_v49 = vsel %vm1918_vm15, %v9835_v43, %v12312_v40  ;;  %v11268_v39 = vld [vmem:[#allocation2 + $0x6c] sm:$0xf]  ;;  %v11272_v43 = vld [vmem:[#allocation2 + $0x7c] sm:$0xf] }
 0x23f   : > { %v2673_v33 = vsel %vm11591_vm8, %v2668_v47, %v2672_v20  ;;  %v2692_v10 = vrot.slane %v2691_v45, 4  ;;  %v2696_v48 = vrot.slane %v2694_v41, 5  ;;  %v2723_v57 = vshrl.u32 %v2506_v30, 16  ;;  %v11271_v20 = vld [vmem:[#allocation2 + $0x7c] sm:$0xf]  ;;  %v12585_v47 = vpop.permute.xlu1 %3200 }
 0x240   : > { %v9907_v21 = vcombine.low %v11265_v5, %v11266_v29  ;;  %v2706_v25 = vrot.slane %v2705_v38, 4  ;;  %v2726_v26 = vshll.u32 %v2506_v30, 16  ;;  %v2732_v40 = vshll.u32 %v11267_v23, 16  ;;  %v2515_v54 = vld [vmem:[#allocation2 + $0x90] sm:$0xf] }
 0x241   : > { %4803 = vmatmul.mubr.bf16.gmra.mrb[60].mxu1 %v12418_v12  ;;  %v3913_v12 = vsel %vm1918_vm15, %v9906_v62, %v12519_v50  ;;  %v2682_v50 = vrot.slane %v2681_v11, 4  ;;  %v2716_v13 = vrot.slane %v2715_v6, 4  ;;  %v2720_v32 = vrot.slane %v2718_v1, 5 }
 0x242   : > { %4810 = vmatprep.mubr.bf16.mxu1 %v2452_v4  ;;  %v2663_v4 = vsel %vm11591_vm8, %v2658_v36, %v12523_v27  ;;  %4915 = vmatprep.mubr.bf16.mxu0 %v3913_v12  ;;  %v2736_v2 = vshrl.u32 %v11267_v23, 16  ;;  %v2509_v27 = vld [vmem:[#allocation2 + $0x78] sm:$0xf]  ;;  %v12581_v56 = vsel %vm1918_vm15, %v9787_v59, %v12349_v37  ;;  %v3917_v14 = vsel %vm1918_vm15, %v9907_v21, %v12540_v46  ;;  %v3876_v36 = vpop.permute.xlu0 %3875  ;;  %v11273_v59 = vld [vmem:[#allocation2 + $0x88] sm:$0xf] }
 0x243   : > { %v9874_v63 = vcombine.low %v2663_v4, %v2673_v33  ;;  %v9908_v53 = vcombine.low %v11268_v39, %v11269_v60  ;;  %v9909_v34 = vcombine.low %v11270_v31, %v11271_v20  ;;  %v2687_v37 = vsel %vm11591_vm8, %v2682_v50, %v12545_v15  ;;  %v11274_v50 = vld [vmem:[#allocation2 + $0x74] sm:$0x1]  ;;  %v2518_v60 = vld [vmem:[#allocation2 + $0x9c] sm:$0xf]  ;;  %v11276_v31 = vld [vmem:[#allocation2 + $0x80] sm:$0x1] }
 0x244   : > { %v2697_v8 = vsel %vm11591_vm8, %v2692_v10, %v2696_v48  ;;  %v2725_v46 = vrot.slane %v2723_v57, 4  ;;  %v2711_v62 = vsel %vm11591_vm8, %v2706_v25, %v12550_v22  ;;  %v2728_v11 = vrot.slane %v2726_v26, 5  ;;  %v12611_v48 = vpop.permute.xlu1 %3202 }
 0x245   : > { %v3240_v18 = vsel %vm1918_vm15, %v9874_v63, %v12543_v19  ;;  %v12598_v45 = vrot.slane %v2732_v40, 5  ;;  %v2747_v44 = vshrl.u32 %v2509_v27, 16  ;;  %v2721_v19 = vsel %vm11591_vm8, %v2716_v13, %v2720_v32  ;;  %v11275_v13 = vld [vmem:[#allocation2 + $0x94] sm:$0xf] }
 0x246   : > { %v2738_v15 = vrot.slane %v2736_v2, 4  ;;  %v2750_v41 = vshll.u32 %v2509_v27, 16  ;;  %v2756_v61 = vshll.u32 %v11272_v43, 16  ;;  %4916 = vmatmul.mubr.bf16.gmra.mrb[36].mxu0 %v3240_v18  ;;  %v9875_v38 = vcombine.low %v2687_v37, %v2697_v8  ;;  %v12609_v4 = vpop.permute.xlu0 %3877 }
 0x247   : > { %v2760_v30 = vshrl.u32 %v11272_v43, 16  ;;  %v2774_v7 = vshll.u32 %v2512_v16, 16  ;;  %4923 = vmatprep.mubr.bf16.mxu0 %v3917_v14  ;;  %v3921_v22 = vsel %vm1918_vm15, %v9908_v53, %v12561_v42  ;;  %v12605_v9 = vsel %vm1918_vm15, %v9909_v34, %v3876_v36 }
 0x248   : > { %v2780_v12 = vshll.u32 %v11273_v59, 16  ;;  %v2784_v6 = vshrl.u32 %v11273_v59, 16  ;;  %v3244_v1 = vsel %vm1918_vm15, %v9875_v38, %v12563_v3  ;;  %v2729_v33 = vor.u32 %v2728_v11, %v2725_v46  ;;  %v12631_v8 = vpop.permute.xlu1 %3204  ;;  %v11277_v46 = vld [vmem:[#allocation2 + $0x8c] sm:$0x1] }
 0x249   : > { %4811 = vmatmul.mubr.bf16.gmra.mrb[64].mxu1 %v12508_v17  ;;  %v2771_v17 = vshrl.u32 %v2512_v16, 16  ;;  %v2742_v10 = vshll.u32 %v11274_v50, 16  ;;  %v2739_v42 = vor.u32 %v2738_v15, %v12598_v45  ;;  %v2749_v57 = vrot.slane %v2747_v44, 4  ;;  %v2521_v50 = vld [vmem:[#allocation2 + $0xa8] sm:$0xf] }
 0x24a   : > { %4818 = vmatprep.mubr.bf16.mxu1 %v2456_v28  ;;  %v9876_v28 = vcombine.low %v2711_v62, %v2721_v19  ;;  %v2752_v5 = vrot.slane %v2750_v41, 5  ;;  %v12614_v29 = vrot.slane %v2756_v61, 5  ;;  %v2762_v21 = vrot.slane %v2760_v30, 4  ;;  %v12628_v18 = vpop.permute.xlu0 %3879  ;;  %v11278_v41 = vld [vmem:[#allocation2 + $0x98] sm:$0x1] }
 0x24b   : > { %v2773_v25 = vrot.slane %v2771_v17, 4  ;;  %v2776_v26 = vrot.slane %v2774_v7, 5  ;;  %v2795_v23 = vshrl.u32 %v2515_v54, 16  ;;  %v12616_v40 = vrot.slane %v2780_v12, 5  ;;  %v11279_v61 = vld [vmem:[#allocation2 + $0xa0] sm:$0xf] }
 0x24c   : > { %v2786_v3 = vrot.slane %v2784_v6, 4  ;;  %v2798_v63 = vshll.u32 %v2515_v54, 16  ;;  %v2804_v32 = vshll.u32 %v11275_v13, 16  ;;  %v12619_v2 = vrot.slane %v2729_v33, 4  ;;  %v12634_v17 = vld [vmem:[#allocation2 + $0x28] sm:$0xf] }
 0x24d   : > { %v12621_v27 = vrot.slane %v2742_v10, 5  ;;  %v2797_v14 = vrot.slane %v2795_v23, 4  ;;  %v2808_v39 = vshrl.u32 %v11275_v13, 16  ;;  %v12624_v53 = vrot.slane %v2739_v42, 4  ;;  %v12647_v10 = vld [vmem:[#allocation2 + $0x2c] sm:$0x1] }
 0x24e   : > { %v2766_v20 = vshll.u32 %v11276_v31, 16  ;;  %v2800_v34 = vrot.slane %v2798_v63, 5  ;;  %v12626_v36 = vrot.slane %v2804_v32, 5  ;;  %4924 = vmatmul.mubr.bf16.gmra.mrb[40].mxu0 %v3244_v1  ;;  %v2763_v37 = vor.u32 %v2762_v21, %v12614_v29  ;;  %v11280_v13 = vld [vmem:[#allocation2 + $0xa4] sm:$0x1] }
 0x24f   : > { %v2790_v16 = vshll.u32 %v11277_v46, 16  ;;  %v2810_v62 = vrot.slane %v2808_v39, 4  ;;  %4931 = vmatprep.mubr.bf16.mxu0 %v3921_v22  ;;  %v2787_v11 = vor.u32 %v2786_v3, %v12616_v40  ;;  %v2819_v44 = vshrl.u32 %v2518_v60, 16  ;;  %v11282_v31 = vld [vmem:[#allocation2 + $0x88] sm:$0xf] }
 0x250   : > { %v2822_v19 = vshll.u32 %v2518_v60, 16  ;;  %v2801_v15 = vor.u32 %v2800_v34, %v2797_v14  ;;  %v2814_v43 = vshll.u32 %v11278_v41, 16  ;;  %v2828_v38 = vshll.u32 %v11279_v61, 16  ;;  %v12678_v41 = vld [vmem:[#allocation2 + $0xb4] sm:$0xf] }
 0x251   : > { %4819 = vmatmul.mubr.bf16.gmra.mrb[68].mxu1 %v12557_v0  ;;  %v2753_v0 = vor.u32 %v2752_v5, %v2749_v57  ;;  %v2832_v30 = vshrl.u32 %v11279_v61, 16  ;;  %v3248_v7 = vsel %vm1918_vm15, %v9876_v28, %v12585_v47  ;;  %v2735_v22 = vsel %vm11591_vm8, %v12619_v2, %v12598_v45  ;;  %v4335_v57 = vld [vmem:[#allocation3 + $0x260] sm:$0xff]  ;;  %v12654_v5 = vpop.permute.xlu0 %3881 }
 0x252   : > { %4826 = vmatprep.mubr.bf16.mxu1 %v12572_v49  ;;  %v2777_v49 = vor.u32 %v2776_v26, %v2773_v25  ;;  %v12642_v59 = vrot.slane %v2766_v20, 5  ;;  %v2811_v12 = vor.u32 %v2810_v62, %v12626_v36  ;;  %v2821_v6 = vrot.slane %v2819_v44, 4  ;;  %v12656_v26 = vpop.permute.xlu1 %3206 }
 0x253   : > { %v2824_v54 = vrot.slane %v2822_v19, 5  ;;  %v12645_v1 = vrot.slane %v2828_v38, 5  ;;  %v2834_v33 = vrot.slane %v2832_v30, 4  ;;  %v2745_v47 = vsel %vm11591_vm8, %v12624_v53, %v12621_v27  ;;  %v11281_v53 = vld [vmem:[#allocation2 + $0x84] sm:$0xf] }
 0x254   : > { %v2754_v28 = vrot.slane %v2753_v0, 4  ;;  %v2764_v42 = vrot.slane %v2763_v37, 4  ;;  %v2792_v45 = vrot.slane %v2790_v16, 5  ;;  %v2778_v21 = vrot.slane %v2777_v49, 4  ;;  %v11283_v0 = vld [vmem:[#allocation2 + $0x90] sm:$0xf] }
 0x255   : > { %v2788_v25 = vrot.slane %v2787_v11, 4  ;;  %v2802_v23 = vrot.slane %v2801_v15, 4  ;;  %v2816_v3 = vrot.slane %v2814_v43, 5  ;;  %v2812_v63 = vrot.slane %v2811_v12, 4  ;;  %v11284_v37 = vld [vmem:[#allocation2 + $0x94] sm:$0xf]  ;;  %v3884_v43 = vpop.permute.xlu0 %3883 }
 0x256   : > { %v2838_v32 = vshll.u32 %v11280_v13, 16  ;;  %v2843_v2 = vshrl.u32 %v2521_v50, 16  ;;  %v2846_v27 = vshll.u32 %v2521_v50, 16  ;;  %4932 = vmatmul.mubr.bf16.gmra.mrb[44].mxu0 %v3248_v7  ;;  %v4076_v14 = vrot.slane %v12634_v17, 5  ;;  %v3209_v61 = vpop.permute.xlu1 %3208 }
 0x257   : > { %v2825_v39 = vor.u32 %v2824_v54, %v2821_v6  ;;  %v2835_v60 = vor.u32 %v2834_v33, %v12645_v1  ;;  %4939 = vmatprep.mubr.bf16.mxu0 %v12605_v9  ;;  %v9910_v20 = vcombine.low %v11281_v53, %v11282_v31  ;;  %v9877_v34 = vcombine.low %v2735_v22, %v2745_v47  ;;  %v11286_v54 = vld [vmem:[#allocation2 + $0x9c] sm:$0xf]  ;;  %v11287_v33 = vld [vmem:[#allocation2 + $0xa0] sm:$0xf]  ;;  %v11292_v53 = vld [vmem:[#allocation2 + $0xb8] sm:$0xf] }
 0x258   : > { %v9911_v46 = vcombine.low %v11283_v0, %v11284_v37  ;;  %v2759_v16 = vsel %vm11591_vm8, %v2754_v28, %v12614_v29  ;;  %v2769_v62 = vsel %vm11591_vm8, %v2764_v42, %v12642_v59  ;;  %v2783_v49 = vsel %vm11591_vm8, %v2778_v21, %v12616_v40  ;;  %v11285_v40 = vld [vmem:[#allocation2 + $0xac] sm:$0xf]  ;;  %v4334_v59 = vld [vmem:[#allocation3 + $0x258] sm:$0xff]  ;;  %v11288_v42 = vld [vmem:[#allocation2 + $0xa8] sm:$0xf] }
 0x259   : > { %4827 = vmatmul.mubr.bf16.gmra.mrb[72].mxu1 %v12581_v56  ;;  %v4079_v56 = vrot.slane %v12647_v10, 5  ;;  %v2793_v9 = vsel %vm11591_vm8, %v2788_v25, %v2792_v45  ;;  %v2807_v11 = vsel %vm11591_vm8, %v2802_v23, %v12626_v36  ;;  %v2817_v44 = vsel %vm11591_vm8, %v2812_v63, %v2816_v3  ;;  %v11289_v45 = vld [vmem:[#allocation2 + $0xac] sm:$0xf]  ;;  %v11290_v21 = vld [vmem:[#allocation2 + $0xb0] sm:$0x1] }
 0x25a   : > { %4834 = vmatprep.mubr.bf16.mxu1 %v4335_v57  ;;  %v2840_v19 = vrot.slane %v2838_v32, 5  ;;  %v2845_v29 = vrot.slane %v2843_v2, 4  ;;  %v2848_v15 = vrot.slane %v2846_v27, 5  ;;  %v2826_v38 = vrot.slane %v2825_v39, 4  ;;  %v3972_v2 = vld [vmem:[#allocation2 + $0x1c] sm:$0xf] }
 0x25b   : > { %v2836_v30 = vrot.slane %v2835_v60, 4  ;;  %v2852_v7 = vshll.u32 %v11285_v40, 16  ;;  %v2856_v22 = vshrl.u32 %v11285_v40, 16  ;;  %v4078_v12 = vrot.slane %v4076_v14, 4  ;;  %v11291_v60 = vld [vmem:[#allocation2 + $0xb4] sm:$0xf] }
 0x25c   : > { %v3929_v36 = vsel %vm1918_vm15, %v9910_v20, %v12609_v4  ;;  %v12686_v6 = vsel %vm1918_vm15, %v9911_v46, %v12628_v18  ;;  %v9912_v50 = vcombine.low %v11286_v54, %v11287_v33  ;;  %v3252_v47 = vsel %vm1918_vm15, %v9877_v34, %v12611_v48  ;;  %v3984_v54 = vld [vmem:[#allocation2 + $0x4c] sm:$0xf] }
 0x25d   : > { %v9878_v28 = vcombine.low %v2759_v16, %v2769_v62  ;;  %v9913_v57 = vcombine.low %v11288_v42, %v11289_v45  ;;  %v2862_v25 = vshll.u32 %v11290_v21, 16  ;;  %v9879_v23 = vcombine.low %v2783_v49, %v2793_v9  ;;  %v3211_v37 = vpop.permute.xlu1 %3210  ;;  %v3978_v16 = vld [vmem:[#allocation2 + $0x34] sm:$0xf]  ;;  %v3980_v42 = vld [vmem:[#allocation2 + $0x3c] sm:$0xe] }
 0x25e   : > { %v9880_v3 = vcombine.low %v2807_v11, %v2817_v44  ;;  %v2849_v4 = vor.u32 %v2848_v15, %v2845_v29  ;;  %v2867_v63 = vshrl.u32 %v12678_v41, 16  ;;  %4940 = vmatmul.mubr.bf16.gmra.mrb[48].mxu0 %v3252_v47  ;;  %v2831_v18 = vsel %vm11591_vm8, %v2826_v38, %v12645_v1  ;;  %v11293_v11 = vld [vmem:[#allocation2 + $0xb8] sm:$0xf]  ;;  %v3973_v44 = vld [vmem:[#allocation2 + $0x20] sm:$0x1] }
 0x25f   : > { %v2841_v13 = vsel %vm11591_vm8, %v2836_v30, %v2840_v19  ;;  %v12696_v48 = vrot.slane %v2852_v7, 5  ;;  %v2858_v32 = vrot.slane %v2856_v22, 4  ;;  %4947 = vmatprep.mubr.bf16.mxu0 %v3929_v36  ;;  %v3256_v27 = vsel %vm1918_vm15, %v9878_v28, %v12631_v8  ;;  %v3886_v8 = vpop.permute.xlu0 %3885  ;;  %v12722_v15 = vld [vmem:[#allocation2 + $0xbc] sm:$0x1]  ;;  %v3981_v38 = vld [vmem:[#allocation2 + $0x40] sm:$0xf] }
 0x260   : > { %v12702_v39 = vsel %vm1918_vm15, %v9912_v50, %v12654_v5  ;;  %v9914_v31 = vcombine.low %v11291_v60, %v11292_v53  ;;  %v2870_v1 = vshll.u32 %v12678_v41, 16  ;;  %v12707_v20 = vsel %vm1918_vm15, %v9879_v23, %v12656_v26  ;;  %v3971_v5 = vld [vmem:[#allocation2 + $0x18] sm:$0xe]  ;;  %v3979_v36 = vld [vmem:[#allocation2 + $0x38] sm:$0x1] }
 0x261   : > { %4835 = vmatmul.mubr.bf16.gmra.mrb[76].mxu1 %v4334_v59  ;;  %v12710_v34 = vsel %vm1918_vm15, %v9913_v57, %v3884_v43  ;;  %v12713_v0 = vsel %vm1918_vm15, %v9880_v3, %v3209_v61  ;;  %v12715_v46 = vrot.slane %v2862_v25, 5  ;;  %v9881_v62 = vcombine.low %v2831_v18, %v2841_v13  ;;  %v3977_v61 = vld [vmem:[#allocation2 + $0x30] sm:$0xe]  ;;  %v3982_v57 = vld [vmem:[#allocation2 + $0x44] sm:$0x1] }
 0x262   : > { %v12717_v49 = vrot.slane %v2849_v4, 4  ;;  %v12719_v9 = vrot.slane %v2867_v63, 4  ;;  %v2876_v26 = vshll.u32 %v11293_v11, 16  ;;  %v2859_v19 = vor.u32 %v2858_v32, %v12696_v48  ;;  %v3983_v21 = vld [vmem:[#allocation2 + $0x48] sm:$0xe] }
 0x263   : > { %v2880_v29 = vshrl.u32 %v11293_v11, 16  ;;  %v2886_v41 = vshll.u32 %v12722_v15, 16  ;;  %v4069_v43 = vrot.slane %v3972_v2, 5  ;;  %v12726_v30 = vsel %vm1918_vm15, %v9914_v31, %v3886_v8  ;;  %v3987_v25 = vld [vmem:[#allocation2 + $0x58] sm:$0xf] }
 0x264   : > { %v12729_v40 = vsel %vm1918_vm15, %v9881_v62, %v3211_v37  ;;  %v12731_v7 = vrot.slane %v2870_v1, 5  ;;  %v14575_v22 = vrot.slane %v12314_v55, 9  ;;  %v9933_v33 = vrot.slane %v3971_v5, 9  ;;  %v3985_v3 = vld [vmem:[#allocation2 + $0x50] sm:$0x1] }
 0x265   : > { %v4071_v50 = vrot.slane %v4069_v43, 4  ;;  %v4072_v47 = vrot.slane %v3973_v44, 5  ;;  %v4080_v28 = vsel %vm12005_vm14, %v4078_v12, %v4079_v56  ;;  %v2855_v17 = vsel %vm11591_vm8, %v12717_v49, %v12696_v48  ;;  %v3986_v32 = vld [vmem:[#allocation2 + $0x54] sm:$0xe]  ;;  %v3990_v2 = vld [vmem:[#allocation2 + $0x64] sm:$0xf] }
 0x266   : > { %v4077_v59 = vsel %vm12005_vm14, %v14575_v22, %v4076_v14  ;;  %v12747_v55 = vrot.slane %v2876_v26, 5  ;;  %v9935_v14 = vrot.slane %v3977_v61, 9  ;;  %4948 = vmatmul.mubr.bf16.gmra.mrb[52].mxu0 %v3256_v27  ;;  %v4070_v10 = vsel %vm12005_vm14, %v9933_v33, %v4069_v43  ;;  %v3988_v1 = vld [vmem:[#allocation2 + $0x5c] sm:$0x1]  ;;  %v3993_v61 = vld [vmem:[#allocation2 + $0x70] sm:$0xf] }
 0x267   : > { %v9950_v45 = vcombine.low %v4077_v59, %v4080_v28  ;;  %v4073_v56 = vsel %vm12005_vm14, %v4071_v50, %v4072_v47  ;;  %v4083_v12 = vrot.slane %v3978_v16, 5  ;;  %v4086_v23 = vrot.slane %v3979_v36, 5  ;;  %4955 = vmatprep.mubr.bf16.mxu0 %v12686_v6  ;;  %v3989_v16 = vld [vmem:[#allocation2 + $0x60] sm:$0xe]  ;;  %v3996_v43 = vld [vmem:[#allocation2 + $0x7c] sm:$0xf] }
 0x268   : > { %v12754_v4 = vrot.slane %v2859_v19, 4  ;;  %v9949_v63 = vcombine.low %v4070_v10, %v4073_v56  ;;  %v9936_v18 = vrot.slane %v3980_v42, 9  ;;  %v4090_v13 = vrot.slane %v3981_v38, 5  ;;  %v3991_v19 = vld [vmem:[#allocation2 + $0x68] sm:$0x1] }
 0x269   : > { %4244 = vst.msk [vmem:[#allocation3 + $0x48] sm:$0xff] %vm1918_vm15, %v9950_v45  ;;  %v4084_v27 = vsel %vm12005_vm14, %v9935_v14, %v4083_v12  ;;  %v4085_v60 = vrot.slane %v4083_v12, 4  ;;  %v4093_v53 = vrot.slane %v3982_v57, 5  ;;  %v9937_v31 = vrot.slane %v3983_v21, 9  ;;  %v3992_v36 = vld [vmem:[#allocation2 + $0x6c] sm:$0xe] }
 0x26a   : > { %v12759_v8 = vrot.slane %v2880_v29, 4  ;;  %4243 = vst.msk [vmem:[#allocation3 + $0x20] sm:$0xff] %vm1918_vm15, %v9949_v63  ;;  %v4091_v6 = vsel %vm12005_vm14, %v9936_v18, %v4090_v13  ;;  %v4092_v37 = vrot.slane %v4090_v13, 4  ;;  %v4097_v5 = vrot.slane %v3984_v54, 5  ;;  %v3999_v54 = vld [vmem:[#allocation2 + $0x88] sm:$0xf] }
 0x26b   : > { %v4087_v62 = vsel %vm12005_vm14, %v4085_v60, %v4086_v23  ;;  %v4100_v11 = vrot.slane %v3985_v3, 5  ;;  %v9938_v26 = vrot.slane %v3986_v32, 9  ;;  %v4104_v44 = vrot.slane %v3987_v25, 5  ;;  %v3994_v42 = vld [vmem:[#allocation2 + $0x74] sm:$0x1] }
 0x26c   : > { %v9951_v38 = vcombine.low %v4084_v27, %v4087_v62  ;;  %v4094_v29 = vsel %vm12005_vm14, %v4092_v37, %v4093_v53  ;;  %v4098_v22 = vsel %vm12005_vm14, %v9937_v31, %v4097_v5  ;;  %v4099_v59 = vrot.slane %v4097_v5, 4  ;;  %v3995_v25 = vld [vmem:[#allocation2 + $0x78] sm:$0xe]  ;;  %v3997_v3 = vld [vmem:[#allocation2 + $0x80] sm:$0x1] }
 0x26d   : > { %v9952_v33 = vcombine.low %v4091_v6, %v4094_v29  ;;  %v4105_v50 = vsel %vm12005_vm14, %v9938_v26, %v4104_v44  ;;  %v4106_v47 = vrot.slane %v4104_v44, 4  ;;  %v4107_v28 = vrot.slane %v3988_v1, 5  ;;  %v3998_v63 = vld [vmem:[#allocation2 + $0x84] sm:$0xe]  ;;  %v4002_v18 = vld [vmem:[#allocation2 + $0x94] sm:$0xf] }
 0x26e   : > { %4245 = vst.msk [vmem:[#allocation3 + $0x70] sm:$0xff] %vm1918_vm15, %v9951_v38  ;;  %v4101_v45 = vsel %vm12005_vm14, %v4099_v59, %v4100_v11  ;;  %4956 = vmatmul.mubr.bf16.gmra.mrb[56].mxu0 %v12707_v20  ;;  %v9939_v14 = vrot.slane %v3989_v16, 9  ;;  %v4111_v57 = vrot.slane %v3990_v2, 5  ;;  %v4114_v21 = vrot.slane %v3991_v19, 5  ;;  %v4000_v27 = vld [vmem:[#allocation2 + $0x8c] sm:$0x1] }
 0x26f   : > { %4246 = vst.msk [vmem:[#allocation3 + $0x98] sm:$0xff] %vm1918_vm15, %v9952_v33  ;;  %v9953_v10 = vcombine.low %v4098_v22, %v4101_v45  ;;  %v4108_v56 = vsel %vm12005_vm14, %v4106_v47, %v4107_v28  ;;  %4963 = vmatprep.mubr.bf16.mxu0 %v12702_v39  ;;  %v9940_v12 = vrot.slane %v3992_v36, 9  ;;  %v4118_v23 = vrot.slane %v3993_v61, 5  ;;  %v4001_v6 = vld [vmem:[#allocation2 + $0x90] sm:$0xe] }
 0x270   : > { %v9954_v13 = vcombine.low %v4105_v50, %v4108_v56  ;;  %v4112_v20 = vsel %vm12005_vm14, %v9939_v14, %v4111_v57  ;;  %v4113_v32 = vrot.slane %v4111_v57, 4  ;;  %v4121_v2 = vrot.slane %v3994_v42, 5  ;;  %v4268_v37 = vld [vmem:[#allocation3 + $0x48] sm:$0xff]  ;;  %v4003_v26 = vld [vmem:[#allocation2 + $0x98] sm:$0x1] }
 0x271   : > { %v4263_v60 = vld [vmem:[#allocation3 + $0x20] sm:$0xff]  ;;  %4247 = vst.msk [vmem:[#allocation3 + $0xc0] sm:$0xff] %vm1918_vm15, %v9953_v10  ;;  %v4119_v53 = vsel %vm12005_vm14, %v9940_v12, %v4118_v23  ;;  %v4120_v31 = vrot.slane %v4118_v23, 4  ;;  %v9941_v39 = vrot.slane %v3995_v25, 9  ;;  %v4125_v1 = vrot.slane %v3996_v43, 5 }
 0x272   : > { %10930 = vmatprep.mubr.msk.bf16.mxu1 %vm1918_vm15, %v4263_v60  ;;  %4248 = vst.msk [vmem:[#allocation3 + $0xe8] sm:$0xff] %vm1918_vm15, %v9954_v13  ;;  %v4115_v5 = vsel %vm12005_vm14, %v4113_v32, %v4114_v21  ;;  %v4128_v16 = vrot.slane %v3997_v3, 5  ;;  %v9942_v62 = vrot.slane %v3998_v63, 9  ;;  %v4132_v11 = vrot.slane %v3999_v54, 5  ;;  %v4005_v44 = vld [vmem:[#allocation2 + $0xa0] sm:$0xf] }
 0x273   : > { %10931 = vmatmul.mubr.msk.bf16.vlgmr.msra.gmra.mrb[80].mxu1 %vm1918_vm15, %v4268_v37  ;;  %v9955_v19 = vcombine.low %v4112_v20, %v4115_v5  ;;  %v4122_v43 = vsel %vm12005_vm14, %v4120_v31, %v4121_v2  ;;  %v4126_v61 = vsel %vm12005_vm14, %v9941_v39, %v4125_v1  ;;  %v4127_v38 = vrot.slane %v4125_v1, 4  ;;  %v4004_v29 = vld [vmem:[#allocation2 + $0x9c] sm:$0xe]  ;;  %v4008_v22 = vld [vmem:[#allocation2 + $0xac] sm:$0xf] }
 0x274   : > { %v9956_v59 = vcombine.low %v4119_v53, %v4122_v43  ;;  %v4133_v36 = vsel %vm12005_vm14, %v9942_v62, %v4132_v11  ;;  %v4134_v33 = vrot.slane %v4132_v11, 4  ;;  %v4135_v54 = vrot.slane %v4000_v27, 5  ;;  %v4006_v50 = vld [vmem:[#allocation2 + $0xa4] sm:$0x1]  ;;  %v4007_v57 = vld [vmem:[#allocation2 + $0xa8] sm:$0xe] }
 0x275   : > { %v4273_v47 = vld [vmem:[#allocation3 + $0x70] sm:$0xff]  ;;  %4249 = vst.msk [vmem:[#allocation3 + $0x110] sm:$0xff] %vm1918_vm15, %v9955_v19  ;;  %v4129_v28 = vsel %vm12005_vm14, %v4127_v38, %v4128_v16  ;;  %v9943_v42 = vrot.slane %v4001_v6, 9  ;;  %v4139_v45 = vrot.slane %v4002_v18, 5  ;;  %v4142_v14 = vrot.slane %v4003_v26, 5 }
 0x276   : > { %10934 = vmatprep.mubr.msk.bf16.mxu1 %vm1918_vm15, %v4273_v47  ;;  %4250 = vst.msk [vmem:[#allocation3 + $0x138] sm:$0xff] %vm1918_vm15, %v9956_v59  ;;  %4964 = vmatmul.mubr.bf16.gmra.mrb[60].mxu0 %v12713_v0  ;;  %v9957_v21 = vcombine.low %v4126_v61, %v4129_v28  ;;  %v4136_v25 = vsel %vm12005_vm14, %v4134_v33, %v4135_v54  ;;  %v9944_v10 = vrot.slane %v4004_v29, 9  ;;  %v4146_v56 = vrot.slane %v4005_v44, 5  ;;  %v4009_v12 = vld [vmem:[#allocation2 + $0xb0] sm:$0x1] }
 0x277   : > { %v4010_v23 = vld [vmem:[#allocation2 + $0xb4] sm:$0xe]  ;;  %v4014_v3 = vld [vmem:[#allocation2 + $0xc4] sm:$0xf]  ;;  %v4011_v63 = vld [vmem:[#allocation2 + $0xb8] sm:$0xf]  ;;  %4971 = vmatprep.mubr.bf16.mxu0 %v12710_v34  ;;  %v9958_v18 = vcombine.low %v4133_v36, %v4136_v25  ;;  %v4140_v13 = vsel %vm12005_vm14, %v9943_v42, %v4139_v45  ;;  %v2873_v39 = vor.u32 %v12731_v7, %v12719_v9 }
 0x278   : > { %v4141_v20 = vrot.slane %v4139_v45, 4  ;;  %v4149_v32 = vrot.slane %v4006_v50, 5  ;;  %v4012_v2 = vld [vmem:[#allocation2 + $0xbc] sm:$0x1]  ;;  %4251 = vst.msk [vmem:[#allocation3 + $0x160] sm:$0xff] %vm1918_vm15, %v9957_v21  ;;  %v4147_v0 = vsel %vm12005_vm14, %v9944_v10, %v4146_v56  ;;  %v4148_v27 = vrot.slane %v4146_v56, 4 }
 0x279   : > { %v9945_v60 = vrot.slane %v4007_v57, 9  ;;  %v4153_v53 = vrot.slane %v4008_v22, 5  ;;  %v4013_v31 = vld [vmem:[#allocation2 + $0xc0] sm:$0xe]  ;;  %4252 = vst.msk [vmem:[#allocation3 + $0x188] sm:$0xff] %vm1918_vm15, %v9958_v18  ;;  %v4156_v1 = vrot.slane %v4009_v12, 5  ;;  %v2865_v21 = vsel %vm11591_vm8, %v12754_v4, %v12715_v46 }
 0x27a   : > { %v4143_v34 = vsel %vm12005_vm14, %v4141_v20, %v4142_v14  ;;  %v9946_v6 = vrot.slane %v4010_v23, 9  ;;  %v4015_v37 = vld [vmem:[#allocation2 + $0xc8] sm:$0x1]  ;;  %v4016_v5 = vld [vmem:[#allocation2 + $0xcc] sm:$0xe]  ;;  %v4278_v16 = vld [vmem:[#allocation3 + $0x98] sm:$0xff]  ;;  %v4150_v11 = vsel %vm12005_vm14, %v4148_v27, %v4149_v32 }
 0x27b   : > { %v9959_v62 = vcombine.low %v4140_v13, %v4143_v34  ;;  %v4154_v26 = vsel %vm12005_vm14, %v9945_v60, %v4153_v53  ;;  %v4155_v44 = vrot.slane %v4153_v53, 4  ;;  %v4017_v19 = vld [vmem:[#allocation2 + $0xd0] sm:$0xf]  ;;  %10935 = vmatmul.mubr.msk.bf16.gmra.mrb[84].mxu1 %vm1918_vm15, %v4278_v16  ;;  %v4283_v43 = vld [vmem:[#allocation3 + $0xc0] sm:$0xff]  ;;  %v9960_v61 = vcombine.low %v4147_v0, %v4150_v11  ;;  %v4018_v59 = vld [vmem:[#allocation2 + $0xd4] sm:$0x1]  ;;  %v3213_v0 = vpop.permute.xlu1 %3212  ;;  %v3888_v53 = vpop.permute.xlu0 %3887 }
 0x27c   : > { %v4160_v38 = vrot.slane %v4011_v63, 5  ;;  %v4163_v29 = vrot.slane %v4012_v2, 5  ;;  %v9947_v22 = vrot.slane %v4013_v31, 9  ;;  %10938 = vmatprep.mubr.msk.bf16.mxu1 %vm1918_vm15, %v4283_v43  ;;  %v4167_v33 = vrot.slane %v4014_v3, 5  ;;  %v8411_v47 = vld [vmem:[#allocation2 + $0xd0] sm:$0xf] }
 0x27d   : > { %4253 = vst.msk [vmem:[#allocation3 + $0x1b0] sm:$0xff] %vm1918_vm15, %v9959_v62  ;;  %v4157_v36 = vsel %vm12005_vm14, %v4155_v44, %v4156_v1  ;;  %v4170_v54 = vrot.slane %v4015_v37, 5  ;;  %v9948_v50 = vrot.slane %v4016_v5, 9  ;;  %4254 = vst.msk [vmem:[#allocation3 + $0x1d8] sm:$0xff] %vm1918_vm15, %v9960_v61  ;;  %v4174_v14 = vrot.slane %v4017_v19, 5  ;;  %v4288_v27 = vld [vmem:[#allocation3 + $0xe8] sm:$0xff] }
 0x27e   : > { %v9961_v28 = vcombine.low %v4154_v26, %v4157_v36  ;;  %v4161_v42 = vsel %vm12005_vm14, %v9946_v6, %v4160_v38  ;;  %v4162_v45 = vrot.slane %v4160_v38, 4  ;;  %v8410_v57 = vld [vmem:[#allocation2 + $0xcc] sm:$0xe]  ;;  %4972 = vmatmul.mubr.bf16.gmra.mrb[64].mxu0 %v12729_v40  ;;  %v4168_v25 = vsel %vm12005_vm14, %v9947_v22, %v4167_v33  ;;  %v8412_v12 = vld [vmem:[#allocation2 + $0xd4] sm:$0x1] }
 0x27f   : > { %v4169_v10 = vrot.slane %v4167_v33, 4  ;;  %v4177_v56 = vrot.slane %v4018_v59, 5  ;;  %4979 = vmatprep.mubr.bf16.mxu0 %v12726_v30  ;;  %v4175_v3 = vsel %vm12005_vm14, %v9948_v50, %v4174_v14  ;;  %v4176_v63 = vrot.slane %v4174_v14, 4  ;;  %v4293_v31 = vld [vmem:[#allocation3 + $0x110] sm:$0xff]  ;;  %v11295_v34 = vld [vmem:[#allocation2 + $0xc0] sm:$0xf] }
 0x280   : > { %4255 = vst.msk [vmem:[#allocation3 + $0x200] sm:$0xff] %vm1918_vm15, %v9961_v28  ;;  %v4164_v23 = vsel %vm12005_vm14, %v4162_v45, %v4163_v29  ;;  %v8568_v46 = vrot.slane %v8411_v47, 5  ;;  %v2883_v40 = vor.u32 %v12759_v8, %v12747_v55  ;;  %v10225_v13 = vrot.slane %v8410_v57, 9  ;;  %v11296_v1 = vld [vmem:[#allocation2 + $0xc4] sm:$0xf]  ;;  %v4298_v61 = vld [vmem:[#allocation3 + $0x138] sm:$0xff] }
 0x281   : > { %v9962_v4 = vcombine.low %v4161_v42, %v4164_v23  ;;  %v4171_v18 = vsel %vm12005_vm14, %v4169_v10, %v4170_v54  ;;  %v4178_v30 = vsel %vm12005_vm14, %v4176_v63, %v4177_v56  ;;  %v8571_v2 = vrot.slane %v8412_v12, 5  ;;  %v2527_v9 = vld [vmem:[#allocation2 + $0xc0] sm:$0xf]  ;;  %v11297_v44 = vld [vmem:[#allocation2 + $0xc4] sm:$0xf]  ;;  %v4303_v29 = vld [vmem:[#allocation3 + $0x160] sm:$0xff] }
 0x282   : > { %v9963_v20 = vcombine.low %v4168_v25, %v4171_v18  ;;  %v8570_v32 = vrot.slane %v8568_v46, 4  ;;  %v9964_v60 = vcombine.low %v4175_v3, %v4178_v30  ;;  %v9882_v8 = vcombine.low %v2855_v17, %v2865_v21  ;;  %v11298_v28 = vld [vmem:[#allocation2 + $0xc8] sm:$0x1]  ;;  %v4308_v45 = vld [vmem:[#allocation3 + $0x188] sm:$0xff]  ;;  %v11299_v23 = vld [vmem:[#allocation2 + $0xd0] sm:$0xf] }
 0x283   : > { %4256 = vst.msk [vmem:[#allocation3 + $0x228] sm:$0xff] %vm1918_vm15, %v9962_v4  ;;  %10939 = vmatmul.mubr.msk.bf16.gmra.mrb[88].mxu1 %vm1918_vm15, %v4288_v27  ;;  %v9915_v6 = vcombine.low %v11295_v34, %v11296_v1  ;;  %v2874_v37 = vrot.slane %v2873_v39, 4  ;;  %v2884_v5 = vrot.slane %v2883_v40, 4  ;;  %v2888_v16 = vrot.slane %v2886_v41, 5  ;;  %v3215_v39 = vpop.permute.xlu1 %3214  ;;  %v11300_v3 = vld [vmem:[#allocation2 + $0xcc] sm:$0xf] }
 0x284   : > { %4257 = vst.msk [vmem:[#allocation3 + $0x250] sm:$0xff] %vm1918_vm15, %v9963_v20  ;;  %10942 = vmatprep.mubr.msk.bf16.mxu1 %vm1918_vm15, %v4293_v31  ;;  %4258 = vst.msk [vmem:[#allocation3 + $0x278] sm:$0xff] %vm1918_vm15, %v9964_v60  ;;  %v3272_v48 = vsel %vm1918_vm15, %v9882_v8, %v3213_v0  ;;  %v8569_v49 = vsel %vm12005_vm14, %v10225_v13, %v8568_v46  ;;  %v8572_v17 = vsel %vm12005_vm14, %v8570_v32, %v8571_v2  ;;  %v4313_v14 = vld [vmem:[#allocation3 + $0x1b0] sm:$0xff]  ;;  %v4318_v12 = vld [vmem:[#allocation3 + $0x1d8] sm:$0xff] }
 0x285   : > { %v3949_v62 = vsel %vm1918_vm15, %v9915_v6, %v3888_v53  ;;  %v2879_v15 = vsel %vm11591_vm8, %v2874_v37, %v12747_v55  ;;  %v2889_v41 = vsel %vm11591_vm8, %v2884_v5, %v2888_v16  ;;  %v10241_v7 = vcombine.low %v8569_v49, %v8572_v17 }
 0x286   : > { %4980 = vmatmul.mubr.bf16.gmra.mrb[68].mxu0 %v3272_v48  ;;  %v2891_v11 = vshrl.u32 %v2527_v9, 16  ;;  %v2894_v26 = vshll.u32 %v2527_v9, 16  ;;  %v2900_v19 = vshll.u32 %v11297_v44, 16  ;;  %v2904_v43 = vshrl.u32 %v11297_v44, 16 }
 0x287   : > { %4987 = vmatprep.mubr.bf16.mxu0 %v3949_v62  ;;  %v9883_v38 = vcombine.low %v2879_v15, %v2889_v41  ;;  %v2910_v42 = vshll.u32 %v11298_v28, 16  ;;  %v9916_v63 = vcombine.low %v11300_v3, %v11299_v23  ;;  %v4323_v46 = vld [vmem:[#allocation3 + $0x200] sm:$0xff]  ;;  %v3217_v40 = vpop.permute.xlu1 %3216 }
 0x288   : > { %v2893_v59 = vrot.slane %v2891_v11, 4  ;;  %v2896_v36 = vrot.slane %v2894_v26, 5  ;;  %v2902_v33 = vrot.slane %v2900_v19, 5  ;;  %v2906_v54 = vrot.slane %v2904_v43, 4 }
 0x289   : > { %v3276_v55 = vsel %vm1918_vm15, %v9883_v38, %v3215_v39  ;;  %v2912_v25 = vrot.slane %v2910_v42, 5 }
 0x28a   : > { %v2897_v50 = vor.u32 %v2896_v36, %v2893_v59  ;;  %v2907_v47 = vor.u32 %v2906_v54, %v2902_v33  ;;  %v4328_v30 = vld [vmem:[#allocation3 + $0x228] sm:$0xff] }
 0x28b   : > { %10943 = vmatmul.mubr.msk.bf16.gmra.mrb[92].mxu1 %vm1918_vm15, %v4298_v61  ;;  %v4338_v22 = vld [vmem:[#allocation3 + $0x278] sm:$0xff]  ;;  %v4333_v32 = vld [vmem:[#allocation3 + $0x250] sm:$0xff] }
 0x28c   : > { %10946 = vmatprep.mubr.msk.bf16.mxu1 %vm1918_vm15, %v4303_v29  ;;  %8652 = vst.msk [vmem:[#allocation3 + $0x278] sm:$0xff] %vm1918_vm15, %v10241_v7  ;;  %v2898_v57 = vrot.slane %v2897_v50, 4  ;;  %v2908_v21 = vrot.slane %v2907_v47, 4 }
 0x28e   : > { %4988 = vmatmul.mubr.bf16.gmra.mrb[72].mxu0 %v3276_v55  ;;  %v2903_v10 = vsel %vm11591_vm8, %v2898_v57, %v2902_v33  ;;  %v2913_v56 = vsel %vm11591_vm8, %v2908_v21, %v2912_v25  ;;  %v11128_v57 = vld [vmem:[%s14556_s5 + $0x40] sm:$0xff]  }
 0x28f   : > { %v9884_v4 = vcombine.low %v2903_v10, %v2913_v56  ;;  %10630 = vmatprep.subr.bf16.mxu0 %v11128_v57  ;;  %v12919_v25 = vld [vmem:[%s14555_s4] ss:$0 sm:$0xff] }
 0x290   : > { %v11129_v56 = vld [vmem:[%s14556_s5] sm:$0xff]  }
 0x291   : > { %v3280_v20 = vsel %vm1918_vm15, %v9884_v4, %v3217_v40  ;;  %10631 = vmatpush3.bf16.msra.mxu0 %v11129_v56 }
 0x293   : > { %10947 = vmatmul.mubr.msk.bf16.gmra.mrb[96].mxu1 %vm1918_vm15, %v4308_v45 }
 0x294   : > { %10950 = vmatprep.mubr.msk.bf16.mxu1 %vm1918_vm15, %v4313_v14 }
 0x29b   : > { %10951 = vmatmul.mubr.msk.bf16.gmra.mrb[100].mxu1 %vm1918_vm15, %v4318_v12 }
 0x29c   : > { %10954 = vmatprep.mubr.msk.bf16.mxu1 %vm1918_vm15, %v4323_v46 }
 0x29e   : > { %v3890_v18 = vpop.permute.xlu0 %3889 }
 0x29f   : > { %v3953_v13 = vsel %vm1918_vm15, %v9916_v63, %v3890_v18 }
 0x2a0   : > { %4995 = vmatprep.mubr.bf16.mxu0 %v3953_v13 }
 0x2a1   : > { %4996 = vmatmul.mubr.bf16.gmra.mrb[76].mxu0 %v3280_v20 }
 0x2a3   : > { %10955 = vmatmul.mubr.msk.bf16.gmra.mrb[104].mxu1 %vm1918_vm15, %v4328_v30 }
 0x2a4   : > { %10958 = vmatprep.mubr.msk.bf16.mxu1 %vm1918_vm15, %v4333_v32 }
 0x2ab   : > { %10959 = vmatmul.mubr.msk.bf16.gmra.mrb[108].mxu1 %vm1918_vm15, %v4338_v22 }
 0x2bb   : > { %v10402_v2 = vpop.f32.mrb[16].mxu1 }
 0x2bc   : > { %v10403_v0 = vpop.f32.mrb[17].mxu1 }
 0x2bd   : > { %v10404_v27 = vadd.f32 %v10403_v0, %v10402_v2  ;;  %v10405_v60 = vpop.f32.mrb[18].mxu1  ;;  %v5725_v0 = vld [vmem:[#allocation2] sm:$0xf] }
 0x2be   : > { %v10406_v53 = vpop.f32.mrb[19].mxu1 }
 0x2bf   : > { %v10407_v8 = vadd.f32 %v10406_v53, %v10405_v60  ;;  %v4717_v40 = vadd.f32 %v10404_v27, %v12919_v25  ;;  %v5726_v60 = vld [vmem:[#allocation2 + $0x4] sm:$0xf]  ;;  %v5757_v53 = vld [vmem:[#allocation2 + $0x8] sm:$0x1] }
 0x2c0   : > { %v5793_v27 = vshll.u32 %v5757_v53, 16 }
 0x2c1   : > { %v4720_v30 = vadd.f32 %v10407_v8, %v12919_v25 }
 0x2c4   : > { %v10408_v31 = vpop.f32.mrb[20].mxu1 }
 0x2c5   : > { %v10409_v34 = vpop.f32.mrb[21].mxu1 }
 0x2c6   : > { %v12889_v1 = vadd.f32 %v10409_v34, %v10408_v31  ;;  %v10411_v6 = vpop.f32.mrb[22].mxu1  ;;  %v5774_v31 = vshrl.u32 %v5725_v0, 16  ;;  %v5777_v34 = vshll.u32 %v5725_v0, 16 }
 0x2c7   : > { %v10412_v37 = vpop.f32.mrb[23].mxu1 }
 0x2c8   : > { %v12891_v5 = vadd.f32 %v10412_v37, %v10411_v6  ;;  %v5783_v6 = vshll.u32 %v5726_v60, 16  ;;  %v5787_v37 = vshrl.u32 %v5726_v60, 16 }
 0x2cc   : > { %v10414_v16 = vpop.f32.mrb[24].mxu1 }
 0x2cd   : > { %v10415_v48 = vpop.f32.mrb[25].mxu1 }
 0x2ce   : > { %v12893_v49 = vadd.f32 %v10415_v48, %v10414_v16  ;;  %v10417_v17 = vpop.f32.mrb[26].mxu1 }
 0x2cf   : > { %v10418_v62 = vpop.f32.mrb[27].mxu1 }
 0x2d0   : > { %v12895_v9 = vadd.f32 %v10418_v62, %v10417_v17  ;;  %v5776_v62 = vrot.slane %v5774_v31, 4  ;;  %v11133_v31 = vld [vmem:[%s14556_s5 + $0x48] sm:$0xff]  }
 0x2d1   : > { %10632 = vmatprep.subr.bf16.mxu0 %v11133_v31 }
 0x2d4   : > { %v10420_v15 = vpop.f32.mrb[28].mxu1 }
 0x2d5   : > { %v10421_v41 = vpop.f32.mrb[29].mxu1 }
 0x2d6   : > { %v12897_v7 = vadd.f32 %v10421_v41, %v10420_v15  ;;  %v10423_v39 = vpop.f32.mrb[30].mxu1  ;;  %v5779_v15 = vrot.slane %v5777_v34, 5  ;;  %v5785_v41 = vrot.slane %v5783_v6, 5  ;;  %v4736_v6 = vadd.f32 %v12895_v9, %v12919_v25 }
 0x2d7   : > { %v10424_v11 = vpop.f32.mrb[31].mxu1 }
 0x2d8   : > { %v12899_v26 = vadd.f32 %v10424_v11, %v10423_v39  ;;  %v5789_v39 = vrot.slane %v5787_v37, 4  ;;  %v4741_v9 = vadd.f32 %v12897_v7, %v12919_v25 }
 0x2dc   : > { %v10426_v44 = vpop.f32.mrb[32].mxu1 }
 0x2dd   : > { %v10427_v19 = vpop.f32.mrb[33].mxu1 }
 0x2de   : > { %v12901_v43 = vadd.f32 %v10427_v19, %v10426_v44  ;;  %v10429_v61 = vpop.f32.mrb[34].mxu1 }
 0x2df   : > { %v10430_v38 = vpop.f32.mrb[35].mxu1 }
 0x2e0   : > { %v12903_v29 = vadd.f32 %v10430_v38, %v10429_v61  ;;  %v5780_v38 = vor.u32 %v5779_v15, %v5776_v62  ;;  %v11135_v62 = vld [vmem:[%s14556_s5 + $0x8] sm:$0xff]  }
 0x2e1   : > { %10633 = vmatpush3.bf16.msra.mxu0 %v11135_v62 }
 0x2e4   : > { %v10432_v22 = vpop.f32.mrb[36].mxu1 }
 0x2e5   : > { %v10433_v55 = vpop.f32.mrb[37].mxu1 }
 0x2e6   : > { %v12905_v59 = vadd.f32 %v10433_v55, %v10432_v22  ;;  %v10435_v36 = vpop.f32.mrb[38].mxu1  ;;  %v5790_v22 = vor.u32 %v5789_v39, %v5785_v41  ;;  %v5795_v55 = vrot.slane %v5793_v27, 5 }
 0x2e7   : > { %v10436_v33 = vpop.f32.mrb[39].mxu1 }
 0x2e8   : > { %v12907_v54 = vadd.f32 %v10436_v33, %v10435_v36  ;;  %v4725_v36 = vadd.f32 %v12889_v1, %v12919_v25  ;;  %v5791_v57 = vrot.slane %v5790_v22, 4 }
 0x2ec   : > { %v10438_v50 = vpop.f32.mrb[40].mxu1 }
 0x2ed   : > { %v10439_v47 = vpop.f32.mrb[41].mxu1 }
 0x2ee   : > { %v12909_v28 = vadd.f32 %v10439_v47, %v10438_v50  ;;  %v10441_v42 = vpop.f32.mrb[42].mxu1 }
 0x2ef   : > { %v10442_v45 = vpop.f32.mrb[43].mxu1 }
 0x2f0   : > { %v12911_v14 = vadd.f32 %v10442_v45, %v10441_v42  ;;  %v10514_v3 = vpop.f32.mrb[16].mxu0  ;;  %v5781_v45 = vrot.slane %v5780_v38, 4 }
 0x2f1   : > { %v10515_v46 = vpop.f32.mrb[17].mxu0 }
 0x2f2   : > { %v10516_v18 = vadd.f32 %v10515_v46, %v10514_v3  ;;  %v10517_v13 = vpop.f32.mrb[18].mxu0  ;;  %v5796_v3 = vsel %vm11591_vm8, %v5791_v57, %v5795_v55  ;;  %v4744_v55 = vadd.f32 %v12899_v26, %v12919_v25 }
 0x2f3   : > { %v10518_v20 = vpop.f32.mrb[19].mxu0 }
 0x2f4   : > { %v10444_v21 = vpop.f32.mrb[44].mxu1  ;;  %v10519_v32 = vadd.f32 %v10518_v20, %v10517_v13  ;;  %v12930_v2 = vadd.f32 %v10516_v18, %v4717_v40 }
 0x2f5   : > { %v10445_v10 = vpop.f32.mrb[45].mxu1 }
 0x2f6   : > { %v12924_v12 = vadd.f32 %v10445_v10, %v10444_v21  ;;  %v10447_v23 = vpop.f32.mrb[46].mxu1  ;;  %v12932_v48 = vadd.f32 %v10519_v32, %v4720_v30  ;;  %v4728_v21 = vadd.f32 %v12891_v5, %v12919_v25  ;;  %v4733_v32 = vadd.f32 %v12893_v49, %v12919_v25 }
 0x2f7   : > { %v10448_v63 = vpop.f32.mrb[47].mxu1 }
 0x2f8   : > { %v12927_v4 = vadd.f32 %v10448_v63, %v10447_v23  ;;  %v5786_v23 = vsel %vm11591_vm8, %v5781_v45, %v5785_v41 }
 0x2f9   : > { %v10520_v44 = vpop.f32.mrb[20].mxu0  ;;  %v10066_v46 = vcombine.low %v5786_v23, %v5796_v3  ;;  %v4749_v3 = vadd.f32 %v12901_v43, %v12919_v25 }
 0x2fa   : > { %v10521_v61 = vpop.f32.mrb[21].mxu0 }
 0x2fb   : > { %v10522_v50 = vadd.f32 %v10521_v61, %v10520_v44  ;;  %v10523_v47 = vpop.f32.mrb[22].mxu0  ;;  %6285 = vrot.lane.b32.xlu1 %v10066_v46, %s11403_s27 }
 0x2fc   : > { %v10450_v16 = vpop.f32.mrb[48].mxu1  ;;  %v10524_v42 = vpop.f32.mrb[23].mxu0 }
 0x2fd   : > { %v10451_v17 = vpop.f32.mrb[49].mxu1  ;;  %v10525_v10 = vadd.f32 %v10524_v42, %v10523_v47  ;;  %v12942_v56 = vadd.f32 %v10522_v50, %v4725_v36 }
 0x2fe   : > { %v12934_v8 = vadd.f32 %v10451_v17, %v10450_v16  ;;  %v10453_v11 = vpop.f32.mrb[50].mxu1 }
 0x2ff   : > { %v10454_v19 = vpop.f32.mrb[51].mxu1  ;;  %v12948_v63 = vadd.f32 %v10525_v10, %v4728_v21 }
 0x300   : > { %v12938_v33 = vadd.f32 %v10454_v19, %v10453_v11 }
 0x301   : > { %v10526_v20 = vpop.f32.mrb[24].mxu0 }
 0x302   : > { %v10527_v30 = vpop.f32.mrb[25].mxu0 }
 0x303   : > { %v10528_v60 = vadd.f32 %v10527_v30, %v10526_v20  ;;  %v10529_v53 = vpop.f32.mrb[26].mxu0 }
 0x304   : > { %v10456_v1 = vpop.f32.mrb[52].mxu1  ;;  %v10530_v34 = vpop.f32.mrb[27].mxu0 }
 0x305   : > { %v10457_v40 = vpop.f32.mrb[53].mxu1  ;;  %v10531_v37 = vadd.f32 %v10530_v34, %v10529_v53  ;;  %v12962_v16 = vadd.f32 %v10528_v60, %v4733_v32 }
 0x306   : > { %v12950_v18 = vadd.f32 %v10457_v40, %v10456_v1  ;;  %v10459_v13 = vpop.f32.mrb[54].mxu1 }
 0x307   : > { %v10460_v5 = vpop.f32.mrb[55].mxu1  ;;  %v12964_v17 = vadd.f32 %v10531_v37, %v4736_v6  ;;  %v4757_v37 = vadd.f32 %v12905_v59, %v12919_v25 }
 0x308   : > { %v12955_v0 = vadd.f32 %v10460_v5, %v10459_v13  ;;  %v4752_v13 = vadd.f32 %v12903_v29, %v12919_v25 }
 0x309   : > { %v10532_v39 = vpop.f32.mrb[28].mxu0 }
 0x30a   : > { %v10533_v44 = vpop.f32.mrb[29].mxu0 }
 0x30b   : > { %v10534_v61 = vadd.f32 %v10533_v44, %v10532_v39  ;;  %v10535_v38 = vpop.f32.mrb[30].mxu0 }
 0x30c   : > { %v10462_v27 = vpop.f32.mrb[56].mxu1  ;;  %v10536_v22 = vpop.f32.mrb[31].mxu0 }
 0x30d   : > { %v10463_v49 = vpop.f32.mrb[57].mxu1  ;;  %v10537_v36 = vadd.f32 %v10536_v22, %v10535_v38  ;;  %v12977_v50 = vadd.f32 %v10534_v61, %v4741_v9 }
 0x30e   : > { %v12969_v15 = vadd.f32 %v10463_v49, %v10462_v27  ;;  %v10465_v41 = vpop.f32.mrb[58].mxu1 }
 0x30f   : > { %v10466_v11 = vpop.f32.mrb[59].mxu1  ;;  %v12979_v42 = vadd.f32 %v10537_v36, %v4744_v55 }
 0x310   : > { %v12973_v19 = vadd.f32 %v10466_v11, %v10465_v41  ;;  %v4760_v41 = vadd.f32 %v12907_v54, %v12919_v25 }
 0x311   : > { %v10538_v10 = vpop.f32.mrb[32].mxu0 }
 0x312   : > { %v10539_v23 = vpop.f32.mrb[33].mxu0 }
 0x313   : > { %v10540_v46 = vadd.f32 %v10539_v23, %v10538_v10  ;;  %v10541_v26 = vpop.f32.mrb[34].mxu0 }
 0x314   : > { %v10468_v47 = vpop.f32.mrb[60].mxu1  ;;  %v10542_v40 = vpop.f32.mrb[35].mxu0 }
 0x315   : > { %v10469_v45 = vpop.f32.mrb[61].mxu1  ;;  %v10543_v20 = vadd.f32 %v10542_v40, %v10541_v26  ;;  %v12989_v5 = vadd.f32 %v10540_v46, %v4749_v3 }
 0x316   : > { %v12981_v57 = vadd.f32 %v10469_v45, %v10468_v47  ;;  %v10471_v21 = vpop.f32.mrb[62].mxu1  ;;  %v4765_v47 = vadd.f32 %v12909_v28, %v12919_v25  ;;  %v11139_v28 = vld [vmem:[%s14556_s5 + $0x50] sm:$0xff]  }
 0x317   : > { %v10472_v7 = vpop.f32.mrb[63].mxu1  ;;  %v12991_v32 = vadd.f32 %v10543_v20, %v4752_v13  ;;  %10634 = vmatprep.subr.bf16.mxu0 %v11139_v28  ;;  %v4789_v28 = vadd.f32 %v12950_v18, %v12919_v25  ;;  %v4800_v18 = vadd.f32 %v12973_v19, %v12919_v25 }
 0x318   : > { %v12985_v1 = vadd.f32 %v10472_v7, %v10471_v21  ;;  %v4768_v7 = vadd.f32 %v12911_v14, %v12919_v25 }
 0x319   : > { %v10544_v34 = vpop.f32.mrb[36].mxu0 }
 0x31a   : > { %v10545_v6 = vpop.f32.mrb[37].mxu0 }
 0x31b   : > { %v10546_v49 = vadd.f32 %v10545_v6, %v10544_v34  ;;  %v10547_v29 = vpop.f32.mrb[38].mxu0  ;;  %v4773_v34 = vadd.f32 %v12924_v12, %v12919_v25 }
 0x31c   : > { %v10474_v30 = vpop.f32.mrb[64].mxu1  ;;  %v10548_v62 = vpop.f32.mrb[39].mxu0 }
 0x31d   : > { %v10475_v60 = vpop.f32.mrb[65].mxu1  ;;  %v10549_v39 = vadd.f32 %v10548_v62, %v10547_v29  ;;  %v13001_v11 = vadd.f32 %v10546_v49, %v4757_v37  ;;  %v4776_v29 = vadd.f32 %v12927_v4, %v12919_v25  ;;  %v4784_v4 = vadd.f32 %v12938_v33, %v12919_v25 }
 0x31e   : > { %v12993_v53 = vadd.f32 %v10475_v60, %v10474_v30  ;;  %v10477_v31 = vpop.f32.mrb[66].mxu1  ;;  %v11141_v60 = vld [vmem:[%s14556_s5 + $0x10] sm:$0xff]  }
 0x31f   : > { %v10478_v43 = vpop.f32.mrb[67].mxu1  ;;  %v13003_v9 = vadd.f32 %v10549_v39, %v4760_v41  ;;  %10635 = vmatpush3.bf16.msra.mxu0 %v11141_v60 }
 0x320   : > { %v12997_v27 = vadd.f32 %v10478_v43, %v10477_v31 }
 0x321   : > { %v10550_v55 = vpop.f32.mrb[40].mxu0 }
 0x322   : > { %v10551_v36 = vpop.f32.mrb[41].mxu0 }
 0x323   : > { %v10552_v21 = vadd.f32 %v10551_v36, %v10550_v55  ;;  %v10553_v54 = vpop.f32.mrb[42].mxu0 }
 0x324   : > { %v10480_v44 = vpop.f32.mrb[68].mxu1  ;;  %v10554_v10 = vpop.f32.mrb[43].mxu0 }
 0x325   : > { %v10481_v61 = vpop.f32.mrb[69].mxu1  ;;  %v10555_v23 = vadd.f32 %v10554_v10, %v10553_v54  ;;  %v13013_v3 = vadd.f32 %v10552_v21, %v4765_v47  ;;  %v4781_v47 = vadd.f32 %v12934_v8, %v12919_v25 }
 0x326   : > { %v13005_v38 = vadd.f32 %v10481_v61, %v10480_v44  ;;  %v10483_v22 = vpop.f32.mrb[70].mxu1 }
 0x327   : > { %v10484_v59 = vpop.f32.mrb[71].mxu1  ;;  %v13015_v26 = vadd.f32 %v10555_v23, %v4768_v7 }
 0x328   : > { %v13009_v45 = vadd.f32 %v10484_v59, %v10483_v22 }
 0x329   : > { %v10556_v30 = vpop.f32.mrb[44].mxu0 }
 0x32a   : > { %v10557_v31 = vpop.f32.mrb[45].mxu0 }
 0x32b   : > { %v10558_v6 = vadd.f32 %v10557_v31, %v10556_v30  ;;  %v10559_v37 = vpop.f32.mrb[46].mxu0  ;;  %v4792_v31 = vadd.f32 %v12955_v0, %v12919_v25 }
 0x32c   : > { %v10486_v46 = vpop.f32.mrb[72].mxu1  ;;  %v10560_v49 = vpop.f32.mrb[47].mxu0 }
 0x32d   : > { %v10487_v40 = vpop.f32.mrb[73].mxu1  ;;  %v10561_v62 = vadd.f32 %v10560_v49, %v10559_v37  ;;  %v13031_v41 = vadd.f32 %v10558_v6, %v4773_v34 }
 0x32e   : > { %v13017_v13 = vadd.f32 %v10487_v40, %v10486_v46  ;;  %v10489_v20 = vpop.f32.mrb[74].mxu1 }
 0x32f   : > { %v10490_v14 = vpop.f32.mrb[75].mxu1  ;;  %v13033_v44 = vadd.f32 %v10561_v62, %v4776_v29  ;;  %v4797_v29 = vadd.f32 %v12969_v15, %v12919_v25  ;;  %v13064_v15 = vadd.f32 %v12985_v1, %v12919_v25 }
 0x330   : > { %v13027_v43 = vadd.f32 %v10490_v14, %v10489_v20 }
 0x331   : > { %v10562_v12 = vpop.f32.mrb[48].mxu0 }
 0x332   : > { %v10563_v36 = vpop.f32.mrb[49].mxu0 }
 0x333   : > { %v10564_v54 = vadd.f32 %v10563_v36, %v10562_v12  ;;  %v10565_v10 = vpop.f32.mrb[50].mxu0 }
 0x334   : > { %v10492_v39 = vpop.f32.mrb[76].mxu1  ;;  %v10566_v7 = vpop.f32.mrb[51].mxu0 }
 0x335   : > { %v10493_v61 = vpop.f32.mrb[77].mxu1  ;;  %v10567_v23 = vadd.f32 %v10566_v7, %v10565_v10  ;;  %v13039_v46 = vadd.f32 %v10564_v54, %v4781_v47  ;;  %v4805_v54 = vadd.f32 %v12981_v57, %v12919_v25  ;;  %v13068_v10 = vadd.f32 %v12993_v53, %v12919_v25 }
 0x336   : > { %v10494_v22 = vadd.f32 %v10493_v61, %v10492_v39  ;;  %v10495_v55 = vpop.f32.mrb[78].mxu1  ;;  %v13082_v53 = vadd.f32 %v13009_v45, %v12919_v25  ;;  %v11144_v45 = vld [vmem:[%s14556_s5 + $0x58] sm:$0xff]  }
 0x337   : > { %v10496_v59 = vpop.f32.mrb[79].mxu1  ;;  %v13041_v40 = vadd.f32 %v10567_v23, %v4784_v4  ;;  %v13077_v4 = vadd.f32 %v13005_v38, %v12919_v25  ;;  %v13091_v38 = vadd.f32 %v13027_v43, %v12919_v25  ;;  %10636 = vmatprep.subr.bf16.mxu0 %v11144_v45 }
 0x338   : > { %v10497_v21 = vadd.f32 %v10496_v59, %v10495_v55 }
 0x339   : > { %v10568_v20 = vpop.f32.mrb[52].mxu0  ;;  %14576 = vst [vmem:[#allocation5_spill] sm:$0xff] %v13091_v38 }
 0x33a   : > { %v10569_v30 = vpop.f32.mrb[53].mxu0 }
 0x33b   : > { %v10570_v60 = vadd.f32 %v10569_v30, %v10568_v20  ;;  %v10571_v14 = vpop.f32.mrb[54].mxu0 }
 0x33c   : > { %v10572_v8 = vpop.f32.mrb[55].mxu0 }
 0x33d   : > { %v10573_v34 = vadd.f32 %v10572_v8, %v10571_v14  ;;  %v13047_v6 = vadd.f32 %v10570_v60, %v4789_v28 }
 0x33f   : > { %v13049_v33 = vadd.f32 %v10573_v34, %v4792_v31  ;;  %v13097_v31 = vadd.f32 %v10494_v22, %v12919_v25 }
 0x341   : > { %v10574_v37 = vpop.f32.mrb[56].mxu0  ;;  %14577 = vst [vmem:[#allocation6_spill] sm:$0xff] %v13097_v31  ;;  %v5673_v31 = vld [vmem:[#allocation2 + $0x74] sm:$0x1] }
 0x342   : > { %v10575_v49 = vpop.f32.mrb[57].mxu0 }
 0x343   : > { %v10576_v62 = vadd.f32 %v10575_v49, %v10574_v37  ;;  %v10577_v39 = vpop.f32.mrb[58].mxu0 }
 0x344   : > { %v10578_v61 = vpop.f32.mrb[59].mxu0 }
 0x345   : > { %v10579_v55 = vadd.f32 %v10578_v61, %v10577_v39  ;;  %v13055_v12 = vadd.f32 %v10576_v62, %v4797_v29 }
 0x346   : > { %v10932_v0 = vpop.f32.mrb[80].mxu1 }
 0x347   : > { %v5047_v59 = vadd.f32 %v10932_v0, %v12942_v56  ;;  %v5038_v36 = vpop.f32.mrb[81].mxu1  ;;  %v13058_v47 = vadd.f32 %v10579_v55, %v4800_v18  ;;  %v13073_v56 = vadd.f32 %v12997_v27, %v12919_v25 }
 0x348   : > { %v5039_v19 = vadd.f32 %v5038_v36, %v12930_v2  ;;  %v10933_v7 = vpop.f32.mrb[82].mxu1  ;;  %v13086_v2 = vadd.f32 %v13017_v13, %v12919_v25  ;;  %v13100_v13 = vadd.f32 %v10497_v21, %v12919_v25  ;;  %v11145_v25 = vld [vmem:[%s14556_s5 + $0x18] sm:$0xff]  }
 0x349   : > { %v5167_v57 = vmax.f32 %v5047_v59, 0.0  ;;  %v5050_v23 = vadd.f32 %v10933_v7, %v12948_v63  ;;  %v5041_v1 = vpop.f32.mrb[83].mxu1  ;;  %v10580_v20 = vpop.f32.mrb[60].mxu0  ;;  %10637 = vmatpush3.bf16.msra.mxu0 %v11145_v25 }
 0x34a   : > { %v5165_v30 = vmax.f32 %v5039_v19, 0.0  ;;  %v5042_v27 = vadd.f32 %v5041_v1, %v12932_v48  ;;  %v10581_v28 = vpop.f32.mrb[61].mxu0  ;;  %14578 = vst [vmem:[#allocation7_spill] sm:$0xff] %v13100_v13 }
 0x34b   : > { %v10332_v60 = vpack.c.bf16 %v5167_v57, %v5167_v57  ;;  %v5168_v63 = vmax.f32 %v5050_v23, 0.0  ;;  %v10582_v14 = vadd.f32 %v10581_v28, %v10580_v20  ;;  %v10583_v8 = vpop.f32.mrb[62].mxu0 }
 0x34c   : > { %v10330_v48 = vpack.c.bf16 %v5165_v30, %v5165_v30  ;;  %v5166_v34 = vmax.f32 %v5042_v27, 0.0  ;;  %v10584_v37 = vpop.f32.mrb[63].mxu0 }
 0x34d   : > { %v5311_v49 = vshrl.u32 %v10332_v60, 16  ;;  %v5314_v43 = vshll.u32 %v10332_v60, 16  ;;  %v10333_v29 = vpack.c.bf16 %v5168_v63, %v5168_v63  ;;  %v13102_v62 = vadd.f32 %v10584_v37, %v10583_v8 }
 0x34e   : > { %v5294_v39 = vshrl.u32 %v10330_v48, 16  ;;  %v5297_v61 = vshll.u32 %v10330_v48, 16  ;;  %v10331_v18 = vpack.c.bf16 %v5166_v34, %v5166_v34  ;;  %v10936_v55 = vpop.f32.mrb[84].mxu1  ;;  %v13104_v0 = vadd.f32 %v10582_v14, %v4805_v54  ;;  %v5620_v14 = vld [vmem:[#allocation2 + $0x18] sm:$0xf] }
 0x34f   : > { %v5313_v22 = vrot.slane %v5311_v49, 7  ;;  %v5319_v21 = vshrl.u32 %v10333_v29, 16  ;;  %v5322_v59 = vshll.u32 %v10333_v29, 16  ;;  %v5063_v36 = vadd.f32 %v10936_v55, %v12977_v50  ;;  %v5054_v19 = vpop.f32.mrb[85].mxu1  ;;  %v5613_v49 = vld [vmem:[#allocation2 + $0xc] sm:$0xf] }
 0x350   : > { %v5296_v7 = vrot.slane %v5294_v39, 7  ;;  %v5302_v57 = vshrl.u32 %v10331_v18, 16  ;;  %v5305_v23 = vshll.u32 %v10331_v18, 16  ;;  %v5055_v1 = vadd.f32 %v5054_v19, %v12962_v16  ;;  %v10937_v20 = vpop.f32.mrb[86].mxu1  ;;  %v5624_v55 = vld [vmem:[#allocation2 + $0x20] sm:$0x1] }
 0x351   : > { %v5316_v30 = vor.u32 %v5314_v43, %v5313_v22  ;;  %v5317_v54 = vrot.slane %v5313_v22, 4  ;;  %v5321_v27 = vrot.slane %v5319_v21, 7  ;;  %v5171_v28 = vmax.f32 %v5063_v36, 0.0  ;;  %v5057_v60 = vpop.f32.mrb[87].mxu1  ;;  %v10586_v63 = vpop.f32.mrb[64].mxu0 }
 0x352   : > { %v5299_v8 = vor.u32 %v5297_v61, %v5296_v7  ;;  %v5300_v45 = vrot.slane %v5296_v7, 4  ;;  %v5304_v48 = vrot.slane %v5302_v57, 7  ;;  %v5169_v34 = vmax.f32 %v5055_v1, 0.0  ;;  %v10587_v50 = vpop.f32.mrb[65].mxu0 }
 0x353   : > { %v5621_v37 = vsel %vm11626_vm10, %v5316_v30, %v5620_v14  ;;  %v5324_v29 = vor.u32 %v5322_v59, %v5321_v27  ;;  %v5326_v16 = vrot.slane %v5321_v27, 4  ;;  %v10336_v39 = vpack.c.bf16 %v5171_v28, %v5171_v28  ;;  %v10589_v18 = vpop.f32.mrb[66].mxu0  ;;  %v5617_v59 = vld [vmem:[#allocation2 + $0x14] sm:$0x1] }
 0x354   : > { %5622 = vst [vmem:[#allocation2 + $0x18] sm:$0xf] %v5621_v37  ;;  %v5614_v43 = vsel %vm11626_vm10, %v5299_v8, %v5613_v49  ;;  %v5307_v25 = vor.u32 %v5305_v23, %v5304_v48  ;;  %v5309_v22 = vrot.slane %v5304_v48, 4  ;;  %v10334_v61 = vpack.c.bf16 %v5169_v34, %v5169_v34  ;;  %v10590_v21 = vpop.f32.mrb[67].mxu0 }
 0x355   : > { %5615 = vst [vmem:[#allocation2 + $0xc] sm:$0xf] %v5614_v43  ;;  %v5325_v36 = vsel %vm11637_vm11, %v5317_v54, %v5324_v29  ;;  %v5625_v19 = vsel %vm11502_vm2, %v5326_v16, %v5624_v55  ;;  %v5345_v7 = vshrl.u32 %v10336_v39, 16  ;;  %v5348_v57 = vshll.u32 %v10336_v39, 16 }
 0x356   : > { %5623 = vst.msk [vmem:[#allocation2 + $0x1c] sm:$0xf] %vm668_vm5, %v5325_v36  ;;  %5626 = vst [vmem:[#allocation2 + $0x20] sm:$0x1] %v5625_v19  ;;  %v5308_v1 = vsel %vm11637_vm11, %v5300_v45, %v5307_v25  ;;  %v5618_v23 = vsel %vm11502_vm2, %v5309_v22, %v5617_v59  ;;  %v5328_v30 = vshrl.u32 %v10334_v61, 16  ;;  %v5331_v27 = vshll.u32 %v10334_v61, 16 }
 0x357   : > { %v10940_v28 = vpop.f32.mrb[88].mxu1  ;;  %5616 = vst.msk [vmem:[#allocation2 + $0x10] sm:$0xf] %vm668_vm5, %v5308_v1  ;;  %5619 = vst [vmem:[#allocation2 + $0x14] sm:$0x1] %v5618_v23  ;;  %v13125_v54 = vrot.slane %v5345_v7, 7  ;;  %v5066_v14 = vadd.f32 %v10937_v20, %v12979_v42  ;;  %v5058_v8 = vadd.f32 %v5057_v60, %v12964_v17  ;;  %v13133_v29 = vadd.f32 %v10587_v50, %v10586_v63 }
 0x358   : > { %v5079_v48 = vadd.f32 %v10940_v28, %v13001_v11  ;;  %v5070_v34 = vpop.f32.mrb[89].mxu1  ;;  %v13130_v37 = vrot.slane %v5328_v30, 7  ;;  %v13135_v16 = vadd.f32 %v10590_v21, %v10589_v18  ;;  %v5634_v11 = vld [vmem:[#allocation2 + $0x30] sm:$0xf]  ;;  %v5627_v18 = vld [vmem:[#allocation2 + $0x24] sm:$0xf] }
 0x359   : > { %v5071_v45 = vadd.f32 %v5070_v34, %v12989_v5  ;;  %v10941_v49 = vpop.f32.mrb[90].mxu1  ;;  %v5350_v39 = vor.u32 %v5348_v57, %v13125_v54  ;;  %v5351_v43 = vrot.slane %v13125_v54, 4  ;;  %v5172_v55 = vmax.f32 %v5066_v14, 0.0  ;;  %v13139_v17 = vpop.f32.mrb[68].mxu0 }
 0x35a   : > { %v5170_v42 = vmax.f32 %v5058_v8, 0.0  ;;  %v5073_v20 = vpop.f32.mrb[91].mxu1  ;;  %v5333_v60 = vor.u32 %v5331_v27, %v13130_v37  ;;  %v5334_v25 = vrot.slane %v13130_v37, 4  ;;  %v5175_v5 = vmax.f32 %v5079_v48, 0.0  ;;  %v13143_v63 = vpop.f32.mrb[69].mxu0 }
 0x35b   : > { %v5173_v22 = vmax.f32 %v5071_v45, 0.0  ;;  %v5635_v50 = vsel %vm11626_vm10, %v5350_v39, %v5634_v11  ;;  %v10337_v61 = vpack.c.bf16 %v5172_v55, %v5172_v55  ;;  %v5082_v36 = vadd.f32 %v10941_v49, %v13003_v9  ;;  %v13148_v19 = vpop.f32.mrb[70].mxu0 }
 0x35c   : > { %v10335_v21 = vpack.c.bf16 %v5170_v42, %v5170_v42  ;;  %5636 = vst [vmem:[#allocation2 + $0x30] sm:$0xf] %v5635_v50  ;;  %v5628_v59 = vsel %vm11626_vm10, %v5333_v60, %v5627_v18  ;;  %v10340_v7 = vpack.c.bf16 %v5175_v5, %v5175_v5  ;;  %v5074_v1 = vadd.f32 %v5073_v20, %v12991_v32  ;;  %v13153_v23 = vpop.f32.mrb[71].mxu0  ;;  %v5638_v18 = vld [vmem:[#allocation2 + $0x38] sm:$0x1] }
 0x35d   : > { %v10338_v57 = vpack.c.bf16 %v5173_v22, %v5173_v22  ;;  %5629 = vst [vmem:[#allocation2 + $0x24] sm:$0xf] %v5628_v59  ;;  %v5353_v30 = vshrl.u32 %v10337_v61, 16  ;;  %v5356_v27 = vshll.u32 %v10337_v61, 16  ;;  %v5176_v39 = vmax.f32 %v5082_v36, 0.0 }
 0x35e   : > { %v5336_v28 = vshrl.u32 %v10335_v21, 16  ;;  %v5339_v54 = vshll.u32 %v10335_v21, 16  ;;  %v5379_v14 = vshrl.u32 %v10340_v7, 16  ;;  %v5382_v8 = vshll.u32 %v10340_v7, 16  ;;  %v10944_v34 = vpop.f32.mrb[92].mxu1  ;;  %v11130_v37 = vld [vmem:[#allocation2 + $0xc] sm:$0xff]  }
 0x35f   : > { %v5362_v9 = vshrl.u32 %v10338_v57, 16  ;;  %v5365_v48 = vshll.u32 %v10338_v57, 16  ;;  %v5355_v45 = vrot.slane %v5353_v30, 7  ;;  %v5174_v55 = vmax.f32 %v5074_v1, 0.0  ;;  %v5086_v42 = vpop.f32.mrb[93].mxu1  ;;  %6765 = vrot.lane.b32.xlu0 %v11130_v37, %s11403_s27  ;;  %v11131_v30 = vld [vmem:[#allocation2 + $0x18] sm:$0xff]  }
 0x360   : > { %v5338_v49 = vrot.slane %v5336_v28, 7  ;;  %v13155_v11 = vrot.slane %v5379_v14, 7  ;;  %v5095_v20 = vadd.f32 %v10944_v34, %v13031_v41  ;;  %v5087_v60 = vadd.f32 %v5086_v42, %v13013_v3  ;;  %v10945_v5 = vpop.f32.mrb[94].mxu1  ;;  %v5631_v7 = vld [vmem:[#allocation2 + $0x2c] sm:$0x1] }
 0x361   : > { %v13157_v32 = vrot.slane %v5362_v9, 7  ;;  %v5358_v22 = vor.u32 %v5356_v27, %v5355_v45  ;;  %v5360_v50 = vrot.slane %v5355_v45, 4  ;;  %v5089_v59 = vpop.f32.mrb[95].mxu1  ;;  %v13162_v36 = vpop.f32.mrb[72].mxu0  ;;  %v5641_v9 = vld [vmem:[#allocation2 + $0x3c] sm:$0xf]  ;;  %v10341_v34 = vpack.c.bf16 %v5176_v39, %v5176_v39 }
 0x362   : > { %v5341_v61 = vor.u32 %v5339_v54, %v5338_v49  ;;  %v5343_v21 = vrot.slane %v5338_v49, 4  ;;  %v5384_v57 = vor.u32 %v5382_v8, %v13155_v11  ;;  %v5385_v1 = vrot.slane %v13155_v11, 4  ;;  %v5648_v8 = vld [vmem:[#allocation2 + $0x48] sm:$0xf]  ;;  %v11148_v45 = vld [vmem:[%s14556_s5 + $0x60] sm:$0xff]  }
 0x363   : > { %v5367_v41 = vor.u32 %v5365_v48, %v13157_v32  ;;  %v5359_v27 = vsel %vm11637_vm11, %v5351_v43, %v5358_v22  ;;  %v5639_v28 = vsel %vm11502_vm2, %v5360_v50, %v5638_v18  ;;  %v10339_v37 = vpack.c.bf16 %v5174_v55, %v5174_v55  ;;  %6767 = vrot.lane.b32.xlu0 %v11131_v30, %s11403_s27  ;;  %v11149_v39 = vld [vmem:[%s14556_s5 + $0x20] sm:$0xff]   ;;  %v5730_v58 = vld [vmem:[#allocation2 + $0x1c] sm:$0xf]  ;;  %v13439_v35 = vld [vmem:[#allocation2 + $0x10] sm:$0xf] }
 0x364   : > { %v5342_v54 = vsel %vm11637_vm11, %v5334_v25, %v5341_v61  ;;  %v5632_v14 = vsel %vm11502_vm2, %v5343_v21, %v5631_v7  ;;  %5637 = vst.msk [vmem:[#allocation2 + $0x34] sm:$0xf] %vm668_vm5, %v5359_v27  ;;  %5640 = vst [vmem:[#allocation2 + $0x38] sm:$0x1] %v5639_v28  ;;  %v5649_v43 = vsel %vm11626_vm10, %v5384_v57, %v5648_v8  ;;  %v13183_v25 = vpop.f32.mrb[73].mxu0  ;;  %v5179_v49 = vmax.f32 %v5095_v20, 0.0 }
 0x365   : > { %5630 = vst.msk [vmem:[#allocation2 + $0x28] sm:$0xf] %vm668_vm5, %v5342_v54  ;;  %5633 = vst [vmem:[#allocation2 + $0x2c] sm:$0x1] %v5632_v14  ;;  %v5642_v48 = vsel %vm11626_vm10, %v5367_v41, %v5641_v9  ;;  %v5177_v42 = vmax.f32 %v5087_v60, 0.0  ;;  %v5098_v22 = vadd.f32 %v10945_v5, %v13033_v44  ;;  %v5090_v50 = vadd.f32 %v5089_v59, %v13015_v26  ;;  %v13190_v18 = vpop.f32.mrb[74].mxu0 }
 0x366   : > { %5650 = vst [vmem:[#allocation2 + $0x48] sm:$0xf] %v5649_v43  ;;  %5643 = vst [vmem:[#allocation2 + $0x3c] sm:$0xf] %v5642_v48  ;;  %v5387_v55 = vshrl.u32 %v10341_v34, 16  ;;  %v5390_v61 = vshll.u32 %v10341_v34, 16  ;;  %10638 = vmatprep.subr.bf16.mxu0 %v11148_v45  ;;  %v10344_v20 = vpack.c.bf16 %v5179_v49, %v5179_v49 }
 0x367   : > { %v5370_v21 = vshrl.u32 %v10339_v37, 16  ;;  %v5373_v7 = vshll.u32 %v10339_v37, 16  ;;  %v10948_v57 = vpop.f32.mrb[96].mxu1  ;;  %v13195_v41 = vpop.f32.mrb[75].mxu0  ;;  %v10342_v60 = vpack.c.bf16 %v5177_v42, %v5177_v42  ;;  %v5180_v30 = vmax.f32 %v5098_v22, 0.0  ;;  %10639 = vmatpush3.bf16.msra.mxu0 %v11149_v39 }
 0x368   : > { %v5178_v44 = vmax.f32 %v5090_v50, 0.0  ;;  %v5102_v5 = vpop.f32.mrb[97].mxu1  ;;  %v5389_v26 = vrot.slane %v5387_v55, 7  ;;  %v5111_v27 = vadd.f32 %v10948_v57, %v13047_v6  ;;  %v5413_v14 = vshrl.u32 %v10344_v20, 16  ;;  %v5652_v45 = vld [vmem:[#allocation2 + $0x50] sm:$0x1] }
 0x369   : > { %v5372_v59 = vrot.slane %v5370_v21, 7  ;;  %v5103_v28 = vadd.f32 %v5102_v5, %v13039_v46  ;;  %v10949_v54 = vpop.f32.mrb[98].mxu1  ;;  %v5416_v8 = vshll.u32 %v10344_v20, 16  ;;  %v5396_v9 = vshrl.u32 %v10342_v60, 16  ;;  %v5645_v22 = vld [vmem:[#allocation2 + $0x44] sm:$0x1] }
 0x36a   : > { %v5399_v43 = vshll.u32 %v10342_v60, 16  ;;  %v5105_v48 = vpop.f32.mrb[99].mxu1  ;;  %v5392_v34 = vor.u32 %v5390_v61, %v5389_v26  ;;  %v5394_v37 = vrot.slane %v5389_v26, 4  ;;  %v5415_v50 = vrot.slane %v5413_v14, 7  ;;  %v5662_v20 = vld [vmem:[#allocation2 + $0x60] sm:$0xf] }
 0x36b   : > { %v5375_v49 = vor.u32 %v5373_v7, %v5372_v59  ;;  %v5377_v42 = vrot.slane %v5372_v59, 4  ;;  %v5398_v39 = vrot.slane %v5396_v9, 7  ;;  %v10345_v55 = vpack.c.bf16 %v5180_v30, %v5180_v30  ;;  %v5655_v60 = vld [vmem:[#allocation2 + $0x54] sm:$0xf] }
 0x36c   : > { %v10343_v21 = vpack.c.bf16 %v5178_v44, %v5178_v44  ;;  %v11132_v3 = vld [vmem:[#allocation2 + $0x24] sm:$0xff]   ;;  %v5393_v46 = vsel %vm11637_vm11, %v5385_v1, %v5392_v34  ;;  %v5653_v6 = vsel %vm11502_vm2, %v5394_v37, %v5652_v45  ;;  %v14579_v61 = vrot.slane %v13157_v32, 4  ;;  %v5727_v32 = vld [vmem:[#allocation2 + $0xc] sm:$0xf] }
 0x36d   : > { %v5646_v57 = vsel %vm11502_vm2, %v5377_v42, %v5645_v22  ;;  %5651 = vst.msk [vmem:[#allocation2 + $0x4c] sm:$0xf] %vm668_vm5, %v5393_v46  ;;  %5654 = vst [vmem:[#allocation2 + $0x50] sm:$0x1] %v5653_v6  ;;  %v5418_v11 = vor.u32 %v5416_v8, %v5415_v50  ;;  %v5419_v1 = vrot.slane %v5415_v50, 4  ;;  %v5401_v30 = vor.u32 %v5399_v43, %v5398_v39 }
 0x36e   : > { %v5376_v7 = vsel %vm11637_vm11, %v14579_v61, %v5375_v49  ;;  %5647 = vst [vmem:[#allocation2 + $0x44] sm:$0x1] %v5646_v57  ;;  %v5402_v44 = vrot.slane %v5398_v39, 4  ;;  %6769 = vrot.lane.b32.xlu0 %v11132_v3, %s11403_s27  ;;  %v5421_v5 = vshrl.u32 %v10345_v55, 16  ;;  %v5424_v26 = vshll.u32 %v10345_v55, 16  ;;  %v13214_v9 = vpop.f32.mrb[100].mxu1 }
 0x36f   : > { %5644 = vst.msk [vmem:[#allocation2 + $0x40] sm:$0xf] %vm668_vm5, %v5376_v7  ;;  %v5404_v59 = vshrl.u32 %v10343_v21, 16  ;;  %v5407_v14 = vshll.u32 %v10343_v21, 16  ;;  %v5663_v34 = vsel %vm11626_vm10, %v5418_v11, %v5662_v20  ;;  %v5656_v37 = vsel %vm11626_vm10, %v5401_v30, %v5655_v60  ;;  %v11134_v49 = vld [vmem:[#allocation2 + $0x30] sm:$0xff]   ;;  %v13220_v43 = vpop.f32.mrb[101].mxu1 }
 0x370   : > { %v5183_v45 = vmax.f32 %v5111_v27, 0.0  ;;  %v5181_v8 = vmax.f32 %v5103_v28, 0.0  ;;  %5664 = vst [vmem:[#allocation2 + $0x60] sm:$0xf] %v5663_v34  ;;  %5657 = vst [vmem:[#allocation2 + $0x54] sm:$0xf] %v5656_v37  ;;  %v5114_v22 = vadd.f32 %v10949_v54, %v13049_v33  ;;  %v5106_v50 = vadd.f32 %v5105_v48, %v13041_v40 }
 0x371   : > { %v5423_v3 = vrot.slane %v5421_v5, 7  ;;  %v5406_v42 = vrot.slane %v5404_v59, 7  ;;  %v13224_v39 = vpop.f32.mrb[102].mxu1  ;;  %v5666_v55 = vld [vmem:[#allocation2 + $0x68] sm:$0x1]  ;;  %v5798_v6 = vshrl.u32 %v5727_v32, 16 }
 0x372   : > { %v10348_v21 = vpack.c.bf16 %v5183_v45, %v5183_v45  ;;  %v10346_v46 = vpack.c.bf16 %v5181_v8, %v5181_v8  ;;  %v5801_v61 = vshll.u32 %v5727_v32, 16  ;;  %6771 = vrot.lane.b32.xlu0 %v11134_v49, %s11403_s27  ;;  %v13227_v27 = vpop.f32.mrb[103].mxu1  ;;  %v5659_v60 = vld [vmem:[#allocation2 + $0x5c] sm:$0x1]  ;;  %v5728_v11 = vld [vmem:[#allocation2 + $0x10] sm:$0xf] }
 0x373   : > { %v5426_v28 = vor.u32 %v5424_v26, %v5423_v3  ;;  %v5428_v7 = vrot.slane %v5423_v3, 4  ;;  %v5409_v57 = vor.u32 %v5407_v14, %v5406_v42  ;;  %v5411_v20 = vrot.slane %v5406_v42, 4  ;;  %v5758_v14 = vld [vmem:[#allocation2 + $0x14] sm:$0x1]  ;;  %v5676_v3 = vld [vmem:[#allocation2 + $0x78] sm:$0xf] }
 0x374   : > { %v5447_v33 = vshrl.u32 %v10348_v21, 16  ;;  %v5450_v54 = vshll.u32 %v10348_v21, 16  ;;  %v5430_v40 = vshrl.u32 %v10346_v46, 16  ;;  %v5433_v48 = vshll.u32 %v10346_v46, 16  ;;  %v13229_v30 = vpop.f32.mrb[76].mxu0 }
 0x375   : > { %v5427_v5 = vsel %vm11637_vm11, %v5419_v1, %v5426_v28  ;;  %v5667_v32 = vsel %vm11502_vm2, %v5428_v7, %v5666_v55  ;;  %v5410_v26 = vsel %vm11637_vm11, %v5402_v44, %v5409_v57  ;;  %v5660_v59 = vsel %vm11502_vm2, %v5411_v20, %v5659_v60  ;;  %v13239_v37 = vpop.f32.mrb[77].mxu0  ;;  %v5669_v42 = vld [vmem:[#allocation2 + $0x6c] sm:$0xf] }
 0x376   : > { %v11136_v34 = vld [vmem:[#allocation2 + $0x3c] sm:$0xff]   ;;  %5665 = vst.msk [vmem:[#allocation2 + $0x64] sm:$0xf] %vm668_vm5, %v5427_v5  ;;  %5668 = vst [vmem:[#allocation2 + $0x68] sm:$0x1] %v5667_v32  ;;  %v13243_v1 = vrot.slane %v5447_v33, 7 }
 0x377   : > { %5658 = vst.msk [vmem:[#allocation2 + $0x58] sm:$0xf] %vm668_vm5, %v5410_v26  ;;  %5661 = vst [vmem:[#allocation2 + $0x5c] sm:$0x1] %v5660_v59  ;;  %v13245_v45 = vrot.slane %v5430_v40, 7  ;;  %v5184_v8 = vmax.f32 %v5114_v22, 0.0  ;;  %6773 = vrot.lane.b32.xlu0 %v11136_v34, %s11403_s27 }
 0x378   : > { %v5182_v49 = vmax.f32 %v5106_v50, 0.0  ;;  %v13247_v44 = vpop.f32.mrb[78].mxu0  ;;  %v5800_v55 = vrot.slane %v5798_v6, 4  ;;  %v5803_v21 = vrot.slane %v5801_v61, 5  ;;  %v5807_v46 = vshll.u32 %v5728_v11, 16  ;;  %v13250_v7 = vpop.f32.mrb[104].mxu1 }
 0x379   : > { %14580 = vst [vmem:[#allocation8_spill] sm:$0xff] %v13247_v44  ;;  %v5811_v28 = vshrl.u32 %v5728_v11, 16  ;;  %v13252_v57 = vpop.f32.mrb[79].mxu0  ;;  %v5452_v20 = vor.u32 %v5450_v54, %v13243_v1  ;;  %v5453_v60 = vrot.slane %v13243_v1, 4  ;;  %v5435_v22 = vor.u32 %v5433_v48, %v13245_v45  ;;  %v13258_v33 = vpop.f32.mrb[105].mxu1  ;;  %v11152_v6 = vld [vmem:[%s14556_s5 + $0x68] sm:$0xff]  }
 0x37a   : > { %14581 = vst [vmem:[#allocation9_spill] sm:$0xff] %v13252_v57  ;;  %v5436_v50 = vrot.slane %v13245_v45, 4  ;;  %v10349_v61 = vpack.c.bf16 %v5184_v8, %v5184_v8  ;;  %v10347_v11 = vpack.c.bf16 %v5182_v49, %v5182_v49  ;;  %v5804_v40 = vor.u32 %v5803_v21, %v5800_v55  ;;  %v5729_v32 = vld [vmem:[#allocation2 + $0x18] sm:$0xf]  ;;  %v11137_v26 = vld [vmem:[#allocation2 + $0x48] sm:$0xff]   ;;  %v13263_v59 = vpop.f32.mrb[106].mxu1  ;;  %10640 = vmatprep.subr.bf16.mxu0 %v11152_v6 }
 0x37b   : > { %v5809_v5 = vrot.slane %v5807_v46, 5  ;;  %v5677_v54 = vsel %vm11626_vm10, %v5452_v20, %v5676_v3  ;;  %v5670_v48 = vsel %vm11626_vm10, %v5435_v22, %v5669_v42  ;;  %v5813_v34 = vrot.slane %v5811_v28, 4  ;;  %v13269_v45 = vpop.f32.mrb[107].mxu1  ;;  %v11153_v8 = vld [vmem:[%s14556_s5 + $0x28] sm:$0xff]   ;;  %6775 = vrot.lane.b32.xlu0 %v11137_v26, %s11403_s27 }
 0x37c   : > { %v5817_v1 = vshll.u32 %v5758_v14, 16  ;;  %5678 = vst [vmem:[#allocation2 + $0x78] sm:$0xf] %v5677_v54  ;;  %5671 = vst [vmem:[#allocation2 + $0x6c] sm:$0xf] %v5670_v48  ;;  %v5455_v49 = vshrl.u32 %v10349_v61, 16  ;;  %v5127_v14 = vadd.f32 %v13214_v9, %v13104_v0  ;;  %10641 = vmatpush3.bf16.msra.mxu0 %v11153_v8 }
 0x37d   : > { %v5458_v55 = vshll.u32 %v10349_v61, 16  ;;  %v5438_v21 = vshrl.u32 %v10347_v11, 16  ;;  %v5441_v46 = vshll.u32 %v10347_v11, 16  ;;  %v5805_v3 = vrot.slane %v5804_v40, 4  ;;  %v5680_v54 = vld [vmem:[#allocation2 + $0x80] sm:$0x1] }
 0x37e   : > { %v5814_v42 = vor.u32 %v5813_v34, %v5809_v5  ;;  %v5819_v28 = vrot.slane %v5817_v1, 5  ;;  %v5457_v20 = vrot.slane %v5455_v49, 7  ;;  %v5822_v6 = vshrl.u32 %v5729_v32, 16  ;;  %v11138_v44 = vld [vmem:[#allocation2 + $0x54] sm:$0xff]   ;;  %v13279_v38 = vpop.f32.mrb[108].mxu1 }
 0x37f   : > { %v5440_v22 = vrot.slane %v5438_v21, 7  ;;  %v5825_v13 = vshll.u32 %v5729_v32, 16  ;;  %v5810_v61 = vsel %vm11591_vm8, %v5805_v3, %v5809_v5  ;;  %v5187_v11 = vmax.f32 %v5127_v14, 0.0  ;;  %v5759_v32 = vld [vmem:[#allocation2 + $0x20] sm:$0x1]  ;;  %6777 = vrot.lane.b32.xlu0 %v11138_v44, %s11403_s27  ;;  %v13284_v5 = vpop.f32.mrb[109].mxu1 }
 0x380   : > { %v5815_v48 = vrot.slane %v5814_v42, 4  ;;  %v5831_v57 = vshll.u32 %v5730_v58, 16  ;;  %v5460_v26 = vor.u32 %v5458_v55, %v5457_v20  ;;  %v5462_v40 = vrot.slane %v5457_v20, 4  ;;  %v13294_v42 = vpop.f32.mrb[110].mxu1  ;;  %v11140_v14 = vld [vmem:[#allocation2 + $0x60] sm:$0xff]  }
 0x381   : > { %v5443_v34 = vor.u32 %v5441_v46, %v5440_v22  ;;  %v5445_v1 = vrot.slane %v5440_v22, 4  ;;  %v10352_v9 = vpack.c.bf16 %v5187_v11, %v5187_v11  ;;  %v5824_v8 = vrot.slane %v5822_v6, 4  ;;  %v13298_v20 = vpop.f32.mrb[111].mxu1 }
 0x382   : > { %v5820_v0 = vsel %vm11591_vm8, %v5815_v48, %v5819_v28  ;;  %v5827_v49 = vrot.slane %v5825_v13, 5  ;;  %v5461_v55 = vsel %vm11637_vm11, %v5453_v60, %v5460_v26  ;;  %v5681_v21 = vsel %vm11502_vm2, %v5462_v40, %v5680_v54  ;;  %v5731_v26 = vld [vmem:[#allocation2 + $0x24] sm:$0xf] }
 0x383   : > { %v5444_v46 = vsel %vm11637_vm11, %v5436_v50, %v5443_v34  ;;  %v5674_v3 = vsel %vm11502_vm2, %v5445_v1, %v5673_v31  ;;  %5679 = vst.msk [vmem:[#allocation2 + $0x7c] sm:$0xf] %vm668_vm5, %v5461_v55  ;;  %5682 = vst [vmem:[#allocation2 + $0x80] sm:$0x1] %v5681_v21  ;;  %v10067_v13 = vcombine.low %v5810_v61, %v5820_v0  ;;  %v5481_v44 = vshrl.u32 %v10352_v9, 16 }
 0x384   : > { %5672 = vst.msk [vmem:[#allocation2 + $0x70] sm:$0xf] %vm668_vm5, %v5444_v46  ;;  %5675 = vst [vmem:[#allocation2 + $0x74] sm:$0x1] %v5674_v3  ;;  %v5484_v60 = vshll.u32 %v10352_v9, 16  ;;  %v5828_v28 = vor.u32 %v5827_v49, %v5824_v8  ;;  %v5833_v22 = vrot.slane %v5831_v57, 5  ;;  %v5119_v31 = vadd.f32 %v13220_v43, %v13055_v12  ;;  %6779 = vrot.lane.b32.xlu0 %v11140_v14, %s11403_s27 }
 0x385   : > { %v5835_v50 = vshrl.u32 %v5730_v58, 16  ;;  %v5841_v6 = vshll.u32 %v5759_v32, 16  ;;  %6287 = vrot.lane.b32.xlu1 %v10067_v13, %s11403_s27  ;;  %v13303_v54 = vrot.slane %v5481_v44, 7  ;;  %v13307_v61 = vadd.f32 %v13143_v63, %v13139_v17  ;;  %v5732_v43 = vld [vmem:[#allocation2 + $0x28] sm:$0xf] }
 0x386   : > { %v5829_v48 = vrot.slane %v5828_v28, 4  ;;  %v4969_v11 = vadd.f32 %v13102_v62, %v13064_v15  ;;  %v5185_v40 = vmax.f32 %v5119_v31, 0.0  ;;  %v5122_v12 = vadd.f32 %v13227_v27, %v13058_v47  ;;  %v5690_v15 = vld [vmem:[#allocation2 + $0x90] sm:$0xf]  ;;  %v5760_v31 = vld [vmem:[#allocation2 + $0x2c] sm:$0x1] }
 0x387   : > { %v5837_v58 = vrot.slane %v5835_v50, 4  ;;  %v5843_v57 = vrot.slane %v5841_v6, 5  ;;  %v5486_v34 = vor.u32 %v5484_v60, %v13303_v54  ;;  %v5487_v1 = vrot.slane %v13303_v54, 4  ;;  %v11157_v54 = vld [vmem:[%s14556_s5 + $0x30] sm:$0xff]  }
 0x388   : > { %v5834_v17 = vsel %vm11591_vm8, %v5829_v48, %v5833_v22  ;;  %v5130_v63 = vadd.f32 %v13224_v39, %v4969_v11  ;;  %v10350_v0 = vpack.c.bf16 %v5185_v40, %v5185_v40  ;;  %v5186_v9 = vmax.f32 %v5122_v12, 0.0 }
 0x389   : > { %v5838_v62 = vor.u32 %v5837_v58, %v5833_v22  ;;  %v5846_v32 = vshrl.u32 %v5731_v26, 16  ;;  %v5691_v8 = vsel %vm11626_vm10, %v5486_v34, %v5690_v15  ;;  %v5849_v47 = vshll.u32 %v5731_v26, 16  ;;  %v11156_v15 = vld [vmem:[%s14556_s5 + $0x70] sm:$0xff]  }
 0x38a   : > { %v5188_v49 = vmax.f32 %v5130_v63, 0.0  ;;  %v5855_v27 = vshll.u32 %v5732_v43, 16  ;;  %5692 = vst [vmem:[#allocation2 + $0x90] sm:$0xf] %v5691_v8  ;;  %v5464_v21 = vshrl.u32 %v10350_v0, 16  ;;  %v5467_v46 = vshll.u32 %v10350_v0, 16  ;;  %10642 = vmatprep.subr.bf16.mxu0 %v11156_v15 }
 0x38b   : > { %v5839_v55 = vrot.slane %v5838_v62, 4  ;;  %v10351_v3 = vpack.c.bf16 %v5186_v9, %v5186_v9  ;;  %v11142_v13 = vld [vmem:[#allocation2 + $0x6c] sm:$0xff]   ;;  %v5848_v60 = vrot.slane %v5846_v32, 4  ;;  %v5851_v39 = vrot.slane %v5849_v47, 5  ;;  %v5735_v15 = vld [vmem:[#allocation2 + $0x3c] sm:$0xf]  ;;  %10643 = vmatpush3.bf16.msra.mxu0 %v11157_v54 }
 0x38c   : > { %v10353_v44 = vpack.c.bf16 %v5188_v49, %v5188_v49  ;;  %v13321_v28 = vrot.slane %v5855_v27, 5  ;;  %v5466_v22 = vrot.slane %v5464_v21, 7  ;;  %6781 = vrot.lane.b32.xlu0 %v11142_v13, %s11403_s27  ;;  %v5859_v63 = vshrl.u32 %v5732_v43, 16  ;;  %v5687_v47 = vld [vmem:[#allocation2 + $0x8c] sm:$0x1] }
 0x38d   : > { %v5844_v14 = vsel %vm11591_vm8, %v5839_v55, %v5843_v57  ;;  %v5472_v50 = vshrl.u32 %v10351_v3, 16  ;;  %v5475_v6 = vshll.u32 %v10351_v3, 16  ;;  %v5852_v58 = vor.u32 %v5851_v39, %v5848_v60  ;;  %v5683_v57 = vld [vmem:[#allocation2 + $0x84] sm:$0xf]  ;;  %v5733_v27 = vld [vmem:[#allocation2 + $0x30] sm:$0xf] }
 0x38e   : > { %v10068_v48 = vcombine.low %v5834_v17, %v5844_v14  ;;  %v5489_v11 = vshrl.u32 %v10353_v44, 16  ;;  %v5492_v26 = vshll.u32 %v10353_v44, 16  ;;  %v5469_v40 = vor.u32 %v5467_v46, %v5466_v22  ;;  %v5734_v13 = vld [vmem:[#allocation2 + $0x34] sm:$0xf]  ;;  %v5694_v44 = vld [vmem:[#allocation2 + $0x98] sm:$0x1] }
 0x38f   : > { %v5470_v12 = vrot.slane %v5466_v22, 4  ;;  %v5474_v34 = vrot.slane %v5472_v50, 7  ;;  %v5853_v0 = vrot.slane %v5852_v58, 4  ;;  %v5865_v9 = vshll.u32 %v5760_v31, 16  ;;  %v5761_v14 = vld [vmem:[#allocation2 + $0x38] sm:$0x1] }
 0x390   : > { %6289 = vrot.lane.b32.xlu1 %v10068_v48, %s11403_s27  ;;  %v5491_v62 = vrot.slane %v5489_v11, 7  ;;  %v10597_v17 = vadd.f32 %v13153_v23, %v13148_v19  ;;  %v5684_v32 = vsel %vm11626_vm10, %v5469_v40, %v5683_v57  ;;  %v5861_v43 = vrot.slane %v5859_v63, 4  ;;  %v5762_v54 = vld [vmem:[#allocation2 + $0x44] sm:$0x1] }
 0x391   : > { %v5477_v8 = vor.u32 %v5475_v6, %v5474_v34  ;;  %v5479_v49 = vrot.slane %v5474_v34, 4  ;;  %5685 = vst [vmem:[#allocation2 + $0x84] sm:$0xf] %v5684_v32  ;;  %v5858_v46 = vsel %vm11591_vm8, %v5853_v0, %v13321_v28  ;;  %v5867_v3 = vrot.slane %v5865_v9, 5 }
 0x392   : > { %v5494_v55 = vor.u32 %v5492_v26, %v5491_v62  ;;  %v5496_v21 = vrot.slane %v5491_v62, 4  ;;  %v5862_v60 = vor.u32 %v5861_v43, %v13321_v28  ;;  %v4982_v39 = vadd.f32 %v13307_v61, %v13077_v4 }
 0x393   : > { %v5478_v19 = vsel %vm11637_vm11, %v5470_v12, %v5477_v8  ;;  %v5688_v23 = vsel %vm11502_vm2, %v5479_v49, %v5687_v47  ;;  %v5870_v6 = vshrl.u32 %v5733_v27, 16  ;;  %v5873_v31 = vshll.u32 %v5733_v27, 16 }
 0x394   : > { %v5495_v22 = vsel %vm11637_vm11, %v5487_v1, %v5494_v55  ;;  %v5695_v50 = vsel %vm11502_vm2, %v5496_v21, %v5694_v44  ;;  %5686 = vst.msk [vmem:[#allocation2 + $0x88] sm:$0xf] %vm668_vm5, %v5478_v19  ;;  %5689 = vst [vmem:[#allocation2 + $0x8c] sm:$0x1] %v5688_v23  ;;  %v5863_v28 = vrot.slane %v5862_v60, 4  ;;  %v5143_v4 = vadd.f32 %v13250_v7, %v4982_v39 }
 0x395   : > { %5693 = vst.msk [vmem:[#allocation2 + $0x94] sm:$0xf] %vm668_vm5, %v5495_v22  ;;  %5696 = vst [vmem:[#allocation2 + $0x98] sm:$0x1] %v5695_v50  ;;  %v5879_v61 = vshll.u32 %v5734_v13, 16  ;;  %v5883_v48 = vshrl.u32 %v5734_v13, 16  ;;  %v4974_v58 = vadd.f32 %v13133_v29, %v13068_v10  ;;  %v13363_v8 = vadd.f32 %v13183_v25, %v13162_v36 }
 0x396   : > { %v5872_v1 = vrot.slane %v5870_v6, 4  ;;  %v5875_v11 = vrot.slane %v5873_v31, 5  ;;  %v5889_v26 = vshll.u32 %v5761_v14, 16  ;;  %v5868_v40 = vsel %vm11591_vm8, %v5863_v28, %v5867_v3  ;;  %v5736_v44 = vld [vmem:[#allocation2 + $0x40] sm:$0xf] }
 0x397   : > { %v5191_v12 = vmax.f32 %v5143_v4, 0.0  ;;  %v5881_v34 = vrot.slane %v5879_v61, 5  ;;  %v5885_v63 = vrot.slane %v5883_v48, 4  ;;  %v10069_v7 = vcombine.low %v5858_v46, %v5868_v40  ;;  %v5704_v50 = vld [vmem:[#allocation2 + $0xa8] sm:$0xf] }
 0x398   : > { %v5876_v57 = vor.u32 %v5875_v11, %v5872_v1  ;;  %v5891_v62 = vrot.slane %v5889_v26, 5  ;;  %v5135_v0 = vadd.f32 %v13258_v33, %v4974_v58  ;;  %v4985_v10 = vadd.f32 %v10597_v17, %v13082_v53  ;;  %v5697_v58 = vld [vmem:[#allocation2 + $0x9c] sm:$0xf] }
 0x399   : > { %v10356_v9 = vpack.c.bf16 %v5191_v12, %v5191_v12  ;;  %v5886_v32 = vor.u32 %v5885_v63, %v5881_v34  ;;  %6291 = vrot.lane.b32.xlu1 %v10069_v7, %s11403_s27  ;;  %v4977_v47 = vadd.f32 %v13135_v16, %v13073_v56  ;;  %v5894_v43 = vshrl.u32 %v5735_v15, 16 }
 0x39a   : > { %v5877_v29 = vrot.slane %v5876_v57, 4  ;;  %v5189_v49 = vmax.f32 %v5135_v0, 0.0  ;;  %v5146_v33 = vadd.f32 %v13263_v59, %v4985_v10  ;;  %v5897_v56 = vshll.u32 %v5735_v15, 16  ;;  %v5737_v57 = vld [vmem:[#allocation2 + $0x48] sm:$0xf] }
 0x39b   : > { %v5515_v27 = vshrl.u32 %v10356_v9, 16  ;;  %v5518_v55 = vshll.u32 %v10356_v9, 16  ;;  %v5887_v21 = vrot.slane %v5886_v32, 4  ;;  %v5138_v25 = vadd.f32 %v13269_v45, %v4977_v47 }
 0x39c   : > { %v5882_v46 = vsel %vm11591_vm8, %v5877_v29, %v5881_v34  ;;  %v10354_v36 = vpack.c.bf16 %v5189_v49, %v5189_v49  ;;  %v5896_v53 = vrot.slane %v5894_v43, 4  ;;  %v5192_v13 = vmax.f32 %v5146_v33, 0.0  ;;  %v5708_v49 = vld [vmem:[#allocation2 + $0xb0] sm:$0x1] }
 0x39d   : > { %v5517_v17 = vrot.slane %v5515_v27, 7  ;;  %v5892_v3 = vsel %vm11591_vm8, %v5887_v21, %v5891_v62  ;;  %v5190_v60 = vmax.f32 %v5138_v25, 0.0  ;;  %v5899_v22 = vrot.slane %v5897_v56, 5  ;;  %v5738_v27 = vld [vmem:[#allocation2 + $0x4c] sm:$0xf] }
 0x39e   : > { %v10070_v16 = vcombine.low %v5882_v46, %v5892_v3  ;;  %v5498_v19 = vshrl.u32 %v10354_v36, 16  ;;  %v5501_v23 = vshll.u32 %v10354_v36, 16  ;;  %v10357_v14 = vpack.c.bf16 %v5192_v13, %v5192_v13  ;;  %v5763_v36 = vld [vmem:[#allocation2 + $0x50] sm:$0x1] }
 0x39f   : > { %v5520_v39 = vor.u32 %v5518_v55, %v5517_v17  ;;  %v5521_v59 = vrot.slane %v5517_v17, 4  ;;  %v10355_v6 = vpack.c.bf16 %v5190_v60, %v5190_v60  ;;  %v5903_v31 = vshll.u32 %v5736_v44, 16  ;;  %v11158_v55 = vld [vmem:[%s14556_s5 + $0x78] sm:$0xff]  }
 0x3a0   : > { %6293 = vrot.lane.b32.xlu1 %v10070_v16, %s11403_s27  ;;  %v5500_v45 = vrot.slane %v5498_v19, 7  ;;  %v5907_v28 = vshrl.u32 %v5736_v44, 16  ;;  %v5523_v61 = vshrl.u32 %v10357_v14, 16  ;;  %v5526_v48 = vshll.u32 %v10357_v14, 16  ;;  %10644 = vmatprep.subr.bf16.mxu0 %v11158_v55  ;;  %v5739_v19 = vld [vmem:[#allocation2 + $0x54] sm:$0xf] }
 0x3a1   : > { %v5705_v4 = vsel %vm11626_vm10, %v5520_v39, %v5704_v50  ;;  %v5900_v1 = vor.u32 %v5899_v22, %v5896_v53  ;;  %v5506_v40 = vshrl.u32 %v10355_v6, 16  ;;  %v5509_v12 = vshll.u32 %v10355_v6, 16  ;;  %v5701_v53 = vld [vmem:[#allocation2 + $0xa4] sm:$0x1]  ;;  %v5740_v6 = vld [vmem:[#allocation2 + $0x58] sm:$0xf] }
 0x3a2   : > { %5706 = vst [vmem:[#allocation2 + $0xa8] sm:$0xf] %v5705_v4  ;;  %v5503_v11 = vor.u32 %v5501_v23, %v5500_v45  ;;  %v5504_v26 = vrot.slane %v5500_v45, 4  ;;  %v5525_v34 = vrot.slane %v5523_v61, 7  ;;  %v5905_v15 = vrot.slane %v5903_v31, 5  ;;  %v11159_v31 = vld [vmem:[%s14556_s5 + $0x38] sm:$0xff]  }
 0x3a3   : > { %v5901_v63 = vrot.slane %v5900_v1, 4  ;;  %v5909_v7 = vrot.slane %v5907_v28, 4  ;;  %v5508_v0 = vrot.slane %v5506_v40, 7  ;;  %v5913_v9 = vshll.u32 %v5762_v54, 16  ;;  %10645 = vmatpush3.bf16.msra.mxu0 %v11159_v31  ;;  %v5715_v31 = vld [vmem:[#allocation2 + $0xbc] sm:$0x1] }
 0x3a4   : > { %v5698_v62 = vsel %vm11626_vm10, %v5503_v11, %v5697_v58  ;;  %v10603_v32 = vadd.f32 %v13195_v41, %v13190_v18  ;;  %v5528_v10 = vor.u32 %v5526_v48, %v5525_v34  ;;  %v5530_v29 = vrot.slane %v5525_v34, 4  ;;  %v14582_v48 = vld [vmem:[#allocation5_spill] sm:$0xff]  ;;  %v14583_v11 = vld [vmem:[#allocation6_spill] sm:$0xff] }
 0x3a5   : > { %5699 = vst [vmem:[#allocation2 + $0x9c] sm:$0xf] %v5698_v62  ;;  %v5906_v47 = vsel %vm11591_vm8, %v5901_v63, %v5905_v15  ;;  %v5910_v43 = vor.u32 %v5909_v7, %v5905_v15  ;;  %v5511_v21 = vor.u32 %v5509_v12, %v5508_v0  ;;  %v5513_v33 = vrot.slane %v5508_v0, 4  ;;  %v5764_v63 = vld [vmem:[#allocation2 + $0x5c] sm:$0x1] }
 0x3a6   : > { %v5915_v46 = vrot.slane %v5913_v9, 5  ;;  %v5918_v25 = vshrl.u32 %v5737_v57, 16  ;;  %v5529_v18 = vsel %vm11637_vm11, %v5521_v59, %v5528_v10  ;;  %v5709_v41 = vsel %vm11502_vm2, %v5530_v29, %v5708_v49 }
 0x3a7   : > { %v5911_v17 = vrot.slane %v5910_v43, 4  ;;  %v5921_v3 = vshll.u32 %v5737_v57, 16  ;;  %5707 = vst.msk [vmem:[#allocation2 + $0xac] sm:$0xf] %vm668_vm5, %v5529_v18  ;;  %5710 = vst [vmem:[#allocation2 + $0xb0] sm:$0x1] %v5709_v41  ;;  %v5512_v13 = vsel %vm11637_vm11, %v5504_v26, %v5511_v21  ;;  %v5702_v44 = vsel %vm11502_vm2, %v5513_v33, %v5701_v53 }
 0x3a8   : > { %v5920_v56 = vrot.slane %v5918_v25, 4  ;;  %v5927_v16 = vshll.u32 %v5738_v27, 16  ;;  %5700 = vst.msk [vmem:[#allocation2 + $0xa0] sm:$0xf] %vm668_vm5, %v5512_v13  ;;  %5703 = vst [vmem:[#allocation2 + $0xa4] sm:$0x1] %v5702_v44  ;;  %v4990_v50 = vadd.f32 %v13363_v8, %v13086_v2  ;;  %v10606_v45 = vadd.f32 %v13239_v37, %v13229_v30 }
 0x3a9   : > { %v5916_v23 = vsel %vm11591_vm8, %v5911_v17, %v5915_v46  ;;  %v5923_v60 = vrot.slane %v5921_v3, 5  ;;  %v5931_v39 = vshrl.u32 %v5738_v27, 16  ;;  %v5937_v59 = vshll.u32 %v5763_v36, 16  ;;  %v14584_v43 = vld [vmem:[#allocation8_spill] sm:$0xff]  ;;  %v5741_v53 = vld [vmem:[#allocation2 + $0x60] sm:$0xf] }
 0x3aa   : > { %v10071_v14 = vcombine.low %v5906_v47, %v5916_v23  ;;  %v5929_v22 = vrot.slane %v5927_v16, 5  ;;  %v4993_v54 = vadd.f32 %v10603_v32, %v14582_v48  ;;  %v5151_v1 = vadd.f32 %v13284_v5, %v4990_v50  ;;  %v14586_v23 = vld [vmem:[#allocation7_spill] sm:$0xff] }
 0x3ab   : > { %v5924_v28 = vor.u32 %v5923_v60, %v5920_v56  ;;  %v5933_v4 = vrot.slane %v5931_v39, 4  ;;  %v5939_v61 = vrot.slane %v5937_v59, 5  ;;  %v4998_v26 = vadd.f32 %v10606_v45, %v14583_v11  ;;  %v5765_v11 = vld [vmem:[#allocation2 + $0x68] sm:$0x1] }
 0x3ac   : > { %6295 = vrot.lane.b32.xlu1 %v10071_v14, %s11403_s27  ;;  %v5942_v2 = vshrl.u32 %v5739_v19, 16  ;;  %v5945_v8 = vshll.u32 %v5739_v19, 16  ;;  %v5154_v58 = vadd.f32 %v13298_v20, %v4993_v54  ;;  %v5951_v40 = vshll.u32 %v5740_v6, 16  ;;  %v5711_v14 = vld [vmem:[#allocation2 + $0xb4] sm:$0xf] }
 0x3ad   : > { %v5925_v30 = vrot.slane %v5924_v28, 4  ;;  %v5934_v37 = vor.u32 %v5933_v4, %v5929_v22  ;;  %v5193_v12 = vmax.f32 %v5151_v1, 0.0  ;;  %v5159_v34 = vadd.f32 %v13279_v38, %v4998_v26  ;;  %v14585_v38 = vld [vmem:[#allocation9_spill] sm:$0xff] }
 0x3ae   : > { %v5944_v15 = vrot.slane %v5942_v2, 4  ;;  %v5947_v7 = vrot.slane %v5945_v8, 5  ;;  %v5194_v62 = vmax.f32 %v5154_v58, 0.0  ;;  %v5953_v0 = vrot.slane %v5951_v40, 5  ;;  %v7693_v2 = vld [vmem:[#allocation2 + $0x18] sm:$0xf] }
 0x3af   : > { %v5930_v57 = vsel %vm11591_vm8, %v5925_v30, %v5929_v22  ;;  %v5935_v5 = vrot.slane %v5934_v37, 4  ;;  %v10358_v9 = vpack.c.bf16 %v5193_v12, %v5193_v12  ;;  %v5195_v32 = vmax.f32 %v5159_v34, 0.0  ;;  %v5718_v8 = vld [vmem:[#allocation2 + $0xc0] sm:$0xf]  ;;  %v7694_v40 = vld [vmem:[#allocation2 + $0x1c] sm:$0xf] }
 0x3b0   : > { %v5948_v10 = vor.u32 %v5947_v7, %v5944_v15  ;;  %v5955_v29 = vshrl.u32 %v5740_v6, 16  ;;  %v10359_v49 = vpack.c.bf16 %v5194_v62, %v5194_v62  ;;  %v5961_v47 = vshll.u32 %v5764_v63, 16  ;;  %v7725_v62 = vld [vmem:[#allocation2 + $0x20] sm:$0x1] }
 0x3b1   : > { %v5940_v20 = vsel %vm11591_vm8, %v5935_v5, %v5939_v61  ;;  %v10609_v27 = vadd.f32 %v14585_v38, %v14584_v43  ;;  %v5532_v21 = vshrl.u32 %v10358_v9, 16  ;;  %v5535_v33 = vshll.u32 %v10358_v9, 16  ;;  %v5742_v61 = vld [vmem:[#allocation2 + $0x64] sm:$0xf]  ;;  %v13441_v38 = vld [vmem:[#allocation2 + $0x14] sm:$0x1] }
 0x3b2   : > { %v10072_v55 = vcombine.low %v5930_v57, %v5940_v20  ;;  %v10360_v46 = vpack.c.bf16 %v5195_v32, %v5195_v32  ;;  %v5540_v36 = vshrl.u32 %v10359_v49, 16  ;;  %v5543_v25 = vshll.u32 %v10359_v49, 16 }
 0x3b3   : > { %v5949_v18 = vrot.slane %v5948_v10, 4  ;;  %v5957_v41 = vrot.slane %v5955_v29, 4  ;;  %v5534_v17 = vrot.slane %v5532_v21, 7  ;;  %v5963_v44 = vrot.slane %v5961_v47, 5 }
 0x3b4   : > { %6297 = vrot.lane.b32.xlu1 %v10072_v55, %s11403_s27  ;;  %v5549_v3 = vshrl.u32 %v10360_v46, 16  ;;  %v5552_v13 = vshll.u32 %v10360_v46, 16  ;;  %v5542_v56 = vrot.slane %v5540_v36, 7  ;;  %v5001_v60 = vadd.f32 %v10609_v27, %v14586_v23 }
 0x3b5   : > { %v5954_v16 = vsel %vm11591_vm8, %v5949_v18, %v5953_v0  ;;  %v5958_v19 = vor.u32 %v5957_v41, %v5953_v0  ;;  %v5537_v39 = vor.u32 %v5535_v33, %v5534_v17  ;;  %v5538_v59 = vrot.slane %v5534_v17, 4  ;;  %v7309_v41 = vld [vmem:[#allocation2 + $0xc] sm:$0xe] }
 0x3b6   : > { %v13422_v22 = vrot.slane %v5549_v3, 7  ;;  %v5966_v50 = vshrl.u32 %v5741_v53, 16  ;;  %v5545_v45 = vor.u32 %v5543_v25, %v5542_v56  ;;  %v5547_v6 = vrot.slane %v5542_v56, 4  ;;  %v5743_v56 = vld [vmem:[#allocation2 + $0x6c] sm:$0xf] }
 0x3b7   : > { %v5959_v28 = vrot.slane %v5958_v19, 4  ;;  %v5162_v4 = vadd.f32 %v13294_v42, %v5001_v60  ;;  %v5712_v48 = vsel %vm11626_vm10, %v5537_v39, %v5711_v14  ;;  %v5969_v63 = vshll.u32 %v5741_v53, 16  ;;  %v5722_v53 = vld [vmem:[#allocation2 + $0xc8] sm:$0x1] }
 0x3b8   : > { %v5554_v54 = vor.u32 %v5552_v13, %v13422_v22  ;;  %v5555_v1 = vrot.slane %v13422_v22, 4  ;;  %v5968_v26 = vrot.slane %v5966_v50, 4  ;;  %5713 = vst [vmem:[#allocation2 + $0xb4] sm:$0xf] %v5712_v48  ;;  %v5546_v30 = vsel %vm11637_vm11, %v5538_v59, %v5545_v45 }
 0x3b9   : > { %v5716_v37 = vsel %vm11502_vm2, %v5547_v6, %v5715_v31  ;;  %v5964_v42 = vsel %vm11591_vm8, %v5959_v28, %v5963_v44  ;;  %v5196_v58 = vmax.f32 %v5162_v4, 0.0  ;;  %5714 = vst.msk [vmem:[#allocation2 + $0xb8] sm:$0xf] %vm668_vm5, %v5546_v30  ;;  %v5975_v15 = vshll.u32 %v5742_v61, 16  ;;  %v5766_v4 = vld [vmem:[#allocation2 + $0x74] sm:$0x1] }
 0x3ba   : > { %v5719_v12 = vsel %vm11626_vm10, %v5554_v54, %v5718_v8  ;;  %5717 = vst [vmem:[#allocation2 + $0xbc] sm:$0x1] %v5716_v37  ;;  %v10073_v34 = vcombine.low %v5954_v16, %v5964_v42  ;;  %v5979_v57 = vshrl.u32 %v5742_v61, 16  ;;  %v5985_v5 = vshll.u32 %v5765_v11, 16  ;;  %v5744_v16 = vld [vmem:[#allocation2 + $0x70] sm:$0xf] }
 0x3bb   : > { %5720 = vst [vmem:[#allocation2 + $0xc0] sm:$0xf] %v5719_v12  ;;  %v10361_v7 = vpack.c.bf16 %v5196_v58, %v5196_v58  ;;  %v7742_v0 = vshrl.u32 %v7693_v2, 16  ;;  %v5971_v9 = vrot.slane %v5969_v63, 5  ;;  %v5977_v32 = vrot.slane %v5975_v15, 5  ;;  %v11160_v12 = vld [vmem:[%s14556_s5 + $0xc0] sm:$0xff]  }
 0x3bc   : > { %6299 = vrot.lane.b32.xlu1 %v10073_v34, %s11403_s27  ;;  %v7745_v10 = vshll.u32 %v7693_v2, 16  ;;  %v7751_v29 = vshll.u32 %v7694_v40, 16  ;;  %v5981_v47 = vrot.slane %v5979_v57, 4  ;;  %v5987_v43 = vrot.slane %v5985_v5, 5  ;;  %v7695_v2 = vld [vmem:[#allocation2 + $0x24] sm:$0xf]  ;;  %10742 = vmatprep.subr.bf16.mxu1 %v11160_v12 }
 0x3bd   : > { %v5557_v20 = vshrl.u32 %v10361_v7, 16  ;;  %v5560_v49 = vshll.u32 %v10361_v7, 16  ;;  %v5972_v27 = vor.u32 %v5971_v9, %v5968_v26  ;;  %v7744_v55 = vrot.slane %v7742_v0, 4  ;;  %v7726_v57 = vld [vmem:[#allocation2 + $0x2c] sm:$0x1]  ;;  %v11161_v5 = vld [vmem:[%s14556_s5 + $0x100] sm:$0xff]  }
 0x3be   : > { %v7747_v21 = vrot.slane %v7745_v10, 5  ;;  %v7753_v33 = vrot.slane %v7751_v29, 5  ;;  %v5982_v36 = vor.u32 %v5981_v47, %v5977_v32  ;;  %v7755_v25 = vshrl.u32 %v7694_v40, 16  ;;  %v7696_v40 = vld [vmem:[#allocation2 + $0x28] sm:$0xf]  ;;  %v11143_v0 = vld [vmem:[#allocation2 + $0x78] sm:$0xff]   ;;  %10962 = vmatprep.subr.bf16.mxu0 %v11161_v5 }
 0x3bf   : > { %v5559_v46 = vrot.slane %v5557_v20, 7  ;;  %v7761_v18 = vshll.u32 %v7725_v62, 16  ;;  %v5973_v17 = vrot.slane %v5972_v27, 4  ;;  %v6939_v13 = vshrl.u32 %v13439_v35, 16  ;;  %v13471_v29 = vld [vmem:[#allocation2 + $0x1c] sm:$0xf] }
 0x3c0   : > { %v7748_v3 = vor.u32 %v7747_v21, %v7744_v55  ;;  %v6945_v44 = vshll.u32 %v13441_v38, 16  ;;  %v5983_v60 = vrot.slane %v5982_v36, 4  ;;  %v7757_v39 = vrot.slane %v7755_v25, 4  ;;  %v13473_v27 = vld [vmem:[#allocation2 + $0x20] sm:$0x1] }
 0x3c1   : > { %v5562_v19 = vor.u32 %v5560_v49, %v5559_v46  ;;  %v5564_v23 = vrot.slane %v5559_v46, 4  ;;  %v5978_v59 = vsel %vm11591_vm8, %v5973_v17, %v5977_v32  ;;  %v7763_v22 = vrot.slane %v7761_v18, 5  ;;  %v7310_v55 = vld [vmem:[#allocation2 + $0x18] sm:$0xe]  ;;  %v11162_v18 = vld [vmem:[%s14556_s5 + $0x80] sm:$0xff]  }
 0x3c2   : > { %v7749_v14 = vrot.slane %v7748_v3, 4  ;;  %v10130_v50 = vrot.slane %v7309_v41, 9  ;;  %v5988_v31 = vsel %vm11591_vm8, %v5983_v60, %v5987_v43  ;;  %v7758_v28 = vor.u32 %v7757_v39, %v7753_v33  ;;  %v5745_v25 = vld [vmem:[#allocation2 + $0x78] sm:$0xf]  ;;  %10743 = vmatpush3.bf16.msra.mxu1 %v11162_v18  ;;  %v11163_v60 = vld [vmem:[%s14556_s5 + $0xc8] sm:$0xff]  }
 0x3c3   : > { %v5563_v45 = vsel %vm11637_vm11, %v5555_v1, %v5562_v19  ;;  %v5723_v6 = vsel %vm11502_vm2, %v5564_v23, %v5722_v53  ;;  %v10074_v61 = vcombine.low %v5978_v59, %v5988_v31  ;;  %v7375_v54 = vrot.slane %v13439_v35, 5  ;;  %10744 = vmatprep.subr.bf16.mxu1 %v11163_v60  ;;  %v7698_v12 = vld [vmem:[#allocation2 + $0x34] sm:$0xf]  ;;  %v7727_v5 = vld [vmem:[#allocation2 + $0x38] sm:$0x1] }
 0x3c4   : > { %5721 = vst.msk [vmem:[#allocation2 + $0xc4] sm:$0xf] %vm668_vm5, %v5563_v45  ;;  %5724 = vst [vmem:[#allocation2 + $0xc8] sm:$0x1] %v5723_v6  ;;  %v7754_v48 = vsel %vm11591_vm8, %v7749_v14, %v7753_v33  ;;  %v7378_v52 = vrot.slane %v13441_v38, 5  ;;  %v7759_v1 = vrot.slane %v7758_v28, 4 }
 0x3c5   : > { %v5990_v11 = vshrl.u32 %v5743_v56, 16  ;;  %v5993_v24 = vshll.u32 %v5743_v56, 16  ;;  %v5999_v26 = vshll.u32 %v5744_v16, 16  ;;  %6301 = vrot.lane.b32.xlu0 %v10074_v61, %s11403_s27  ;;  %v7376_v30 = vsel %vm12005_vm14, %v10130_v50, %v7375_v54  ;;  %v5746_v50 = vld [vmem:[#allocation2 + $0x7c] sm:$0xf] }
 0x3c6   : > { %v7377_v37 = vrot.slane %v7375_v54, 4  ;;  %v6003_v42 = vshrl.u32 %v5744_v16, 16  ;;  %v6009_v58 = vshll.u32 %v5766_v4, 16  ;;  %v7764_v34 = vsel %vm11591_vm8, %v7759_v1, %v7763_v22  ;;  %v11164_v1 = vld [vmem:[%s14556_s5 + $0x88] sm:$0xff]  }
 0x3c7   : > { %v5992_v63 = vrot.slane %v5990_v11, 4  ;;  %v5995_v15 = vrot.slane %v5993_v24, 5  ;;  %v6001_v7 = vrot.slane %v5999_v26, 5  ;;  %v10194_v62 = vcombine.low %v7754_v48, %v7764_v34  ;;  %v5767_v48 = vld [vmem:[#allocation2 + $0x80] sm:$0x1]  ;;  %10745 = vmatpush3.bf16.msra.mxu1 %v11164_v1  ;;  %v11165_v34 = vld [vmem:[%s14556_s5 + $0xd0] sm:$0xff]  }
 0x3c8   : > { %v7379_v9 = vsel %vm12005_vm14, %v7377_v37, %v7378_v52  ;;  %v6005_v32 = vrot.slane %v6003_v42, 4  ;;  %v6011_v10 = vrot.slane %v6009_v58, 5  ;;  %v7766_v47 = vshrl.u32 %v7695_v2, 16  ;;  %10746 = vmatprep.subr.bf16.mxu1 %v11165_v34  ;;  %v5768_v1 = vld [vmem:[#allocation2 + $0x8c] sm:$0x1] }
 0x3c9   : > { %v10162_v20 = vcombine.low %v7376_v30, %v7379_v9  ;;  %v5996_v49 = vor.u32 %v5995_v15, %v5992_v63  ;;  %v7769_v43 = vshll.u32 %v7695_v2, 16  ;;  %8253 = vrot.lane.b32.xlu1 %v10194_v62, %s11403_s27  ;;  %6783 = vrot.lane.b32.xlu0 %v11143_v0, %s11403_s27  ;;  %v7775_v33 = vshll.u32 %v7696_v40, 16  ;;  %v7697_v30 = vld [vmem:[#allocation2 + $0x30] sm:$0xf]  ;;  %v11146_v0 = vld [vmem:[#allocation2 + $0x84] sm:$0xff]  }
 0x3ca   : > { %v6006_v21 = vor.u32 %v6005_v32, %v6001_v7  ;;  %v7779_v46 = vshrl.u32 %v7696_v40, 16  ;;  %v7785_v36 = vshll.u32 %v7726_v57, 16  ;;  %v7768_v53 = vrot.slane %v7766_v47, 4  ;;  %v11326_v35 = vld [vmem:[#allocation2 + $0x28] sm:$0xf] }
 0x3cb   : > { %v5997_v41 = vrot.slane %v5996_v49, 4  ;;  %v7771_v17 = vrot.slane %v7769_v43, 5  ;;  %v6963_v3 = vshrl.u32 %v13471_v29, 16  ;;  %v7777_v16 = vrot.slane %v7775_v33, 5  ;;  %v11166_v49 = vld [vmem:[%s14556_s5 + $0x90] sm:$0xff]  }
 0x3cc   : > { %v6007_v56 = vrot.slane %v6006_v21, 4  ;;  %v7781_v19 = vrot.slane %v7779_v46, 4  ;;  %v7787_v23 = vrot.slane %v7785_v36, 5  ;;  %v6969_v14 = vshll.u32 %v13473_v27, 16  ;;  %v13512_v33 = vld [vmem:[#allocation2 + $0x2c] sm:$0x1]  ;;  %10747 = vmatpush3.bf16.msra.mxu1 %v11166_v49 }
 0x3cd   : > { %v6002_v39 = vsel %vm11591_vm8, %v5997_v41, %v6001_v7  ;;  %v7772_v59 = vor.u32 %v7771_v17, %v7768_v53  ;;  %v10131_v22 = vrot.slane %v7310_v55, 9  ;;  %7581 = vrot.lane.b32.xlu1 %v10162_v20, %s11403_s27  ;;  %v7382_v31 = vrot.slane %v13471_v29, 5  ;;  %v13507_v20 = vld [vmem:[#allocation2 + $0x28] sm:$0xf]  ;;  %v7311_v41 = vld [vmem:[#allocation2 + $0x24] sm:$0xe] }
 0x3ce   : > { %v6012_v45 = vsel %vm11591_vm8, %v6007_v56, %v6011_v10  ;;  %v7782_v6 = vor.u32 %v7781_v19, %v7777_v16  ;;  %v7385_v28 = vrot.slane %v13473_v27, 5  ;;  %v6014_v54 = vshrl.u32 %v5745_v25, 16  ;;  %v11167_v53 = vld [vmem:[%s14556_s5 + $0xd8] sm:$0xff]   ;;  %v11331_v29 = vld [vmem:[#allocation2 + $0x34] sm:$0xf] }
 0x3cf   : > { %v10075_v4 = vcombine.low %v6002_v39, %v6012_v45  ;;  %v7773_v61 = vrot.slane %v7772_v59, 4  ;;  %v6017_v52 = vshll.u32 %v5745_v25, 16  ;;  %v7383_v24 = vsel %vm12005_vm14, %v10131_v22, %v7382_v31  ;;  %10748 = vmatprep.subr.bf16.mxu1 %v11167_v53  ;;  %v13545_v49 = vld [vmem:[#allocation2 + $0x38] sm:$0x1] }
 0x3d0   : > { %v7783_v11 = vrot.slane %v7782_v6, 4  ;;  %v7384_v26 = vrot.slane %v7382_v31, 4  ;;  %v6023_v2 = vshll.u32 %v5746_v50, 16  ;;  %v6016_v42 = vrot.slane %v6014_v54, 4 }
 0x3d1   : > { %6303 = vrot.lane.b32.xlu0 %v10075_v4, %s11403_s27  ;;  %v7778_v37 = vsel %vm11591_vm8, %v7773_v61, %v7777_v16  ;;  %v6019_v58 = vrot.slane %v6017_v52, 5  ;;  %v6027_v40 = vshrl.u32 %v5746_v50, 16  ;;  %v6033_v57 = vshll.u32 %v5767_v48, 16  ;;  %v11168_v50 = vld [vmem:[%s14556_s5 + $0x98] sm:$0xff]   ;;  %v5748_v4 = vld [vmem:[#allocation2 + $0x88] sm:$0xf] }
 0x3d2   : > { %v7788_v63 = vsel %vm11591_vm8, %v7783_v11, %v7787_v23  ;;  %v7386_v15 = vsel %vm12005_vm14, %v7384_v26, %v7385_v28  ;;  %v6025_v7 = vrot.slane %v6023_v2, 5  ;;  %v7790_v43 = vshrl.u32 %v7697_v30, 16  ;;  %v5747_v23 = vld [vmem:[#allocation2 + $0x84] sm:$0xf]  ;;  %10749 = vmatpush3.bf16.msra.mxu1 %v11168_v50 }
 0x3d3   : > { %v10195_v62 = vcombine.low %v7778_v37, %v7788_v63  ;;  %v10163_v9 = vcombine.low %v7383_v24, %v7386_v15  ;;  %v6020_v32 = vor.u32 %v6019_v58, %v6016_v42  ;;  %v6029_v10 = vrot.slane %v6027_v40, 4  ;;  %v11169_v61 = vld [vmem:[%s14556_s5 + $0xe0] sm:$0xff]  }
 0x3d4   : > { %v6035_v47 = vrot.slane %v6033_v57, 5  ;;  %v7793_v55 = vshll.u32 %v7697_v30, 16  ;;  %v7799_v21 = vshll.u32 %v7698_v12, 16  ;;  %v7803_v25 = vshrl.u32 %v7698_v12, 16  ;;  %v7699_v12 = vld [vmem:[#allocation2 + $0x3c] sm:$0xf]  ;;  %10750 = vmatprep.subr.bf16.mxu1 %v11169_v61 }
 0x3d5   : > { %8255 = vrot.lane.b32.xlu1 %v10195_v62, %s11403_s27  ;;  %6785 = vrot.lane.b32.xlu0 %v11146_v0, %s11403_s27  ;;  %v6021_v46 = vrot.slane %v6020_v32, 4  ;;  %v6030_v36 = vor.u32 %v6029_v10, %v6025_v7  ;;  %v7809_v18 = vshll.u32 %v7727_v5, 16  ;;  %v7792_v17 = vrot.slane %v7790_v43, 4  ;;  %v7700_v57 = vld [vmem:[#allocation2 + $0x40] sm:$0xf]  ;;  %v11147_v43 = vld [vmem:[#allocation2 + $0x90] sm:$0xff]  }
 0x3d6   : > { %v7795_v56 = vrot.slane %v7793_v55, 5  ;;  %v7801_v16 = vrot.slane %v7799_v21, 5  ;;  %v6987_v19 = vshrl.u32 %v13507_v20, 16  ;;  %v7805_v59 = vrot.slane %v7803_v25, 4  ;;  %v7728_v5 = vld [vmem:[#allocation2 + $0x44] sm:$0x1] }
 0x3d7   : > { %v6026_v60 = vsel %vm11591_vm8, %v6021_v46, %v6025_v7  ;;  %v6031_v39 = vrot.slane %v6030_v36, 4  ;;  %v7811_v22 = vrot.slane %v7809_v18, 5  ;;  %v6993_v6 = vshll.u32 %v13512_v33, 16  ;;  %v13543_v10 = vld [vmem:[#allocation2 + $0x34] sm:$0xf]  ;;  %v11170_v36 = vld [vmem:[%s14556_s5 + $0xa0] sm:$0xff]  }
 0x3d8   : > { %v7796_v45 = vor.u32 %v7795_v56, %v7792_v17  ;;  %v10132_v31 = vrot.slane %v7311_v41, 9  ;;  %v7389_v28 = vrot.slane %v13507_v20, 5  ;;  %v7806_v54 = vor.u32 %v7805_v59, %v7801_v16  ;;  %v7312_v17 = vld [vmem:[#allocation2 + $0x30] sm:$0xe]  ;;  %v11173_v56 = vld [vmem:[%s14556_s5 + $0xe8] sm:$0xff]   ;;  %10751 = vmatpush3.bf16.msra.mxu1 %v11170_v36 }
 0x3d9   : > { %7583 = vrot.lane.b32.xlu1 %v10163_v9, %s11403_s27  ;;  %v6036_v48 = vsel %vm11591_vm8, %v6031_v39, %v6035_v47  ;;  %v7392_v52 = vrot.slane %v13512_v33, 5  ;;  %v6038_v11 = vshrl.u32 %v5747_v23, 16  ;;  %v6041_v58 = vshll.u32 %v5747_v23, 16  ;;  %v5749_v59 = vld [vmem:[#allocation2 + $0x90] sm:$0xf]  ;;  %10752 = vmatprep.subr.bf16.mxu1 %v11173_v56  ;;  %v11150_v56 = vld [vmem:[#allocation2 + $0x9c] sm:$0xff]  }
 0x3da   : > { %v10076_v24 = vcombine.low %v6026_v60, %v6036_v48  ;;  %v7797_v26 = vrot.slane %v7796_v45, 4  ;;  %v7390_v2 = vsel %vm12005_vm14, %v10132_v31, %v7389_v28  ;;  %v7391_v30 = vrot.slane %v7389_v28, 4  ;;  %v11174_v28 = vld [vmem:[%s14556_s5 + $0xa8] sm:$0xff]  }
 0x3db   : > { %v7807_v37 = vrot.slane %v7806_v54, 4  ;;  %v6040_v42 = vrot.slane %v6038_v11, 4  ;;  %v6047_v40 = vshll.u32 %v5748_v4, 16  ;;  %v6051_v15 = vshrl.u32 %v5748_v4, 16 }
 0x3dc   : > { %6305 = vrot.lane.b32.xlu0 %v10076_v24, %s11403_s27  ;;  %v7802_v34 = vsel %vm11591_vm8, %v7797_v26, %v7801_v16  ;;  %v7393_v63 = vsel %vm12005_vm14, %v7391_v30, %v7392_v52  ;;  %v6057_v7 = vshll.u32 %v5768_v1, 16  ;;  %v6043_v9 = vrot.slane %v6041_v58, 5  ;;  %v5750_v26 = vld [vmem:[#allocation2 + $0x94] sm:$0xf]  ;;  %10753 = vmatpush3.bf16.msra.mxu1 %v11174_v28 }
 0x3dd   : > { %v7812_v62 = vsel %vm11591_vm8, %v7807_v37, %v7811_v22  ;;  %v10164_v0 = vcombine.low %v7390_v2, %v7393_v63  ;;  %v6049_v32 = vrot.slane %v6047_v40, 5  ;;  %v6053_v55 = vrot.slane %v6051_v15, 4  ;;  %v5769_v37 = vld [vmem:[#allocation2 + $0x98] sm:$0x1]  ;;  %v11176_v40 = vld [vmem:[%s14556_s5 + $0xf0] sm:$0xff]  }
 0x3de   : > { %v10196_v47 = vcombine.low %v7802_v34, %v7812_v62  ;;  %v6059_v21 = vrot.slane %v6057_v7, 5  ;;  %v7814_v46 = vshrl.u32 %v7699_v12, 16  ;;  %v6044_v25 = vor.u32 %v6043_v9, %v6040_v42  ;;  %10754 = vmatprep.subr.bf16.mxu1 %v11176_v40 }
 0x3df   : > { %v7817_v18 = vshll.u32 %v7699_v12, 16  ;;  %v7823_v41 = vshll.u32 %v7700_v57, 16  ;;  %v7827_v53 = vshrl.u32 %v7700_v57, 16  ;;  %v6054_v16 = vor.u32 %v6053_v55, %v6049_v32  ;;  %v7702_v55 = vld [vmem:[#allocation2 + $0x4c] sm:$0xf] }
 0x3e0   : > { %8257 = vrot.lane.b32.xlu1 %v10196_v47, %s11403_s27  ;;  %6787 = vrot.lane.b32.xlu0 %v11147_v43, %s11403_s27  ;;  %v7816_v23 = vrot.slane %v7814_v46, 4  ;;  %v7833_v60 = vshll.u32 %v7728_v5, 16  ;;  %v7011_v39 = vshrl.u32 %v13543_v10, 16  ;;  %v6045_v22 = vrot.slane %v6044_v25, 4 }
 0x3e1   : > { %v7819_v50 = vrot.slane %v7817_v18, 5  ;;  %v7825_v45 = vrot.slane %v7823_v41, 5  ;;  %v7829_v31 = vrot.slane %v7827_v53, 4  ;;  %v6055_v4 = vrot.slane %v6054_v16, 4  ;;  %v6890_v41 = vld [vmem:[#allocation2 + $0x40] sm:$0xf] }
 0x3e2   : > { %v7835_v61 = vrot.slane %v7833_v60, 5  ;;  %v7017_v48 = vshll.u32 %v13545_v49, 16  ;;  %v10133_v54 = vrot.slane %v7312_v17, 9  ;;  %v6050_v52 = vsel %vm11591_vm8, %v6045_v22, %v6049_v32  ;;  %v7313_v53 = vld [vmem:[#allocation2 + $0x3c] sm:$0xe]  ;;  %v11177_v17 = vld [vmem:[%s14556_s5 + $0xb0] sm:$0xff]  }
 0x3e3   : > { %v7820_v1 = vor.u32 %v7819_v50, %v7816_v23  ;;  %v7830_v11 = vor.u32 %v7829_v31, %v7825_v45  ;;  %v7396_v24 = vrot.slane %v13543_v10, 5  ;;  %v6060_v2 = vsel %vm11591_vm8, %v6055_v4, %v6059_v21  ;;  %v7729_v21 = vld [vmem:[#allocation2 + $0x50] sm:$0x1]  ;;  %v11180_v22 = vld [vmem:[%s14556_s5 + $0xf8] sm:$0xff]   ;;  %v6891_v4 = vld [vmem:[#allocation2 + $0x44] sm:$0x1]  ;;  %10755 = vmatpush3.bf16.msra.mxu1 %v11177_v17 }
 0x3e4   : > { %7585 = vrot.lane.b32.xlu1 %v10164_v0, %s11403_s27  ;;  %v7399_v30 = vrot.slane %v13545_v49, 5  ;;  %v6062_v42 = vshrl.u32 %v5749_v59, 16  ;;  %v6065_v58 = vshll.u32 %v5749_v59, 16  ;;  %v10077_v12 = vcombine.low %v6050_v52, %v6060_v2  ;;  %v7701_v0 = vld [vmem:[#allocation2 + $0x48] sm:$0xf]  ;;  %10756 = vmatprep.subr.bf16.mxu1 %v11180_v22 }
 0x3e5   : > { %v7821_v34 = vrot.slane %v7820_v1, 4  ;;  %v7831_v63 = vrot.slane %v7830_v11, 4  ;;  %v7397_v15 = vsel %vm12005_vm14, %v10133_v54, %v7396_v24  ;;  %v7398_v7 = vrot.slane %v7396_v24, 4  ;;  %v5751_v11 = vld [vmem:[#allocation2 + $0x9c] sm:$0xf] }
 0x3e6   : > { %v6064_v57 = vrot.slane %v6062_v42, 4  ;;  %v6067_v5 = vrot.slane %v6065_v58, 5  ;;  %v6071_v62 = vshll.u32 %v5750_v26, 16  ;;  %6307 = vrot.lane.b32.xlu0 %v10077_v12, %s11403_s27  ;;  %v6075_v47 = vshrl.u32 %v5750_v26, 16  ;;  %v11181_v24 = vld [vmem:[%s14556_s5 + $0xb8] sm:$0xff]  }
 0x3e7   : > { %v7826_v9 = vsel %vm11591_vm8, %v7821_v34, %v7825_v45  ;;  %v7836_v32 = vsel %vm11591_vm8, %v7831_v63, %v7835_v61  ;;  %v6081_v43 = vshll.u32 %v5769_v37, 16  ;;  %v7400_v36 = vsel %vm12005_vm14, %v7398_v7, %v7399_v30  ;;  %v5752_v42 = vld [vmem:[#allocation2 + $0xa0] sm:$0xf]  ;;  %10757 = vmatpush3.bf16.msra.mxu1 %v11181_v24 }
 0x3e8   : > { %v10197_v46 = vcombine.low %v7826_v9, %v7836_v32  ;;  %v6068_v25 = vor.u32 %v6067_v5, %v6064_v57  ;;  %v6073_v18 = vrot.slane %v6071_v62, 5  ;;  %v10165_v16 = vcombine.low %v7397_v15, %v7400_v36  ;;  %v5770_v9 = vld [vmem:[#allocation2 + $0xa4] sm:$0x1] }
 0x3e9   : > { %v6077_v23 = vrot.slane %v6075_v47, 4  ;;  %v6083_v60 = vrot.slane %v6081_v43, 5  ;;  %v7838_v59 = vshrl.u32 %v7701_v0, 16  ;;  %v7841_v45 = vshll.u32 %v7701_v0, 16 }
 0x3ea   : > { %8259 = vrot.lane.b32.xlu1 %v10197_v46, %s11403_s27  ;;  %v6069_v50 = vrot.slane %v6068_v25, 4  ;;  %v7847_v31 = vshll.u32 %v7702_v55, 16  ;;  %v7851_v28 = vshrl.u32 %v7702_v55, 16  ;;  %6789 = vrot.lane.b32.xlu0 %v11150_v56, %s11403_s27  ;;  %v7857_v52 = vshll.u32 %v7729_v21, 16  ;;  %v7703_v46 = vld [vmem:[#allocation2 + $0x54] sm:$0xf] }
 0x3eb   : > { %v6078_v61 = vor.u32 %v6077_v23, %v6073_v18  ;;  %v7840_v54 = vrot.slane %v7838_v59, 4  ;;  %v10134_v1 = vrot.slane %v7313_v53, 9  ;;  %v7843_v2 = vrot.slane %v7841_v45, 5  ;;  %v7704_v53 = vld [vmem:[#allocation2 + $0x58] sm:$0xf] }
 0x3ec   : > { %v6074_v26 = vsel %vm11591_vm8, %v6069_v50, %v6073_v18  ;;  %v7849_v30 = vrot.slane %v7847_v31, 5  ;;  %v7853_v37 = vrot.slane %v7851_v28, 4  ;;  %v7859_v40 = vrot.slane %v7857_v52, 5  ;;  %v6893_v59 = vld [vmem:[#allocation2 + $0x4c] sm:$0xf] }
 0x3ed   : > { %v6079_v58 = vrot.slane %v6078_v61, 4  ;;  %v7403_v12 = vrot.slane %v6890_v41, 5  ;;  %v7406_v34 = vrot.slane %v6891_v4, 5  ;;  %v7844_v63 = vor.u32 %v7843_v2, %v7840_v54  ;;  %v6894_v28 = vld [vmem:[#allocation2 + $0x50] sm:$0x1]  ;;  %v11151_v61 = vld [vmem:[#allocation2 + $0xa8] sm:$0xff]  }
 0x3ee   : > { %7587 = vrot.lane.b32.xlu1 %v10165_v16, %s11403_s27  ;;  %v7854_v15 = vor.u32 %v7853_v37, %v7849_v30  ;;  %v6086_v7 = vshrl.u32 %v5751_v11, 16  ;;  %v6089_v57 = vshll.u32 %v5751_v11, 16  ;;  %v6095_v32 = vshll.u32 %v5752_v42, 16  ;;  %v7314_v4 = vld [vmem:[#allocation2 + $0x48] sm:$0xe] }
 0x3ef   : > { %v6084_v5 = vsel %vm11591_vm8, %v6079_v58, %v6083_v60  ;;  %v7404_v62 = vsel %vm12005_vm14, %v10134_v1, %v7403_v12  ;;  %v7405_v0 = vrot.slane %v7403_v12, 4  ;;  %v7845_v43 = vrot.slane %v7844_v63, 4  ;;  %v7730_v60 = vld [vmem:[#allocation2 + $0x5c] sm:$0x1]  ;;  %v5753_v37 = vld [vmem:[#allocation2 + $0xa8] sm:$0xf] }
 0x3f0   : > { %v10078_v47 = vcombine.low %v6074_v26, %v6084_v5  ;;  %v7855_v55 = vrot.slane %v7854_v15, 4  ;;  %v6088_v21 = vrot.slane %v6086_v7, 4  ;;  %v6091_v25 = vrot.slane %v6089_v57, 5 }
 0x3f1   : > { %v7407_v36 = vsel %vm12005_vm14, %v7405_v0, %v7406_v34  ;;  %v6097_v18 = vrot.slane %v6095_v32, 5  ;;  %v6099_v41 = vshrl.u32 %v5752_v42, 16  ;;  %v7850_v17 = vsel %vm11591_vm8, %v7845_v43, %v7849_v30  ;;  %v5754_v0 = vld [vmem:[#allocation2 + $0xac] sm:$0xf] }
 0x3f2   : > { %6309 = vrot.lane.b32.xlu0 %v10078_v47, %s11403_s27  ;;  %v7860_v56 = vsel %vm11591_vm8, %v7855_v55, %v7859_v40  ;;  %v10166_v16 = vcombine.low %v7404_v62, %v7407_v36  ;;  %v6105_v23 = vshll.u32 %v5770_v9, 16  ;;  %v6092_v50 = vor.u32 %v6091_v25, %v6088_v21  ;;  %v5771_v55 = vld [vmem:[#allocation2 + $0xb0] sm:$0x1] }
 0x3f3   : > { %v10198_v22 = vcombine.low %v7850_v17, %v7860_v56  ;;  %v6101_v45 = vrot.slane %v6099_v41, 4  ;;  %v7862_v31 = vshrl.u32 %v7703_v46, 16  ;;  %v7865_v52 = vshll.u32 %v7703_v46, 16  ;;  %v7705_v41 = vld [vmem:[#allocation2 + $0x60] sm:$0xf] }
 0x3f4   : > { %v6107_v54 = vrot.slane %v6105_v23, 5  ;;  %v7871_v1 = vshll.u32 %v7704_v53, 16  ;;  %v7875_v11 = vshrl.u32 %v7704_v53, 16  ;;  %v6093_v24 = vrot.slane %v6092_v50, 4  ;;  %v7706_v23 = vld [vmem:[#allocation2 + $0x64] sm:$0xf] }
 0x3f5   : > { %8261 = vrot.lane.b32.xlu1 %v10198_v22, %s11403_s27  ;;  %v6102_v26 = vor.u32 %v6101_v45, %v6097_v18  ;;  %v7864_v2 = vrot.slane %v7862_v31, 4  ;;  %v7881_v30 = vshll.u32 %v7730_v60, 16  ;;  %v7867_v42 = vrot.slane %v7865_v52, 5  ;;  %v7731_v45 = vld [vmem:[#allocation2 + $0x68] sm:$0x1] }
 0x3f6   : > { %6791 = vrot.lane.b32.xlu0 %v11151_v61, %s11403_s27  ;;  %v7873_v58 = vrot.slane %v7871_v1, 5  ;;  %v7877_v40 = vrot.slane %v7875_v11, 4  ;;  %v10135_v12 = vrot.slane %v7314_v4, 9  ;;  %v6098_v34 = vsel %vm11591_vm8, %v6093_v24, %v6097_v18  ;;  %v6897_v52 = vld [vmem:[#allocation2 + $0x5c] sm:$0x1]  ;;  %v11154_v11 = vld [vmem:[#allocation2 + $0xb4] sm:$0xff]  }
 0x3f7   : > { %v6103_v63 = vrot.slane %v6102_v26, 4  ;;  %v7883_v15 = vrot.slane %v7881_v30, 5  ;;  %v7410_v7 = vrot.slane %v6893_v59, 5  ;;  %v7868_v57 = vor.u32 %v7867_v42, %v7864_v2  ;;  %v7315_v1 = vld [vmem:[#allocation2 + $0x54] sm:$0xe] }
 0x3f8   : > { %v7878_v5 = vor.u32 %v7877_v40, %v7873_v58  ;;  %v7413_v62 = vrot.slane %v6894_v28, 5  ;;  %v6110_v9 = vshrl.u32 %v5753_v37, 16  ;;  %v6113_v21 = vshll.u32 %v5753_v37, 16 }
 0x3f9   : > { %7589 = vrot.lane.b32.xlu1 %v10166_v16, %s11403_s27  ;;  %v6108_v32 = vsel %vm11591_vm8, %v6103_v63, %v6107_v54  ;;  %v7411_v47 = vsel %vm12005_vm14, %v10135_v12, %v7410_v7  ;;  %v7412_v43 = vrot.slane %v7410_v7, 4  ;;  %v7869_v36 = vrot.slane %v7868_v57, 4  ;;  %v6896_v54 = vld [vmem:[#allocation2 + $0x58] sm:$0xf]  ;;  %v5755_v12 = vld [vmem:[#allocation2 + $0xb4] sm:$0xf] }
 0x3fa   : > { %v10079_v46 = vcombine.low %v6098_v34, %v6108_v32  ;;  %v7879_v25 = vrot.slane %v7878_v5, 4  ;;  %v6112_v18 = vrot.slane %v6110_v9, 4  ;;  %v6115_v17 = vrot.slane %v6113_v21, 5  ;;  %v5756_v57 = vld [vmem:[#allocation2 + $0xb8] sm:$0xf]  ;;  %v13624_v21 = vpop.permute.xlu0 %6765 }
 0x3fb   : > { %v7414_v53 = vsel %vm12005_vm14, %v7412_v43, %v7413_v62  ;;  %v6119_v56 = vshll.u32 %v5754_v0, 16  ;;  %v6123_v16 = vshrl.u32 %v5754_v0, 16  ;;  %v7874_v60 = vsel %vm11591_vm8, %v7869_v36, %v7873_v58 }
 0x3fc   : > { %6311 = vrot.lane.b32.xlu0 %v10079_v46, %s11403_s27  ;;  %v7884_v59 = vsel %vm11591_vm8, %v7879_v25, %v7883_v15  ;;  %v10167_v22 = vcombine.low %v7411_v47, %v7414_v53  ;;  %v6129_v50 = vshll.u32 %v5771_v55, 16  ;;  %v6116_v28 = vor.u32 %v6115_v17, %v6112_v18  ;;  %v5772_v25 = vld [vmem:[#allocation2 + $0xbc] sm:$0x1] }
 0x3fd   : > { %v10199_v31 = vcombine.low %v7874_v60, %v7884_v59  ;;  %v6121_v4 = vrot.slane %v6119_v56, 5  ;;  %v6125_v61 = vrot.slane %v6123_v16, 4  ;;  %v7886_v26 = vshrl.u32 %v7705_v41, 16 }
 0x3fe   : > { %v6131_v24 = vrot.slane %v6129_v50, 5  ;;  %v7889_v2 = vshll.u32 %v7705_v41, 16  ;;  %v7895_v30 = vshll.u32 %v7706_v23, 16  ;;  %v6117_v37 = vrot.slane %v6116_v28, 4 }
 0x3ff   : > { %8263 = vrot.lane.b32.xlu1 %v10199_v31, %s11403_s27  ;;  %v6126_v42 = vor.u32 %v6125_v61, %v6121_v4  ;;  %v7899_v58 = vshrl.u32 %v7706_v23, 16  ;;  %v7905_v40 = vshll.u32 %v7731_v45, 16  ;;  %v7888_v34 = vrot.slane %v7886_v26, 4  ;;  %v7707_v23 = vld [vmem:[#allocation2 + $0x6c] sm:$0xf] }
 0x400   : > { %6793 = vrot.lane.b32.xlu0 %v11154_v11, %s11403_s27  ;;  %v7891_v63 = vrot.slane %v7889_v2, 5  ;;  %v7897_v15 = vrot.slane %v7895_v30, 5  ;;  %v10136_v7 = vrot.slane %v7315_v1, 9  ;;  %v6122_v5 = vsel %vm11591_vm8, %v6117_v37, %v6121_v4  ;;  %v7708_v61 = vld [vmem:[#allocation2 + $0x70] sm:$0xf]  ;;  %v11155_v30 = vld [vmem:[#allocation2 + $0xc0] sm:$0xff]  }
 0x401   : > { %v6127_v62 = vrot.slane %v6126_v42, 4  ;;  %v7901_v0 = vrot.slane %v7899_v58, 4  ;;  %v7907_v9 = vrot.slane %v7905_v40, 5  ;;  %v7417_v47 = vrot.slane %v6896_v54, 5  ;;  %v7732_v11 = vld [vmem:[#allocation2 + $0x74] sm:$0x1]  ;;  %v13638_v40 = vpop.permute.xlu0 %6767 }
 0x402   : > { %v7892_v32 = vor.u32 %v7891_v63, %v7888_v34  ;;  %v7420_v43 = vrot.slane %v6897_v52, 5  ;;  %v6134_v55 = vshrl.u32 %v5755_v12, 16  ;;  %v6137_v18 = vshll.u32 %v5755_v12, 16  ;;  %v7709_v26 = vld [vmem:[#allocation2 + $0x78] sm:$0xf] }
 0x403   : > { %7591 = vrot.lane.b32.xlu1 %v10167_v22, %s11403_s27  ;;  %v6132_v46 = vsel %vm11591_vm8, %v6127_v62, %v6131_v24  ;;  %v7902_v36 = vor.u32 %v7901_v0, %v7897_v15  ;;  %v6143_v41 = vshll.u32 %v5756_v57, 16  ;;  %v7418_v56 = vsel %vm12005_vm14, %v10136_v7, %v7417_v47  ;;  %v7710_v7 = vld [vmem:[#allocation2 + $0x7c] sm:$0xf]  ;;  %v7733_v0 = vld [vmem:[#allocation2 + $0x80] sm:$0x1] }
 0x404   : > { %v10080_v53 = vcombine.low %v6122_v5, %v6132_v46  ;;  %v7893_v17 = vrot.slane %v7892_v32, 4  ;;  %v7419_v16 = vrot.slane %v7417_v47, 4  ;;  %v6136_v59 = vrot.slane %v6134_v55, 4  ;;  %v7316_v46 = vld [vmem:[#allocation2 + $0x60] sm:$0xe] }
 0x405   : > { %v7903_v60 = vrot.slane %v7902_v36, 4  ;;  %v6139_v50 = vrot.slane %v6137_v18, 5  ;;  %v6145_v45 = vrot.slane %v6143_v41, 5  ;;  %v6147_v28 = vshrl.u32 %v5756_v57, 16 }
 0x406   : > { %6313 = vrot.lane.b32.xlu0 %v10080_v53, %s11403_s27  ;;  %v7898_v22 = vsel %vm11591_vm8, %v7893_v17, %v7897_v15  ;;  %v7421_v31 = vsel %vm12005_vm14, %v7419_v16, %v7420_v43  ;;  %v6153_v4 = vshll.u32 %v5772_v25, 16  ;;  %v7910_v24 = vshrl.u32 %v7707_v23, 16  ;;  %v6899_v53 = vld [vmem:[#allocation2 + $0x64] sm:$0xf] }
 0x407   : > { %v7908_v54 = vsel %vm11591_vm8, %v7903_v60, %v7907_v9  ;;  %v10168_v52 = vcombine.low %v7418_v56, %v7421_v31  ;;  %v6140_v1 = vor.u32 %v6139_v50, %v6136_v59  ;;  %v6149_v37 = vrot.slane %v6147_v28, 4  ;;  %v6900_v60 = vld [vmem:[#allocation2 + $0x68] sm:$0x1]  ;;  %v7711_v31 = vld [vmem:[#allocation2 + $0x84] sm:$0xf]  ;;  %v13647_v28 = vpop.permute.xlu1 %6285 }
 0x408   : > { %v10200_v2 = vcombine.low %v7898_v22, %v7908_v54  ;;  %v6155_v42 = vrot.slane %v6153_v4, 5  ;;  %v7913_v58 = vshll.u32 %v7707_v23, 16  ;;  %v7912_v34 = vrot.slane %v7910_v24, 4  ;;  %v13649_v4 = vpop.permute.xlu0 %6769 }
 0x409   : > { %v6141_v12 = vrot.slane %v6140_v1, 4  ;;  %v7919_v63 = vshll.u32 %v7708_v61, 16  ;;  %v7923_v15 = vshrl.u32 %v7708_v61, 16  ;;  %v6150_v57 = vor.u32 %v6149_v37, %v6145_v45 }
 0x40a   : > { %8265 = vrot.lane.b32.xlu1 %v10200_v2, %s11403_s27  ;;  %6795 = vrot.lane.b32.xlu0 %v11155_v30, %s11403_s27  ;;  %v7915_v5 = vrot.slane %v7913_v58, 5  ;;  %v7929_v62 = vshll.u32 %v7732_v11, 16  ;;  %v7934_v9 = vshrl.u32 %v7709_v26, 16  ;;  %v7937_v55 = vshll.u32 %v7709_v26, 16  ;;  %v7712_v30 = vld [vmem:[#allocation2 + $0x88] sm:$0xf] }
 0x40b   : > { %v6146_v32 = vsel %vm11591_vm8, %v6141_v12, %v6145_v45  ;;  %v7921_v47 = vrot.slane %v7919_v63, 5  ;;  %v7925_v43 = vrot.slane %v7923_v15, 4  ;;  %v6151_v36 = vrot.slane %v6150_v57, 4  ;;  %v7734_v12 = vld [vmem:[#allocation2 + $0x8c] sm:$0x1] }
 0x40c   : > { %v7916_v25 = vor.u32 %v7915_v5, %v7912_v34  ;;  %v7931_v18 = vrot.slane %v7929_v62, 5  ;;  %v7936_v41 = vrot.slane %v7934_v9, 4  ;;  %v7939_v56 = vrot.slane %v7937_v55, 5  ;;  %v6902_v5 = vld [vmem:[#allocation2 + $0x70] sm:$0xf] }
 0x40d   : > { %v7926_v17 = vor.u32 %v7925_v43, %v7921_v47  ;;  %v7943_v16 = vshll.u32 %v7710_v7, 16  ;;  %v7947_v23 = vshrl.u32 %v7710_v7, 16  ;;  %v6156_v59 = vsel %vm11591_vm8, %v6151_v36, %v6155_v42  ;;  %v7317_v62 = vld [vmem:[#allocation2 + $0x6c] sm:$0xe]  ;;  %v6903_v55 = vld [vmem:[#allocation2 + $0x74] sm:$0x1] }
 0x40e   : > { %7593 = vrot.lane.b32.xlu1 %v10168_v52, %s11403_s27  ;;  %v7917_v50 = vrot.slane %v7916_v25, 4  ;;  %v7953_v45 = vshll.u32 %v7733_v0, 16  ;;  %v10137_v22 = vrot.slane %v7316_v46, 9  ;;  %v10081_v61 = vcombine.low %v6146_v32, %v6156_v59  ;;  %v13658_v0 = vpop.permute.xlu1 %6287 }
 0x40f   : > { %v7927_v54 = vrot.slane %v7926_v17, 4  ;;  %v7940_v1 = vor.u32 %v7939_v56, %v7936_v41  ;;  %v7945_v11 = vrot.slane %v7943_v16, 5  ;;  %v7949_v26 = vrot.slane %v7947_v23, 4  ;;  %v7713_v41 = vld [vmem:[#allocation2 + $0x90] sm:$0xf] }
 0x410   : > { %v7922_v24 = vsel %vm11591_vm8, %v7917_v50, %v7921_v47  ;;  %v7955_v52 = vrot.slane %v7953_v45, 5  ;;  %v7424_v2 = vrot.slane %v6899_v53, 5  ;;  %6315 = vrot.lane.b32.xlu0 %v10081_v61, %s11403_s27  ;;  %v7427_v58 = vrot.slane %v6900_v60, 5  ;;  %v13665_v53 = vpop.permute.xlu0 %6771 }
 0x411   : > { %v7932_v37 = vsel %vm11591_vm8, %v7927_v54, %v7931_v18  ;;  %v7941_v42 = vrot.slane %v7940_v1, 4  ;;  %v7958_v34 = vshrl.u32 %v7711_v31, 16  ;;  %v7950_v15 = vor.u32 %v7949_v26, %v7945_v11  ;;  %v7735_v1 = vld [vmem:[#allocation2 + $0x98] sm:$0x1] }
 0x412   : > { %v10201_v63 = vcombine.low %v7922_v24, %v7932_v37  ;;  %v7425_v7 = vsel %vm12005_vm14, %v10137_v22, %v7424_v2  ;;  %v7426_v57 = vrot.slane %v7424_v2, 4  ;;  %v7961_v47 = vshll.u32 %v7711_v31, 16  ;;  %v7714_v22 = vld [vmem:[#allocation2 + $0x94] sm:$0xf]  ;;  %v6905_v37 = vld [vmem:[#allocation2 + $0x7c] sm:$0xf] }
 0x413   : > { %v7946_v9 = vsel %vm11591_vm8, %v7941_v42, %v7945_v11  ;;  %v7960_v32 = vrot.slane %v7958_v34, 4  ;;  %v7967_v43 = vshll.u32 %v7712_v30, 16  ;;  %v7951_v46 = vrot.slane %v7950_v15, 4  ;;  %v13672_v42 = vpop.permute.xlu1 %6289 }
 0x414   : > { %8267 = vrot.lane.b32.xlu1 %v10201_v63, %s11403_s27  ;;  %v7428_v36 = vsel %vm12005_vm14, %v7426_v57, %v7427_v58  ;;  %v7971_v25 = vshrl.u32 %v7712_v30, 16  ;;  %v7977_v18 = vshll.u32 %v7734_v12, 16  ;;  %v7963_v56 = vrot.slane %v7961_v47, 5  ;;  %v7318_v63 = vld [vmem:[#allocation2 + $0x78] sm:$0xe] }
 0x415   : > { %v10169_v17 = vcombine.low %v7425_v7, %v7428_v36  ;;  %v7969_v16 = vrot.slane %v7967_v43, 5  ;;  %v10138_v23 = vrot.slane %v7317_v62, 9  ;;  %v7956_v60 = vsel %vm11591_vm8, %v7951_v46, %v7955_v52  ;;  %v6906_v62 = vld [vmem:[#allocation2 + $0x80] sm:$0x1]  ;;  %v7715_v46 = vld [vmem:[#allocation2 + $0x9c] sm:$0xf] }
 0x416   : > { %v7973_v59 = vrot.slane %v7971_v25, 4  ;;  %v7979_v50 = vrot.slane %v7977_v18, 5  ;;  %v7431_v45 = vrot.slane %v6902_v5, 5  ;;  %v10202_v31 = vcombine.low %v7946_v9, %v7956_v60  ;;  %v13677_v9 = vpop.permute.xlu0 %6773  ;;  %v7716_v36 = vld [vmem:[#allocation2 + $0xa0] sm:$0xf] }
 0x417   : > { %v7964_v61 = vor.u32 %v7963_v56, %v7960_v32  ;;  %v7434_v54 = vrot.slane %v6903_v55, 5  ;;  %v7982_v11 = vshrl.u32 %v7713_v41, 16  ;;  %v7985_v30 = vshll.u32 %v7713_v41, 16 }
 0x418   : > { %7595 = vrot.lane.b32.xlu1 %v10169_v17, %s11403_s27  ;;  %v7974_v24 = vor.u32 %v7973_v59, %v7969_v16  ;;  %v7432_v26 = vsel %vm12005_vm14, %v10138_v23, %v7431_v45  ;;  %v7433_v2 = vrot.slane %v7431_v45, 4  ;;  %8269 = vrot.lane.b32.xlu0 %v10202_v31, %s11403_s27  ;;  %v7991_v12 = vshll.u32 %v7714_v22, 16  ;;  %v7736_v45 = vld [vmem:[#allocation2 + $0xa4] sm:$0x1] }
 0x419   : > { %v7965_v52 = vrot.slane %v7964_v61, 4  ;;  %v7984_v58 = vrot.slane %v7982_v11, 4  ;;  %v7995_v34 = vshrl.u32 %v7714_v22, 16  ;;  %v7987_v57 = vrot.slane %v7985_v30, 5 }
 0x41a   : > { %v7975_v15 = vrot.slane %v7974_v24, 4  ;;  %v7435_v7 = vsel %vm12005_vm14, %v7433_v2, %v7434_v54  ;;  %v8001_v5 = vshll.u32 %v7735_v1, 16  ;;  %v7993_v43 = vrot.slane %v7991_v12, 5  ;;  %v6908_v54 = vld [vmem:[#allocation2 + $0x88] sm:$0xf]  ;;  %v13684_v1 = vpop.permute.xlu1 %6291 }
 0x41b   : > { %v7970_v32 = vsel %vm11591_vm8, %v7965_v52, %v7969_v16  ;;  %v10170_v47 = vcombine.low %v7432_v26, %v7435_v7  ;;  %v7997_v55 = vrot.slane %v7995_v34, 4  ;;  %v7988_v18 = vor.u32 %v7987_v57, %v7984_v58  ;;  %v7319_v2 = vld [vmem:[#allocation2 + $0x84] sm:$0xe]  ;;  %v6909_v12 = vld [vmem:[#allocation2 + $0x8c] sm:$0x1]  ;;  %v13691_v34 = vpop.permute.xlu0 %6775 }
 0x41c   : > { %v7980_v25 = vsel %vm11591_vm8, %v7975_v15, %v7979_v50  ;;  %v8003_v41 = vrot.slane %v8001_v5, 5  ;;  %v10139_v17 = vrot.slane %v7318_v63, 9  ;;  %v7438_v60 = vrot.slane %v6905_v37, 5  ;;  %v7717_v5 = vld [vmem:[#allocation2 + $0xa8] sm:$0xf] }
 0x41d   : > { %v10203_v56 = vcombine.low %v7970_v32, %v7980_v25  ;;  %7597 = vrot.lane.b32.xlu1 %v10170_v47, %s11403_s27  ;;  %v7998_v23 = vor.u32 %v7997_v55, %v7993_v43  ;;  %v7441_v59 = vrot.slane %v6906_v62, 5  ;;  %v7989_v22 = vrot.slane %v7988_v18, 4  ;;  %v7718_v62 = vld [vmem:[#allocation2 + $0xac] sm:$0xf] }
 0x41e   : > { %v8006_v16 = vshrl.u32 %v7715_v46, 16  ;;  %v8009_v31 = vshll.u32 %v7715_v46, 16  ;;  %v8015_v61 = vshll.u32 %v7716_v36, 16  ;;  %v7439_v11 = vsel %vm12005_vm14, %v10139_v17, %v7438_v60  ;;  %v7737_v17 = vld [vmem:[#allocation2 + $0xb0] sm:$0x1] }
 0x41f   : > { %8271 = vrot.lane.b32.xlu0 %v10203_v56, %s11403_s27  ;;  %v7999_v50 = vrot.slane %v7998_v23, 4  ;;  %v7440_v24 = vrot.slane %v7438_v60, 4  ;;  %v8019_v26 = vshrl.u32 %v7716_v36, 16  ;;  %v7994_v30 = vsel %vm11591_vm8, %v7989_v22, %v7993_v43  ;;  %v13699_v22 = vpop.permute.xlu1 %6293 }
 0x420   : > { %v8008_v37 = vrot.slane %v8006_v16, 4  ;;  %v8011_v52 = vrot.slane %v8009_v31, 5  ;;  %v8017_v58 = vrot.slane %v8015_v61, 5  ;;  %v8025_v57 = vshll.u32 %v7736_v45, 16  ;;  %v6912_v45 = vld [vmem:[#allocation2 + $0x98] sm:$0x1] }
 0x421   : > { %v8004_v63 = vsel %vm11591_vm8, %v7999_v50, %v8003_v41  ;;  %v7442_v15 = vsel %vm12005_vm14, %v7440_v24, %v7441_v59  ;;  %v8021_v7 = vrot.slane %v8019_v26, 4  ;;  %v10140_v43 = vrot.slane %v7319_v2, 9  ;;  %v6911_v59 = vld [vmem:[#allocation2 + $0x94] sm:$0xf]  ;;  %v7320_v50 = vld [vmem:[#allocation2 + $0x90] sm:$0xe] }
 0x422   : > { %v10204_v32 = vcombine.low %v7994_v30, %v8004_v63  ;;  %v10171_v47 = vcombine.low %v7439_v11, %v7442_v15  ;;  %v8012_v55 = vor.u32 %v8011_v52, %v8008_v37  ;;  %v8027_v36 = vrot.slane %v8025_v57, 5  ;;  %v6397_v30 = vld [vmem:[#allocation2] sm:$0xe]  ;;  %v13705_v37 = vpop.permute.xlu0 %6777  ;;  %v6399_v57 = vld [vmem:[#allocation2 + $0x8] sm:$0x1] }
 0x423   : > { %v8022_v46 = vor.u32 %v8021_v7, %v8017_v58  ;;  %v7445_v25 = vrot.slane %v6908_v54, 5  ;;  %v7448_v18 = vrot.slane %v6909_v12, 5  ;;  %v8030_v56 = vshrl.u32 %v7717_v5, 16  ;;  %v6398_v7 = vld [vmem:[#allocation2 + $0x4] sm:$0xf] }
 0x424   : > { %8273 = vrot.lane.b32.xlu0 %v10204_v32, %s11403_s27  ;;  %7599 = vrot.lane.b32.xlu1 %v10171_v47, %s11403_s27  ;;  %v8013_v41 = vrot.slane %v8012_v55, 4  ;;  %v8033_v23 = vshll.u32 %v7717_v5, 16  ;;  %v8039_v60 = vshll.u32 %v7718_v62, 16  ;;  %v8043_v54 = vshrl.u32 %v7718_v62, 16 }
 0x425   : > { %v8023_v16 = vrot.slane %v8022_v46, 4  ;;  %v7446_v31 = vsel %vm12005_vm14, %v10140_v43, %v7445_v25  ;;  %v7447_v61 = vrot.slane %v7445_v25, 4  ;;  %v8032_v24 = vrot.slane %v8030_v56, 4  ;;  %v7719_v25 = vld [vmem:[#allocation2 + $0xb4] sm:$0xf] }
 0x426   : > { %v8018_v11 = vsel %vm11591_vm8, %v8013_v41, %v8017_v58  ;;  %v8035_v26 = vrot.slane %v8033_v23, 5  ;;  %v8041_v2 = vrot.slane %v8039_v60, 5  ;;  %v8045_v63 = vrot.slane %v8043_v54, 4 }
 0x427   : > { %v8028_v52 = vsel %vm11591_vm8, %v8023_v16, %v8027_v36  ;;  %v7449_v12 = vsel %vm12005_vm14, %v7447_v61, %v7448_v18  ;;  %v8049_v15 = vshll.u32 %v7737_v17, 16  ;;  %v10141_v58 = vrot.slane %v7320_v50, 9  ;;  %v13713_v17 = vpop.permute.xlu1 %6295  ;;  %v11302_v61 = vld [vmem:[#allocation2 + $0x4] sm:$0xf] }
 0x428   : > { %v10205_v5 = vcombine.low %v8018_v11, %v8028_v52  ;;  %v10172_v62 = vcombine.low %v7446_v31, %v7449_v12  ;;  %v8036_v32 = vor.u32 %v8035_v26, %v8032_v24  ;;  %v8046_v47 = vor.u32 %v8045_v63, %v8041_v2  ;;  %v11301_v31 = vld [vmem:[#allocation2] sm:$0xf]  ;;  %v7738_v24 = vld [vmem:[#allocation2 + $0xbc] sm:$0x1]  ;;  %v13721_v52 = vpop.permute.xlu0 %6779 }
 0x429   : > { %v8051_v55 = vrot.slane %v8049_v15, 5  ;;  %v7452_v43 = vrot.slane %v6911_v59, 5  ;;  %v7455_v46 = vrot.slane %v6912_v45, 5  ;;  %v10082_v41 = vrot.slane %v6397_v30, 9  ;;  %v7720_v45 = vld [vmem:[#allocation2 + $0xb8] sm:$0xf] }
 0x42a   : > { %8275 = vrot.lane.b32.xlu0 %v10205_v5, %s11403_s27  ;;  %7601 = vrot.lane.b32.xlu1 %v10172_v62, %s11403_s27  ;;  %v8037_v36 = vrot.slane %v8036_v32, 4  ;;  %v6495_v18 = vrot.slane %v6398_v7, 5  ;;  %v6498_v56 = vrot.slane %v6399_v57, 5  ;;  %v8047_v23 = vrot.slane %v8046_v47, 4  ;;  %v6914_v30 = vld [vmem:[#allocation2 + $0xa0] sm:$0xf] }
 0x42b   : > { %v7453_v60 = vsel %vm12005_vm14, %v10141_v58, %v7452_v43  ;;  %v7454_v16 = vrot.slane %v7452_v43, 4  ;;  %v10050_v59 = vcombine.low %v11301_v31, %v11302_v61  ;;  %v8054_v26 = vshrl.u32 %v7719_v25, 16  ;;  %v7321_v57 = vld [vmem:[#allocation2 + $0x9c] sm:$0xe]  ;;  %v6400_v47 = vld [vmem:[#allocation2 + $0xc] sm:$0xe]  ;;  %v13733_v31 = vpop.permute.xlu1 %6297 }
 0x42c   : > { %v8042_v54 = vsel %vm11591_vm8, %v8037_v36, %v8041_v2  ;;  %v6496_v50 = vsel %vm12005_vm14, %v10082_v41, %v6495_v18  ;;  %v6497_v11 = vrot.slane %v6495_v18, 4  ;;  %v8052_v12 = vsel %vm11591_vm8, %v8047_v23, %v8051_v55  ;;  %v6915_v2 = vld [vmem:[#allocation2 + $0xa4] sm:$0x1]  ;;  %v6401_v43 = vld [vmem:[#allocation2 + $0x10] sm:$0xf] }
 0x42d   : > { %v7456_v63 = vsel %vm12005_vm14, %v7454_v16, %v7455_v46  ;;  %v6319_v15 = vsel %vm1918_vm15, %v10050_v59, %v13647_v28  ;;  %v8057_v7 = vshll.u32 %v7719_v25, 16  ;;  %v10206_v5 = vcombine.low %v8042_v54, %v8052_v12  ;;  %v6402_v23 = vld [vmem:[#allocation2 + $0x14] sm:$0x1]  ;;  %v13742_v12 = vpop.permute.xlu0 %6781 }
 0x42e   : > { %v10173_v62 = vcombine.low %v7453_v60, %v7456_v63  ;;  %v6499_v32 = vsel %vm12005_vm14, %v6497_v11, %v6498_v56  ;;  %v8056_v58 = vrot.slane %v8054_v26, 4  ;;  %v8063_v55 = vshll.u32 %v7720_v45, 16  ;;  %v7721_v60 = vld [vmem:[#allocation2 + $0xc0] sm:$0xf] }
 0x42f   : > { %v10098_v36 = vcombine.low %v6496_v50, %v6499_v32  ;;  %v8059_v41 = vrot.slane %v8057_v7, 5  ;;  %v8067_v18 = vshrl.u32 %v7720_v45, 16  ;;  %8277 = vrot.lane.b32.xlu0 %v10206_v5, %s11403_s27  ;;  %v8073_v28 = vshll.u32 %v7738_v24, 16  ;;  %v7722_v50 = vld [vmem:[#allocation2 + $0xc4] sm:$0xf]  ;;  %v11175_v45 = vld [vmem:[%s14556_s5 + $0x108] sm:$0xff]  }
 0x430   : > { %7603 = vrot.lane.b32.xlu1 %v10173_v62, %s11403_s27  ;;  %v10142_v46 = vrot.slane %v7321_v57, 9  ;;  %v7459_v25 = vrot.slane %v6914_v30, 5  ;;  %v7462_v16 = vrot.slane %v6915_v2, 5  ;;  %v8065_v59 = vrot.slane %v8063_v55, 5  ;;  %v7739_v57 = vld [vmem:[#allocation2 + $0xc8] sm:$0x1] }
 0x431   : > { %v6799_v56 = vsel %vm1918_vm15, %v10098_v36, %v13624_v21  ;;  %v8060_v61 = vor.u32 %v8059_v41, %v8056_v58  ;;  %v8069_v54 = vrot.slane %v8067_v18, 4  ;;  %v8075_v11 = vrot.slane %v8073_v28, 5  ;;  %v7322_v36 = vld [vmem:[#allocation2 + $0xa8] sm:$0xe]  ;;  %v6917_v18 = vld [vmem:[#allocation2 + $0xac] sm:$0xf] }
 0x432   : > { %v7460_v24 = vsel %vm12005_vm14, %v10142_v46, %v7459_v25  ;;  %v7461_v26 = vrot.slane %v7459_v25, 4  ;;  %v10083_v30 = vrot.slane %v6400_v47, 9  ;;  %9108 = vmatprep.mubr.bf16.mxu0 %v6799_v56  ;;  %v6502_v21 = vrot.slane %v6401_v43, 5  ;;  %v11303_v47 = vld [vmem:[%s14556_s5 + $0x100] sm:$0xff]   ;;  %v13758_v56 = vpop.permute.xlu1 %6299 }
 0x433   : > { %v8061_v63 = vrot.slane %v8060_v61, 4  ;;  %v8070_v7 = vor.u32 %v8069_v54, %v8065_v59  ;;  %v6505_v2 = vrot.slane %v6402_v23, 5  ;;  %9109 = vmatmul.mubr.bf16.vlgmr.msra.gmra.mrb[80].mxu0 %v6319_v15  ;;  %v8078_v62 = vshrl.u32 %v7721_v60, 16  ;;  %v11188_v23 = vld [vmem:[%s14556_s5 + $0x110] sm:$0xff]  }
 0x434   : > { %v7463_v5 = vsel %vm12005_vm14, %v7461_v26, %v7462_v16  ;;  %v8081_v32 = vshll.u32 %v7721_v60, 16  ;;  %v8087_v58 = vshll.u32 %v7722_v50, 16  ;;  %10963 = vmatpush3.bf16.msra.mxu0 %v11303_v47  ;;  %v6503_v15 = vsel %vm12005_vm14, %v10083_v30, %v6502_v21  ;;  %v6918_v60 = vld [vmem:[#allocation2 + $0xb0] sm:$0x1]  ;;  %v6403_v26 = vld [vmem:[#allocation2 + $0x18] sm:$0xe] }
 0x435   : > { %v8066_v41 = vsel %vm11591_vm8, %v8061_v63, %v8065_v59  ;;  %v8071_v55 = vrot.slane %v8070_v7, 4  ;;  %v10174_v43 = vcombine.low %v7460_v24, %v7463_v5  ;;  %10964 = vmatprep.subr.bf16.mxu0 %v11175_v45  ;;  %v6504_v28 = vrot.slane %v6502_v21, 4  ;;  %v6404_v5 = vld [vmem:[#allocation2 + $0x1c] sm:$0xf] }
 0x436   : > { %v8080_v46 = vrot.slane %v8078_v62, 4  ;;  %v8083_v25 = vrot.slane %v8081_v32, 5  ;;  %v13756_v16 = vrot.slane %v8087_v58, 5  ;;  %v8091_v59 = vshrl.u32 %v7722_v50, 16  ;;  %v6405_v62 = vld [vmem:[#allocation2 + $0x20] sm:$0x1] }
 0x437   : > { %v8076_v61 = vsel %vm11591_vm8, %v8071_v55, %v8075_v11  ;;  %7605 = vrot.lane.b32.xlu1 %v10174_v43, %s11403_s27  ;;  %v8097_v54 = vshll.u32 %v7739_v57, 16  ;;  %v10143_v24 = vrot.slane %v7322_v36, 9  ;;  %v6506_v63 = vsel %vm12005_vm14, %v6504_v28, %v6505_v2  ;;  %v13765_v32 = vpop.permute.xlu0 %6301  ;;  %v7323_v43 = vld [vmem:[#allocation2 + $0xb4] sm:$0xe]  ;;  %v11198_v50 = vld [vmem:[%s14556_s5 + $0x118] sm:$0xff]  }
 0x438   : > { %v10207_v30 = vcombine.low %v8066_v41, %v8076_v61  ;;  %v8084_v7 = vor.u32 %v8083_v25, %v8080_v46  ;;  %v7466_v21 = vrot.slane %v6917_v18, 5  ;;  %10965 = vmatpush3.bf16.msra.mxu0 %v11175_v45  ;;  %v10099_v58 = vcombine.low %v6503_v15, %v6506_v63  ;;  %v6920_v18 = vld [vmem:[#allocation2 + $0xb8] sm:$0xf]  ;;  %v6921_v25 = vld [vmem:[#allocation2 + $0xbc] sm:$0x1] }
 0x439   : > { %v8093_v47 = vrot.slane %v8091_v59, 4  ;;  %v8099_v11 = vrot.slane %v8097_v54, 5  ;;  %v7469_v55 = vrot.slane %v6918_v60, 5  ;;  %10966 = vmatprep.subr.bf16.mxu0 %v11188_v23  ;;  %v10084_v41 = vrot.slane %v6403_v26, 9  ;;  %v6406_v60 = vld [vmem:[#allocation2 + $0x24] sm:$0xe] }
 0x43a   : > { %8279 = vrot.lane.b32.xlu0 %v10207_v30, %s11403_s27  ;;  %v8085_v2 = vrot.slane %v8084_v7, 4  ;;  %v7467_v57 = vsel %vm12005_vm14, %v10143_v24, %v7466_v21  ;;  %v7468_v36 = vrot.slane %v7466_v21, 4  ;;  %v6803_v45 = vsel %vm1918_vm15, %v10099_v58, %v13638_v40  ;;  %v11304_v54 = vld [vmem:[#allocation2 + $0xc] sm:$0xf]  ;;  %v11305_v24 = vld [vmem:[#allocation2 + $0x10] sm:$0xf] }
 0x43b   : > { %v8094_v15 = vor.u32 %v8093_v47, %v13756_v16  ;;  %v6509_v28 = vrot.slane %v6404_v5, 5  ;;  %v6512_v46 = vrot.slane %v6405_v62, 5  ;;  %v10051_v26 = vcombine.low %v11304_v54, %v11305_v24  ;;  %v6407_v63 = vld [vmem:[#allocation2 + $0x28] sm:$0xf]  ;;  %v6408_v7 = vld [vmem:[#allocation2 + $0x2c] sm:$0x1]  ;;  %9116 = vmatprep.mubr.bf16.mxu0 %v6803_v45  ;;  %v13781_v40 = vpop.permute.xlu1 %8253 }
 0x43c   : > { %v8090_v61 = vsel %vm11591_vm8, %v8085_v2, %v13756_v16  ;;  %v7470_v59 = vsel %vm12005_vm14, %v7468_v36, %v7469_v55  ;;  %v10144_v30 = vrot.slane %v7323_v43, 9  ;;  %10967 = vmatpush3.bf16.msra.mxu0 %v11188_v23  ;;  %v13785_v16 = vpop.permute.xlu0 %6783  ;;  %v7473_v55 = vrot.slane %v6920_v18, 5  ;;  %v7324_v36 = vld [vmem:[#allocation2 + $0xc0] sm:$0xe]  ;;  %v11306_v24 = vld [vmem:[#allocation2 + $0x18] sm:$0xf] }
 0x43d   : > { %v8095_v21 = vrot.slane %v8094_v15, 4  ;;  %v10175_v5 = vcombine.low %v7467_v57, %v7470_v59  ;;  %v6510_v62 = vsel %vm12005_vm14, %v10084_v41, %v6509_v28  ;;  %v6511_v58 = vrot.slane %v6509_v28, 4  ;;  %10968 = vmatprep.subr.bf16.mxu0 %v11198_v50  ;;  %v6923_v15 = vld [vmem:[#allocation2 + $0xc4] sm:$0xf]  ;;  %v6924_v28 = vld [vmem:[#allocation2 + $0xc8] sm:$0x1] }
 0x43e   : > { %v6323_v47 = vsel %vm1918_vm15, %v10051_v26, %v13658_v0  ;;  %v7476_v43 = vrot.slane %v6921_v25, 5  ;;  %v10085_v2 = vrot.slane %v6406_v60, 9  ;;  %v6516_v57 = vrot.slane %v6407_v63, 5  ;;  %v6409_v25 = vld [vmem:[#allocation2 + $0x30] sm:$0xe] }
 0x43f   : > { %v8100_v45 = vsel %vm11591_vm8, %v8095_v21, %v8099_v11  ;;  %7607 = vrot.lane.b32.xlu1 %v10175_v5, %s11403_s27  ;;  %v6513_v23 = vsel %vm12005_vm14, %v6511_v58, %v6512_v46  ;;  %v6519_v41 = vrot.slane %v6408_v7, 5  ;;  %9117 = vmatmul.mubr.bf16.gmra.mrb[84].mxu0 %v6323_v47  ;;  %v7474_v0 = vsel %vm12005_vm14, %v10144_v30, %v7473_v55  ;;  %v11307_v26 = vld [vmem:[#allocation2 + $0x1c] sm:$0xf]  ;;  %v6410_v7 = vld [vmem:[#allocation2 + $0x34] sm:$0xf]  ;;  %v13798_v5 = vpop.permute.xlu1 %7581 }
 0x440   : > { %v10208_v59 = vcombine.low %v8090_v61, %v8100_v45  ;;  %v10100_v54 = vcombine.low %v6510_v62, %v6513_v23  ;;  %v7475_v18 = vrot.slane %v7473_v55, 4  ;;  %10969 = vmatpush3.bf16.msra.mxu0 %v11198_v50  ;;  %v6517_v11 = vsel %vm12005_vm14, %v10085_v2, %v6516_v57  ;;  %v6411_v21 = vld [vmem:[#allocation2 + $0x38] sm:$0x1]  ;;  %v6412_v58 = vld [vmem:[#allocation2 + $0x3c] sm:$0xe] }
 0x441   : > { %v6518_v60 = vrot.slane %v6516_v57, 4  ;;  %v10052_v46 = vcombine.low %v11306_v24, %v11307_v26  ;;  %v10145_v63 = vrot.slane %v7324_v36, 9  ;;  %v7480_v30 = vrot.slane %v6923_v15, 5  ;;  %v6413_v47 = vld [vmem:[#allocation2 + $0x40] sm:$0xf] }
 0x442   : > { %8281 = vrot.lane.b32.xlu0 %v10208_v59, %s11403_s27  ;;  %v6807_v61 = vsel %vm1918_vm15, %v10100_v54, %v13649_v4  ;;  %v7477_v50 = vsel %vm12005_vm14, %v7475_v18, %v7476_v43  ;;  %v7483_v62 = vrot.slane %v6924_v28, 5  ;;  %v10086_v45 = vrot.slane %v6409_v25, 9  ;;  %v6414_v28 = vld [vmem:[#allocation2 + $0x44] sm:$0x1] }
 0x443   : > { %v10176_v55 = vcombine.low %v7474_v0, %v7477_v50  ;;  %v6520_v2 = vsel %vm12005_vm14, %v6518_v60, %v6519_v41  ;;  %v6327_v36 = vsel %vm1918_vm15, %v10052_v46, %v13672_v42  ;;  %9124 = vmatprep.mubr.bf16.mxu0 %v6807_v61  ;;  %v13809_v23 = vpop.permute.xlu0 %6303  ;;  %v7481_v4 = vsel %vm12005_vm14, %v10145_v63, %v7480_v30  ;;  %v11308_v54 = vld [vmem:[#allocation2 + $0x24] sm:$0xf]  ;;  %v11309_v0 = vld [vmem:[#allocation2 + $0x28] sm:$0xf]  ;;  %v6416_v46 = vld [vmem:[#allocation2 + $0x4c] sm:$0xf] }
 0x444   : > { %v10101_v57 = vcombine.low %v6517_v11, %v6520_v2  ;;  %v7482_v43 = vrot.slane %v7480_v30, 4  ;;  %v6523_v15 = vrot.slane %v6410_v7, 5  ;;  %v6526_v59 = vrot.slane %v6411_v21, 5  ;;  %v6415_v42 = vld [vmem:[#allocation2 + $0x48] sm:$0xe] }
 0x445   : > { %7609 = vrot.lane.b32.xlu1 %v10176_v55, %s11403_s27  ;;  %v10053_v41 = vcombine.low %v11308_v54, %v11309_v0  ;;  %v10087_v18 = vrot.slane %v6412_v58, 9  ;;  %v6530_v60 = vrot.slane %v6413_v47, 5  ;;  %v6417_v63 = vld [vmem:[#allocation2 + $0x50] sm:$0x1]  ;;  %v6418_v30 = vld [vmem:[#allocation2 + $0x54] sm:$0xe] }
 0x446   : > { %v6811_v25 = vsel %vm1918_vm15, %v10101_v57, %v13665_v53  ;;  %v7484_v11 = vsel %vm12005_vm14, %v7482_v43, %v7483_v62  ;;  %v6524_v24 = vsel %vm12005_vm14, %v10086_v45, %v6523_v15  ;;  %v6525_v26 = vrot.slane %v6523_v15, 4  ;;  %v6419_v53 = vld [vmem:[#allocation2 + $0x58] sm:$0xf]  ;;  %v11310_v55 = vld [vmem:[#allocation2 + $0x30] sm:$0xf] }
 0x447   : > { %v10177_v7 = vcombine.low %v7481_v4, %v7484_v11  ;;  %v6331_v21 = vsel %vm1918_vm15, %v10053_v41, %v13684_v1  ;;  %v6531_v61 = vsel %vm12005_vm14, %v10087_v18, %v6530_v60  ;;  %v6532_v50 = vrot.slane %v6530_v60, 4  ;;  %9125 = vmatmul.mubr.bf16.gmra.mrb[88].mxu0 %v6327_v36  ;;  %v13824_v58 = vpop.permute.xlu1 %8255  ;;  %v11311_v2 = vld [vmem:[#allocation2 + $0x34] sm:$0xf]  ;;  %v13828_v4 = vpop.permute.xlu0 %6785  ;;  %v11312_v15 = vld [vmem:[#allocation2 + $0x3c] sm:$0xf] }
 0x448   : > { %v6527_v62 = vsel %vm12005_vm14, %v6525_v26, %v6526_v59  ;;  %v6533_v47 = vrot.slane %v6414_v28, 5  ;;  %v10054_v45 = vcombine.low %v11310_v55, %v11311_v2  ;;  %v10088_v57 = vrot.slane %v6415_v42, 9  ;;  %9132 = vmatprep.mubr.bf16.mxu0 %v6811_v25  ;;  %v11313_v54 = vld [vmem:[#allocation2 + $0x40] sm:$0xf]  ;;  %v6420_v41 = vld [vmem:[#allocation2 + $0x5c] sm:$0x1] }
 0x449   : > { %7611 = vrot.lane.b32.xlu1 %v10177_v7, %s11403_s27  ;;  %v10102_v1 = vcombine.low %v6524_v24, %v6527_v62  ;;  %v6537_v43 = vrot.slane %v6416_v46, 5  ;;  %v6540_v36 = vrot.slane %v6417_v63, 5  ;;  %v10055_v0 = vcombine.low %v11312_v15, %v11313_v54  ;;  %v6421_v42 = vld [vmem:[#allocation2 + $0x60] sm:$0xe]  ;;  %v6422_v46 = vld [vmem:[#allocation2 + $0x64] sm:$0xf] }
 0x44a   : > { %v6534_v59 = vsel %vm12005_vm14, %v6532_v50, %v6533_v47  ;;  %v13835_v28 = vsel %vm1918_vm15, %v10054_v45, %v13699_v22  ;;  %v10089_v18 = vrot.slane %v6418_v30, 9  ;;  %v6544_v60 = vrot.slane %v6419_v53, 5  ;;  %v6423_v63 = vld [vmem:[#allocation2 + $0x68] sm:$0x1]  ;;  %v11315_v47 = vld [vmem:[#allocation2 + $0x4c] sm:$0xf] }
 0x44b   : > { %v6815_v25 = vsel %vm1918_vm15, %v10102_v1, %v13677_v9  ;;  %v10103_v11 = vcombine.low %v6531_v61, %v6534_v59  ;;  %v6538_v24 = vsel %vm12005_vm14, %v10088_v57, %v6537_v43  ;;  %v6539_v26 = vrot.slane %v6537_v43, 4  ;;  %v13847_v53 = vpop.permute.xlu1 %7583  ;;  %v11314_v62 = vld [vmem:[#allocation2 + $0x48] sm:$0xf]  ;;  %v6424_v43 = vld [vmem:[#allocation2 + $0x6c] sm:$0xe] }
 0x44c   : > { %v13843_v7 = vsel %vm1918_vm15, %v10055_v0, %v13713_v17  ;;  %v6545_v22 = vsel %vm12005_vm14, %v10089_v18, %v6544_v60  ;;  %v6546_v50 = vrot.slane %v6544_v60, 4  ;;  %v6547_v30 = vrot.slane %v6420_v41, 5  ;;  %v11316_v0 = vld [vmem:[#allocation2 + $0x54] sm:$0xf]  ;;  %v11318_v59 = vld [vmem:[#allocation2 + $0x60] sm:$0xf] }
 0x44d   : > { %v13851_v9 = vsel %vm1918_vm15, %v10103_v11, %v13691_v34  ;;  %v6541_v61 = vsel %vm12005_vm14, %v6539_v26, %v6540_v36  ;;  %v10056_v55 = vcombine.low %v11314_v62, %v11315_v47  ;;  %v10090_v2 = vrot.slane %v6421_v42, 9  ;;  %v11317_v36 = vld [vmem:[#allocation2 + $0x58] sm:$0xf]  ;;  %v11319_v18 = vld [vmem:[#allocation2 + $0x64] sm:$0xf] }
 0x44e   : > { %v10104_v17 = vcombine.low %v6538_v24, %v6541_v61  ;;  %v6548_v45 = vsel %vm12005_vm14, %v6546_v50, %v6547_v30  ;;  %v6551_v57 = vrot.slane %v6422_v46, 5  ;;  %v6554_v1 = vrot.slane %v6423_v63, 5  ;;  %v13857_v15 = vpop.permute.xlu0 %6305  ;;  %v6425_v42 = vld [vmem:[#allocation2 + $0x70] sm:$0xf]  ;;  %v6426_v11 = vld [vmem:[#allocation2 + $0x74] sm:$0x1] }
 0x44f   : > { %v10105_v54 = vcombine.low %v6545_v22, %v6548_v45  ;;  %v13861_v34 = vsel %vm1918_vm15, %v10056_v55, %v13733_v31  ;;  %v10057_v41 = vcombine.low %v11316_v0, %v11317_v36  ;;  %9133 = vmatmul.mubr.bf16.gmra.mrb[92].mxu0 %v6331_v21  ;;  %v10058_v60 = vcombine.low %v11318_v59, %v11319_v18  ;;  %v11320_v31 = vld [vmem:[#allocation2 + $0x18] sm:$0xf]  ;;  %v11321_v63 = vld [vmem:[#allocation2 + $0x1c] sm:$0xf]  ;;  %v6877_v50 = vld [vmem:[#allocation2 + $0xc] sm:$0xf] }
 0x450   : > { %v13865_v24 = vsel %vm1918_vm15, %v10104_v17, %v13705_v37  ;;  %v6552_v26 = vsel %vm12005_vm14, %v10090_v2, %v6551_v57  ;;  %v6553_v46 = vrot.slane %v6551_v57, 4  ;;  %9140 = vmatprep.mubr.bf16.mxu0 %v6815_v25  ;;  %v10178_v22 = vcombine.low %v11320_v31, %v11321_v63  ;;  %v11325_v31 = vld [vmem:[#allocation2 + $0x24] sm:$0xf] }
 0x451   : > { %v13871_v21 = vsel %vm1918_vm15, %v10105_v54, %v13721_v52  ;;  %v13875_v30 = vsel %vm1918_vm15, %v10057_v41, %v13758_v56  ;;  %v13879_v37 = vsel %vm1918_vm15, %v10058_v60, %v13765_v32  ;;  %v10091_v61 = vrot.slane %v6424_v43, 9  ;;  %v11322_v56 = vld [vmem:[#allocation2 + $0x10] sm:$0xf]  ;;  %v7723_v54 = vld [vmem:[#allocation2 + $0xcc] sm:$0xf] }
 0x452   : > { %v6555_v25 = vsel %vm12005_vm14, %v6553_v46, %v6554_v1  ;;  %v8287_v62 = vsel %vm1918_vm15, %v10178_v22, %v13781_v40  ;;  %v6558_v47 = vrot.slane %v6425_v42, 5  ;;  %v6561_v55 = vrot.slane %v6426_v11, 5  ;;  %v13885_v2 = vpop.permute.xlu1 %8257  ;;  %v13887_v32 = vpop.permute.xlu0 %6787  ;;  %v7724_v60 = vld [vmem:[#allocation2 + $0xd0] sm:$0xf]  ;;  %v11323_v11 = vld [vmem:[#allocation2 + $0x6c] sm:$0xf] }
 0x453   : > { %v10106_v52 = vcombine.low %v6552_v26, %v6555_v25  ;;  %v6926_v17 = vshrl.u32 %v6877_v50, 16  ;;  %v6929_v45 = vshll.u32 %v6877_v50, 16  ;;  %v6935_v57 = vshll.u32 %v11322_v56, 16  ;;  %9269 = vmatprep.mubr.bf16.mxu1 %v8287_v62  ;;  %v11324_v26 = vld [vmem:[#allocation2 + $0x70] sm:$0xf] }
 0x454   : > { %v6559_v43 = vsel %vm12005_vm14, %v10091_v61, %v6558_v47  ;;  %v6560_v1 = vrot.slane %v6558_v47, 4  ;;  %v6941_v40 = vrot.slane %v6939_v13, 4  ;;  %v6947_v0 = vrot.slane %v6945_v44, 5  ;;  %v7740_v50 = vld [vmem:[#allocation2 + $0xd4] sm:$0x1] }
 0x455   : > { %v13897_v36 = vsel %vm1918_vm15, %v10106_v52, %v13742_v12  ;;  %v6928_v41 = vrot.slane %v6926_v17, 4  ;;  %v6931_v59 = vrot.slane %v6929_v45, 5  ;;  %v6937_v18 = vrot.slane %v6935_v57, 5  ;;  %v6427_v25 = vld [vmem:[#allocation2 + $0x78] sm:$0xe] }
 0x456   : > { %v6562_v42 = vsel %vm12005_vm14, %v6560_v1, %v6561_v55  ;;  %v10059_v46 = vcombine.low %v11323_v11, %v11324_v26  ;;  %v10179_v13 = vcombine.low %v11325_v31, %v11326_v35  ;;  %v8102_v63 = vshrl.u32 %v7723_v54, 16  ;;  %v13901_v38 = vpop.permute.xlu1 %7585  ;;  %v6428_v17 = vld [vmem:[#allocation2 + $0x7c] sm:$0xf] }
 0x457   : > { %v10107_v44 = vcombine.low %v6559_v43, %v6562_v42  ;;  %v6932_v22 = vor.u32 %v6931_v59, %v6928_v41  ;;  %v6942_v12 = vor.u32 %v6941_v40, %v6937_v18  ;;  %9141 = vmatmul.mubr.bf16.gmra.mrb[96].mxu0 %v13835_v28  ;;  %v8105_v61 = vshll.u32 %v7723_v54, 16  ;;  %v6429_v54 = vld [vmem:[#allocation2 + $0x80] sm:$0x1]  ;;  %v6880_v41 = vld [vmem:[#allocation2 + $0x18] sm:$0xf] }
 0x458   : > { %v13906_v62 = vsel %vm1918_vm15, %v10059_v46, %v13809_v23  ;;  %9148 = vmatprep.mubr.bf16.mxu0 %v13851_v9  ;;  %v8291_v47 = vsel %vm1918_vm15, %v10179_v13, %v13824_v58  ;;  %v8104_v55 = vrot.slane %v8102_v63, 4  ;;  %v8111_v52 = vshll.u32 %v7724_v60, 16  ;;  %v13915_v43 = vpop.permute.xlu0 %6307 }
 0x459   : > { %v13913_v45 = vsel %vm1918_vm15, %v10107_v44, %v13785_v16  ;;  %v6933_v28 = vrot.slane %v6932_v22, 4  ;;  %v6943_v56 = vrot.slane %v6942_v12, 4  ;;  %v8107_v57 = vrot.slane %v8105_v61, 5  ;;  %v6430_v61 = vld [vmem:[#allocation2 + $0x84] sm:$0xe] }
 0x45a   : > { %v8113_v23 = vrot.slane %v8111_v52, 5  ;;  %v8115_v1 = vshrl.u32 %v7724_v60, 16  ;;  %v8121_v40 = vshll.u32 %v7740_v50, 16  ;;  %v10092_v9 = vrot.slane %v6427_v25, 9 }
 0x45b   : > { %v6938_v58 = vsel %vm11591_vm8, %v6933_v28, %v6937_v18  ;;  %v6948_v59 = vsel %vm11591_vm8, %v6943_v56, %v6947_v0  ;;  %v8108_v42 = vor.u32 %v8107_v57, %v8104_v55  ;;  %v6565_v16 = vrot.slane %v6428_v17, 5  ;;  %v11327_v0 = vld [vmem:[#allocation2 + $0x1c] sm:$0xf] }
 0x45c   : > { %v10146_v11 = vcombine.low %v6938_v58, %v6948_v59  ;;  %v8117_v26 = vrot.slane %v8115_v1, 4  ;;  %v8123_v46 = vrot.slane %v8121_v40, 5  ;;  %v6568_v31 = vrot.slane %v6429_v54, 5  ;;  %v13921_v35 = vpop.permute.xlu1 %8259  ;;  %v13927_v25 = vpop.permute.xlu0 %6789  ;;  %v6431_v1 = vld [vmem:[#allocation2 + $0x88] sm:$0xf] }
 0x45d   : > { %v8109_v13 = vrot.slane %v8108_v42, 4  ;;  %v6566_v60 = vsel %vm12005_vm14, %v10092_v9, %v6565_v16  ;;  %v6567_v63 = vrot.slane %v6565_v16, 4  ;;  %v6950_v44 = vshrl.u32 %v6880_v41, 16  ;;  %v11328_v40 = vld [vmem:[#allocation2 + $0x78] sm:$0xf] }
 0x45e   : > { %v7615_v18 = vsel %vm1918_vm15, %v10146_v11, %v13798_v5  ;;  %v8118_v22 = vor.u32 %v8117_v26, %v8113_v23  ;;  %v6953_v12 = vshll.u32 %v6880_v41, 16  ;;  %v6959_v50 = vshll.u32 %v11327_v0, 16  ;;  %v11329_v9 = vld [vmem:[#allocation2 + $0x7c] sm:$0xf]  ;;  %v11330_v58 = vld [vmem:[#allocation2 + $0x30] sm:$0xf] }
 0x45f   : > { %v8114_v55 = vsel %vm11591_vm8, %v8109_v13, %v8113_v23  ;;  %v6569_v52 = vsel %vm12005_vm14, %v6567_v63, %v6568_v31  ;;  %v6952_v17 = vrot.slane %v6950_v44, 4  ;;  %v6965_v28 = vrot.slane %v6963_v3, 4  ;;  %9149 = vmatmul.mubr.bf16.gmra.mrb[100].mxu0 %v13843_v7  ;;  %9270 = vmatmul.mubr.bf16.vlgmr.msra.gmra.mrb[112].mxu1 %v7615_v18  ;;  %v6432_v59 = vld [vmem:[#allocation2 + $0x8c] sm:$0x1]  ;;  %v6883_v42 = vld [vmem:[#allocation2 + $0x24] sm:$0xf] }
 0x460   : > { %v8119_v5 = vrot.slane %v8118_v22, 4  ;;  %v10108_v56 = vcombine.low %v6566_v60, %v6569_v52  ;;  %v6955_v57 = vrot.slane %v6953_v12, 5  ;;  %v6961_v54 = vrot.slane %v6959_v50, 5  ;;  %9156 = vmatprep.mubr.bf16.mxu0 %v13865_v24  ;;  %9277 = vmatprep.mubr.bf16.mxu1 %v8291_v47  ;;  %v13939_v16 = vpop.permute.xlu1 %7587  ;;  %v11332_v0 = vld [vmem:[#allocation2 + $0x28] sm:$0xf] }
 0x461   : > { %v6971_v23 = vrot.slane %v6969_v14, 5  ;;  %v10060_v41 = vcombine.low %v11328_v40, %v11329_v9  ;;  %v10180_v3 = vcombine.low %v11330_v58, %v11331_v29  ;;  %v10093_v7 = vrot.slane %v6430_v61, 9  ;;  %v6433_v52 = vld [vmem:[#allocation2 + $0x90] sm:$0xe]  ;;  %v11333_v40 = vld [vmem:[#allocation2 + $0x84] sm:$0xf] }
 0x462   : > { %v8124_v11 = vsel %vm11591_vm8, %v8119_v5, %v8123_v46  ;;  %v13945_v24 = vsel %vm1918_vm15, %v10108_v56, %v13828_v4  ;;  %v6956_v27 = vor.u32 %v6955_v57, %v6952_v17  ;;  %v6966_v14 = vor.u32 %v6965_v28, %v6961_v54  ;;  %v6434_v57 = vld [vmem:[#allocation2 + $0x94] sm:$0xf]  ;;  %v11334_v9 = vld [vmem:[#allocation2 + $0x88] sm:$0xf]  ;;  %v6435_v29 = vld [vmem:[#allocation2 + $0x98] sm:$0x1] }
 0x463   : > { %v10209_v47 = vcombine.low %v8114_v55, %v8124_v11  ;;  %v13949_v26 = vsel %vm1918_vm15, %v10060_v41, %v13857_v15  ;;  %v8295_v31 = vsel %vm1918_vm15, %v10180_v3, %v13885_v2  ;;  %v6572_v13 = vrot.slane %v6431_v1, 5  ;;  %v11336_v41 = vld [vmem:[#allocation2 + $0x40] sm:$0xf]  ;;  %v6886_v3 = vld [vmem:[#allocation2 + $0x30] sm:$0xf] }
 0x464   : > { %v6957_v60 = vrot.slane %v6956_v27, 4  ;;  %v6967_v63 = vrot.slane %v6966_v14, 4  ;;  %v6575_v44 = vrot.slane %v6432_v59, 5  ;;  %v6974_v18 = vshrl.u32 %v6883_v42, 16  ;;  %v13953_v46 = vpop.permute.xlu0 %6309 }
 0x465   : > { %8283 = vrot.lane.b32.xlu0 %v10209_v47, %s11403_s27  ;;  %v6573_v4 = vsel %vm12005_vm14, %v10093_v7, %v6572_v13  ;;  %v6574_v22 = vrot.slane %v6572_v13, 4  ;;  %v6977_v12 = vshll.u32 %v6883_v42, 16  ;;  %v6983_v15 = vshll.u32 %v11332_v0, 16 }
 0x466   : > { %v6962_v50 = vsel %vm11591_vm8, %v6957_v60, %v6961_v54  ;;  %v6972_v2 = vsel %vm11591_vm8, %v6967_v63, %v6971_v23  ;;  %v6976_v61 = vrot.slane %v6974_v18, 4  ;;  %v6989_v55 = vrot.slane %v6987_v19, 4  ;;  %v11335_v19 = vld [vmem:[#allocation2 + $0x3c] sm:$0xf]  ;;  %v11337_v18 = vld [vmem:[#allocation2 + $0x34] sm:$0xf] }
 0x467   : > { %v10147_v17 = vcombine.low %v6962_v50, %v6972_v2  ;;  %v6576_v28 = vsel %vm12005_vm14, %v6574_v22, %v6575_v44  ;;  %v6979_v5 = vrot.slane %v6977_v12, 5  ;;  %v6985_v56 = vrot.slane %v6983_v15, 5  ;;  %9157 = vmatmul.mubr.bf16.gmra.mrb[104].mxu0 %v13861_v34  ;;  %v13967_v1 = vpop.permute.xlu1 %8261  ;;  %v6436_v12 = vld [vmem:[#allocation2 + $0x9c] sm:$0xe] }
 0x468   : > { %v10109_v54 = vcombine.low %v6573_v4, %v6576_v28  ;;  %v6995_v23 = vrot.slane %v6993_v6, 5  ;;  %v10061_v20 = vcombine.low %v11333_v40, %v11334_v9  ;;  %9164 = vmatprep.mubr.bf16.mxu0 %v13871_v21  ;;  %v10181_v58 = vcombine.low %v11335_v19, %v11336_v41  ;;  %v13972_v59 = vpop.permute.xlu0 %6791  ;;  %v11338_v28 = vld [vmem:[#allocation2 + $0x90] sm:$0xf] }
 0x469   : > { %v7619_v34 = vsel %vm1918_vm15, %v10147_v17, %v13847_v53  ;;  %v6980_v7 = vor.u32 %v6979_v5, %v6976_v61  ;;  %v6990_v42 = vor.u32 %v6989_v55, %v6985_v56  ;;  %v10094_v11 = vrot.slane %v6433_v52, 9  ;;  %v6437_v61 = vld [vmem:[#allocation2 + $0xa0] sm:$0xf]  ;;  %v11339_v5 = vld [vmem:[#allocation2 + $0x94] sm:$0xf] }
 0x46a   : > { %v13978_v33 = vsel %vm1918_vm15, %v10109_v54, %v13887_v32  ;;  %9278 = vmatmul.mubr.bf16.gmra.mrb[116].mxu1 %v7619_v34  ;;  %v13982_v6 = vsel %vm1918_vm15, %v10061_v20, %v13915_v43  ;;  %v8299_v21 = vsel %vm1918_vm15, %v10181_v58, %v13921_v35  ;;  %v6579_v27 = vrot.slane %v6434_v57, 5  ;;  %v6438_v54 = vld [vmem:[#allocation2 + $0xa4] sm:$0x1] }
 0x46b   : > { %v6981_v14 = vrot.slane %v6980_v7, 4  ;;  %v6991_v47 = vrot.slane %v6990_v42, 4  ;;  %9285 = vmatprep.mubr.bf16.mxu1 %v8295_v31  ;;  %v6582_v53 = vrot.slane %v6435_v29, 5  ;;  %v6998_v13 = vshrl.u32 %v6886_v3, 16  ;;  %v13986_v60 = vpop.permute.xlu1 %7589 }
 0x46c   : > { %v6580_v32 = vsel %vm12005_vm14, %v10094_v11, %v6579_v27  ;;  %v6581_v63 = vrot.slane %v6579_v27, 4  ;;  %v7001_v44 = vshll.u32 %v6886_v3, 16  ;;  %v7007_v4 = vshll.u32 %v11337_v18, 16 }
 0x46d   : > { %v6986_v43 = vsel %vm11591_vm8, %v6981_v14, %v6985_v56  ;;  %v6996_v35 = vsel %vm11591_vm8, %v6991_v47, %v6995_v23  ;;  %v7000_v22 = vrot.slane %v6998_v13, 4  ;;  %v7013_v31 = vrot.slane %v7011_v39, 4  ;;  %v11340_v39 = vld [vmem:[#allocation2 + $0x48] sm:$0xf]  ;;  %v11341_v56 = vld [vmem:[#allocation2 + $0x4c] sm:$0xf] }
 0x46e   : > { %v10148_v0 = vcombine.low %v6986_v43, %v6996_v35  ;;  %v6583_v15 = vsel %vm12005_vm14, %v6581_v63, %v6582_v53  ;;  %v7003_v50 = vrot.slane %v7001_v44, 5  ;;  %v7009_v2 = vrot.slane %v7007_v4, 5  ;;  %v13998_v55 = vpop.permute.xlu0 %6311  ;;  %v6889_v23 = vld [vmem:[#allocation2 + $0x3c] sm:$0xf]  ;;  %v6439_v53 = vld [vmem:[#allocation2 + $0xa8] sm:$0xe] }
 0x46f   : > { %v10110_v52 = vcombine.low %v6580_v32, %v6583_v15  ;;  %v7019_v17 = vrot.slane %v7017_v48, 5  ;;  %9165 = vmatmul.mubr.bf16.gmra.mrb[108].mxu0 %v13875_v30  ;;  %v10062_v10 = vcombine.low %v11338_v28, %v11339_v5  ;;  %v10182_v57 = vcombine.low %v11340_v39, %v11341_v56  ;;  %v11343_v4 = vld [vmem:[#allocation2 + $0x44] sm:$0x1]  ;;  %v11344_v35 = vld [vmem:[#allocation2 + $0x9c] sm:$0xf] }
 0x470   : > { %v7623_v40 = vsel %vm1918_vm15, %v10148_v0, %v13901_v38  ;;  %v7004_v9 = vor.u32 %v7003_v50, %v7000_v22  ;;  %v7014_v20 = vor.u32 %v7013_v31, %v7009_v2  ;;  %9172 = vmatprep.mubr.bf16.mxu0 %v13897_v36  ;;  %v10095_v19 = vrot.slane %v6436_v12, 9  ;;  %v11345_v22 = vld [vmem:[#allocation2 + $0xa0] sm:$0xf]  ;;  %v6440_v12 = vld [vmem:[#allocation2 + $0xac] sm:$0xf] }
 0x471   : > { %v14008_v49 = vsel %vm1918_vm15, %v10110_v52, %v13927_v25  ;;  %v14012_v48 = vsel %vm1918_vm15, %v10062_v10, %v13953_v46  ;;  %v8303_v30 = vsel %vm1918_vm15, %v10182_v57, %v13967_v1  ;;  %v6586_v41 = vrot.slane %v6437_v61, 5  ;;  %v8264_v58 = vpop.permute.xlu1 %8263  ;;  %v11342_v46 = vld [vmem:[#allocation2 + $0x40] sm:$0xf]  ;;  %v6441_v0 = vld [vmem:[#allocation2 + $0xb0] sm:$0x1] }
 0x472   : > { %v7005_v29 = vrot.slane %v7004_v9, 4  ;;  %v7015_v38 = vrot.slane %v7014_v20, 4  ;;  %9286 = vmatmul.mubr.bf16.gmra.mrb[120].mxu1 %v7623_v40  ;;  %v6589_v3 = vrot.slane %v6438_v54, 5  ;;  %v7022_v34 = vshrl.u32 %v6889_v23, 16  ;;  %v14016_v36 = vpop.permute.xlu0 %6793  ;;  %v11346_v61 = vld [vmem:[#allocation2 + $0x54] sm:$0xf] }
 0x473   : > { %9293 = vmatprep.mubr.bf16.mxu1 %v8299_v21  ;;  %v6587_v25 = vsel %vm12005_vm14, %v10095_v19, %v6586_v41  ;;  %v6588_v7 = vrot.slane %v6586_v41, 4  ;;  %v7025_v42 = vshll.u32 %v6889_v23, 16  ;;  %v7031_v11 = vshll.u32 %v11342_v46, 16  ;;  %v11347_v52 = vld [vmem:[#allocation2 + $0x58] sm:$0xf] }
 0x474   : > { %v7010_v1 = vsel %vm11591_vm8, %v7005_v29, %v7009_v2  ;;  %v7020_v27 = vsel %vm11591_vm8, %v7015_v38, %v7019_v17  ;;  %v7024_v14 = vrot.slane %v7022_v34, 4  ;;  %v7035_v47 = vshrl.u32 %v11342_v46, 16  ;;  %v6892_v5 = vld [vmem:[#allocation2 + $0x48] sm:$0xf] }
 0x475   : > { %v10149_v13 = vcombine.low %v7010_v1, %v7020_v27  ;;  %v6590_v21 = vsel %vm12005_vm14, %v6588_v7, %v6589_v3  ;;  %v7027_v32 = vrot.slane %v7025_v42, 5  ;;  %v7033_v63 = vrot.slane %v7031_v11, 5  ;;  %v14026_v15 = vpop.permute.xlu1 %7591  ;;  %v6442_v42 = vld [vmem:[#allocation2 + $0xb4] sm:$0xe]  ;;  %v11349_v27 = vld [vmem:[#allocation2 + $0x50] sm:$0x1] }
 0x476   : > { %v10111_v44 = vcombine.low %v6587_v25, %v6590_v21  ;;  %v7037_v18 = vrot.slane %v7035_v47, 4  ;;  %v7041_v43 = vshll.u32 %v11343_v4, 16  ;;  %v10063_v31 = vcombine.low %v11344_v35, %v11345_v22  ;;  %v6444_v4 = vld [vmem:[#allocation2 + $0xbc] sm:$0x1]  ;;  %v6895_v35 = vld [vmem:[#allocation2 + $0x54] sm:$0xf] }
 0x477   : > { %v7627_v50 = vsel %vm1918_vm15, %v10149_v13, %v13939_v16  ;;  %v7028_v2 = vor.u32 %v7027_v32, %v7024_v14  ;;  %9173 = vmatmul.mubr.bf16.gmra.mrb[112].mxu0 %v13879_v37  ;;  %v10183_v17 = vcombine.low %v11346_v61, %v11347_v52  ;;  %v10096_v28 = vrot.slane %v6439_v53, 9  ;;  %v11350_v53 = vld [vmem:[#allocation2 + $0xa8] sm:$0xf]  ;;  %v11351_v13 = vld [vmem:[#allocation2 + $0xac] sm:$0xf] }
 0x478   : > { %v14033_v10 = vsel %vm1918_vm15, %v10111_v44, %v13972_v59  ;;  %v7038_v39 = vor.u32 %v7037_v18, %v7033_v63  ;;  %v7043_v56 = vrot.slane %v7041_v43, 5  ;;  %v14037_v57 = vsel %vm1918_vm15, %v10063_v31, %v13998_v55  ;;  %9180 = vmatprep.mubr.bf16.mxu0 %v13913_v45  ;;  %v6314_v16 = vpop.permute.xlu0 %6313  ;;  %v11348_v59 = vld [vmem:[#allocation2 + $0x4c] sm:$0xf]  ;;  %v11352_v32 = vld [vmem:[#allocation2 + $0x60] sm:$0xf] }
 0x479   : > { %v7029_v54 = vrot.slane %v7028_v2, 4  ;;  %v8307_v37 = vsel %vm1918_vm15, %v10183_v17, %v8264_v58  ;;  %v6593_v23 = vrot.slane %v6440_v12, 5  ;;  %v6596_v40 = vrot.slane %v6441_v0, 5  ;;  %v6443_v18 = vld [vmem:[#allocation2 + $0xb8] sm:$0xf] }
 0x47a   : > { %v7039_v9 = vrot.slane %v7038_v39, 4  ;;  %9294 = vmatmul.mubr.bf16.gmra.mrb[124].mxu1 %v7627_v50  ;;  %v7046_v20 = vshrl.u32 %v6892_v5, 16  ;;  %v7049_v19 = vshll.u32 %v6892_v5, 16  ;;  %v7055_v41 = vshll.u32 %v11348_v59, 16 }
 0x47b   : > { %v7034_v29 = vsel %vm11591_vm8, %v7029_v54, %v7033_v63  ;;  %9301 = vmatprep.mubr.bf16.mxu1 %v8303_v30  ;;  %v6594_v55 = vsel %vm12005_vm14, %v10096_v28, %v6593_v23  ;;  %v6595_v45 = vrot.slane %v6593_v23, 4  ;;  %v7059_v38 = vshrl.u32 %v11348_v59, 16  ;;  %v11353_v63 = vld [vmem:[#allocation2 + $0x64] sm:$0xf] }
 0x47c   : > { %v7044_v58 = vsel %vm11591_vm8, %v7039_v9, %v7043_v56  ;;  %v7048_v3 = vrot.slane %v7046_v20, 4  ;;  %v7051_v34 = vrot.slane %v7049_v19, 5  ;;  %v7057_v25 = vrot.slane %v7055_v41, 5  ;;  %v8266_v7 = vpop.permute.xlu1 %8265  ;;  %v6796_v43 = vpop.permute.xlu0 %6795  ;;  %v11354_v56 = vld [vmem:[#allocation2 + $0x58] sm:$0xf] }
 0x47d   : > { %v10150_v46 = vcombine.low %v7034_v29, %v7044_v58  ;;  %v6597_v11 = vsel %vm12005_vm14, %v6595_v45, %v6596_v40  ;;  %v7061_v1 = vrot.slane %v7059_v38, 4  ;;  %v7065_v30 = vshll.u32 %v11349_v27, 16  ;;  %v11355_v45 = vld [vmem:[#allocation2 + $0x5c] sm:$0x1]  ;;  %v11356_v58 = vld [vmem:[#allocation2 + $0xb4] sm:$0xf] }
 0x47e   : > { %v10112_v14 = vcombine.low %v6594_v55, %v6597_v11  ;;  %v7052_v47 = vor.u32 %v7051_v34, %v7048_v3  ;;  %v10064_v21 = vcombine.low %v11350_v53, %v11351_v13  ;;  %v10184_v44 = vcombine.low %v11352_v32, %v11353_v63  ;;  %v11357_v3 = vld [vmem:[#allocation2 + $0xb8] sm:$0xf] }
 0x47f   : > { %v7631_v22 = vsel %vm1918_vm15, %v10150_v46, %v13986_v60  ;;  %v7062_v31 = vor.u32 %v7061_v1, %v7057_v25  ;;  %v7067_v12 = vrot.slane %v7065_v30, 5  ;;  %9181 = vmatmul.mubr.bf16.gmra.mrb[116].mxu0 %v13906_v62  ;;  %v10097_v0 = vrot.slane %v6442_v42, 9  ;;  %v6898_v42 = vld [vmem:[#allocation2 + $0x60] sm:$0xf]  ;;  %v11360_v63 = vld [vmem:[#allocation2 + $0x78] sm:$0xf] }
 0x480   : > { %v14054_v50 = vsel %vm1918_vm15, %v10112_v14, %v14016_v36  ;;  %v7053_v2 = vrot.slane %v7052_v47, 4  ;;  %v14057_v61 = vsel %vm1918_vm15, %v10064_v21, %v6314_v16  ;;  %9188 = vmatprep.mubr.bf16.mxu0 %v13945_v24  ;;  %v14061_v52 = vsel %vm1918_vm15, %v10184_v44, %v8266_v7  ;;  %v14063_v17 = vpop.permute.xlu1 %7593 }
 0x481   : > { %v7063_v60 = vrot.slane %v7062_v31, 4  ;;  %v6600_v28 = vrot.slane %v6443_v18, 5  ;;  %v6603_v5 = vrot.slane %v6444_v4, 5  ;;  %v7070_v62 = vshrl.u32 %v6895_v35, 16  ;;  %v11362_v4 = vld [vmem:[#allocation2 + $0x64] sm:$0xf] }
 0x482   : > { %v7058_v39 = vsel %vm11591_vm8, %v7053_v2, %v7057_v25  ;;  %9302 = vmatmul.mubr.bf16.gmra.mrb[128].mxu1 %v7631_v22  ;;  %v7073_v36 = vshll.u32 %v6895_v35, 16  ;;  %v7079_v54 = vshll.u32 %v11354_v56, 16  ;;  %v7083_v16 = vshrl.u32 %v11354_v56, 16  ;;  %v6316_v29 = vpop.permute.xlu0 %6315  ;;  %v11358_v25 = vld [vmem:[#allocation2 + $0x6c] sm:$0xf] }
 0x483   : > { %v7068_v24 = vsel %vm11591_vm8, %v7063_v60, %v7067_v12  ;;  %9309 = vmatprep.mubr.bf16.mxu1 %v8307_v37  ;;  %v6601_v23 = vsel %vm12005_vm14, %v10097_v0, %v6600_v28  ;;  %v6602_v40 = vrot.slane %v6600_v28, 4  ;;  %v7072_v9 = vrot.slane %v7070_v62, 4  ;;  %v11359_v37 = vld [vmem:[#allocation2 + $0x70] sm:$0xf]  ;;  %v6901_v31 = vld [vmem:[#allocation2 + $0x6c] sm:$0xf] }
 0x484   : > { %v10151_v20 = vcombine.low %v7058_v39, %v7068_v24  ;;  %v7075_v19 = vrot.slane %v7073_v36, 5  ;;  %v7081_v59 = vrot.slane %v7079_v54, 5  ;;  %v7085_v41 = vrot.slane %v7083_v16, 4  ;;  %v11364_v54 = vld [vmem:[#allocation2 + $0x84] sm:$0xf] }
 0x485   : > { %v6604_v55 = vsel %vm12005_vm14, %v6602_v40, %v6603_v5  ;;  %v7089_v38 = vshll.u32 %v11355_v45, 16  ;;  %v10065_v34 = vcombine.low %v11356_v58, %v11357_v3  ;;  %v10185_v7 = vcombine.low %v11358_v25, %v11359_v37  ;;  %v11365_v16 = vld [vmem:[#allocation2 + $0x88] sm:$0xf]  ;;  %v11367_v25 = vld [vmem:[#allocation2 + $0x74] sm:$0x1] }
 0x486   : > { %v7635_v46 = vsel %vm1918_vm15, %v10151_v20, %v14026_v15  ;;  %v10113_v11 = vcombine.low %v6601_v23, %v6604_v55  ;;  %v7076_v1 = vor.u32 %v7075_v19, %v7072_v9  ;;  %v7086_v27 = vor.u32 %v7085_v41, %v7081_v59  ;;  %v8268_v30 = vpop.permute.xlu1 %8267  ;;  %v6904_v41 = vld [vmem:[#allocation2 + $0x78] sm:$0xf] }
 0x487   : > { %v7091_v14 = vrot.slane %v7089_v38, 5  ;;  %9189 = vmatmul.mubr.bf16.gmra.mrb[120].mxu0 %v13949_v26  ;;  %v14077_v47 = vsel %vm1918_vm15, %v10065_v34, %v6316_v29  ;;  %v14080_v53 = vsel %vm1918_vm15, %v10185_v7, %v8268_v30  ;;  %v7094_v15 = vshrl.u32 %v6898_v42, 16  ;;  %v11361_v26 = vld [vmem:[#allocation2 + $0x7c] sm:$0xf] }
 0x488   : > { %v14083_v13 = vsel %vm1918_vm15, %v10113_v11, %v6796_v43  ;;  %v7077_v21 = vrot.slane %v7076_v1, 4  ;;  %v7087_v32 = vrot.slane %v7086_v27, 4  ;;  %6396 = vst [vmem:[#allocation3 + $0x258] sm:$0xff] %v14077_v47  ;;  %9196 = vmatprep.mubr.bf16.mxu0 %v13978_v33  ;;  %v10186_v44 = vcombine.low %v11360_v63, %v11361_v26  ;;  %v11363_v33 = vld [vmem:[#allocation2 + $0x68] sm:$0x1] }
 0x489   : > { %6876 = vst [vmem:[#allocation3 + $0x260] sm:$0xff] %v14083_v13  ;;  %v7097_v18 = vshll.u32 %v6898_v42, 16  ;;  %v7103_v35 = vshll.u32 %v11362_v4, 16  ;;  %v7107_v22 = vshrl.u32 %v11362_v4, 16  ;;  %v7096_v0 = vrot.slane %v7094_v15, 4 }
 0x48a   : > { %v7082_v43 = vsel %vm11591_vm8, %v7077_v21, %v7081_v59  ;;  %v7092_v12 = vsel %vm11591_vm8, %v7087_v32, %v7091_v14  ;;  %9310 = vmatmul.mubr.bf16.gmra.mrb[132].mxu1 %v7635_v46  ;;  %v7113_v2 = vshll.u32 %v11363_v33, 16  ;;  %v8270_v28 = vpop.permute.xlu0 %8269  ;;  %v7596_v56 = vpop.permute.xlu1 %7595  ;;  %v10187_v24 = vcombine.low %v11364_v54, %v11365_v16  ;;  %v11366_v59 = vld [vmem:[#allocation2 + $0x70] sm:$0xf]  ;;  %v11369_v46 = vld [vmem:[#allocation2 + $0x94] sm:$0xf] }
 0x48b   : > { %v10152_v60 = vcombine.low %v7082_v43, %v7092_v12  ;;  %9317 = vmatprep.mubr.bf16.mxu1 %v14061_v52  ;;  %v7099_v5 = vrot.slane %v7097_v18, 5  ;;  %v7105_v62 = vrot.slane %v7103_v35, 5  ;;  %v7109_v39 = vrot.slane %v7107_v22, 4  ;;  %v11368_v42 = vld [vmem:[#allocation2 + $0x90] sm:$0xf] }
 0x48c   : > { %v14094_v36 = vsel %vm1918_vm15, %v10186_v44, %v8270_v28  ;;  %v7118_v23 = vshrl.u32 %v6901_v31, 16  ;;  %v7121_v40 = vshll.u32 %v6901_v31, 16  ;;  %v7127_v52 = vshll.u32 %v11366_v59, 16  ;;  %v6907_v18 = vld [vmem:[#allocation2 + $0x84] sm:$0xf] }
 0x48d   : > { %v7639_v9 = vsel %vm1918_vm15, %v10152_v60, %v14063_v17  ;;  %v7100_v20 = vor.u32 %v7099_v5, %v7096_v0  ;;  %v7110_v19 = vor.u32 %v7109_v39, %v7105_v62  ;;  %v7115_v29 = vrot.slane %v7113_v2, 5  ;;  %v11371_v28 = vld [vmem:[#allocation2 + $0x80] sm:$0x1]  ;;  %v11372_v54 = vld [vmem:[#allocation2 + $0x9c] sm:$0xf] }
 0x48e   : > { %v7120_v55 = vrot.slane %v7118_v23, 4  ;;  %v7123_v45 = vrot.slane %v7121_v40, 5  ;;  %v7131_v38 = vshrl.u32 %v11366_v59, 16  ;;  %v7129_v34 = vrot.slane %v7127_v52, 5  ;;  %v11373_v16 = vld [vmem:[#allocation2 + $0xa0] sm:$0xf] }
 0x48f   : > { %v7101_v58 = vrot.slane %v7100_v20, 4  ;;  %v7111_v3 = vrot.slane %v7110_v19, 4  ;;  %9197 = vmatmul.mubr.bf16.gmra.mrb[124].mxu0 %v13982_v6  ;;  %v7137_v37 = vshll.u32 %v11367_v25, 16  ;;  %v10188_v11 = vcombine.low %v11368_v42, %v11369_v46  ;;  %v11370_v6 = vld [vmem:[#allocation2 + $0x7c] sm:$0xf]  ;;  %v7598_v44 = vpop.permute.xlu1 %7597 }
 0x490   : > { %9204 = vmatprep.mubr.bf16.mxu0 %v14008_v49  ;;  %v7124_v7 = vor.u32 %v7123_v45, %v7120_v55  ;;  %v7133_v17 = vrot.slane %v7131_v38, 4  ;;  %v7142_v1 = vshrl.u32 %v6904_v41, 16  ;;  %v7145_v21 = vshll.u32 %v6904_v41, 16  ;;  %v11374_v40 = vld [vmem:[#allocation2 + $0x88] sm:$0xf] }
 0x491   : > { %v7106_v27 = vsel %vm11591_vm8, %v7101_v58, %v7105_v62  ;;  %v7116_v30 = vsel %vm11591_vm8, %v7111_v3, %v7115_v29  ;;  %v8272_v14 = vpop.permute.xlu0 %8271  ;;  %v7151_v32 = vshll.u32 %v11370_v6, 16  ;;  %v7155_v31 = vshrl.u32 %v11370_v6, 16  ;;  %v6910_v52 = vld [vmem:[#allocation2 + $0x90] sm:$0xf]  ;;  %v11376_v46 = vld [vmem:[#allocation2 + $0xa8] sm:$0xf] }
 0x492   : > { %v10153_v15 = vcombine.low %v7106_v27, %v7116_v30  ;;  %9318 = vmatmul.mubr.bf16.gmra.mrb[136].mxu1 %v7639_v9  ;;  %v14105_v49 = vsel %vm1918_vm15, %v10187_v24, %v8272_v14  ;;  %v7125_v63 = vrot.slane %v7124_v7, 4  ;;  %v7134_v26 = vor.u32 %v7133_v17, %v7129_v34  ;;  %v11375_v17 = vld [vmem:[#allocation2 + $0x8c] sm:$0x1]  ;;  %v11378_v30 = vld [vmem:[#allocation2 + $0x94] sm:$0xf] }
 0x493   : > { %9325 = vmatprep.mubr.bf16.mxu1 %v14080_v53  ;;  %v7144_v4 = vrot.slane %v7142_v1, 4  ;;  %v7147_v35 = vrot.slane %v7145_v21, 5  ;;  %v7153_v22 = vrot.slane %v7151_v32, 5  ;;  %v7139_v33 = vrot.slane %v7137_v37, 5 }
 0x494   : > { %v7643_v43 = vsel %vm1918_vm15, %v10153_v15, %v7596_v56  ;;  %v7130_v12 = vsel %vm11591_vm8, %v7125_v63, %v7129_v34  ;;  %v7135_v0 = vrot.slane %v7134_v26, 4  ;;  %v7157_v60 = vrot.slane %v7155_v31, 4  ;;  %v6913_v26 = vld [vmem:[#allocation2 + $0x9c] sm:$0xf] }
 0x495   : > { %v7148_v2 = vor.u32 %v7147_v35, %v7144_v4  ;;  %v7161_v5 = vshll.u32 %v11371_v28, 16  ;;  %v7166_v62 = vshrl.u32 %v6907_v18, 16  ;;  %v10189_v24 = vcombine.low %v11372_v54, %v11373_v16  ;;  %v11382_v16 = vld [vmem:[#allocation2 + $0xa0] sm:$0xf] }
 0x496   : > { %v7140_v39 = vsel %vm11591_vm8, %v7135_v0, %v7139_v33  ;;  %v8274_v53 = vpop.permute.xlu0 %8273  ;;  %v7169_v23 = vshll.u32 %v6907_v18, 16  ;;  %v7175_v56 = vshll.u32 %v11374_v40, 16  ;;  %v7158_v59 = vor.u32 %v7157_v60, %v7153_v22  ;;  %v7600_v41 = vpop.permute.xlu1 %7599 }
 0x497   : > { %v10154_v9 = vcombine.low %v7130_v12, %v7140_v39  ;;  %v14114_v20 = vsel %vm1918_vm15, %v10188_v11, %v8274_v53  ;;  %v7149_v19 = vrot.slane %v7148_v2, 4  ;;  %9205 = vmatmul.mubr.bf16.gmra.mrb[128].mxu0 %v14012_v48  ;;  %v7168_v29 = vrot.slane %v7166_v62, 4  ;;  %v11377_v11 = vld [vmem:[#allocation2 + $0xac] sm:$0xf]  ;;  %v11379_v2 = vld [vmem:[#allocation2 + $0x98] sm:$0x1] }
 0x498   : > { %9212 = vmatprep.mubr.bf16.mxu0 %v14033_v10  ;;  %v7171_v55 = vrot.slane %v7169_v23, 5  ;;  %v7177_v45 = vrot.slane %v7175_v56, 5  ;;  %v7179_v38 = vshrl.u32 %v11374_v40, 16  ;;  %v7159_v34 = vrot.slane %v7158_v59, 4  ;;  %v14135_v62 = vld [vmem:[#allocation2 + $0xb4] sm:$0xf] }
 0x499   : > { %v7647_v58 = vsel %vm1918_vm15, %v10154_v9, %v7598_v44  ;;  %v7154_v3 = vsel %vm11591_vm8, %v7149_v19, %v7153_v22  ;;  %v7163_v25 = vrot.slane %v7161_v5, 5  ;;  %v7185_v48 = vshll.u32 %v11375_v17, 16  ;;  %v14137_v39 = vld [vmem:[#allocation2 + $0xb8] sm:$0xf] }
 0x49a   : > { %9326 = vmatmul.mubr.bf16.gmra.mrb[140].mxu1 %v7643_v43  ;;  %v7172_v37 = vor.u32 %v7171_v55, %v7168_v29  ;;  %v7181_v7 = vrot.slane %v7179_v38, 4  ;;  %v7190_v42 = vshrl.u32 %v6910_v52, 16  ;;  %v10190_v1 = vcombine.low %v11376_v46, %v11377_v11  ;;  %v6916_v55 = vld [vmem:[#allocation2 + $0xa8] sm:$0xf] }
 0x49b   : > { %v7164_v10 = vsel %vm11591_vm8, %v7159_v34, %v7163_v25  ;;  %9333 = vmatprep.mubr.bf16.mxu1 %v14094_v36  ;;  %v7193_v27 = vshll.u32 %v6910_v52, 16  ;;  %v7199_v14 = vshll.u32 %v11378_v30, 16  ;;  %v7203_v35 = vshrl.u32 %v11378_v30, 16 }
 0x49c   : > { %v10155_v21 = vcombine.low %v7154_v3, %v7164_v10  ;;  %v8276_v6 = vpop.permute.xlu0 %8275  ;;  %v7173_v32 = vrot.slane %v7172_v37, 4  ;;  %v7182_v15 = vor.u32 %v7181_v7, %v7177_v45  ;;  %v7192_v63 = vrot.slane %v7190_v42, 4  ;;  %v7602_v12 = vpop.permute.xlu1 %7601  ;;  %v11384_v10 = vld [vmem:[#allocation2 + $0xac] sm:$0xf] }
 0x49d   : > { %v14125_v44 = vsel %vm1918_vm15, %v10189_v24, %v8276_v6  ;;  %v7195_v18 = vrot.slane %v7193_v27, 5  ;;  %v7201_v4 = vrot.slane %v7199_v14, 5  ;;  %v7187_v43 = vrot.slane %v7185_v48, 5  ;;  %v6919_v14 = vld [vmem:[#allocation2 + $0xb4] sm:$0xf] }
 0x49e   : > { %v14128_v36 = vsel %vm1918_vm15, %v10155_v21, %v7600_v41  ;;  %v7178_v22 = vsel %vm11591_vm8, %v7173_v32, %v7177_v45  ;;  %v7183_v31 = vrot.slane %v7182_v15, 4  ;;  %v7205_v33 = vrot.slane %v7203_v35, 4  ;;  %v11383_v41 = vld [vmem:[#allocation2 + $0xa4] sm:$0x1]  ;;  %v11385_v32 = vld [vmem:[#allocation2 + $0xb0] sm:$0x1] }
 0x49f   : > { %v7196_v0 = vor.u32 %v7195_v18, %v7192_v63  ;;  %v7209_v60 = vshll.u32 %v11379_v2, 16  ;;  %9213 = vmatmul.mubr.bf16.gmra.mrb[132].mxu0 %v14037_v57  ;;  %v7214_v28 = vshrl.u32 %v6913_v26, 16  ;;  %v10191_v53 = vcombine.low %v14135_v62, %v14137_v39  ;;  %v11388_v62 = vld [vmem:[#allocation2 + $0xc4] sm:$0xf] }
 0x4a0   : > { %v7188_v5 = vsel %vm11591_vm8, %v7183_v31, %v7187_v43  ;;  %9220 = vmatprep.mubr.bf16.mxu0 %v14054_v50  ;;  %v7217_v54 = vshll.u32 %v6913_v26, 16  ;;  %v7223_v24 = vshll.u32 %v11382_v16, 16  ;;  %v7206_v56 = vor.u32 %v7205_v33, %v7201_v4 }
 0x4a1   : > { %v10156_v23 = vcombine.low %v7178_v22, %v7188_v5  ;;  %v7197_v40 = vrot.slane %v7196_v0, 4  ;;  %v7216_v57 = vrot.slane %v7214_v28, 4  ;;  %v8278_v9 = vpop.permute.xlu0 %8277  ;;  %v7227_v52 = vshrl.u32 %v11382_v16, 16  ;;  %v6922_v16 = vld [vmem:[#allocation2 + $0xc0] sm:$0xf] }
 0x4a2   : > { %9334 = vmatmul.mubr.bf16.gmra.mrb[144].mxu1 %v7647_v58  ;;  %v7219_v19 = vrot.slane %v7217_v54, 5  ;;  %v7225_v59 = vrot.slane %v7223_v24, 5  ;;  %v7233_v29 = vshll.u32 %v11383_v41, 16  ;;  %v14146_v50 = vsel %vm1918_vm15, %v10190_v1, %v8278_v9  ;;  %v7604_v58 = vpop.permute.xlu1 %7603 }
 0x4a3   : > { %v14143_v45 = vsel %vm1918_vm15, %v10156_v23, %v7602_v12  ;;  %v7207_v38 = vrot.slane %v7206_v56, 4  ;;  %v7211_v3 = vrot.slane %v7209_v60, 5  ;;  %9341 = vmatprep.mubr.bf16.mxu1 %v14105_v49  ;;  %v7202_v34 = vsel %vm11591_vm8, %v7197_v40, %v7201_v4 }
 0x4a4   : > { %v7220_v25 = vor.u32 %v7219_v19, %v7216_v57  ;;  %v7229_v37 = vrot.slane %v7227_v52, 4  ;;  %v7235_v7 = vrot.slane %v7233_v29, 5  ;;  %v7238_v48 = vshrl.u32 %v6916_v55, 16  ;;  %v11387_v57 = vld [vmem:[#allocation2 + $0xbc] sm:$0x1] }
 0x4a5   : > { %v7212_v17 = vsel %vm11591_vm8, %v7207_v38, %v7211_v3  ;;  %v7241_v42 = vshll.u32 %v6916_v55, 16  ;;  %v7247_v46 = vshll.u32 %v11384_v10, 16  ;;  %v7251_v30 = vshrl.u32 %v11384_v10, 16  ;;  %v11391_v10 = vld [vmem:[#allocation2 + $0xc4] sm:$0xf] }
 0x4a6   : > { %v10157_v11 = vcombine.low %v7202_v34, %v7212_v17  ;;  %v7221_v1 = vrot.slane %v7220_v25, 4  ;;  %v7230_v27 = vor.u32 %v7229_v37, %v7225_v59  ;;  %v7240_v49 = vrot.slane %v7238_v48, 4  ;;  %v8366_v48 = vld [vmem:[#allocation2 + $0x1c] sm:$0xf] }
 0x4a7   : > { %v7243_v21 = vrot.slane %v7241_v42, 5  ;;  %v7249_v6 = vrot.slane %v7247_v46, 5  ;;  %v7257_v15 = vshll.u32 %v11385_v32, 16  ;;  %9221 = vmatmul.mubr.bf16.gmra.mrb[136].mxu0 %v14057_v61  ;;  %v7253_v4 = vrot.slane %v7251_v30, 4  ;;  %v11386_v61 = vld [vmem:[#allocation2 + $0xb8] sm:$0xf] }
 0x4a8   : > { %v14155_v63 = vsel %vm1918_vm15, %v10157_v11, %v7604_v58  ;;  %v7226_v26 = vsel %vm11591_vm8, %v7221_v1, %v7225_v59  ;;  %v7231_v18 = vrot.slane %v7230_v27, 4  ;;  %9228 = vmatprep.mubr.bf16.mxu0 %v14083_v13  ;;  %v7262_v31 = vshrl.u32 %v6919_v14, 16  ;;  %v11390_v42 = vld [vmem:[#allocation2 + $0xc0] sm:$0xf]  ;;  %v8368_v32 = vld [vmem:[#allocation2 + $0x24] sm:$0xe] }
 0x4a9   : > { %v7244_v35 = vor.u32 %v7243_v21, %v7240_v49  ;;  %v7259_v22 = vrot.slane %v7257_v15, 5  ;;  %v7265_v43 = vshll.u32 %v6919_v14, 16  ;;  %v7606_v0 = vpop.permute.xlu1 %7605  ;;  %v7254_v33 = vor.u32 %v7253_v4, %v7249_v6  ;;  %v8367_v30 = vld [vmem:[#allocation2 + $0x20] sm:$0x1]  ;;  %v8369_v14 = vld [vmem:[#allocation2 + $0x28] sm:$0xf] }
 0x4aa   : > { %v7236_v12 = vsel %vm11591_vm8, %v7231_v18, %v7235_v7  ;;  %9342 = vmatmul.mubr.bf16.gmra.mrb[148].mxu1 %v14128_v36  ;;  %v7271_v2 = vshll.u32 %v11386_v61, 16  ;;  %v7275_v60 = vshrl.u32 %v11386_v61, 16  ;;  %v7264_v54 = vrot.slane %v7262_v31, 4  ;;  %v11389_v7 = vld [vmem:[#allocation2 + $0xc8] sm:$0x1] }
 0x4ab   : > { %v10158_v28 = vcombine.low %v7226_v26, %v7236_v12  ;;  %v7245_v5 = vrot.slane %v7244_v35, 4  ;;  %9349 = vmatprep.mubr.bf16.mxu1 %v14114_v20  ;;  %v7267_v13 = vrot.slane %v7265_v43, 5  ;;  %v7255_v23 = vrot.slane %v7254_v33, 4  ;;  %v8370_v35 = vld [vmem:[#allocation2 + $0x2c] sm:$0x1] }
 0x4ac   : > { %v8280_v24 = vpop.permute.xlu0 %8279  ;;  %v7273_v40 = vrot.slane %v7271_v2, 5  ;;  %v7277_v56 = vrot.slane %v7275_v60, 4  ;;  %v7281_v9 = vshll.u32 %v11387_v57, 16  ;;  %v7286_v55 = vshrl.u32 %v6922_v16, 16  ;;  %v8371_v33 = vld [vmem:[#allocation2 + $0x30] sm:$0xe] }
 0x4ad   : > { %v14168_v36 = vsel %vm1918_vm15, %v10191_v53, %v8280_v24  ;;  %v14171_v19 = vsel %vm1918_vm15, %v10158_v28, %v7606_v0  ;;  %v7250_v20 = vsel %vm11591_vm8, %v7245_v5, %v7249_v6  ;;  %v7268_v59 = vor.u32 %v7267_v13, %v7264_v54  ;;  %v8365_v53 = vld [vmem:[#allocation2 + $0x18] sm:$0xe]  ;;  %v8372_v61 = vld [vmem:[#allocation2 + $0x34] sm:$0xf] }
 0x4ae   : > { %v7260_v52 = vsel %vm11591_vm8, %v7255_v23, %v7259_v22  ;;  %v7278_v41 = vor.u32 %v7277_v56, %v7273_v40  ;;  %v7283_v29 = vrot.slane %v7281_v9, 5  ;;  %v7289_v34 = vshll.u32 %v6922_v16, 16  ;;  %v8373_v16 = vld [vmem:[#allocation2 + $0x38] sm:$0x1]  ;;  %v8374_v9 = vld [vmem:[#allocation2 + $0x3c] sm:$0xe] }
 0x4af   : > { %v10159_v38 = vcombine.low %v7250_v20, %v7260_v52  ;;  %v7269_v3 = vrot.slane %v7268_v59, 4  ;;  %v7295_v39 = vshll.u32 %v11388_v62, 16  ;;  %9229 = vmatmul.mubr.bf16.gmra.mrb[140].mxu0 %v14077_v47  ;;  %v7288_v25 = vrot.slane %v7286_v55, 4  ;;  %v8375_v20 = vld [vmem:[#allocation2 + $0x40] sm:$0xf] }
 0x4b0   : > { %v7279_v58 = vrot.slane %v7278_v41, 4  ;;  %v7299_v37 = vshrl.u32 %v11388_v62, 16  ;;  %v7305_v17 = vshll.u32 %v11389_v7, 16  ;;  %v10192_v46 = vcombine.low %v11390_v42, %v11391_v10  ;;  %v8376_v55 = vld [vmem:[#allocation2 + $0x44] sm:$0x1] }
 0x4b1   : > { %v7608_v11 = vpop.permute.xlu1 %7607  ;;  %v7291_v1 = vrot.slane %v7289_v34, 5  ;;  %v7297_v27 = vrot.slane %v7295_v39, 5  ;;  %v7274_v47 = vsel %vm11591_vm8, %v7269_v3, %v7273_v40  ;;  %v10210_v18 = vrot.slane %v8365_v53, 9  ;;  %v8378_v3 = vld [vmem:[#allocation2 + $0x4c] sm:$0xf] }
 0x4b2   : > { %v14179_v49 = vsel %vm1918_vm15, %v10159_v38, %v7608_v11  ;;  %v7284_v21 = vsel %vm11591_vm8, %v7279_v58, %v7283_v29  ;;  %v7301_v6 = vrot.slane %v7299_v37, 4  ;;  %9350 = vmatmul.mubr.bf16.gmra.mrb[152].mxu1 %v14143_v45  ;;  %v7307_v26 = vrot.slane %v7305_v17, 5  ;;  %v8377_v38 = vld [vmem:[#allocation2 + $0x48] sm:$0xe]  ;;  %v8379_v58 = vld [vmem:[#allocation2 + $0x50] sm:$0x1] }
 0x4b3   : > { %v7292_v15 = vor.u32 %v7291_v1, %v7288_v25  ;;  %9357 = vmatprep.mubr.bf16.mxu1 %v14125_v44  ;;  %v8463_v4 = vrot.slane %v8366_v48, 5  ;;  %v10160_v31 = vcombine.low %v7274_v47, %v7284_v21  ;;  %v8466_v12 = vrot.slane %v8367_v30, 5  ;;  %v8380_v25 = vld [vmem:[#allocation2 + $0x54] sm:$0xe]  ;;  %v8381_v42 = vld [vmem:[#allocation2 + $0x58] sm:$0xf] }
 0x4b4   : > { %v8282_v22 = vpop.permute.xlu0 %8281  ;;  %v7302_v43 = vor.u32 %v7301_v6, %v7297_v27  ;;  %v8470_v0 = vrot.slane %v8369_v14, 5  ;;  %v10211_v28 = vrot.slane %v8368_v32, 9  ;;  %v8473_v13 = vrot.slane %v8370_v35, 5  ;;  %v8384_v10 = vld [vmem:[#allocation2 + $0x64] sm:$0xf] }
 0x4b5   : > { %v14188_v2 = vsel %vm1918_vm15, %v10192_v46, %v8282_v22  ;;  %v7293_v60 = vrot.slane %v7292_v15, 4  ;;  %v8465_v45 = vrot.slane %v8463_v4, 4  ;;  %v8464_v44 = vsel %vm12005_vm14, %v10210_v18, %v8463_v4  ;;  %v8382_v30 = vld [vmem:[#allocation2 + $0x5c] sm:$0x1]  ;;  %v8383_v6 = vld [vmem:[#allocation2 + $0x60] sm:$0xe] }
 0x4b6   : > { %v7303_v5 = vrot.slane %v7302_v43, 4  ;;  %v8472_v54 = vrot.slane %v8470_v0, 4  ;;  %v8471_v40 = vsel %vm12005_vm14, %v10211_v28, %v8470_v0  ;;  %v10212_v56 = vrot.slane %v8371_v33, 9  ;;  %v8385_v32 = vld [vmem:[#allocation2 + $0x68] sm:$0x1] }
 0x4b7   : > { %v7610_v24 = vpop.permute.xlu1 %7609  ;;  %v8467_v23 = vsel %vm12005_vm14, %v8465_v45, %v8466_v12  ;;  %v8477_v57 = vrot.slane %v8372_v61, 5  ;;  %v7298_v34 = vsel %vm11591_vm8, %v7293_v60, %v7297_v27  ;;  %v8480_v53 = vrot.slane %v8373_v16, 5  ;;  %v8386_v4 = vld [vmem:[#allocation2 + $0x6c] sm:$0xe]  ;;  %v8389_v35 = vld [vmem:[#allocation2 + $0x78] sm:$0xe] }
 0x4b8   : > { %v14197_v59 = vsel %vm1918_vm15, %v10160_v31, %v7610_v24  ;;  %v7308_v52 = vsel %vm11591_vm8, %v7303_v5, %v7307_v26  ;;  %v10226_v41 = vcombine.low %v8464_v44, %v8467_v23  ;;  %v8474_v29 = vsel %vm12005_vm14, %v8472_v54, %v8473_v13  ;;  %v8387_v0 = vld [vmem:[#allocation2 + $0x70] sm:$0xf]  ;;  %v8390_v33 = vld [vmem:[#allocation2 + $0x7c] sm:$0xf]  ;;  %v8388_v5 = vld [vmem:[#allocation2 + $0x74] sm:$0x1] }
 0x4b9   : > { %v10227_v62 = vcombine.low %v8471_v40, %v8474_v29  ;;  %v8479_v39 = vrot.slane %v8477_v57, 4  ;;  %v10161_v37 = vcombine.low %v7298_v34, %v7308_v52  ;;  %v8478_v7 = vsel %vm12005_vm14, %v10212_v56, %v8477_v57  ;;  %v8391_v44 = vld [vmem:[#allocation2 + $0x80] sm:$0x1]  ;;  %v8392_v23 = vld [vmem:[#allocation2 + $0x84] sm:$0xe] }
 0x4ba   : > { %8637 = vst.msk [vmem:[#allocation3 + $0x20] sm:$0xff] %vm1918_vm15, %v10226_v41  ;;  %9358 = vmatmul.mubr.bf16.gmra.mrb[156].mxu1 %v14155_v63  ;;  %v10213_v17 = vrot.slane %v8374_v9, 9  ;;  %v8484_v48 = vrot.slane %v8375_v20, 5  ;;  %v8487_v11 = vrot.slane %v8376_v55, 5  ;;  %v10214_v1 = vrot.slane %v8377_v38, 9 }
 0x4bb   : > { %v7612_v46 = vpop.permute.xlu1 %7611  ;;  %8638 = vst.msk [vmem:[#allocation3 + $0x48] sm:$0xff] %vm1918_vm15, %v10227_v62  ;;  %9365 = vmatprep.mubr.bf16.mxu1 %v14146_v50  ;;  %v8481_v51 = vsel %vm12005_vm14, %v8479_v39, %v8480_v53  ;;  %v8491_v27 = vrot.slane %v8378_v3, 5  ;;  %v8494_v21 = vrot.slane %v8379_v58, 5  ;;  %v10215_v50 = vrot.slane %v8380_v25, 9  ;;  %v8396_v40 = vld [vmem:[#allocation2 + $0x94] sm:$0xf] }
 0x4bc   : > { %v14214_v63 = vsel %vm1918_vm15, %v10161_v37, %v7612_v46  ;;  %v10228_v14 = vcombine.low %v8478_v7, %v8481_v51  ;;  %v8486_v47 = vrot.slane %v8484_v48, 4  ;;  %v8485_v15 = vsel %vm12005_vm14, %v10213_v17, %v8484_v48  ;;  %v8393_v41 = vld [vmem:[#allocation2 + $0x88] sm:$0xf]  ;;  %v8394_v62 = vld [vmem:[#allocation2 + $0x8c] sm:$0x1] }
 0x4bd   : > { %v8493_v26 = vrot.slane %v8491_v27, 4  ;;  %v8498_v18 = vrot.slane %v8381_v42, 5  ;;  %v8492_v31 = vsel %vm12005_vm14, %v10214_v1, %v8491_v27  ;;  %v8501_v43 = vrot.slane %v8382_v30, 5  ;;  %v8397_v42 = vld [vmem:[#allocation2 + $0x98] sm:$0x1] }
 0x4be   : > { %8639 = vst.msk [vmem:[#allocation3 + $0x70] sm:$0xff] %vm1918_vm15, %v10228_v14  ;;  %v8488_v22 = vsel %vm12005_vm14, %v8486_v47, %v8487_v11  ;;  %v8505_v12 = vrot.slane %v8384_v10, 5  ;;  %v10216_v28 = vrot.slane %v8383_v6, 9  ;;  %v8508_v24 = vrot.slane %v8385_v32, 5  ;;  %v8399_v1 = vld [vmem:[#allocation2 + $0xa0] sm:$0xf] }
 0x4bf   : > { %v10229_v61 = vcombine.low %v8485_v15, %v8488_v22  ;;  %v8495_v60 = vsel %vm12005_vm14, %v8493_v26, %v8494_v21  ;;  %v8500_v45 = vrot.slane %v8498_v18, 4  ;;  %v8499_v13 = vsel %vm12005_vm14, %v10215_v50, %v8498_v18  ;;  %v8401_v27 = vld [vmem:[#allocation2 + $0xa8] sm:$0xe]  ;;  %v8398_v6 = vld [vmem:[#allocation2 + $0x9c] sm:$0xe] }
 0x4c0   : > { %v10230_v54 = vcombine.low %v8492_v31, %v8495_v60  ;;  %v8507_v16 = vrot.slane %v8505_v12, 4  ;;  %v8506_v9 = vsel %vm12005_vm14, %v10216_v28, %v8505_v12  ;;  %v10217_v20 = vrot.slane %v8386_v4, 9  ;;  %v8402_v32 = vld [vmem:[#allocation2 + $0xac] sm:$0xf]  ;;  %v8400_v18 = vld [vmem:[#allocation2 + $0xa4] sm:$0x1] }
 0x4c1   : > { %v8657_v56 = vld [vmem:[#allocation3 + $0x20] sm:$0xff]  ;;  %8640 = vst.msk [vmem:[#allocation3 + $0x98] sm:$0xff] %vm1918_vm15, %v10229_v61  ;;  %v8502_v57 = vsel %vm12005_vm14, %v8500_v45, %v8501_v43  ;;  %v8512_v52 = vrot.slane %v8387_v0, 5  ;;  %v10218_v3 = vrot.slane %v8389_v35, 9  ;;  %v8519_v34 = vrot.slane %v8390_v33, 5 }
 0x4c2   : > { %10970 = vmatprep.mubr.msk.bf16.mxu0 %vm1918_vm15, %v8657_v56  ;;  %v8662_v29 = vld [vmem:[#allocation3 + $0x48] sm:$0xff]  ;;  %9366 = vmatmul.mubr.bf16.gmra.mrb[160].mxu1 %v14171_v19  ;;  %8641 = vst.msk [vmem:[#allocation3 + $0xc0] sm:$0xff] %vm1918_vm15, %v10230_v54  ;;  %v10231_v55 = vcombine.low %v8499_v13, %v8502_v57  ;;  %v8509_v38 = vsel %vm12005_vm14, %v8507_v16, %v8508_v24  ;;  %v8515_v25 = vrot.slane %v8388_v5, 5  ;;  %v8395_v19 = vld [vmem:[#allocation2 + $0x90] sm:$0xe]  ;;  %v8522_v17 = vrot.slane %v8391_v44, 5 }
 0x4c3   : > { %10971 = vmatmul.mubr.msk.bf16.vlgmr.msra.gmra.mrb[144].mxu0 %vm1918_vm15, %v8662_v29  ;;  %9373 = vmatprep.mubr.bf16.mxu1 %v14168_v36  ;;  %v10232_v39 = vcombine.low %v8506_v9, %v8509_v38  ;;  %v8513_v53 = vsel %vm12005_vm14, %v10217_v20, %v8512_v52  ;;  %v8514_v58 = vrot.slane %v8512_v52, 4  ;;  %v8520_v37 = vsel %vm12005_vm14, %v10218_v3, %v8519_v34  ;;  %v8403_v4 = vld [vmem:[#allocation2 + $0xb0] sm:$0x1]  ;;  %v8404_v12 = vld [vmem:[#allocation2 + $0xb4] sm:$0xe] }
 0x4c4   : > { %8642 = vst.msk [vmem:[#allocation3 + $0xe8] sm:$0xff] %vm1918_vm15, %v10231_v55  ;;  %v8521_v7 = vrot.slane %v8519_v34, 4  ;;  %v8526_v48 = vrot.slane %v8393_v41, 5  ;;  %v10219_v46 = vrot.slane %v8392_v23, 9  ;;  %v8529_v51 = vrot.slane %v8394_v62, 5 }
 0x4c5   : > { %v8667_v10 = vld [vmem:[#allocation3 + $0x70] sm:$0xff]  ;;  %8643 = vst.msk [vmem:[#allocation3 + $0x110] sm:$0xff] %vm1918_vm15, %v10232_v39  ;;  %v8516_v36 = vsel %vm12005_vm14, %v8514_v58, %v8515_v25  ;;  %v8533_v11 = vrot.slane %v8396_v40, 5  ;;  %v10220_v21 = vrot.slane %v8395_v19, 9  ;;  %v8536_v50 = vrot.slane %v8397_v42, 5 }
 0x4c6   : > { %10974 = vmatprep.mubr.msk.bf16.mxu0 %vm1918_vm15, %v8667_v10  ;;  %v10233_v30 = vcombine.low %v8513_v53, %v8516_v36  ;;  %v8523_v14 = vsel %vm12005_vm14, %v8521_v7, %v8522_v17  ;;  %v8528_v47 = vrot.slane %v8526_v48, 4  ;;  %v8527_v35 = vsel %vm12005_vm14, %v10219_v46, %v8526_v48  ;;  %v8405_v0 = vld [vmem:[#allocation2 + $0xb8] sm:$0xf]  ;;  %v8406_v28 = vld [vmem:[#allocation2 + $0xbc] sm:$0x1] }
 0x4c7   : > { %v10234_v15 = vcombine.low %v8520_v37, %v8523_v14  ;;  %v8535_v26 = vrot.slane %v8533_v11, 4  ;;  %v8534_v31 = vsel %vm12005_vm14, %v10220_v21, %v8533_v11  ;;  %v8540_v43 = vrot.slane %v8399_v1, 5  ;;  %v8408_v5 = vld [vmem:[#allocation2 + $0xc4] sm:$0xf]  ;;  %v8407_v23 = vld [vmem:[#allocation2 + $0xc0] sm:$0xe] }
 0x4c8   : > { %8644 = vst.msk [vmem:[#allocation3 + $0x138] sm:$0xff] %vm1918_vm15, %v10233_v30  ;;  %v8530_v22 = vsel %vm12005_vm14, %v8528_v47, %v8529_v51  ;;  %v10221_v60 = vrot.slane %v8398_v6, 9  ;;  %v8547_v45 = vrot.slane %v8402_v32, 5  ;;  %v8672_v44 = vld [vmem:[#allocation3 + $0x98] sm:$0xff]  ;;  %v8543_v16 = vrot.slane %v8400_v18, 5 }
 0x4c9   : > { %8645 = vst.msk [vmem:[#allocation3 + $0x160] sm:$0xff] %vm1918_vm15, %v10234_v15  ;;  %v10235_v33 = vcombine.low %v8527_v35, %v8530_v22  ;;  %v8537_v61 = vsel %vm12005_vm14, %v8535_v26, %v8536_v50  ;;  %v8542_v13 = vrot.slane %v8540_v43, 4  ;;  %v10222_v24 = vrot.slane %v8401_v27, 9  ;;  %v8677_v40 = vld [vmem:[#allocation3 + $0xc0] sm:$0xff]  ;;  %v8409_v52 = vld [vmem:[#allocation2 + $0xc8] sm:$0x1] }
 0x4ca   : > { %9374 = vmatmul.mubr.bf16.gmra.mrb[164].mxu1 %v14179_v49  ;;  %v10236_v54 = vcombine.low %v8534_v31, %v8537_v61  ;;  %v8541_v56 = vsel %vm12005_vm14, %v10221_v60, %v8540_v43  ;;  %v8549_v57 = vrot.slane %v8547_v45, 4  ;;  %v8550_v9 = vrot.slane %v8403_v4, 5  ;;  %v11392_v36 = vld [vmem:[#allocation2 + $0xcc] sm:$0xf]  ;;  %v11393_v46 = vld [vmem:[#allocation2 + $0xd0] sm:$0xf] }
 0x4cb   : > { %10975 = vmatmul.mubr.msk.bf16.gmra.mrb[148].mxu0 %vm1918_vm15, %v8672_v44  ;;  %9381 = vmatprep.mubr.bf16.mxu1 %v14188_v2  ;;  %8646 = vst.msk [vmem:[#allocation3 + $0x188] sm:$0xff] %vm1918_vm15, %v10235_v33  ;;  %v8554_v20 = vrot.slane %v8405_v0, 5  ;;  %v8544_v49 = vsel %vm12005_vm14, %v8542_v13, %v8543_v16  ;;  %v8548_v41 = vsel %vm12005_vm14, %v10222_v24, %v8547_v45  ;;  %v10223_v2 = vrot.slane %v8404_v12, 9  ;;  %v8682_v42 = vld [vmem:[#allocation3 + $0xe8] sm:$0xff]  ;;  %v8732_v6 = vld [vmem:[#allocation3 + $0x278] sm:$0xff] }
 0x4cc   : > { %10978 = vmatprep.mubr.msk.bf16.mxu0 %vm1918_vm15, %v8677_v40  ;;  %8647 = vst.msk [vmem:[#allocation3 + $0x1b0] sm:$0xff] %vm1918_vm15, %v10236_v54  ;;  %v8561_v29 = vrot.slane %v8408_v5, 5  ;;  %v10237_v55 = vcombine.low %v8541_v56, %v8544_v49  ;;  %v8551_v38 = vsel %vm12005_vm14, %v8549_v57, %v8550_v9  ;;  %v8557_v34 = vrot.slane %v8406_v28, 5  ;;  %v8687_v10 = vld [vmem:[#allocation3 + $0x110] sm:$0xff]  ;;  %v14311_v49 = vld [vmem:[%s14557_s6] ss:$0 sm:$0xff] }
 0x4cd   : > { %v8556_v3 = vrot.slane %v8554_v20, 4  ;;  %v10238_v62 = vcombine.low %v8548_v41, %v8551_v38  ;;  %v10224_v39 = vrot.slane %v8407_v23, 9  ;;  %v8564_v58 = vrot.slane %v8409_v52, 5 }
 0x4ce   : > { %v8563_v53 = vrot.slane %v8561_v29, 4  ;;  %8648 = vst.msk [vmem:[#allocation3 + $0x1d8] sm:$0xff] %vm1918_vm15, %v10237_v55  ;;  %v8555_v25 = vsel %vm12005_vm14, %v10223_v2, %v8554_v20  ;;  %v10193_v51 = vcombine.low %v11392_v36, %v11393_v46 }
 0x4cf   : > { %v8558_v19 = vsel %vm12005_vm14, %v8556_v3, %v8557_v34  ;;  %8649 = vst.msk [vmem:[#allocation3 + $0x200] sm:$0xff] %vm1918_vm15, %v10238_v62  ;;  %v8562_v7 = vsel %vm12005_vm14, %v10224_v39, %v8561_v29  ;;  %v8692_v1 = vld [vmem:[#allocation3 + $0x138] sm:$0xff] }
 0x4d0   : > { %v10239_v37 = vcombine.low %v8555_v25, %v8558_v19  ;;  %v8565_v17 = vsel %vm12005_vm14, %v8563_v53, %v8564_v58 }
 0x4d1   : > { %v10240_v48 = vcombine.low %v8562_v7, %v8565_v17 }
 0x4d2   : > { %9382 = vmatmul.mubr.bf16.gmra.mrb[168].mxu1 %v14197_v59  ;;  %8650 = vst.msk [vmem:[#allocation3 + $0x228] sm:$0xff] %vm1918_vm15, %v10239_v37  ;;  %v8697_v59 = vld [vmem:[#allocation3 + $0x160] sm:$0xff]  ;;  %v8702_v27 = vld [vmem:[#allocation3 + $0x188] sm:$0xff] }
 0x4d3   : > { %10979 = vmatmul.mubr.msk.bf16.gmra.mrb[152].mxu0 %vm1918_vm15, %v8682_v42  ;;  %8651 = vst.msk [vmem:[#allocation3 + $0x250] sm:$0xff] %vm1918_vm15, %v10240_v48  ;;  %v8707_v30 = vld [vmem:[#allocation3 + $0x1b0] sm:$0xff] }
 0x4d4   : > { %10982 = vmatprep.mubr.msk.bf16.mxu0 %vm1918_vm15, %v8687_v10 }
 0x4d5   : > { %v8712_v14 = vld [vmem:[#allocation3 + $0x1d8] sm:$0xff] }
 0x4d6   : > { %v8717_v47 = vld [vmem:[#allocation3 + $0x200] sm:$0xff] }
 0x4d7   : > { %v8284_v11 = vpop.permute.xlu0 %8283 }
 0x4d8   : > { %v8347_v8 = vsel %vm1918_vm15, %v10193_v51, %v8284_v11 }
 0x4d9   : > { %9389 = vmatprep.mubr.bf16.mxu1 %v8347_v8  ;;  %v8722_v21 = vld [vmem:[#allocation3 + $0x228] sm:$0xff] }
 0x4da   : > { %9390 = vmatmul.mubr.bf16.gmra.mrb[172].mxu1 %v14214_v63  ;;  %v8727_v63 = vld [vmem:[#allocation3 + $0x250] sm:$0xff] }
 0x4db   : > { %10983 = vmatmul.mubr.msk.bf16.gmra.mrb[156].mxu0 %vm1918_vm15, %v8692_v1 }
 0x4dc   : > { %10986 = vmatprep.mubr.msk.bf16.mxu0 %vm1918_vm15, %v8697_v59 }
 0x4e3   : > { %10987 = vmatmul.mubr.msk.bf16.gmra.mrb[160].mxu0 %vm1918_vm15, %v8702_v27 }
 0x4e4   : > { %10990 = vmatprep.mubr.msk.bf16.mxu0 %vm1918_vm15, %v8707_v30 }
 0x4eb   : > { %10991 = vmatmul.mubr.msk.bf16.gmra.mrb[164].mxu0 %vm1918_vm15, %v8712_v14 }
 0x4ec   : > { %10994 = vmatprep.mubr.msk.bf16.mxu0 %vm1918_vm15, %v8717_v47 }
 0x4f3   : > { %10995 = vmatmul.mubr.msk.bf16.gmra.mrb[168].mxu0 %vm1918_vm15, %v8722_v21 }
 0x4f4   : > { %10998 = vmatprep.mubr.msk.bf16.mxu0 %vm1918_vm15, %v8727_v63 }
 0x4fb   : > { %10999 = vmatmul.mubr.msk.bf16.gmra.mrb[172].mxu0 %vm1918_vm15, %v8732_v6 }
 0x506   : > { %v10646_v32 = vpop.f32.mrb[80].mxu0 }
 0x507   : > { %v10647_v15 = vpop.f32.mrb[81].mxu0 }
 0x508   : > { %v10648_v26 = vadd.f32 %v10647_v15, %v10646_v32  ;;  %v10649_v50 = vpop.f32.mrb[82].mxu0 }
 0x509   : > { %v10650_v18 = vpop.f32.mrb[83].mxu0 }
 0x50a   : > { %v10651_v4 = vadd.f32 %v10650_v18, %v10649_v50  ;;  %v9111_v38 = vadd.f32 %v10648_v26, %v14311_v49 }
 0x50c   : > { %v9114_v25 = vadd.f32 %v10651_v4, %v14311_v49 }
 0x512   : > { %v10652_v35 = vpop.f32.mrb[84].mxu0 }
 0x513   : > { %v10653_v22 = vpop.f32.mrb[85].mxu0 }
 0x514   : > { %v10654_v31 = vadd.f32 %v10653_v22, %v10652_v35  ;;  %v10655_v43 = vpop.f32.mrb[86].mxu0 }
 0x515   : > { %v10656_v12 = vpop.f32.mrb[87].mxu0 }
 0x516   : > { %v10657_v0 = vadd.f32 %v10656_v12, %v10655_v43  ;;  %v9119_v1 = vadd.f32 %v10654_v31, %v14311_v49 }
 0x518   : > { %v9122_v14 = vadd.f32 %v10657_v0, %v14311_v49 }
 0x51a   : > { %v10658_v33 = vpop.f32.mrb[88].mxu0 }
 0x51b   : > { %v10659_v61 = vpop.f32.mrb[89].mxu0 }
 0x51c   : > { %v10660_v60 = vadd.f32 %v10659_v61, %v10658_v33  ;;  %v10661_v45 = vpop.f32.mrb[90].mxu0 }
 0x51d   : > { %v10662_v28 = vpop.f32.mrb[91].mxu0 }
 0x51e   : > { %v10663_v5 = vadd.f32 %v10662_v28, %v10661_v45  ;;  %v9127_v22 = vadd.f32 %v10660_v60, %v14311_v49 }
 0x520   : > { %v9130_v0 = vadd.f32 %v10663_v5, %v14311_v49 }
 0x522   : > { %v10664_v44 = vpop.f32.mrb[92].mxu0 }
 0x523   : > { %v10665_v54 = vpop.f32.mrb[93].mxu0 }
 0x524   : > { %v14300_v13 = vadd.f32 %v10665_v54, %v10664_v44  ;;  %v10667_v16 = vpop.f32.mrb[94].mxu0 }
 0x525   : > { %v10668_v24 = vpop.f32.mrb[95].mxu0 }
 0x526   : > { %v14302_v23 = vadd.f32 %v10668_v24, %v10667_v16  ;;  %v9135_v60 = vadd.f32 %v14300_v13, %v14311_v49 }
 0x52a   : > { %v10670_v40 = vpop.f32.mrb[96].mxu0 }
 0x52b   : > { %v10671_v56 = vpop.f32.mrb[97].mxu0 }
 0x52c   : > { %v14304_v57 = vadd.f32 %v10671_v56, %v10670_v40  ;;  %v10673_v9 = vpop.f32.mrb[98].mxu0 }
 0x52d   : > { %v10674_v20 = vpop.f32.mrb[99].mxu0 }
 0x52e   : > { %v14306_v52 = vadd.f32 %v10674_v20, %v10673_v9 }
 0x532   : > { %v10676_v41 = vpop.f32.mrb[100].mxu0  ;;  %v10758_v2 = vpop.f32.mrb[112].mxu1 }
 0x533   : > { %v10677_v29 = vpop.f32.mrb[101].mxu0  ;;  %v10759_v55 = vpop.f32.mrb[113].mxu1 }
 0x534   : > { %v14314_v3 = vadd.f32 %v10677_v29, %v10676_v41  ;;  %v10760_v34 = vadd.f32 %v10759_v55, %v10758_v2  ;;  %v10679_v62 = vpop.f32.mrb[102].mxu0  ;;  %v10761_v39 = vpop.f32.mrb[114].mxu1  ;;  %v9138_v2 = vadd.f32 %v14302_v23, %v14311_v49 }
 0x535   : > { %v10680_v53 = vpop.f32.mrb[103].mxu0  ;;  %v10762_v58 = vpop.f32.mrb[115].mxu1 }
 0x536   : > { %v14317_v19 = vadd.f32 %v10680_v53, %v10679_v62  ;;  %v10763_v37 = vadd.f32 %v10762_v58, %v10761_v39  ;;  %v14319_v7 = vadd.f32 %v10760_v34, %v9111_v38 }
 0x538   : > { %v14321_v17 = vadd.f32 %v10763_v37, %v9114_v25 }
 0x53a   : > { %v10682_v48 = vpop.f32.mrb[104].mxu0 }
 0x53b   : > { %v10683_v42 = vpop.f32.mrb[105].mxu0 }
 0x53c   : > { %v14323_v10 = vadd.f32 %v10683_v42, %v10682_v48  ;;  %v10685_v36 = vpop.f32.mrb[106].mxu0  ;;  %v9143_v48 = vadd.f32 %v14304_v57, %v14311_v49 }
 0x53d   : > { %v10764_v46 = vpop.f32.mrb[116].mxu1  ;;  %v10686_v51 = vpop.f32.mrb[107].mxu0 }
 0x53e   : > { %v10765_v11 = vpop.f32.mrb[117].mxu1  ;;  %v14325_v8 = vadd.f32 %v10686_v51, %v10685_v36 }
 0x53f   : > { %v10766_v59 = vadd.f32 %v10765_v11, %v10764_v46  ;;  %v10767_v27 = vpop.f32.mrb[118].mxu1  ;;  %v9146_v46 = vadd.f32 %v14306_v52, %v14311_v49 }
 0x540   : > { %v10768_v30 = vpop.f32.mrb[119].mxu1 }
 0x541   : > { %v10769_v47 = vadd.f32 %v10768_v30, %v10767_v27  ;;  %v14329_v21 = vadd.f32 %v10766_v59, %v9119_v1 }
 0x542   : > { %v10688_v63 = vpop.f32.mrb[108].mxu0 }
 0x543   : > { %v10689_v6 = vpop.f32.mrb[109].mxu0  ;;  %v14331_v32 = vadd.f32 %v10769_v47, %v9122_v14 }
 0x544   : > { %v14333_v15 = vadd.f32 %v10689_v6, %v10688_v63  ;;  %v10691_v26 = vpop.f32.mrb[110].mxu0 }
 0x545   : > { %v10770_v50 = vpop.f32.mrb[120].mxu1  ;;  %v10692_v18 = vpop.f32.mrb[111].mxu0 }
 0x546   : > { %v10771_v4 = vpop.f32.mrb[121].mxu1  ;;  %v14335_v35 = vadd.f32 %v10692_v18, %v10691_v26  ;;  %v9151_v26 = vadd.f32 %v14314_v3, %v14311_v49 }
 0x547   : > { %v10772_v31 = vadd.f32 %v10771_v4, %v10770_v50  ;;  %v10773_v43 = vpop.f32.mrb[122].mxu1  ;;  %v9154_v4 = vadd.f32 %v14317_v19, %v14311_v49 }
 0x548   : > { %v10774_v12 = vpop.f32.mrb[123].mxu1 }
 0x549   : > { %v10775_v33 = vadd.f32 %v10774_v12, %v10773_v43  ;;  %v14339_v61 = vadd.f32 %v10772_v31, %v9127_v22 }
 0x54a   : > { %v10694_v45 = vpop.f32.mrb[112].mxu0 }
 0x54b   : > { %v10695_v28 = vpop.f32.mrb[113].mxu0  ;;  %v14341_v44 = vadd.f32 %v10775_v33, %v9130_v0 }
 0x54c   : > { %v14343_v54 = vadd.f32 %v10695_v28, %v10694_v45  ;;  %v10697_v16 = vpop.f32.mrb[114].mxu0 }
 0x54d   : > { %v10776_v24 = vpop.f32.mrb[124].mxu1  ;;  %v10698_v40 = vpop.f32.mrb[115].mxu0 }
 0x54e   : > { %v10777_v56 = vpop.f32.mrb[125].mxu1  ;;  %v14345_v9 = vadd.f32 %v10698_v40, %v10697_v16  ;;  %v9159_v40 = vadd.f32 %v14323_v10, %v14311_v49 }
 0x54f   : > { %v10778_v20 = vadd.f32 %v10777_v56, %v10776_v24  ;;  %v10779_v5 = vpop.f32.mrb[126].mxu1 }
 0x550   : > { %v10780_v41 = vpop.f32.mrb[127].mxu1 }
 0x551   : > { %v10781_v29 = vadd.f32 %v10780_v41, %v10779_v5  ;;  %v14351_v55 = vadd.f32 %v10778_v20, %v9135_v60  ;;  %v9162_v20 = vadd.f32 %v14325_v8, %v14311_v49 }
 0x552   : > { %v10700_v38 = vpop.f32.mrb[116].mxu0 }
 0x553   : > { %v10701_v34 = vpop.f32.mrb[117].mxu0  ;;  %v14353_v62 = vadd.f32 %v10781_v29, %v9138_v2 }
 0x554   : > { %v14355_v39 = vadd.f32 %v10701_v34, %v10700_v38  ;;  %v10703_v53 = vpop.f32.mrb[118].mxu0 }
 0x555   : > { %v10782_v58 = vpop.f32.mrb[128].mxu1  ;;  %v10704_v25 = vpop.f32.mrb[119].mxu0 }
 0x556   : > { %v10783_v37 = vpop.f32.mrb[129].mxu1  ;;  %v14357_v13 = vadd.f32 %v10704_v25, %v10703_v53 }
 0x557   : > { %v10784_v42 = vadd.f32 %v10783_v37, %v10782_v58  ;;  %v10785_v23 = vpop.f32.mrb[130].mxu1 }
 0x558   : > { %v10786_v36 = vpop.f32.mrb[131].mxu1 }
 0x559   : > { %v10787_v51 = vadd.f32 %v10786_v36, %v10785_v23  ;;  %v14363_v11 = vadd.f32 %v10784_v42, %v9143_v48  ;;  %v9167_v48 = vadd.f32 %v14333_v15, %v14311_v49  ;;  %v9170_v36 = vadd.f32 %v14335_v35, %v14311_v49 }
 0x55a   : > { %v10706_v1 = vpop.f32.mrb[120].mxu0 }
 0x55b   : > { %v10707_v59 = vpop.f32.mrb[121].mxu0  ;;  %v14365_v27 = vadd.f32 %v10787_v51, %v9146_v46 }
 0x55c   : > { %v14367_v30 = vadd.f32 %v10707_v59, %v10706_v1  ;;  %v10709_v14 = vpop.f32.mrb[122].mxu0 }
 0x55d   : > { %v10788_v47 = vpop.f32.mrb[132].mxu1  ;;  %v10710_v63 = vpop.f32.mrb[123].mxu0 }
 0x55e   : > { %v10789_v6 = vpop.f32.mrb[133].mxu1  ;;  %v14369_v57 = vadd.f32 %v10710_v63, %v10709_v14 }
 0x55f   : > { %v10790_v50 = vadd.f32 %v10789_v6, %v10788_v47  ;;  %v10791_v52 = vpop.f32.mrb[134].mxu1 }
 0x560   : > { %v10792_v18 = vpop.f32.mrb[135].mxu1 }
 0x561   : > { %v10793_v22 = vadd.f32 %v10792_v18, %v10791_v52  ;;  %v14375_v31 = vadd.f32 %v10790_v50, %v9151_v26  ;;  %v9175_v52 = vadd.f32 %v14343_v54, %v14311_v49 }
 0x562   : > { %v10712_v43 = vpop.f32.mrb[124].mxu0 }
 0x563   : > { %v10713_v12 = vpop.f32.mrb[125].mxu0  ;;  %v14377_v0 = vadd.f32 %v10793_v22, %v9154_v4  ;;  %v9178_v22 = vadd.f32 %v14345_v9, %v14311_v49 }
 0x564   : > { %v14379_v33 = vadd.f32 %v10713_v12, %v10712_v43  ;;  %v10715_v45 = vpop.f32.mrb[126].mxu0 }
 0x565   : > { %v10794_v28 = vpop.f32.mrb[136].mxu1  ;;  %v10716_v16 = vpop.f32.mrb[127].mxu0 }
 0x566   : > { %v10795_v24 = vpop.f32.mrb[137].mxu1  ;;  %v14381_v3 = vadd.f32 %v10716_v16, %v10715_v45 }
 0x567   : > { %v10796_v56 = vadd.f32 %v10795_v24, %v10794_v28  ;;  %v10797_v19 = vpop.f32.mrb[138].mxu1 }
 0x568   : > { %v10798_v60 = vpop.f32.mrb[139].mxu1 }
 0x569   : > { %v10799_v5 = vadd.f32 %v10798_v60, %v10797_v19  ;;  %v14387_v41 = vadd.f32 %v10796_v56, %v9159_v40 }
 0x56a   : > { %v10718_v2 = vpop.f32.mrb[128].mxu0 }
 0x56b   : > { %v10719_v29 = vpop.f32.mrb[129].mxu0  ;;  %v14389_v38 = vadd.f32 %v10799_v5, %v9162_v20  ;;  %v9183_v20 = vadd.f32 %v14355_v39, %v14311_v49 }
 0x56c   : > { %v14391_v34 = vadd.f32 %v10719_v29, %v10718_v2  ;;  %v10721_v53 = vpop.f32.mrb[130].mxu0  ;;  %v9186_v29 = vadd.f32 %v14357_v13, %v14311_v49 }
 0x56d   : > { %v10800_v58 = vpop.f32.mrb[140].mxu1  ;;  %v10722_v25 = vpop.f32.mrb[131].mxu0 }
 0x56e   : > { %v10801_v37 = vpop.f32.mrb[141].mxu1  ;;  %v14393_v10 = vadd.f32 %v10722_v25, %v10721_v53 }
 0x56f   : > { %v10802_v42 = vadd.f32 %v10801_v37, %v10800_v58  ;;  %v10803_v8 = vpop.f32.mrb[142].mxu1 }
 0x570   : > { %v10804_v23 = vpop.f32.mrb[143].mxu1 }
 0x571   : > { %v10805_v46 = vadd.f32 %v10804_v23, %v10803_v8  ;;  %v14399_v51 = vadd.f32 %v10802_v42, %v9167_v48 }
 0x572   : > { %v10724_v1 = vpop.f32.mrb[132].mxu0 }
 0x573   : > { %v10725_v59 = vpop.f32.mrb[133].mxu0  ;;  %v14401_v14 = vadd.f32 %v10805_v46, %v9170_v36 }
 0x574   : > { %v14403_v47 = vadd.f32 %v10725_v59, %v10724_v1  ;;  %v10727_v63 = vpop.f32.mrb[134].mxu0  ;;  %v9191_v1 = vadd.f32 %v14367_v30, %v14311_v49  ;;  %v9202_v30 = vadd.f32 %v14381_v3, %v14311_v49 }
 0x575   : > { %v10806_v6 = vpop.f32.mrb[144].mxu1  ;;  %v10728_v26 = vpop.f32.mrb[135].mxu0 }
 0x576   : > { %v10807_v50 = vpop.f32.mrb[145].mxu1  ;;  %v14405_v15 = vadd.f32 %v10728_v26, %v10727_v63 }
 0x577   : > { %v10808_v18 = vadd.f32 %v10807_v50, %v10806_v6  ;;  %v10809_v35 = vpop.f32.mrb[146].mxu1  ;;  %v9194_v6 = vadd.f32 %v14369_v57, %v14311_v49 }
 0x578   : > { %v10810_v4 = vpop.f32.mrb[147].mxu1 }
 0x579   : > { %v10811_v43 = vadd.f32 %v10810_v4, %v10809_v35  ;;  %v14411_v12 = vadd.f32 %v10808_v18, %v9175_v52  ;;  %v9199_v4 = vadd.f32 %v14379_v33, %v14311_v49 }
 0x57a   : > { %v10730_v45 = vpop.f32.mrb[136].mxu0 }
 0x57b   : > { %v10731_v28 = vpop.f32.mrb[137].mxu0  ;;  %v14413_v16 = vadd.f32 %v10811_v43, %v9178_v22 }
 0x57c   : > { %v14415_v24 = vadd.f32 %v10731_v28, %v10730_v45  ;;  %v10733_v40 = vpop.f32.mrb[138].mxu0 }
 0x57d   : > { %v10812_v56 = vpop.f32.mrb[148].mxu1  ;;  %v10734_v19 = vpop.f32.mrb[139].mxu0 }
 0x57e   : > { %v10813_v60 = vpop.f32.mrb[149].mxu1  ;;  %v14417_v54 = vadd.f32 %v10734_v19, %v10733_v40 }
 0x57f   : > { %v10814_v5 = vadd.f32 %v10813_v60, %v10812_v56  ;;  %v10815_v9 = vpop.f32.mrb[150].mxu1 }
 0x580   : > { %v10816_v2 = vpop.f32.mrb[151].mxu1 }
 0x581   : > { %v10817_v53 = vadd.f32 %v10816_v2, %v10815_v9  ;;  %v14423_v58 = vadd.f32 %v10814_v5, %v9183_v20  ;;  %v9207_v20 = vadd.f32 %v14391_v34, %v14311_v49 }
 0x582   : > { %v10736_v25 = vpop.f32.mrb[140].mxu0 }
 0x583   : > { %v10737_v37 = vpop.f32.mrb[141].mxu0  ;;  %v14425_v48 = vadd.f32 %v10817_v53, %v9186_v29 }
 0x584   : > { %v14427_v42 = vadd.f32 %v10737_v37, %v10736_v25  ;;  %v10739_v8 = vpop.f32.mrb[142].mxu0  ;;  %v9210_v25 = vadd.f32 %v14393_v10, %v14311_v49 }
 0x585   : > { %v10818_v23 = vpop.f32.mrb[152].mxu1  ;;  %v10740_v36 = vpop.f32.mrb[143].mxu0 }
 0x586   : > { %v10819_v46 = vpop.f32.mrb[153].mxu1  ;;  %v14429_v39 = vadd.f32 %v10740_v36, %v10739_v8 }
 0x587   : > { %v10820_v59 = vadd.f32 %v10819_v46, %v10818_v23  ;;  %v10821_v13 = vpop.f32.mrb[154].mxu1 }
 0x588   : > { %v10822_v63 = vpop.f32.mrb[155].mxu1 }
 0x589   : > { %v10823_v26 = vadd.f32 %v10822_v63, %v10821_v13  ;;  %v14435_v50 = vadd.f32 %v10820_v59, %v9191_v1 }
 0x58b   : > { %v14437_v52 = vadd.f32 %v10823_v26, %v9194_v6 }
 0x58d   : > { %v10824_v18 = vpop.f32.mrb[156].mxu1 }
 0x58e   : > { %v10825_v35 = vpop.f32.mrb[157].mxu1 }
 0x58f   : > { %v10826_v22 = vadd.f32 %v10825_v35, %v10824_v18  ;;  %v10827_v43 = vpop.f32.mrb[158].mxu1 }
 0x590   : > { %v10828_v45 = vpop.f32.mrb[159].mxu1 }
 0x591   : > { %v10829_v28 = vadd.f32 %v10828_v45, %v10827_v43  ;;  %v14443_v40 = vadd.f32 %v10826_v22, %v9199_v4 }
 0x593   : > { %v14445_v57 = vadd.f32 %v10829_v28, %v9202_v30 }
 0x595   : > { %v10830_v56 = vpop.f32.mrb[160].mxu1 }
 0x596   : > { %v10972_v19 = vpop.f32.mrb[144].mxu0  ;;  %v10831_v60 = vpop.f32.mrb[161].mxu1 }
 0x597   : > { %v9441_v5 = vadd.f32 %v10972_v19, %v14329_v21  ;;  %v9432_v33 = vpop.f32.mrb[145].mxu0  ;;  %v10832_v9 = vadd.f32 %v10831_v60, %v10830_v56  ;;  %v10833_v2 = vpop.f32.mrb[162].mxu1  ;;  %v9218_v56 = vadd.f32 %v14405_v15, %v14311_v49 }
 0x598   : > { %v9433_v29 = vadd.f32 %v9432_v33, %v14319_v7  ;;  %v10973_v53 = vpop.f32.mrb[146].mxu0  ;;  %v10834_v3 = vpop.f32.mrb[163].mxu1 }
 0x599   : > { %v9444_v37 = vadd.f32 %v10973_v53, %v14331_v32  ;;  %v9435_v8 = vpop.f32.mrb[147].mxu0  ;;  %v10835_v23 = vadd.f32 %v10834_v3, %v10833_v2  ;;  %v14454_v36 = vadd.f32 %v10832_v9, %v9207_v20  ;;  %v9561_v1 = vmax.f32 %v9441_v5, 0.0 }
 0x59a   : > { %v9559_v46 = vmax.f32 %v9433_v29, 0.0  ;;  %v9436_v34 = vadd.f32 %v9435_v8, %v14321_v17  ;;  %v9215_v17 = vadd.f32 %v14403_v47, %v14311_v49 }
 0x59b   : > { %v14457_v21 = vadd.f32 %v10835_v23, %v9210_v25  ;;  %v9562_v63 = vmax.f32 %v9444_v37, 0.0  ;;  %v9594_v43 = vsel %vm1918_vm15, %v9561_v1, 0.0 }
 0x59c   : > { %v9560_v59 = vmax.f32 %v9436_v34, 0.0  ;;  %v9591_v7 = vsel %vm1918_vm15, %v9559_v46, 0.0 }
 0x59d   : > { %v10836_v13 = vpop.f32.mrb[164].mxu1  ;;  %v9596_v5 = vsel %vm1918_vm15, %v9562_v63, 0.0 }
 0x59e   : > { %v9592_v6 = vsel %vm1918_vm15, %v9560_v59, 0.0  ;;  %v10976_v10 = vpop.f32.mrb[148].mxu0  ;;  %v10837_v26 = vpop.f32.mrb[165].mxu1 }
 0x59f   : > { %v9593_v32 = vadd.f32 %v9592_v6, %v9591_v7  ;;  %v9457_v18 = vadd.f32 %v10976_v10, %v14351_v55  ;;  %v9448_v35 = vpop.f32.mrb[149].mxu0  ;;  %v10838_v4 = vadd.f32 %v10837_v26, %v10836_v13  ;;  %v10839_v22 = vpop.f32.mrb[166].mxu1  ;;  %v9223_v13 = vadd.f32 %v14415_v24, %v14311_v49 }
 0x5a0   : > { %v9449_v45 = vadd.f32 %v9448_v35, %v14339_v61  ;;  %v10977_v30 = vpop.f32.mrb[150].mxu0  ;;  %v10840_v28 = vpop.f32.mrb[167].mxu1  ;;  %v9226_v26 = vadd.f32 %v14417_v54, %v14311_v49 }
 0x5a1   : > { %v9595_v19 = vadd.f32 %v9594_v43, %v9593_v32  ;;  %v9460_v60 = vadd.f32 %v10977_v30, %v14353_v62  ;;  %v9451_v20 = vpop.f32.mrb[151].mxu0  ;;  %v10841_v55 = vadd.f32 %v10840_v28, %v10839_v22  ;;  %v14471_v47 = vadd.f32 %v10838_v4, %v9215_v17 }
 0x5a2   : > { %v9563_v33 = vmax.f32 %v9449_v45, 0.0  ;;  %v9452_v9 = vadd.f32 %v9451_v20, %v14341_v44  ;;  %v9565_v61 = vmax.f32 %v9457_v18, 0.0 }
 0x5a3   : > { %v9597_v2 = vadd.f32 %v9596_v5, %v9595_v19  ;;  %v14473_v29 = vadd.f32 %v10841_v55, %v9218_v56  ;;  %v9566_v37 = vmax.f32 %v9460_v60, 0.0 }
 0x5a4   : > { %v9598_v53 = vsel %vm1918_vm15, %v9563_v33, 0.0  ;;  %v9564_v3 = vmax.f32 %v9452_v9, 0.0  ;;  %v9602_v7 = vsel %vm1918_vm15, %v9565_v61, 0.0 }
 0x5a5   : > { %v9599_v15 = vadd.f32 %v9598_v53, %v9597_v2  ;;  %v10842_v25 = vpop.f32.mrb[168].mxu1  ;;  %v9604_v4 = vsel %vm1918_vm15, %v9566_v37, 0.0  ;;  %v9231_v2 = vadd.f32 %v14427_v42, %v14311_v49 }
 0x5a6   : > { %v9600_v62 = vsel %vm1918_vm15, %v9564_v3, 0.0  ;;  %v10980_v8 = vpop.f32.mrb[152].mxu0  ;;  %v10843_v23 = vpop.f32.mrb[169].mxu1 }
 0x5a7   : > { %v9601_v46 = vadd.f32 %v9600_v62, %v9599_v15  ;;  %v9473_v34 = vadd.f32 %v10980_v8, %v14375_v31  ;;  %v9464_v44 = vpop.f32.mrb[153].mxu0  ;;  %v10844_v1 = vadd.f32 %v10843_v23, %v10842_v25  ;;  %v10845_v59 = vpop.f32.mrb[170].mxu1  ;;  %v9234_v25 = vadd.f32 %v14429_v39, %v14311_v49 }
 0x5a8   : > { %v9465_v63 = vadd.f32 %v9464_v44, %v14363_v11  ;;  %v10981_v6 = vpop.f32.mrb[154].mxu0  ;;  %v10846_v10 = vpop.f32.mrb[171].mxu1 }
 0x5a9   : > { %v9603_v32 = vadd.f32 %v9602_v7, %v9601_v46  ;;  %v9476_v18 = vadd.f32 %v10981_v6, %v14377_v0  ;;  %v9467_v35 = vpop.f32.mrb[155].mxu0  ;;  %v10847_v31 = vadd.f32 %v10846_v10, %v10845_v59  ;;  %v14487_v24 = vadd.f32 %v10844_v1, %v9223_v13 }
 0x5aa   : > { %v9567_v22 = vmax.f32 %v9465_v63, 0.0  ;;  %v9468_v17 = vadd.f32 %v9467_v35, %v14365_v27  ;;  %v9569_v11 = vmax.f32 %v9473_v34, 0.0 }
 0x5ab   : > { %v9605_v43 = vadd.f32 %v9604_v4, %v9603_v32  ;;  %v14489_v45 = vadd.f32 %v10847_v31, %v9226_v26  ;;  %v9570_v19 = vmax.f32 %v9476_v18, 0.0 }
 0x5ac   : > { %v9606_v30 = vsel %vm1918_vm15, %v9567_v22, 0.0  ;;  %v9568_v28 = vmax.f32 %v9468_v17, 0.0  ;;  %v9610_v61 = vsel %vm1918_vm15, %v9569_v11, 0.0 }
 0x5ad   : > { %v9607_v54 = vadd.f32 %v9606_v30, %v9605_v43  ;;  %v10848_v56 = vpop.f32.mrb[172].mxu1  ;;  %v9612_v23 = vsel %vm1918_vm15, %v9570_v19, 0.0 }
 0x5ae   : > { %v9608_v0 = vsel %vm1918_vm15, %v9568_v28, 0.0  ;;  %v10984_v60 = vpop.f32.mrb[156].mxu0  ;;  %v10849_v20 = vpop.f32.mrb[173].mxu1 }
 0x5af   : > { %v9609_v55 = vadd.f32 %v9608_v0, %v9607_v54  ;;  %v9489_v5 = vadd.f32 %v10984_v60, %v14399_v51  ;;  %v9480_v27 = vpop.f32.mrb[157].mxu0  ;;  %v10850_v33 = vadd.f32 %v10849_v20, %v10848_v56  ;;  %v10851_v9 = vpop.f32.mrb[174].mxu1 }
 0x5b0   : > { %v9481_v53 = vadd.f32 %v9480_v27, %v14387_v41  ;;  %v10985_v3 = vpop.f32.mrb[158].mxu0  ;;  %v10852_v15 = vpop.f32.mrb[175].mxu1 }
 0x5b1   : > { %v9611_v37 = vadd.f32 %v9610_v61, %v9609_v55  ;;  %v9492_v62 = vadd.f32 %v10985_v3, %v14401_v14  ;;  %v9483_v8 = vpop.f32.mrb[159].mxu0  ;;  %v10853_v51 = vadd.f32 %v10852_v15, %v10851_v9  ;;  %v14503_v42 = vadd.f32 %v10850_v33, %v9231_v2 }
 0x5b2   : > { %v9571_v46 = vmax.f32 %v9481_v53, 0.0  ;;  %v9484_v34 = vadd.f32 %v9483_v8, %v14389_v38  ;;  %v9573_v41 = vmax.f32 %v9489_v5, 0.0 }
 0x5b3   : > { %v9613_v44 = vadd.f32 %v9612_v23, %v9611_v37  ;;  %v14505_v1 = vadd.f32 %v10853_v51, %v9234_v25  ;;  %v9574_v39 = vmax.f32 %v9492_v62, 0.0 }
 0x5b4   : > { %v9614_v59 = vsel %vm1918_vm15, %v9571_v46, 0.0  ;;  %v9572_v13 = vmax.f32 %v9484_v34, 0.0  ;;  %v9618_v38 = vsel %vm1918_vm15, %v9573_v41, 0.0 }
 0x5b5   : > { %v9615_v49 = vadd.f32 %v9614_v59, %v9613_v44  ;;  %v9620_v4 = vsel %vm1918_vm15, %v9574_v39, 0.0 }
 0x5b6   : > { %v9616_v14 = vsel %vm1918_vm15, %v9572_v13, 0.0  ;;  %v10988_v7 = vpop.f32.mrb[160].mxu0 }
 0x5b7   : > { %v9617_v63 = vadd.f32 %v9616_v14, %v9615_v49  ;;  %v9505_v6 = vadd.f32 %v10988_v7, %v14423_v58  ;;  %v9496_v10 = vpop.f32.mrb[161].mxu0 }
 0x5b8   : > { %v9497_v26 = vadd.f32 %v9496_v10, %v14411_v12  ;;  %v10989_v32 = vpop.f32.mrb[162].mxu0 }
 0x5b9   : > { %v9619_v18 = vadd.f32 %v9618_v38, %v9617_v63  ;;  %v9508_v35 = vadd.f32 %v10989_v32, %v14425_v48  ;;  %v9499_v31 = vpop.f32.mrb[163].mxu0  ;;  %v9577_v11 = vmax.f32 %v9505_v6, 0.0 }
 0x5ba   : > { %v9575_v22 = vmax.f32 %v9497_v26, 0.0  ;;  %v9500_v17 = vadd.f32 %v9499_v31, %v14413_v16 }
 0x5bb   : > { %v9621_v43 = vadd.f32 %v9620_v4, %v9619_v18  ;;  %v9578_v54 = vmax.f32 %v9508_v35, 0.0  ;;  %v9626_v60 = vsel %vm1918_vm15, %v9577_v11, 0.0 }
 0x5bc   : > { %v9622_v30 = vsel %vm1918_vm15, %v9575_v22, 0.0  ;;  %v9576_v58 = vmax.f32 %v9500_v17, 0.0 }
 0x5bd   : > { %v9623_v28 = vadd.f32 %v9622_v30, %v9621_v43  ;;  %v9628_v33 = vsel %vm1918_vm15, %v9578_v54, 0.0 }
 0x5be   : > { %v9624_v56 = vsel %vm1918_vm15, %v9576_v58, 0.0  ;;  %v10992_v12 = vpop.f32.mrb[164].mxu0 }
 0x5bf   : > { %v9625_v19 = vadd.f32 %v9624_v56, %v9623_v28  ;;  %v9521_v0 = vadd.f32 %v10992_v12, %v14443_v40  ;;  %v9512_v48 = vpop.f32.mrb[165].mxu0 }
 0x5c0   : > { %v9513_v20 = vadd.f32 %v9512_v48, %v14435_v50  ;;  %v10993_v55 = vpop.f32.mrb[166].mxu0 }
 0x5c1   : > { %v9627_v16 = vadd.f32 %v9626_v60, %v9625_v19  ;;  %v9524_v5 = vadd.f32 %v10993_v55, %v14445_v57  ;;  %v9515_v27 = vpop.f32.mrb[167].mxu0  ;;  %v9581_v53 = vmax.f32 %v9521_v0, 0.0 }
 0x5c2   : > { %v9579_v9 = vmax.f32 %v9513_v20, 0.0  ;;  %v9516_v2 = vadd.f32 %v9515_v27, %v14437_v52 }
 0x5c3   : > { %v9629_v61 = vadd.f32 %v9628_v33, %v9627_v16  ;;  %v9582_v25 = vmax.f32 %v9524_v5, 0.0  ;;  %v9634_v51 = vsel %vm1918_vm15, %v9581_v53, 0.0 }
 0x5c4   : > { %v9630_v3 = vsel %vm1918_vm15, %v9579_v9, 0.0  ;;  %v9580_v40 = vmax.f32 %v9516_v2, 0.0 }
 0x5c5   : > { %v9631_v15 = vadd.f32 %v9630_v3, %v9629_v61  ;;  %v9636_v41 = vsel %vm1918_vm15, %v9582_v25, 0.0 }
 0x5c6   : > { %v9632_v37 = vsel %vm1918_vm15, %v9580_v40, 0.0  ;;  %v10996_v50 = vpop.f32.mrb[168].mxu0 }
 0x5c7   : > { %v9633_v62 = vadd.f32 %v9632_v37, %v9631_v15  ;;  %v9537_v8 = vadd.f32 %v10996_v50, %v14471_v47  ;;  %v9528_v57 = vpop.f32.mrb[169].mxu0 }
 0x5c8   : > { %v9529_v23 = vadd.f32 %v9528_v57, %v14454_v36  ;;  %v10997_v46 = vpop.f32.mrb[170].mxu0 }
 0x5c9   : > { %v9635_v52 = vadd.f32 %v9634_v51, %v9633_v62  ;;  %v9540_v34 = vadd.f32 %v10997_v46, %v14473_v29  ;;  %v9531_v44 = vpop.f32.mrb[171].mxu0  ;;  %v9585_v39 = vmax.f32 %v9537_v8, 0.0 }
 0x5ca   : > { %v9583_v59 = vmax.f32 %v9529_v23, 0.0  ;;  %v9532_v13 = vadd.f32 %v9531_v44, %v14457_v21 }
 0x5cb   : > { %v9637_v49 = vadd.f32 %v9636_v41, %v9635_v52  ;;  %v9586_v63 = vmax.f32 %v9540_v34, 0.0  ;;  %v9642_v26 = vsel %vm1918_vm15, %v9585_v39, 0.0 }
 0x5cc   : > { %v9638_v14 = vsel %vm1918_vm15, %v9583_v59, 0.0  ;;  %v9584_v47 = vmax.f32 %v9532_v13, 0.0 }
 0x5cd   : > { %v9639_v7 = vadd.f32 %v9638_v14, %v9637_v49  ;;  %v9644_v4 = vsel %vm1918_vm15, %v9586_v63, 0.0 }
 0x5ce   : > { %v9640_v6 = vsel %vm1918_vm15, %v9584_v47, 0.0  ;;  %v11000_v36 = vpop.f32.mrb[172].mxu0 }
 0x5cf   : > { %v9641_v10 = vadd.f32 %v9640_v6, %v9639_v7  ;;  %v9553_v38 = vadd.f32 %v11000_v36, %v14503_v42  ;;  %v9544_v29 = vpop.f32.mrb[173].mxu0 }
 0x5d0   : > { %v9545_v32 = vadd.f32 %v9544_v29, %v14487_v24  ;;  %v11001_v18 = vpop.f32.mrb[174].mxu0 }
 0x5d1   : > { %v9643_v21 = vadd.f32 %v9642_v26, %v9641_v10  ;;  %v9556_v35 = vadd.f32 %v11001_v18, %v14505_v1  ;;  %v9547_v31 = vpop.f32.mrb[175].mxu0  ;;  %v9589_v11 = vmax.f32 %v9553_v38, 0.0 }
 0x5d2   : > { %v9587_v22 = vmax.f32 %v9545_v32, 0.0  ;;  %v9548_v17 = vadd.f32 %v9547_v31, %v14489_v45 }
 0x5d3   : > { %v9645_v43 = vadd.f32 %v9644_v4, %v9643_v21  ;;  %v9590_v28 = vmax.f32 %v9556_v35, 0.0  ;;  %v9650_v56 = vsel %vm1918_vm15, %v9589_v11, 0.0 }
 0x5d4   : > { %v9646_v30 = vsel %vm1918_vm15, %v9587_v22, 0.0  ;;  %v9588_v42 = vmax.f32 %v9548_v17, 0.0 }
 0x5d5   : > { %v9647_v58 = vadd.f32 %v9646_v30, %v9645_v43  ;;  %v9652_v12 = vsel %vm1918_vm15, %v9590_v28, 0.0 }
 0x5d6   : > { %v9648_v24 = vsel %vm1918_vm15, %v9588_v42, 0.0 }
 0x5d7   : > { %v9649_v54 = vadd.f32 %v9648_v24, %v9647_v58 }
 0x5d9   : > { %v9651_v1 = vadd.f32 %v9650_v56, %v9649_v54 }
 0x5db   : > { %v9653_v19 = vadd.f32 %v9652_v12, %v9651_v1 }
 0x5dd   : > { %v9654_v0 = vrot.slane %v9653_v19, 4 }
 0x5df   : > { %v9655_v48 = vadd.f32 %v9654_v0, %v9653_v19 }
 0x5e1   : > { %v9656_v45 = vrot.slane %v9655_v48, 2 }
 0x5e3   : > { %v9657_v60 = vadd.f32 %v9656_v45, %v9655_v48 }
 0x5e5   : > { %v9658_v20 = vrot.slane %v9657_v60, 1 }
 0x5e7   : > { %v9659_v55 = vadd.f32 %v9658_v20, %v9657_v60 }
 0x5e9   : > { %v9660_v16 = vmul.f32 0.00390625, %v9659_v55 }
 0x5eb   : > { %9661 = vst.msk [vmem:[%s274_s20] sm:$0x1] %vm671_vm0, %v9660_v16 }
 0x5ec PF: > { %s17_s24 = sadd.s32 1, %s11400_s24  }
 0x5ed   : > { %p14_p4 = scmp.ge.s32.totalorder %s17_s24, 4  }
 0x5ef   :  { %16 = sbr.rel (!%p14_p4) target bundleno = 1 (0x1), region = 81 }

</bundles_post_ra>
